<compile_context>
chip_gen: v7x
topology: tpu7x:2x2x1
jax: 0.10.0
libtpu: 0.0.40
codegen_flags: <defaults>
</compile_context>

<pallas_src>
import functools
import math

import jax
import jax.numpy as jnp
import numpy as np
from jax import lax
from jax.experimental import pallas as pl
from jax.experimental.pallas import tpu as pltpu

N = 128            # points per cloud (forced by the module, see above)
FEAT = 32          # coarse feature dim
NUM_CLASSES = 3    # cfg.model.num_classes
NUM_GROUPS = 8     # cfg.model.group_norm
EPS = 1e-5         # PyTorch GroupNorm default eps
PAD_OUT = 128      # lane-dense logits slab width


# ---------------------------------------------------------------------------
# The single fused kernel
# ---------------------------------------------------------------------------
def scorer_kernel(pts_ref, m_ref, reff_ref, srcf_ref,
                  w1_hbm, aux1_hbm, w2_hbm, aux2_hbm,
                  out_ref,
                  w1_v, aux1_v, w2_v, aux2_v, sem):
    f32 = jnp.float32
    bf16 = jnp.bfloat16
    n = N
    m2n = 2 * N

    # ---- kick off cls_head weight DMAs; overlapped with the geometry phase ----
    cp_w1 = pltpu.make_async_copy(w1_hbm, w1_v, sem.at[0])
    cp_a1 = pltpu.make_async_copy(aux1_hbm, aux1_v, sem.at[1])
    cp_w2 = pltpu.make_async_copy(w2_hbm, w2_v, sem.at[2])
    cp_a2 = pltpu.make_async_copy(aux2_hbm, aux2_v, sem.at[3])
    cp_w1.start()
    cp_a1.start()
    cp_w2.start()
    cp_a2.start()

    # ---------------- preprocessing (fused into the kernel) ----------------
    col8 = lax.broadcasted_iota(jnp.int32, (n, 8), 1)
    xyz = col8 < 3
    ref_h = pts_ref[0:n, :]                      # (N, 8): [x, y, z, 1, 0...]
    src_h = pts_ref[n:2 * n, :]                  # (N, 8): [x, y, z, 1, 0...]
    ref_p = jnp.where(xyz, ref_h, 0.0)
    # apply_transform: src_h @ trans^T (padded to 8x8) -> rotated + translated
    src_t = jnp.dot(src_h, m_ref[...], preferred_element_type=f32)
    src_p = jnp.where(xyz, src_t, 0.0)

    # joint normalization: shared centroid, shared max-norm scale
    centroid = (jnp.sum(ref_p, axis=0) + jnp.sum(src_p, axis=0)) * (1.0 / m2n)
    ref_c = ref_p - centroid[None, :]
    src_c = src_p - centroid[None, :]
    nr = jnp.sum(ref_c * ref_c, axis=1)          # (N,) squared norms
    ns = jnp.sum(src_c * src_c, axis=1)
    max_sq = jnp.maximum(jnp.max(nr), jnp.max(ns))
    inv_m = lax.rsqrt(max_sq)
    inv_m2 = 1.0 / max_sq
    refn = ref_c * inv_m
    srcn = src_c * inv_m
    sq_r = nr * inv_m2                           # |refn_i|^2
    sq_s = ns * inv_m2                           # |srcn_j|^2

    # ---------- pairwise squared distance via ONE augmented matmul ----------
    # ref_aug = [x, y, z, |r|^2, 1, 0,0,0]; src_aug = [-2x,-2y,-2z, 1, |s|^2, 0,0,0]
    ref_aug = jnp.where(col8 == 3, sq_r[:, None],
                        jnp.where(col8 == 4, 1.0, refn))
    src_aug = jnp.where(col8 == 3, 1.0,
                        jnp.where(col8 == 4, sq_s[:, None], -2.0 * srcn))
    d2 = lax.dot_general(ref_aug, src_aug, (((1,), (1,)), ((), ())),
                         preferred_element_type=f32)          # (N, N)
    negd2 = jnp.minimum(-d2, 0.0)                # == -max(d2, 0); exp deferred
    feat = lax.dot_general(reff_ref[...], srcf_ref[...], (((1,), (1,)), ((), ())),
                           preferred_element_type=f32)        # (N, N)

    iota_c = lax.broadcasted_iota(jnp.int32, (n, n), 1)       # lane (column) idx
    iota_r = lax.broadcasted_iota(jnp.int32, (n, n), 0)       # sublane (row) idx
    ones_n8 = jnp.ones((n, 8), f32)
    ones_1n = jnp.ones((1, n), f32)

    # row/col maxima (exp is monotone -> same maximizers as on exp(-d2))
    rmax_d = jnp.max(negd2, axis=1)              # -> min_dist_ref = exp(rmax_d)
    cmax_d = jnp.max(negd2, axis=0)              # -> min_dist_src
    rmax_f = jnp.max(feat, axis=1)               # feat_match_ref
    cmax_f = jnp.max(feat, axis=0)               # feat_match_src

    # first-occurrence argmax indices (PyTorch max returns the first maximum).
    # Equality is exact because the max is a reduction over the same array.
    idx_rd = jnp.min(jnp.where(negd2 == rmax_d[:, None], iota_c, n), axis=1)
    idx_cd = jnp.min(jnp.where(negd2 == cmax_d[None, :], iota_r, n), axis=0)
    idx_rf = jnp.min(jnp.where(feat == rmax_f[:, None], iota_c, n), axis=1)
    idx_cf = jnp.min(jnp.where(feat == cmax_f[None, :], iota_r, n), axis=0)

    # fused one-hot cross-gathers, reduced on the (otherwise idle) MXU:
    #   2 matmuls instead of 4 (fewer MXU pushes / result-FIFO pops).
    row_stack = jnp.concatenate(
        [jnp.where(iota_c == idx_rd[:, None], feat, 0.0),
         jnp.where(iota_c == idx_rf[:, None], negd2, 0.0)], axis=0)   # (2N, N)
    row_red = jnp.dot(row_stack, ones_n8, preferred_element_type=f32)  # (2N, 8)
    fs_ref = row_red[0:n, 0]                     # feat[i, match_idx_ref[i]]
    nd_ref = row_red[n:2 * n, 0]                 # -d2[i, feat_match_idx_ref[i]]

    col_stack = jnp.concatenate(
        [jnp.where(iota_r == idx_cd[None, :], feat, 0.0),
         jnp.where(iota_r == idx_cf[None, :], negd2, 0.0)], axis=1)   # (N, 2N)
    col_red = jnp.dot(ones_1n, col_stack, preferred_element_type=f32)  # (1, 2N)
    fs_src = col_red[0, 0:n]                     # feat[match_idx_src[j], j]
    nd_src = col_red[0, n:2 * n]                 # -d2[feat_match_idx_src[j], j]

    # deferred exp: only 4 x 128 values instead of 128 x 128
    min_dist_ref = jnp.exp(rmax_d)
    min_dist_src = jnp.exp(cmax_d)
    dist_ref = jnp.exp(nd_ref)
    dist_src = jnp.exp(nd_src)

    def cat_row(a, b):                           # (N,), (N,) -> (1, 2N)
        return jnp.concatenate([a[None, :], b[None, :]], axis=1)

    def cat_col(a, b):                           # (N,), (N,) -> (2N, 1)
        return jnp.concatenate([a[:, None], b[:, None]], axis=0)

    md_row = cat_row(min_dist_ref, min_dist_src)     # sort #1 keys (min_dist)
    md_col = cat_col(min_dist_ref, min_dist_src)
    fsc_row = cat_row(fs_ref, fs_src)                # sort #1 carried values
    mf_row = cat_row(rmax_f, cmax_f)                 # sort #2 keys (match_feat)
    mf_col = cat_col(rmax_f, cmax_f)
    mdist_row = cat_row(dist_ref, dist_src)          # sort #2 carried values

    # -------- in-kernel stable descending sort: rank + one-hot matmul --------
    ii = lax.broadcasted_iota(jnp.int32, (m2n, m2n), 0)
    jj = lax.broadcasted_iota(jnp.int32, (m2n, m2n), 1)
    ones_m8 = jnp.ones((m2n, 8), f32)

    def sort_apply(krow, kcol, prow):
        # rank[i] = #{j: k[j] > k[i]} + #{j < i: k[j] == k[i]}  (stable, desc.)
        cnt = jnp.where((krow > kcol) | ((krow == kcol) & (jj < ii)), 1.0, 0.0)
        rank = jnp.dot(cnt, ones_m8, preferred_element_type=f32)[:, 0:1]
        perm = (rank.astype(jnp.int32) == jj).astype(f32)      # perm[i, r]
        # output position r receives the element whose rank is r
        return jnp.dot(prow, perm, preferred_element_type=f32)  # (1, 2N)

    # d_m = sorted(min_dist) * feat_score[perm]  == perm applied to the product
    d_m = sort_apply(md_row, md_col, md_row * fsc_row)
    # m_d = match_dist[perm] * sorted(match_feat)
    m_d = sort_apply(mf_row, mf_col, mf_row * mdist_row)
    geo = jnp.concatenate([d_m, m_d], axis=1)        # (1, 512)

    # ----------------------------- cls_head ---------------------------------
    def group_norm(h, gamma, beta):
        # per-group mean/var on the native (1,C) lane layout via a constant
        # block-averaging matmul; constant built with int iota + shift compares
        # (no float floor/mul construction, no (1,C)->(G,C/G) relayout).
        c = h.shape[1]
        gs = c // NUM_GROUPS
        shift = gs.bit_length() - 1                  # gs is a power of two
        inv = 1.0 / gs
        gi = lax.broadcasted_iota(jnp.int32, (c, c), 0) >> shift
        gj = lax.broadcasted_iota(jnp.int32, (c, c), 1) >> shift
        avg = jnp.where(gi == gj, inv, 0.0)
        mean = jnp.dot(h, avg, preferred_element_type=f32)
        cen = h - mean
        var = jnp.dot(cen * cen, avg, preferred_element_type=f32)  # biased (PyTorch)
        return cen * lax.rsqrt(var + EPS) * gamma + beta

    # Linear1: weights arrive via the DMA started at kernel entry.
    cp_w1.wait()
    cp_a1.wait()
    aux1 = aux1_v[...]                               # (3, 256): b1, gamma1, beta1
    h1 = jnp.dot(geo.astype(bf16), w1_v[...],
                 preferred_element_type=f32) + aux1[0:1, :]
    h1 = jnp.maximum(group_norm(h1, aux1[1:2, :], aux1[2:3, :]), 0.0)   # (1, 256)

    # Linear2 / Linear3
    cp_w2.wait()
    cp_a2.wait()
    w3 = aux2_v[0:128, :]                            # (128, 128): Linear3, zero-padded
    tail = aux2_v[128:132, :]                        # (4, 128): b2, gamma2, beta2, b3(pad)
    h2 = jnp.dot(h1.astype(bf16), w2_v[...],
                 preferred_element_type=f32) + tail[0:1, :]
    h2 = jnp.maximum(group_norm(h2, tail[1:2, :], tail[2:3, :]), 0.0)   # (1, 128)
    out_ref[...] = jnp.dot(h2, w3, preferred_element_type=f32) + tail[3:4, :]


# ---------------------------------------------------------------------------
# Wrapper / parameter packing / forward
# ---------------------------------------------------------------------------
def init_params(key):
    def linear(k, fan_in, fan_out):
        kw, kb = jax.random.split(k)
        bound = 1.0 / math.sqrt(fan_in)
        w = jax.random.uniform(kw, (fan_in, fan_out), jnp.float32, -bound, bound)
        b = jax.random.uniform(kb, (1, fan_out), jnp.float32, -bound, bound)
        return w, b

    k1, k2, k3 = jax.random.split(key, 3)
    w1, b1 = linear(k1, 512, 256)
    w2, b2 = linear(k2, 256, 128)
    w3, b3 = linear(k3, 128, NUM_CLASSES)
    return dict(
        w1=w1, b1=b1, g1=jnp.ones((1, 256), jnp.float32), be1=jnp.zeros((1, 256), jnp.float32),
        w2=w2, b2=b2, g2=jnp.ones((1, 128), jnp.float32), be2=jnp.zeros((1, 128), jnp.float32),
        w3=w3, b3=b3)


def pack_params(raw):
    """Pack cls_head params: bf16 matmul weights + two small f32 aux blobs."""
    aux1 = jnp.concatenate([raw['b1'], raw['g1'], raw['be1']], axis=0)            # (3, 256)
    w3p = jnp.zeros((128, PAD_OUT), jnp.float32).at[:, :NUM_CLASSES].set(raw['w3'])
    b3p = jnp.zeros((1, PAD_OUT), jnp.float32).at[:, :NUM_CLASSES].set(raw['b3'])
    aux2 = jnp.concatenate([w3p, raw['b2'], raw['g2'], raw['be2'], b3p], axis=0)  # (132, 128)
    return dict(w1=raw['w1'].astype(jnp.bfloat16), aux1=aux1,
                w2=raw['w2'].astype(jnp.bfloat16), aux2=aux2)


@functools.partial(jax.jit, static_argnums=(5,))
def _scorer_impl(packed, points_c, ref_feats, src_feats, trans, ref_length):
    f32 = jnp.float32
    assert ref_length == N and points_c.shape[0] == 2 * N
    points_c = points_c.astype(f32)
    n2 = points_c.shape[0]

    # (2N, 8) homogeneous points: [x, y, z, 1, 0, 0, 0, 0] (one concatenate;
    # split/transform/normalize all happen inside the kernel).
    pts8 = jnp.concatenate([points_c, jnp.ones((n2, 1), f32),
                            jnp.zeros((n2, 4), f32)], axis=1)
    # (8, 8) zero-padded trans^T so apply_transform is a single src_h @ m8.
    m8 = jnp.zeros((8, 8), f32).at[:4, :4].set(jnp.transpose(trans.astype(f32)))

    vmem = pl.BlockSpec(memory_space=pltpu.MemorySpace.VMEM)
    hbm = pl.BlockSpec(memory_space=pl.ANY)   # manual DMA, overlapped in-kernel
    logits_pad = pl.pallas_call(
        scorer_kernel,
        out_shape=jax.ShapeDtypeStruct((1, PAD_OUT), jnp.float32),
        in_specs=[vmem, vmem, vmem, vmem, hbm, hbm, hbm, hbm],
        out_specs=vmem,
        scratch_shapes=[
            pltpu.VMEM((512, 256), jnp.bfloat16),   # w1 landing buffer
            pltpu.VMEM((3, 256), jnp.float32),      # aux1 landing buffer
            pltpu.VMEM((256, 128), jnp.bfloat16),   # w2 landing buffer
            pltpu.VMEM((132, 128), jnp.float32),    # aux2 landing buffer
            pltpu.SemaphoreType.DMA((4,)),
        ],
    )(pts8, m8, ref_feats.astype(f32), src_feats.astype(f32),
      packed['w1'], packed['aux1'], packed['w2'], packed['aux2'])
    return logits_pad[:, :NUM_CLASSES]


def scorer_forward(packed, data_dict, ref_feats_c_norm, src_feats_c_norm, trans):
    # ref_length_c is a host-side scalar in the original module (.item()).
    ref_length = int(data_dict['lengths'][-1][0])
    points_c = data_dict['points'][-1]
    return _scorer_impl(packed, points_c, ref_feats_c_norm, src_feats_c_norm,
                        trans, ref_length)


# ---------------------------------------------------------------------------
# Plain-JAX reference (mirrors the PyTorch module) for a sanity check
# ---------------------------------------------------------------------------
def scorer_reference(raw, data_dict, ref_feats, src_feats, trans):
    hp = lax.Precision.HIGHEST
    ref_length = int(data_dict['lengths'][-1][0])
    points_c = data_dict['points'][-1]
    ref_points = points_c[:ref_length]
    src_points = points_c[ref_length:]
    rot = trans[:3, :3]
    t = trans[:3, 3]
    src_points = src_points @ rot.T + t
    pc = jnp.concatenate([ref_points, src_points], axis=0)
    centroid = jnp.mean(pc, axis=0)
    ref_c = ref_points - centroid
    src_c = src_points - centroid
    m = jnp.max(jnp.sqrt(jnp.sum(jnp.concatenate([ref_c, src_c], axis=0) ** 2, axis=1)))
    refn = ref_c / m
    srcn = src_c / m

    d2 = (jnp.sum(refn ** 2, axis=1)[:, None] + jnp.sum(srcn ** 2, axis=1)[None, :]
          - 2.0 * jnp.dot(refn, srcn.T, precision=hp))
    d2 = jnp.maximum(d2, 0.0)
    dist_mat = jnp.exp(-d2)
    feat = jnp.dot(ref_feats, src_feats.T, precision=hp)

    match_idx_ref = jnp.argmax(dist_mat, axis=1)
    match_idx_src = jnp.argmax(dist_mat, axis=0)
    min_dist_ref = jnp.max(dist_mat, axis=1)
    min_dist_src = jnp.max(dist_mat, axis=0)
    fidx_ref = jnp.argmax(feat, axis=1)
    fidx_src = jnp.argmax(feat, axis=0)
    feat_match_ref = jnp.max(feat, axis=1)
    feat_match_src = jnp.max(feat, axis=0)
    rng = jnp.arange(feat.shape[0])
    feat_score_ref = feat[rng, match_idx_ref]
    feat_score_src = feat[match_idx_src, rng]
    dist_ref = dist_mat[rng, fidx_ref]
    dist_src = dist_mat[fidx_src, rng]

    min_dist = jnp.concatenate([min_dist_ref, min_dist_src])
    feat_score = jnp.concatenate([feat_score_ref, feat_score_src])
    perm_d = jnp.argsort(-min_dist)
    d_m = min_dist[perm_d] * feat_score[perm_d]
    match_feat = jnp.concatenate([feat_match_ref, feat_match_src])
    match_dist = jnp.concatenate([dist_ref, dist_src])
    perm_f = jnp.argsort(-match_feat)
    m_d = match_dist[perm_f] * match_feat[perm_f]
    geo = jnp.concatenate([d_m, m_d])[None, :]

    def gn(h, gamma, beta):
        c = h.shape[1]
        hg = h.reshape(NUM_GROUPS, c // NUM_GROUPS)
        mean = jnp.mean(hg, axis=1, keepdims=True)
        var = jnp.mean((hg - mean) ** 2, axis=1, keepdims=True)
        return ((hg - mean) * lax.rsqrt(var + EPS)).reshape(1, c) * gamma + beta

    h1 = jnp.dot(geo, raw['w1'], precision=hp) + raw['b1']
    h1 = jnp.maximum(gn(h1, raw['g1'], raw['be1']), 0.0)
    h2 = jnp.dot(h1, raw['w2'], precision=hp) + raw['b2']
    h2 = jnp.maximum(gn(h2, raw['g2'], raw['be2']), 0.0)
    return jnp.dot(h2, raw['w3'], precision=hp) + raw['b3']


if __name__ == "__main__":
    key = jax.random.PRNGKey(0)
    k_pts, k_noise, k_f, k_fn, k_par = jax.random.split(key, 5)

    # ref cloud + a noisily-corresponding src cloud (realistic registration pair)
    ref_points = jax.random.normal(k_pts, (N, 3), jnp.float32)
    src_in_ref = ref_points + 0.05 * jax.random.normal(k_noise, (N, 3), jnp.float32)

    ang = 0.3
    c, s = math.cos(ang), math.sin(ang)
    rot = jnp.array([[c, -s, 0.0], [s, c, 0.0], [0.0, 0.0, 1.0]], jnp.float32)
    t = jnp.array([0.1, -0.2, 0.05], jnp.float32)
    trans = jnp.eye(4, dtype=jnp.float32).at[:3, :3].set(rot).at[:3, 3].set(t)
    # store src so that apply_transform(src, trans) lands back next to ref
    src_points = (src_in_ref - t) @ rot
    points_c = jnp.concatenate([ref_points, src_points], axis=0)

    lengths = jnp.array([N, N], dtype=jnp.int32)
    data_dict = {'lengths': [lengths], 'points': [points_c]}

    ref_feats = jax.random.normal(k_f, (N, FEAT), jnp.float32)
    src_feats = ref_feats + 0.1 * jax.random.normal(k_fn, (N, FEAT), jnp.float32)
    ref_feats = ref_feats / jnp.linalg.norm(ref_feats, axis=1, keepdims=True)
    src_feats = src_feats / jnp.linalg.norm(src_feats, axis=1, keepdims=True)

    raw = init_params(k_par)
    packed = pack_params(raw)

    logits = scorer_forward(packed, data_dict, ref_feats, src_feats, trans)
    logits = jax.block_until_ready(logits)
    assert logits.shape == (1, NUM_CLASSES)

    ref_logits = jax.block_until_ready(
        scorer_reference(raw, data_dict, ref_feats, src_feats, trans))
    np.testing.assert_allclose(np.asarray(logits), np.asarray(ref_logits),
                               rtol=5e-2, atol=5e-2)
    print("KERNEL_OK")
</pallas_src>

<mosaic_0001>
module attributes {stable_mosaic.version = 11 : i64} {
  func.func @scorer_kernel(%arg0: memref<256x8xf32, #tpu.memory_space<vmem>>, %arg1: memref<8x8xf32, #tpu.memory_space<vmem>>, %arg2: memref<128x32xf32, #tpu.memory_space<vmem>>, %arg3: memref<128x32xf32, #tpu.memory_space<vmem>>, %arg4: memref<512x256xbf16, #tpu.memory_space<any>>, %arg5: memref<3x256xf32, #tpu.memory_space<any>>, %arg6: memref<256x128xbf16, #tpu.memory_space<any>>, %arg7: memref<132x128xf32, #tpu.memory_space<any>>, %arg8: memref<1x128xf32, #tpu.memory_space<vmem>>, %arg9: memref<512x256xbf16, #tpu.memory_space<vmem>>, %arg10: memref<3x256xf32, #tpu.memory_space<vmem>>, %arg11: memref<256x128xbf16, #tpu.memory_space<vmem>>, %arg12: memref<132x128xf32, #tpu.memory_space<vmem>>, %arg13: memref<4x!tpu.dma_semaphore, #tpu.memory_space<semaphore_mem>>) attributes {dimension_semantics = [], scalar_prefetch = 0 : i64, scratch_operands = 5 : i64, tpu.core_type = #tpu.core_type<tc>} {
    %c0_i32 = arith.constant 0 : i32
    %0 = tpu.memref_slice %arg13[%c0_i32] : memref<4x!tpu.dma_semaphore, #tpu.memory_space<semaphore_mem>> -> memref<1x!tpu.dma_semaphore, #tpu.memory_space<semaphore_mem>>
    %1 = tpu.memref_squeeze %0 : memref<1x!tpu.dma_semaphore, #tpu.memory_space<semaphore_mem>> -> memref<!tpu.dma_semaphore, #tpu.memory_space<semaphore_mem>>
    tpu.enqueue_dma source(%arg4 : memref<512x256xbf16, #tpu.memory_space<any>>) target(%arg9 : memref<512x256xbf16, #tpu.memory_space<vmem>>) target_semaphore(%1 : memref<!tpu.dma_semaphore, #tpu.memory_space<semaphore_mem>>)
    %c1_i32 = arith.constant 1 : i32
    %2 = tpu.memref_slice %arg13[%c1_i32] : memref<4x!tpu.dma_semaphore, #tpu.memory_space<semaphore_mem>> -> memref<1x!tpu.dma_semaphore, #tpu.memory_space<semaphore_mem>>
    %3 = tpu.memref_squeeze %2 : memref<1x!tpu.dma_semaphore, #tpu.memory_space<semaphore_mem>> -> memref<!tpu.dma_semaphore, #tpu.memory_space<semaphore_mem>>
    tpu.enqueue_dma source(%arg5 : memref<3x256xf32, #tpu.memory_space<any>>) target(%arg10 : memref<3x256xf32, #tpu.memory_space<vmem>>) target_semaphore(%3 : memref<!tpu.dma_semaphore, #tpu.memory_space<semaphore_mem>>)
    %c2_i32 = arith.constant 2 : i32
    %4 = tpu.memref_slice %arg13[%c2_i32] : memref<4x!tpu.dma_semaphore, #tpu.memory_space<semaphore_mem>> -> memref<1x!tpu.dma_semaphore, #tpu.memory_space<semaphore_mem>>
    %5 = tpu.memref_squeeze %4 : memref<1x!tpu.dma_semaphore, #tpu.memory_space<semaphore_mem>> -> memref<!tpu.dma_semaphore, #tpu.memory_space<semaphore_mem>>
    tpu.enqueue_dma source(%arg6 : memref<256x128xbf16, #tpu.memory_space<any>>) target(%arg11 : memref<256x128xbf16, #tpu.memory_space<vmem>>) target_semaphore(%5 : memref<!tpu.dma_semaphore, #tpu.memory_space<semaphore_mem>>)
    %c3_i32 = arith.constant 3 : i32
    %6 = tpu.memref_slice %arg13[%c3_i32] : memref<4x!tpu.dma_semaphore, #tpu.memory_space<semaphore_mem>> -> memref<1x!tpu.dma_semaphore, #tpu.memory_space<semaphore_mem>>
    %7 = tpu.memref_squeeze %6 : memref<1x!tpu.dma_semaphore, #tpu.memory_space<semaphore_mem>> -> memref<!tpu.dma_semaphore, #tpu.memory_space<semaphore_mem>>
    tpu.enqueue_dma source(%arg7 : memref<132x128xf32, #tpu.memory_space<any>>) target(%arg12 : memref<132x128xf32, #tpu.memory_space<vmem>>) target_semaphore(%7 : memref<!tpu.dma_semaphore, #tpu.memory_space<semaphore_mem>>)
    %8 = tpu.iota {dimensions = array<i32: 1>} : vector<128x8xi32>
    %c3_i32_0 = arith.constant 3 : i32
    %9 = vector.broadcast %c3_i32_0 : i32 to vector<128x8xi32>
    %10 = arith.cmpi slt, %8, %9 : vector<128x8xi32>
    %c0 = arith.constant 0 : index
    %c0_1 = arith.constant 0 : index
    %11 = vector.load %arg0[%c0, %c0_1] : memref<256x8xf32, #tpu.memory_space<vmem>>, vector<128x8xf32>
    %c128 = arith.constant 128 : index
    %c0_2 = arith.constant 0 : index
    %12 = vector.load %arg0[%c128, %c0_2] : memref<256x8xf32, #tpu.memory_space<vmem>>, vector<128x8xf32>
    %cst = arith.constant 0.000000e+00 : f32
    %13 = vector.broadcast %cst : f32 to vector<128x8xf32>
    %14 = arith.select %10, %11, %13 : vector<128x8xi1>, vector<128x8xf32>
    %c0_3 = arith.constant 0 : index
    %c0_4 = arith.constant 0 : index
    %15 = vector.load %arg1[%c0_3, %c0_4] : memref<8x8xf32, #tpu.memory_space<vmem>>, vector<8x8xf32>
    %cst_5 = arith.constant dense<0.000000e+00> : vector<128x8xf32>
    %16 = tpu.matmul %12, %15, %cst_5 {dimension_numbers = #tpu.dot_dimension_numbers<[1], [0], [0], [1], [0, 0, 1, 1], [], []>} : vector<128x8xf32>, vector<8x8xf32>, vector<128x8xf32> -> vector<128x8xf32>
    %cst_6 = arith.constant 0.000000e+00 : f32
    %17 = vector.broadcast %cst_6 : f32 to vector<128x8xf32>
    %18 = arith.select %10, %16, %17 : vector<128x8xi1>, vector<128x8xf32>
    %cst_7 = arith.constant dense<0.000000e+00> : vector<8xf32>
    %19 = vector.multi_reduction <add>, %14, %cst_7 [0] : vector<128x8xf32> to vector<8xf32>
    %cst_8 = arith.constant dense<0.000000e+00> : vector<8xf32>
    %20 = vector.multi_reduction <add>, %18, %cst_8 [0] : vector<128x8xf32> to vector<8xf32>
    %21 = arith.addf %19, %20 : vector<8xf32>
    %cst_9 = arith.constant 3.906250e-03 : f32
    %22 = vector.broadcast %cst_9 : f32 to vector<8xf32>
    %23 = arith.mulf %21, %22 : vector<8xf32>
    %24 = vector.shape_cast %23 : vector<8xf32> to vector<1x8xf32>
    %25 = vector.broadcast %24 : vector<1x8xf32> to vector<128x8xf32>
    %26 = arith.subf %14, %25 : vector<128x8xf32>
    %27 = vector.shape_cast %23 : vector<8xf32> to vector<1x8xf32>
    %28 = vector.broadcast %27 : vector<1x8xf32> to vector<128x8xf32>
    %29 = arith.subf %18, %28 : vector<128x8xf32>
    %30 = arith.mulf %26, %26 : vector<128x8xf32>
    %cst_10 = arith.constant dense<0.000000e+00> : vector<128xf32>
    %31 = vector.multi_reduction <add>, %30, %cst_10 [1] : vector<128x8xf32> to vector<128xf32>
    %32 = arith.mulf %29, %29 : vector<128x8xf32>
    %cst_11 = arith.constant dense<0.000000e+00> : vector<128xf32>
    %33 = vector.multi_reduction <add>, %32, %cst_11 [1] : vector<128x8xf32> to vector<128xf32>
    %34 = vector.shape_cast %31 : vector<128xf32> to vector<1x128xf32>
    %cst_12 = arith.constant dense<0xFF800000> : vector<1xf32>
    %35 = vector.multi_reduction <maximumf>, %34, %cst_12 [1] : vector<1x128xf32> to vector<1xf32>
    %36 = vector.shape_cast %35 : vector<1xf32> to vector<1x1xf32>
    %37 = vector.extract %36[0, 0] : f32 from vector<1x1xf32>
    %38 = vector.shape_cast %33 : vector<128xf32> to vector<1x128xf32>
    %cst_13 = arith.constant dense<0xFF800000> : vector<1xf32>
    %39 = vector.multi_reduction <maximumf>, %38, %cst_13 [1] : vector<1x128xf32> to vector<1xf32>
    %40 = vector.shape_cast %39 : vector<1xf32> to vector<1x1xf32>
    %41 = vector.extract %40[0, 0] : f32 from vector<1x1xf32>
    %42 = arith.maximumf %37, %41 : f32
    %43 = math.rsqrt %42 : f32
    %cst_14 = arith.constant 1.000000e+00 : f32
    %44 = arith.divf %cst_14, %42 : f32
    %45 = vector.broadcast %43 : f32 to vector<128x8xf32>
    %46 = arith.mulf %26, %45 : vector<128x8xf32>
    %47 = vector.broadcast %43 : f32 to vector<128x8xf32>
    %48 = arith.mulf %29, %47 : vector<128x8xf32>
    %49 = vector.broadcast %44 : f32 to vector<128xf32>
    %50 = arith.mulf %31, %49 : vector<128xf32>
    %51 = vector.broadcast %44 : f32 to vector<128xf32>
    %52 = arith.mulf %33, %51 : vector<128xf32>
    %c3_i32_15 = arith.constant 3 : i32
    %53 = vector.broadcast %c3_i32_15 : i32 to vector<128x8xi32>
    %54 = arith.cmpi eq, %8, %53 : vector<128x8xi32>
    %55 = vector.shape_cast %50 : vector<128xf32> to vector<128x1xf32>
    %c4_i32 = arith.constant 4 : i32
    %56 = vector.broadcast %c4_i32 : i32 to vector<128x8xi32>
    %57 = arith.cmpi eq, %8, %56 : vector<128x8xi32>
    %cst_16 = arith.constant 1.000000e+00 : f32
    %58 = vector.broadcast %cst_16 : f32 to vector<128x8xf32>
    %59 = arith.select %57, %58, %46 : vector<128x8xi1>, vector<128x8xf32>
    %60 = vector.shape_cast %55 : vector<128x1xf32> to vector<128x1xf32>
    %61 = vector.broadcast %60 : vector<128x1xf32> to vector<128x8xf32>
    %62 = arith.select %54, %61, %59 : vector<128x8xi1>, vector<128x8xf32>
    %c3_i32_17 = arith.constant 3 : i32
    %63 = vector.broadcast %c3_i32_17 : i32 to vector<128x8xi32>
    %64 = arith.cmpi eq, %8, %63 : vector<128x8xi32>
    %c4_i32_18 = arith.constant 4 : i32
    %65 = vector.broadcast %c4_i32_18 : i32 to vector<128x8xi32>
    %66 = arith.cmpi eq, %8, %65 : vector<128x8xi32>
    %67 = vector.shape_cast %52 : vector<128xf32> to vector<128x1xf32>
    %cst_19 = arith.constant -2.000000e+00 : f32
    %68 = vector.broadcast %cst_19 : f32 to vector<128x8xf32>
    %69 = arith.mulf %68, %48 : vector<128x8xf32>
    %70 = vector.shape_cast %67 : vector<128x1xf32> to vector<128x1xf32>
    %71 = vector.broadcast %70 : vector<128x1xf32> to vector<128x8xf32>
    %72 = arith.select %66, %71, %69 : vector<128x8xi1>, vector<128x8xf32>
    %cst_20 = arith.constant 1.000000e+00 : f32
    %73 = vector.broadcast %cst_20 : f32 to vector<128x8xf32>
    %74 = arith.select %64, %73, %72 : vector<128x8xi1>, vector<128x8xf32>
    %cst_21 = arith.constant dense<0.000000e+00> : vector<128x128xf32>
    %75 = tpu.matmul %62, %74, %cst_21 {dimension_numbers = #tpu.dot_dimension_numbers<[1], [1], [0], [0], [0, 0, 1, 0], [], []>} : vector<128x8xf32>, vector<128x8xf32>, vector<128x128xf32> -> vector<128x128xf32>
    %cst_22 = arith.constant 0.000000e+00 : f32
    %76 = vector.broadcast %cst_22 : f32 to vector<128x128xf32>
    %77 = arith.subf %76, %75 : vector<128x128xf32>
    %cst_23 = arith.constant 0.000000e+00 : f32
    %78 = vector.broadcast %cst_23 : f32 to vector<128x128xf32>
    %79 = arith.minimumf %77, %78 : vector<128x128xf32>
    %c0_24 = arith.constant 0 : index
    %c0_25 = arith.constant 0 : index
    %80 = vector.load %arg2[%c0_24, %c0_25] : memref<128x32xf32, #tpu.memory_space<vmem>>, vector<128x32xf32>
    %c0_26 = arith.constant 0 : index
    %c0_27 = arith.constant 0 : index
    %81 = vector.load %arg3[%c0_26, %c0_27] : memref<128x32xf32, #tpu.memory_space<vmem>>, vector<128x32xf32>
    %cst_28 = arith.constant dense<0.000000e+00> : vector<128x128xf32>
    %82 = tpu.matmul %80, %81, %cst_28 {dimension_numbers = #tpu.dot_dimension_numbers<[1], [1], [0], [0], [0, 0, 1, 0], [], []>} : vector<128x32xf32>, vector<128x32xf32>, vector<128x128xf32> -> vector<128x128xf32>
    %83 = tpu.iota {dimensions = array<i32: 1>} : vector<128x128xi32>
    %84 = tpu.iota {dimensions = array<i32: 0>} : vector<128x128xi32>
    %cst_29 = arith.constant 1.000000e+00 : f32
    %85 = vector.broadcast %cst_29 : f32 to vector<128x8xf32>
    %cst_30 = arith.constant 1.000000e+00 : f32
    %86 = vector.broadcast %cst_30 : f32 to vector<1x128xf32>
    %cst_31 = arith.constant dense<0xFF800000> : vector<128xf32>
    %87 = vector.multi_reduction <maximumf>, %79, %cst_31 [1] : vector<128x128xf32> to vector<128xf32>
    %cst_32 = arith.constant dense<0xFF800000> : vector<128xf32>
    %88 = vector.multi_reduction <maximumf>, %79, %cst_32 [0] : vector<128x128xf32> to vector<128xf32>
    %cst_33 = arith.constant dense<0xFF800000> : vector<128xf32>
    %89 = vector.multi_reduction <maximumf>, %82, %cst_33 [1] : vector<128x128xf32> to vector<128xf32>
    %cst_34 = arith.constant dense<0xFF800000> : vector<128xf32>
    %90 = vector.multi_reduction <maximumf>, %82, %cst_34 [0] : vector<128x128xf32> to vector<128xf32>
    %91 = vector.shape_cast %87 : vector<128xf32> to vector<128x1xf32>
    %92 = vector.broadcast %91 : vector<128x1xf32> to vector<128x128xf32>
    %93 = arith.cmpf oeq, %79, %92 : vector<128x128xf32>
    %c128_i32 = arith.constant 128 : i32
    %94 = vector.broadcast %c128_i32 : i32 to vector<128x128xi32>
    %95 = arith.select %93, %83, %94 : vector<128x128xi1>, vector<128x128xi32>
    %cst_35 = arith.constant dense<2147483647> : vector<128xi32>
    %96 = vector.multi_reduction <minsi>, %95, %cst_35 [1] : vector<128x128xi32> to vector<128xi32>
    %97 = vector.shape_cast %88 : vector<128xf32> to vector<1x128xf32>
    %98 = vector.broadcast %97 : vector<1x128xf32> to vector<128x128xf32>
    %99 = arith.cmpf oeq, %79, %98 : vector<128x128xf32>
    %c128_i32_36 = arith.constant 128 : i32
    %100 = vector.broadcast %c128_i32_36 : i32 to vector<128x128xi32>
    %101 = arith.select %99, %84, %100 : vector<128x128xi1>, vector<128x128xi32>
    %cst_37 = arith.constant dense<2147483647> : vector<128xi32>
    %102 = vector.multi_reduction <minsi>, %101, %cst_37 [0] : vector<128x128xi32> to vector<128xi32>
    %103 = vector.shape_cast %89 : vector<128xf32> to vector<128x1xf32>
    %104 = vector.broadcast %103 : vector<128x1xf32> to vector<128x128xf32>
    %105 = arith.cmpf oeq, %82, %104 : vector<128x128xf32>
    %c128_i32_38 = arith.constant 128 : i32
    %106 = vector.broadcast %c128_i32_38 : i32 to vector<128x128xi32>
    %107 = arith.select %105, %83, %106 : vector<128x128xi1>, vector<128x128xi32>
    %cst_39 = arith.constant dense<2147483647> : vector<128xi32>
    %108 = vector.multi_reduction <minsi>, %107, %cst_39 [1] : vector<128x128xi32> to vector<128xi32>
    %109 = vector.shape_cast %90 : vector<128xf32> to vector<1x128xf32>
    %110 = vector.broadcast %109 : vector<1x128xf32> to vector<128x128xf32>
    %111 = arith.cmpf oeq, %82, %110 : vector<128x128xf32>
    %c128_i32_40 = arith.constant 128 : i32
    %112 = vector.broadcast %c128_i32_40 : i32 to vector<128x128xi32>
    %113 = arith.select %111, %84, %112 : vector<128x128xi1>, vector<128x128xi32>
    %cst_41 = arith.constant dense<2147483647> : vector<128xi32>
    %114 = vector.multi_reduction <minsi>, %113, %cst_41 [0] : vector<128x128xi32> to vector<128xi32>
    %115 = vector.shape_cast %96 : vector<128xi32> to vector<128x1xi32>
    %116 = vector.broadcast %115 : vector<128x1xi32> to vector<128x128xi32>
    %117 = arith.cmpi eq, %83, %116 : vector<128x128xi32>
    %cst_42 = arith.constant 0.000000e+00 : f32
    %118 = vector.broadcast %cst_42 : f32 to vector<128x128xf32>
    %119 = arith.select %117, %82, %118 : vector<128x128xi1>, vector<128x128xf32>
    %120 = vector.shape_cast %108 : vector<128xi32> to vector<128x1xi32>
    %121 = vector.broadcast %120 : vector<128x1xi32> to vector<128x128xi32>
    %122 = arith.cmpi eq, %83, %121 : vector<128x128xi32>
    %cst_43 = arith.constant 0.000000e+00 : f32
    %123 = vector.broadcast %cst_43 : f32 to vector<128x128xf32>
    %124 = arith.select %122, %79, %123 : vector<128x128xi1>, vector<128x128xf32>
    %125 = tpu.concatenate %119, %124 in 0 : vector<128x128xf32>, vector<128x128xf32> -> vector<256x128xf32>
    %cst_44 = arith.constant dense<0.000000e+00> : vector<256x8xf32>
    %126 = tpu.matmul %125, %85, %cst_44 {dimension_numbers = #tpu.dot_dimension_numbers<[1], [0], [0], [1], [0, 0, 1, 1], [], []>} : vector<256x128xf32>, vector<128x8xf32>, vector<256x8xf32> -> vector<256x8xf32>
    %127 = vector.extract_strided_slice %126 {offsets = [0, 0], sizes = [128, 1], strides = [1, 1]} : vector<256x8xf32> to vector<128x1xf32>
    %128 = vector.shape_cast %127 : vector<128x1xf32> to vector<128xf32>
    %129 = vector.extract_strided_slice %126 {offsets = [128, 0], sizes = [128, 1], strides = [1, 1]} : vector<256x8xf32> to vector<128x1xf32>
    %130 = vector.shape_cast %129 : vector<128x1xf32> to vector<128xf32>
    %131 = vector.shape_cast %102 : vector<128xi32> to vector<1x128xi32>
    %132 = vector.broadcast %131 : vector<1x128xi32> to vector<128x128xi32>
    %133 = arith.cmpi eq, %84, %132 : vector<128x128xi32>
    %cst_45 = arith.constant 0.000000e+00 : f32
    %134 = vector.broadcast %cst_45 : f32 to vector<128x128xf32>
    %135 = arith.select %133, %82, %134 : vector<128x128xi1>, vector<128x128xf32>
    %136 = vector.shape_cast %114 : vector<128xi32> to vector<1x128xi32>
    %137 = vector.broadcast %136 : vector<1x128xi32> to vector<128x128xi32>
    %138 = arith.cmpi eq, %84, %137 : vector<128x128xi32>
    %cst_46 = arith.constant 0.000000e+00 : f32
    %139 = vector.broadcast %cst_46 : f32 to vector<128x128xf32>
    %140 = arith.select %138, %79, %139 : vector<128x128xi1>, vector<128x128xf32>
    %141 = tpu.concatenate %135, %140 in 1 : vector<128x128xf32>, vector<128x128xf32> -> vector<128x256xf32>
    %cst_47 = arith.constant dense<0.000000e+00> : vector<1x256xf32>
    %142 = tpu.matmul %86, %141, %cst_47 {dimension_numbers = #tpu.dot_dimension_numbers<[1], [0], [0], [1], [0, 0, 1, 1], [], []>} : vector<1x128xf32>, vector<128x256xf32>, vector<1x256xf32> -> vector<1x256xf32>
    %143 = vector.extract_strided_slice %142 {offsets = [0, 0], sizes = [1, 128], strides = [1, 1]} : vector<1x256xf32> to vector<1x128xf32>
    %144 = vector.shape_cast %143 : vector<1x128xf32> to vector<128xf32>
    %145 = vector.extract_strided_slice %142 {offsets = [0, 128], sizes = [1, 128], strides = [1, 1]} : vector<1x256xf32> to vector<1x128xf32>
    %146 = vector.shape_cast %145 : vector<1x128xf32> to vector<128xf32>
    %147 = math.exp %87 : vector<128xf32>
    %148 = math.exp %88 : vector<128xf32>
    %149 = math.exp %130 : vector<128xf32>
    %150 = math.exp %146 : vector<128xf32>
    %151 = vector.shape_cast %147 : vector<128xf32> to vector<1x128xf32>
    %152 = vector.shape_cast %148 : vector<128xf32> to vector<1x128xf32>
    %153 = tpu.concatenate %151, %152 in 1 : vector<1x128xf32>, vector<1x128xf32> -> vector<1x256xf32>
    %154 = vector.shape_cast %147 : vector<128xf32> to vector<128x1xf32>
    %155 = vector.shape_cast %148 : vector<128xf32> to vector<128x1xf32>
    %156 = tpu.concatenate %154, %155 in 0 : vector<128x1xf32>, vector<128x1xf32> -> vector<256x1xf32>
    %157 = vector.shape_cast %128 : vector<128xf32> to vector<1x128xf32>
    %158 = vector.shape_cast %144 : vector<128xf32> to vector<1x128xf32>
    %159 = tpu.concatenate %157, %158 in 1 : vector<1x128xf32>, vector<1x128xf32> -> vector<1x256xf32>
    %160 = vector.shape_cast %89 : vector<128xf32> to vector<1x128xf32>
    %161 = vector.shape_cast %90 : vector<128xf32> to vector<1x128xf32>
    %162 = tpu.concatenate %160, %161 in 1 : vector<1x128xf32>, vector<1x128xf32> -> vector<1x256xf32>
    %163 = vector.shape_cast %89 : vector<128xf32> to vector<128x1xf32>
    %164 = vector.shape_cast %90 : vector<128xf32> to vector<128x1xf32>
    %165 = tpu.concatenate %163, %164 in 0 : vector<128x1xf32>, vector<128x1xf32> -> vector<256x1xf32>
    %166 = vector.shape_cast %149 : vector<128xf32> to vector<1x128xf32>
    %167 = vector.shape_cast %150 : vector<128xf32> to vector<1x128xf32>
    %168 = tpu.concatenate %166, %167 in 1 : vector<1x128xf32>, vector<1x128xf32> -> vector<1x256xf32>
    %169 = tpu.iota {dimensions = array<i32: 0>} : vector<256x256xi32>
    %170 = tpu.iota {dimensions = array<i32: 1>} : vector<256x256xi32>
    %cst_48 = arith.constant 1.000000e+00 : f32
    %171 = vector.broadcast %cst_48 : f32 to vector<256x8xf32>
    %172 = arith.mulf %153, %159 : vector<1x256xf32>
    %173 = vector.broadcast %153 : vector<1x256xf32> to vector<256x256xf32>
    %174 = vector.broadcast %156 : vector<256x1xf32> to vector<256x256xf32>
    %175 = arith.cmpf ogt, %173, %174 : vector<256x256xf32>
    %176 = vector.broadcast %153 : vector<1x256xf32> to vector<256x256xf32>
    %177 = vector.broadcast %156 : vector<256x1xf32> to vector<256x256xf32>
    %178 = arith.cmpf oeq, %176, %177 : vector<256x256xf32>
    %179 = arith.cmpi slt, %170, %169 : vector<256x256xi32>
    %180 = arith.andi %178, %179 : vector<256x256xi1>
    %181 = arith.ori %175, %180 : vector<256x256xi1>
    %cst_49 = arith.constant 1.000000e+00 : f32
    %cst_50 = arith.constant 0.000000e+00 : f32
    %182 = vector.broadcast %cst_49 : f32 to vector<256x256xf32>
    %183 = vector.broadcast %cst_50 : f32 to vector<256x256xf32>
    %184 = arith.select %181, %182, %183 : vector<256x256xi1>, vector<256x256xf32>
    %cst_51 = arith.constant dense<0.000000e+00> : vector<256x8xf32>
    %185 = tpu.matmul %184, %171, %cst_51 {dimension_numbers = #tpu.dot_dimension_numbers<[1], [0], [0], [1], [0, 0, 1, 1], [], []>} : vector<256x256xf32>, vector<256x8xf32>, vector<256x8xf32> -> vector<256x8xf32>
    %186 = vector.extract_strided_slice %185 {offsets = [0, 0], sizes = [256, 1], strides = [1, 1]} : vector<256x8xf32> to vector<256x1xf32>
    %187 = arith.fptosi %186 : vector<256x1xf32> to vector<256x1xi32>
    %188 = vector.broadcast %187 : vector<256x1xi32> to vector<256x256xi32>
    %189 = arith.cmpi eq, %188, %170 : vector<256x256xi32>
    %190 = arith.extui %189 : vector<256x256xi1> to vector<256x256xi32>
    %191 = arith.sitofp %190 : vector<256x256xi32> to vector<256x256xf32>
    %cst_52 = arith.constant dense<0.000000e+00> : vector<1x256xf32>
    %192 = tpu.matmul %172, %191, %cst_52 {dimension_numbers = #tpu.dot_dimension_numbers<[1], [0], [0], [1], [0, 0, 1, 1], [], []>} : vector<1x256xf32>, vector<256x256xf32>, vector<1x256xf32> -> vector<1x256xf32>
    %193 = arith.mulf %162, %168 : vector<1x256xf32>
    %194 = vector.broadcast %162 : vector<1x256xf32> to vector<256x256xf32>
    %195 = vector.broadcast %165 : vector<256x1xf32> to vector<256x256xf32>
    %196 = arith.cmpf ogt, %194, %195 : vector<256x256xf32>
    %197 = vector.broadcast %162 : vector<1x256xf32> to vector<256x256xf32>
    %198 = vector.broadcast %165 : vector<256x1xf32> to vector<256x256xf32>
    %199 = arith.cmpf oeq, %197, %198 : vector<256x256xf32>
    %200 = arith.cmpi slt, %170, %169 : vector<256x256xi32>
    %201 = arith.andi %199, %200 : vector<256x256xi1>
    %202 = arith.ori %196, %201 : vector<256x256xi1>
    %cst_53 = arith.constant 1.000000e+00 : f32
    %cst_54 = arith.constant 0.000000e+00 : f32
    %203 = vector.broadcast %cst_53 : f32 to vector<256x256xf32>
    %204 = vector.broadcast %cst_54 : f32 to vector<256x256xf32>
    %205 = arith.select %202, %203, %204 : vector<256x256xi1>, vector<256x256xf32>
    %cst_55 = arith.constant dense<0.000000e+00> : vector<256x8xf32>
    %206 = tpu.matmul %205, %171, %cst_55 {dimension_numbers = #tpu.dot_dimension_numbers<[1], [0], [0], [1], [0, 0, 1, 1], [], []>} : vector<256x256xf32>, vector<256x8xf32>, vector<256x8xf32> -> vector<256x8xf32>
    %207 = vector.extract_strided_slice %206 {offsets = [0, 0], sizes = [256, 1], strides = [1, 1]} : vector<256x8xf32> to vector<256x1xf32>
    %208 = arith.fptosi %207 : vector<256x1xf32> to vector<256x1xi32>
    %209 = vector.broadcast %208 : vector<256x1xi32> to vector<256x256xi32>
    %210 = arith.cmpi eq, %209, %170 : vector<256x256xi32>
    %211 = arith.extui %210 : vector<256x256xi1> to vector<256x256xi32>
    %212 = arith.sitofp %211 : vector<256x256xi32> to vector<256x256xf32>
    %cst_56 = arith.constant dense<0.000000e+00> : vector<1x256xf32>
    %213 = tpu.matmul %193, %212, %cst_56 {dimension_numbers = #tpu.dot_dimension_numbers<[1], [0], [0], [1], [0, 0, 1, 1], [], []>} : vector<1x256xf32>, vector<256x256xf32>, vector<1x256xf32> -> vector<1x256xf32>
    %214 = tpu.concatenate %192, %213 in 1 : vector<1x256xf32>, vector<1x256xf32> -> vector<1x512xf32>
    %c0_i32_57 = arith.constant 0 : i32
    %215 = tpu.memref_slice %arg13[%c0_i32_57] : memref<4x!tpu.dma_semaphore, #tpu.memory_space<semaphore_mem>> -> memref<1x!tpu.dma_semaphore, #tpu.memory_space<semaphore_mem>>
    %216 = tpu.memref_squeeze %215 : memref<1x!tpu.dma_semaphore, #tpu.memory_space<semaphore_mem>> -> memref<!tpu.dma_semaphore, #tpu.memory_space<semaphore_mem>>
    tpu.wait_dma2 semaphore(%216 : memref<!tpu.dma_semaphore, #tpu.memory_space<semaphore_mem>>) src(%arg4 : memref<512x256xbf16, #tpu.memory_space<any>>) dst(%arg9 : memref<512x256xbf16, #tpu.memory_space<vmem>>)
    %c1_i32_58 = arith.constant 1 : i32
    %217 = tpu.memref_slice %arg13[%c1_i32_58] : memref<4x!tpu.dma_semaphore, #tpu.memory_space<semaphore_mem>> -> memref<1x!tpu.dma_semaphore, #tpu.memory_space<semaphore_mem>>
    %218 = tpu.memref_squeeze %217 : memref<1x!tpu.dma_semaphore, #tpu.memory_space<semaphore_mem>> -> memref<!tpu.dma_semaphore, #tpu.memory_space<semaphore_mem>>
    tpu.wait_dma2 semaphore(%218 : memref<!tpu.dma_semaphore, #tpu.memory_space<semaphore_mem>>) src(%arg5 : memref<3x256xf32, #tpu.memory_space<any>>) dst(%arg10 : memref<3x256xf32, #tpu.memory_space<vmem>>)
    %c0_59 = arith.constant 0 : index
    %c0_60 = arith.constant 0 : index
    %219 = vector.load %arg10[%c0_59, %c0_60] : memref<3x256xf32, #tpu.memory_space<vmem>>, vector<3x256xf32>
    %220 = arith.truncf %214 : vector<1x512xf32> to vector<1x512xbf16>
    %c0_61 = arith.constant 0 : index
    %c0_62 = arith.constant 0 : index
    %221 = vector.load %arg9[%c0_61, %c0_62] : memref<512x256xbf16, #tpu.memory_space<vmem>>, vector<512x256xbf16>
    %cst_63 = arith.constant dense<0.000000e+00> : vector<1x256xf32>
    %222 = tpu.matmul %220, %221, %cst_63 {dimension_numbers = #tpu.dot_dimension_numbers<[1], [0], [0], [1], [0, 0, 1, 1], [], []>} : vector<1x512xbf16>, vector<512x256xbf16>, vector<1x256xf32> -> vector<1x256xf32>
    %223 = vector.extract_strided_slice %219 {offsets = [0, 0], sizes = [1, 256], strides = [1, 1]} : vector<3x256xf32> to vector<1x256xf32>
    %224 = arith.addf %222, %223 : vector<1x256xf32>
    %225 = vector.extract_strided_slice %219 {offsets = [1, 0], sizes = [1, 256], strides = [1, 1]} : vector<3x256xf32> to vector<1x256xf32>
    %226 = vector.extract_strided_slice %219 {offsets = [2, 0], sizes = [1, 256], strides = [1, 1]} : vector<3x256xf32> to vector<1x256xf32>
    %227 = tpu.iota {dimensions = array<i32: 0>} : vector<256x256xi32>
    %c5_i32 = arith.constant 5 : i32
    %228 = vector.broadcast %c5_i32 : i32 to vector<256x256xi32>
    %229 = arith.shrsi %227, %228 : vector<256x256xi32>
    %230 = tpu.iota {dimensions = array<i32: 1>} : vector<256x256xi32>
    %c5_i32_64 = arith.constant 5 : i32
    %231 = vector.broadcast %c5_i32_64 : i32 to vector<256x256xi32>
    %232 = arith.shrsi %230, %231 : vector<256x256xi32>
    %233 = arith.cmpi eq, %229, %232 : vector<256x256xi32>
    %cst_65 = arith.constant 3.125000e-02 : f32
    %cst_66 = arith.constant 0.000000e+00 : f32
    %234 = vector.broadcast %cst_65 : f32 to vector<256x256xf32>
    %235 = vector.broadcast %cst_66 : f32 to vector<256x256xf32>
    %236 = arith.select %233, %234, %235 : vector<256x256xi1>, vector<256x256xf32>
    %cst_67 = arith.constant dense<0.000000e+00> : vector<1x256xf32>
    %237 = tpu.matmul %224, %236, %cst_67 {dimension_numbers = #tpu.dot_dimension_numbers<[1], [0], [0], [1], [0, 0, 1, 1], [], []>} : vector<1x256xf32>, vector<256x256xf32>, vector<1x256xf32> -> vector<1x256xf32>
    %238 = arith.subf %224, %237 : vector<1x256xf32>
    %239 = arith.mulf %238, %238 : vector<1x256xf32>
    %cst_68 = arith.constant dense<0.000000e+00> : vector<1x256xf32>
    %240 = tpu.matmul %239, %236, %cst_68 {dimension_numbers = #tpu.dot_dimension_numbers<[1], [0], [0], [1], [0, 0, 1, 1], [], []>} : vector<1x256xf32>, vector<256x256xf32>, vector<1x256xf32> -> vector<1x256xf32>
    %cst_69 = arith.constant 9.99999974E-6 : f32
    %241 = vector.broadcast %cst_69 : f32 to vector<1x256xf32>
    %242 = arith.addf %240, %241 : vector<1x256xf32>
    %243 = math.rsqrt %242 : vector<1x256xf32>
    %244 = arith.mulf %238, %243 : vector<1x256xf32>
    %245 = arith.mulf %244, %225 : vector<1x256xf32>
    %246 = arith.addf %245, %226 : vector<1x256xf32>
    %cst_70 = arith.constant 0.000000e+00 : f32
    %247 = vector.broadcast %cst_70 : f32 to vector<1x256xf32>
    %248 = arith.maximumf %246, %247 : vector<1x256xf32>
    %c2_i32_71 = arith.constant 2 : i32
    %249 = tpu.memref_slice %arg13[%c2_i32_71] : memref<4x!tpu.dma_semaphore, #tpu.memory_space<semaphore_mem>> -> memref<1x!tpu.dma_semaphore, #tpu.memory_space<semaphore_mem>>
    %250 = tpu.memref_squeeze %249 : memref<1x!tpu.dma_semaphore, #tpu.memory_space<semaphore_mem>> -> memref<!tpu.dma_semaphore, #tpu.memory_space<semaphore_mem>>
    tpu.wait_dma2 semaphore(%250 : memref<!tpu.dma_semaphore, #tpu.memory_space<semaphore_mem>>) src(%arg6 : memref<256x128xbf16, #tpu.memory_space<any>>) dst(%arg11 : memref<256x128xbf16, #tpu.memory_space<vmem>>)
    %c3_i32_72 = arith.constant 3 : i32
    %251 = tpu.memref_slice %arg13[%c3_i32_72] : memref<4x!tpu.dma_semaphore, #tpu.memory_space<semaphore_mem>> -> memref<1x!tpu.dma_semaphore, #tpu.memory_space<semaphore_mem>>
    %252 = tpu.memref_squeeze %251 : memref<1x!tpu.dma_semaphore, #tpu.memory_space<semaphore_mem>> -> memref<!tpu.dma_semaphore, #tpu.memory_space<semaphore_mem>>
    tpu.wait_dma2 semaphore(%252 : memref<!tpu.dma_semaphore, #tpu.memory_space<semaphore_mem>>) src(%arg7 : memref<132x128xf32, #tpu.memory_space<any>>) dst(%arg12 : memref<132x128xf32, #tpu.memory_space<vmem>>)
    %c0_73 = arith.constant 0 : index
    %c0_74 = arith.constant 0 : index
    %253 = vector.load %arg12[%c0_73, %c0_74] : memref<132x128xf32, #tpu.memory_space<vmem>>, vector<128x128xf32>
    %c128_75 = arith.constant 128 : index
    %c0_76 = arith.constant 0 : index
    %254 = vector.load %arg12[%c128_75, %c0_76] : memref<132x128xf32, #tpu.memory_space<vmem>>, vector<4x128xf32>
    %255 = arith.truncf %248 : vector<1x256xf32> to vector<1x256xbf16>
    %c0_77 = arith.constant 0 : index
    %c0_78 = arith.constant 0 : index
    %256 = vector.load %arg11[%c0_77, %c0_78] : memref<256x128xbf16, #tpu.memory_space<vmem>>, vector<256x128xbf16>
    %cst_79 = arith.constant dense<0.000000e+00> : vector<1x128xf32>
    %257 = tpu.matmul %255, %256, %cst_79 {dimension_numbers = #tpu.dot_dimension_numbers<[1], [0], [0], [1], [0, 0, 1, 1], [], []>} : vector<1x256xbf16>, vector<256x128xbf16>, vector<1x128xf32> -> vector<1x128xf32>
    %258 = vector.extract_strided_slice %254 {offsets = [0, 0], sizes = [1, 128], strides = [1, 1]} : vector<4x128xf32> to vector<1x128xf32>
    %259 = arith.addf %257, %258 : vector<1x128xf32>
    %260 = vector.extract_strided_slice %254 {offsets = [1, 0], sizes = [1, 128], strides = [1, 1]} : vector<4x128xf32> to vector<1x128xf32>
    %261 = vector.extract_strided_slice %254 {offsets = [2, 0], sizes = [1, 128], strides = [1, 1]} : vector<4x128xf32> to vector<1x128xf32>
    %262 = tpu.iota {dimensions = array<i32: 0>} : vector<128x128xi32>
    %c4_i32_80 = arith.constant 4 : i32
    %263 = vector.broadcast %c4_i32_80 : i32 to vector<128x128xi32>
    %264 = arith.shrsi %262, %263 : vector<128x128xi32>
    %265 = tpu.iota {dimensions = array<i32: 1>} : vector<128x128xi32>
    %c4_i32_81 = arith.constant 4 : i32
    %266 = vector.broadcast %c4_i32_81 : i32 to vector<128x128xi32>
    %267 = arith.shrsi %265, %266 : vector<128x128xi32>
    %268 = arith.cmpi eq, %264, %267 : vector<128x128xi32>
    %cst_82 = arith.constant 6.250000e-02 : f32
    %cst_83 = arith.constant 0.000000e+00 : f32
    %269 = vector.broadcast %cst_82 : f32 to vector<128x128xf32>
    %270 = vector.broadcast %cst_83 : f32 to vector<128x128xf32>
    %271 = arith.select %268, %269, %270 : vector<128x128xi1>, vector<128x128xf32>
    %cst_84 = arith.constant dense<0.000000e+00> : vector<1x128xf32>
    %272 = tpu.matmul %259, %271, %cst_84 {dimension_numbers = #tpu.dot_dimension_numbers<[1], [0], [0], [1], [0, 0, 1, 1], [], []>} : vector<1x128xf32>, vector<128x128xf32>, vector<1x128xf32> -> vector<1x128xf32>
    %273 = arith.subf %259, %272 : vector<1x128xf32>
    %274 = arith.mulf %273, %273 : vector<1x128xf32>
    %cst_85 = arith.constant dense<0.000000e+00> : vector<1x128xf32>
    %275 = tpu.matmul %274, %271, %cst_85 {dimension_numbers = #tpu.dot_dimension_numbers<[1], [0], [0], [1], [0, 0, 1, 1], [], []>} : vector<1x128xf32>, vector<128x128xf32>, vector<1x128xf32> -> vector<1x128xf32>
    %cst_86 = arith.constant 9.99999974E-6 : f32
    %276 = vector.broadcast %cst_86 : f32 to vector<1x128xf32>
    %277 = arith.addf %275, %276 : vector<1x128xf32>
    %278 = math.rsqrt %277 : vector<1x128xf32>
    %279 = arith.mulf %273, %278 : vector<1x128xf32>
    %280 = arith.mulf %279, %260 : vector<1x128xf32>
    %281 = arith.addf %280, %261 : vector<1x128xf32>
    %cst_87 = arith.constant 0.000000e+00 : f32
    %282 = vector.broadcast %cst_87 : f32 to vector<1x128xf32>
    %283 = arith.maximumf %281, %282 : vector<1x128xf32>
    %cst_88 = arith.constant dense<0.000000e+00> : vector<1x128xf32>
    %284 = tpu.matmul %283, %253, %cst_88 {dimension_numbers = #tpu.dot_dimension_numbers<[1], [0], [0], [1], [0, 0, 1, 1], [], []>} : vector<1x128xf32>, vector<128x128xf32>, vector<1x128xf32> -> vector<1x128xf32>
    %285 = vector.extract_strided_slice %254 {offsets = [3, 0], sizes = [1, 128], strides = [1, 1]} : vector<4x128xf32> to vector<1x128xf32>
    %286 = arith.addf %284, %285 : vector<1x128xf32>
    %c0_89 = arith.constant 0 : index
    %c0_90 = arith.constant 0 : index
    %287 = vector.load %arg8[%c0_89, %c0_90] : memref<1x128xf32, #tpu.memory_space<vmem>>, vector<1x128xf32>
    tpu.vector_store %arg8[%c0_89, %c0_90], %286 {strides = array<i32>} : memref<1x128xf32, #tpu.memory_space<vmem>>, vector<1x128xf32>,
    return
  }
}

</mosaic_0001>

<bundles_post_ra>
// kernel: _scorer_impl.1
= control target key start
LH: loop header
LB: loop body
LE: loop exit
PB: predicated region body
PF: predicated region fallthrough
CT: control target
= control target key end

     0   :  { %13 = vsyncpa [#allocation8], 0  ;;  %s14480_s0 = inlined_call_operand.vmem [shape: f32[256,8], index: 0, kind: input, shape index: {}]   ;;  %s14481_s1 = inlined_call_operand.vmem [shape: f32[8,8], index: 1, kind: input, shape index: {}]   ;;  %s14482_s2 = inlined_call_operand.vmem [shape: f32[128,32], index: 2, kind: input, shape index: {}]   ;;  %s14483_s3 = inlined_call_operand.vmem [shape: f32[128,32], index: 3, kind: input, shape index: {}]   ;;  %s14484_s4 = inlined_call_operand.vmem [shape: bf16[512,256], index: 4, kind: input, shape index: {}]   ;;  %s14485_s5 = inlined_call_operand.vmem [shape: f32[3,256], index: 5, kind: input, shape index: {}]   ;;  %s14486_s6 = inlined_call_operand.hbm [shape: bf16[256,128], index: 6, kind: input, shape index: {}]   ;;  %s14487_s7 = inlined_call_operand.vmem [shape: f32[132,128], index: 7, kind: input, shape index: {}]   ;;  %s14488_s8 = inlined_call_operand.hbm [shape: f32[1,128], index: 8, kind: output, shape index: {}]  }
   0x1   :  { %v40_v0 = vld [vmem:[%s14484_s4] sm:$0xf]  ;;  %v42_v1 = vld [vmem:[%s14484_s4 + $0x8] sm:$0xf]  ;;  %v44_v2 = vld [vmem:[%s14484_s4 + $0x4] sm:$0xf] }
   0x2   :  { %41 = vst [vmem:[#allocation2] sm:$0xf] %v40_v0  ;;  %43 = vst [vmem:[#allocation2 + $0x4] sm:$0xf] %v42_v1  ;;  %v46_v3 = vld [vmem:[%s14484_s4 + $0xc] sm:$0xff]   ;;  %v54_v6 = vld [vmem:[%s14484_s4 + $0x1c] sm:$0xff]  }
   0x3   :  { %v50_v4 = vld [vmem:[%s14484_s4 + $0x18] sm:$0xf]  ;;  %45 = vst [vmem:[#allocation2 + $0x8] sm:$0xf] %v44_v2  ;;  %47 = vst [vmem:[#allocation2 + $0xc] sm:$0xff] %v46_v3   ;;  %v62_v9 = vld [vmem:[%s14484_s4 + $0x2c] sm:$0xff]  }
   0x4   :  { %51 = vst [vmem:[#allocation2 + $0x14] sm:$0xf] %v50_v4  ;;  %v52_v5 = vld [vmem:[%s14484_s4 + $0x14] sm:$0xf]  ;;  %v58_v7 = vld [vmem:[%s14484_s4 + $0x28] sm:$0xf] }
   0x5   :  { %53 = vst [vmem:[#allocation2 + $0x18] sm:$0xf] %v52_v5  ;;  %55 = vst [vmem:[#allocation2 + $0x1c] sm:$0xff] %v54_v6   ;;  %v60_v8 = vld [vmem:[%s14484_s4 + $0x24] sm:$0xf]  ;;  %v70_v12 = vld [vmem:[%s14484_s4 + $0x3c] sm:$0xff]  }
   0x6   :  { %59 = vst [vmem:[#allocation2 + $0x24] sm:$0xf] %v58_v7  ;;  %v66_v10 = vld [vmem:[%s14484_s4 + $0x38] sm:$0xf]  ;;  %61 = vst [vmem:[#allocation2 + $0x28] sm:$0xf] %v60_v8 }
   0x7   :  { %63 = vst [vmem:[#allocation2 + $0x2c] sm:$0xff] %v62_v9   ;;  %67 = vst [vmem:[#allocation2 + $0x34] sm:$0xf] %v66_v10  ;;  %v68_v11 = vld [vmem:[%s14484_s4 + $0x34] sm:$0xf]  ;;  %v78_v15 = vld [vmem:[%s14484_s4 + $0x4c] sm:$0xff]  }
   0x8   :  { %v74_v13 = vld [vmem:[%s14484_s4 + $0x48] sm:$0xf]  ;;  %69 = vst [vmem:[#allocation2 + $0x38] sm:$0xf] %v68_v11  ;;  %71 = vst [vmem:[#allocation2 + $0x3c] sm:$0xff] %v70_v12   ;;  %v86_v18 = vld [vmem:[%s14484_s4 + $0x5c] sm:$0xff]  }
   0x9   :  { %75 = vst [vmem:[#allocation2 + $0x44] sm:$0xf] %v74_v13  ;;  %v76_v14 = vld [vmem:[%s14484_s4 + $0x44] sm:$0xf]  ;;  %v82_v16 = vld [vmem:[%s14484_s4 + $0x58] sm:$0xf] }
   0xa   :  { %77 = vst [vmem:[#allocation2 + $0x48] sm:$0xf] %v76_v14  ;;  %79 = vst [vmem:[#allocation2 + $0x4c] sm:$0xff] %v78_v15   ;;  %v84_v17 = vld [vmem:[%s14484_s4 + $0x54] sm:$0xf]  ;;  %v94_v21 = vld [vmem:[%s14484_s4 + $0x6c] sm:$0xff]  }
   0xb   :  { %83 = vst [vmem:[#allocation2 + $0x54] sm:$0xf] %v82_v16  ;;  %v90_v19 = vld [vmem:[%s14484_s4 + $0x68] sm:$0xf]  ;;  %85 = vst [vmem:[#allocation2 + $0x58] sm:$0xf] %v84_v17 }
   0xc   :  { %87 = vst [vmem:[#allocation2 + $0x5c] sm:$0xff] %v86_v18   ;;  %91 = vst [vmem:[#allocation2 + $0x64] sm:$0xf] %v90_v19  ;;  %v92_v20 = vld [vmem:[%s14484_s4 + $0x64] sm:$0xf]  ;;  %v102_v24 = vld [vmem:[%s14484_s4 + $0x7c] sm:$0xff]  }
   0xd   :  { %v98_v22 = vld [vmem:[%s14484_s4 + $0x78] sm:$0xf]  ;;  %93 = vst [vmem:[#allocation2 + $0x68] sm:$0xf] %v92_v20  ;;  %95 = vst [vmem:[#allocation2 + $0x6c] sm:$0xff] %v94_v21   ;;  %v110_v27 = vld [vmem:[%s14484_s4 + $0x8c] sm:$0xff]  }
   0xe   :  { %99 = vst [vmem:[#allocation2 + $0x74] sm:$0xf] %v98_v22  ;;  %v100_v23 = vld [vmem:[%s14484_s4 + $0x74] sm:$0xf]  ;;  %v106_v25 = vld [vmem:[%s14484_s4 + $0x88] sm:$0xf] }
   0xf   :  { %101 = vst [vmem:[#allocation2 + $0x78] sm:$0xf] %v100_v23  ;;  %103 = vst [vmem:[#allocation2 + $0x7c] sm:$0xff] %v102_v24   ;;  %v108_v26 = vld [vmem:[%s14484_s4 + $0x84] sm:$0xf]  ;;  %v118_v30 = vld [vmem:[%s14484_s4 + $0x9c] sm:$0xff]  }
  0x10   :  { %107 = vst [vmem:[#allocation2 + $0x84] sm:$0xf] %v106_v25  ;;  %v114_v28 = vld [vmem:[%s14484_s4 + $0x98] sm:$0xf]  ;;  %109 = vst [vmem:[#allocation2 + $0x88] sm:$0xf] %v108_v26 }
  0x11   :  { %111 = vst [vmem:[#allocation2 + $0x8c] sm:$0xff] %v110_v27   ;;  %115 = vst [vmem:[#allocation2 + $0x94] sm:$0xf] %v114_v28  ;;  %v116_v29 = vld [vmem:[%s14484_s4 + $0x94] sm:$0xf]  ;;  %v126_v33 = vld [vmem:[%s14484_s4 + $0xac] sm:$0xff]  }
  0x12   :  { %v122_v31 = vld [vmem:[%s14484_s4 + $0xa8] sm:$0xf]  ;;  %117 = vst [vmem:[#allocation2 + $0x98] sm:$0xf] %v116_v29  ;;  %119 = vst [vmem:[#allocation2 + $0x9c] sm:$0xff] %v118_v30   ;;  %v134_v36 = vld [vmem:[%s14484_s4 + $0xbc] sm:$0xff]  }
  0x13   :  { %123 = vst [vmem:[#allocation2 + $0xa4] sm:$0xf] %v122_v31  ;;  %v124_v32 = vld [vmem:[%s14484_s4 + $0xa4] sm:$0xf]  ;;  %v130_v34 = vld [vmem:[%s14484_s4 + $0xb8] sm:$0xf] }
  0x14   :  { %125 = vst [vmem:[#allocation2 + $0xa8] sm:$0xf] %v124_v32  ;;  %127 = vst [vmem:[#allocation2 + $0xac] sm:$0xff] %v126_v33   ;;  %v132_v35 = vld [vmem:[%s14484_s4 + $0xb4] sm:$0xf]  ;;  %v142_v39 = vld [vmem:[%s14484_s4 + $0xcc] sm:$0xff]  }
  0x15   :  { %131 = vst [vmem:[#allocation2 + $0xb4] sm:$0xf] %v130_v34  ;;  %v138_v37 = vld [vmem:[%s14484_s4 + $0xc8] sm:$0xf]  ;;  %133 = vst [vmem:[#allocation2 + $0xb8] sm:$0xf] %v132_v35 }
  0x16   :  { %135 = vst [vmem:[#allocation2 + $0xbc] sm:$0xff] %v134_v36   ;;  %139 = vst [vmem:[#allocation2 + $0xc4] sm:$0xf] %v138_v37  ;;  %v140_v38 = vld [vmem:[%s14484_s4 + $0xc4] sm:$0xf]  ;;  %v150_v42 = vld [vmem:[%s14484_s4 + $0xdc] sm:$0xff]  }
  0x17   :  { %v146_v40 = vld [vmem:[%s14484_s4 + $0xd8] sm:$0xf]  ;;  %141 = vst [vmem:[#allocation2 + $0xc8] sm:$0xf] %v140_v38  ;;  %143 = vst [vmem:[#allocation2 + $0xcc] sm:$0xff] %v142_v39   ;;  %v158_v45 = vld [vmem:[%s14484_s4 + $0xec] sm:$0xff]  }
  0x18   :  { %147 = vst [vmem:[#allocation2 + $0xd4] sm:$0xf] %v146_v40  ;;  %v148_v41 = vld [vmem:[%s14484_s4 + $0xd4] sm:$0xf]  ;;  %v154_v43 = vld [vmem:[%s14484_s4 + $0xe8] sm:$0xf] }
  0x19   :  { %149 = vst [vmem:[#allocation2 + $0xd8] sm:$0xf] %v148_v41  ;;  %151 = vst [vmem:[#allocation2 + $0xdc] sm:$0xff] %v150_v42   ;;  %v156_v44 = vld [vmem:[%s14484_s4 + $0xe4] sm:$0xf]  ;;  %v166_v48 = vld [vmem:[%s14484_s4 + $0xfc] sm:$0xff]  }
  0x1a   :  { %155 = vst [vmem:[#allocation2 + $0xe4] sm:$0xf] %v154_v43  ;;  %v162_v46 = vld [vmem:[%s14484_s4 + $0xf8] sm:$0xf]  ;;  %157 = vst [vmem:[#allocation2 + $0xe8] sm:$0xf] %v156_v44 }
  0x1b   :  { %159 = vst [vmem:[#allocation2 + $0xec] sm:$0xff] %v158_v45   ;;  %163 = vst [vmem:[#allocation2 + $0xf4] sm:$0xf] %v162_v46  ;;  %v164_v47 = vld [vmem:[%s14484_s4 + $0xf4] sm:$0xf]  ;;  %v174_v51 = vld [vmem:[%s14484_s4 + $0x10c] sm:$0xff]  }
  0x1c   :  { %v170_v49 = vld [vmem:[%s14484_s4 + $0x108] sm:$0xf]  ;;  %165 = vst [vmem:[#allocation2 + $0xf8] sm:$0xf] %v164_v47  ;;  %167 = vst [vmem:[#allocation2 + $0xfc] sm:$0xff] %v166_v48   ;;  %v182_v54 = vld [vmem:[%s14484_s4 + $0x11c] sm:$0xff]  }
  0x1d   :  { %171 = vst [vmem:[#allocation2 + $0x104] sm:$0xf] %v170_v49  ;;  %v172_v50 = vld [vmem:[%s14484_s4 + $0x104] sm:$0xf]  ;;  %v178_v52 = vld [vmem:[%s14484_s4 + $0x118] sm:$0xf] }
  0x1e   :  { %173 = vst [vmem:[#allocation2 + $0x108] sm:$0xf] %v172_v50  ;;  %175 = vst [vmem:[#allocation2 + $0x10c] sm:$0xff] %v174_v51   ;;  %v180_v53 = vld [vmem:[%s14484_s4 + $0x114] sm:$0xf]  ;;  %v190_v57 = vld [vmem:[%s14484_s4 + $0x12c] sm:$0xff]  }
  0x1f   :  { %179 = vst [vmem:[#allocation2 + $0x114] sm:$0xf] %v178_v52  ;;  %v186_v55 = vld [vmem:[%s14484_s4 + $0x128] sm:$0xf]  ;;  %181 = vst [vmem:[#allocation2 + $0x118] sm:$0xf] %v180_v53 }
  0x20   :  { %183 = vst [vmem:[#allocation2 + $0x11c] sm:$0xff] %v182_v54   ;;  %187 = vst [vmem:[#allocation2 + $0x124] sm:$0xf] %v186_v55  ;;  %v188_v56 = vld [vmem:[%s14484_s4 + $0x124] sm:$0xf]  ;;  %v198_v60 = vld [vmem:[%s14484_s4 + $0x13c] sm:$0xff]  }
  0x21   :  { %v194_v58 = vld [vmem:[%s14484_s4 + $0x138] sm:$0xf]  ;;  %189 = vst [vmem:[#allocation2 + $0x128] sm:$0xf] %v188_v56  ;;  %191 = vst [vmem:[#allocation2 + $0x12c] sm:$0xff] %v190_v57   ;;  %v206_v63 = vld [vmem:[%s14484_s4 + $0x14c] sm:$0xff]  }
  0x22   :  { %195 = vst [vmem:[#allocation2 + $0x134] sm:$0xf] %v194_v58  ;;  %v196_v59 = vld [vmem:[%s14484_s4 + $0x134] sm:$0xf]  ;;  %v202_v61 = vld [vmem:[%s14484_s4 + $0x148] sm:$0xf] }
  0x23   :  { %197 = vst [vmem:[#allocation2 + $0x138] sm:$0xf] %v196_v59  ;;  %199 = vst [vmem:[#allocation2 + $0x13c] sm:$0xff] %v198_v60   ;;  %v204_v62 = vld [vmem:[%s14484_s4 + $0x144] sm:$0xf]  ;;  %v214_v2 = vld [vmem:[%s14484_s4 + $0x15c] sm:$0xff]  }
  0x24   :  { %203 = vst [vmem:[#allocation2 + $0x144] sm:$0xf] %v202_v61  ;;  %v210_v0 = vld [vmem:[%s14484_s4 + $0x158] sm:$0xf]  ;;  %205 = vst [vmem:[#allocation2 + $0x148] sm:$0xf] %v204_v62 }
  0x25   :  { %207 = vst [vmem:[#allocation2 + $0x14c] sm:$0xff] %v206_v63   ;;  %211 = vst [vmem:[#allocation2 + $0x154] sm:$0xf] %v210_v0  ;;  %v212_v1 = vld [vmem:[%s14484_s4 + $0x154] sm:$0xf]  ;;  %v222_v5 = vld [vmem:[%s14484_s4 + $0x16c] sm:$0xff]  }
  0x26   :  { %v218_v3 = vld [vmem:[%s14484_s4 + $0x168] sm:$0xf]  ;;  %213 = vst [vmem:[#allocation2 + $0x158] sm:$0xf] %v212_v1  ;;  %215 = vst [vmem:[#allocation2 + $0x15c] sm:$0xff] %v214_v2   ;;  %v230_v8 = vld [vmem:[%s14484_s4 + $0x17c] sm:$0xff]  }
  0x27   :  { %219 = vst [vmem:[#allocation2 + $0x164] sm:$0xf] %v218_v3  ;;  %v220_v4 = vld [vmem:[%s14484_s4 + $0x164] sm:$0xf]  ;;  %v226_v6 = vld [vmem:[%s14484_s4 + $0x178] sm:$0xf] }
  0x28   :  { %221 = vst [vmem:[#allocation2 + $0x168] sm:$0xf] %v220_v4  ;;  %223 = vst [vmem:[#allocation2 + $0x16c] sm:$0xff] %v222_v5   ;;  %v228_v7 = vld [vmem:[%s14484_s4 + $0x174] sm:$0xf]  ;;  %v238_v11 = vld [vmem:[%s14484_s4 + $0x18c] sm:$0xff]  }
  0x29   :  { %227 = vst [vmem:[#allocation2 + $0x174] sm:$0xf] %v226_v6  ;;  %v234_v9 = vld [vmem:[%s14484_s4 + $0x188] sm:$0xf]  ;;  %229 = vst [vmem:[#allocation2 + $0x178] sm:$0xf] %v228_v7 }
  0x2a   :  { %231 = vst [vmem:[#allocation2 + $0x17c] sm:$0xff] %v230_v8   ;;  %235 = vst [vmem:[#allocation2 + $0x184] sm:$0xf] %v234_v9  ;;  %v236_v10 = vld [vmem:[%s14484_s4 + $0x184] sm:$0xf]  ;;  %v246_v14 = vld [vmem:[%s14484_s4 + $0x19c] sm:$0xff]  }
  0x2b   :  { %v242_v12 = vld [vmem:[%s14484_s4 + $0x198] sm:$0xf]  ;;  %237 = vst [vmem:[#allocation2 + $0x188] sm:$0xf] %v236_v10  ;;  %239 = vst [vmem:[#allocation2 + $0x18c] sm:$0xff] %v238_v11   ;;  %v254_v17 = vld [vmem:[%s14484_s4 + $0x1ac] sm:$0xff]  }
  0x2c   :  { %243 = vst [vmem:[#allocation2 + $0x194] sm:$0xf] %v242_v12  ;;  %v244_v13 = vld [vmem:[%s14484_s4 + $0x194] sm:$0xf]  ;;  %v250_v15 = vld [vmem:[%s14484_s4 + $0x1a8] sm:$0xf] }
  0x2d   :  { %245 = vst [vmem:[#allocation2 + $0x198] sm:$0xf] %v244_v13  ;;  %247 = vst [vmem:[#allocation2 + $0x19c] sm:$0xff] %v246_v14   ;;  %v252_v16 = vld [vmem:[%s14484_s4 + $0x1a4] sm:$0xf]  ;;  %v262_v20 = vld [vmem:[%s14484_s4 + $0x1bc] sm:$0xff]  }
  0x2e   :  { %251 = vst [vmem:[#allocation2 + $0x1a4] sm:$0xf] %v250_v15  ;;  %v258_v18 = vld [vmem:[%s14484_s4 + $0x1b8] sm:$0xf]  ;;  %253 = vst [vmem:[#allocation2 + $0x1a8] sm:$0xf] %v252_v16 }
  0x2f   :  { %255 = vst [vmem:[#allocation2 + $0x1ac] sm:$0xff] %v254_v17   ;;  %259 = vst [vmem:[#allocation2 + $0x1b4] sm:$0xf] %v258_v18  ;;  %v260_v19 = vld [vmem:[%s14484_s4 + $0x1b4] sm:$0xf]  ;;  %v270_v23 = vld [vmem:[%s14484_s4 + $0x1cc] sm:$0xff]  }
  0x30   :  { %v266_v21 = vld [vmem:[%s14484_s4 + $0x1c8] sm:$0xf]  ;;  %261 = vst [vmem:[#allocation2 + $0x1b8] sm:$0xf] %v260_v19  ;;  %263 = vst [vmem:[#allocation2 + $0x1bc] sm:$0xff] %v262_v20   ;;  %v278_v26 = vld [vmem:[%s14484_s4 + $0x1dc] sm:$0xff]  }
  0x31   :  { %267 = vst [vmem:[#allocation2 + $0x1c4] sm:$0xf] %v266_v21  ;;  %v268_v22 = vld [vmem:[%s14484_s4 + $0x1c4] sm:$0xf]  ;;  %v274_v24 = vld [vmem:[%s14484_s4 + $0x1d8] sm:$0xf] }
  0x32   :  { %269 = vst [vmem:[#allocation2 + $0x1c8] sm:$0xf] %v268_v22  ;;  %271 = vst [vmem:[#allocation2 + $0x1cc] sm:$0xff] %v270_v23   ;;  %v276_v25 = vld [vmem:[%s14484_s4 + $0x1d4] sm:$0xf]  ;;  %v286_v29 = vld [vmem:[%s14484_s4 + $0x1ec] sm:$0xff]  }
  0x33   :  { %275 = vst [vmem:[#allocation2 + $0x1d4] sm:$0xf] %v274_v24  ;;  %v282_v27 = vld [vmem:[%s14484_s4 + $0x1e8] sm:$0xf]  ;;  %277 = vst [vmem:[#allocation2 + $0x1d8] sm:$0xf] %v276_v25 }
  0x34   :  { %279 = vst [vmem:[#allocation2 + $0x1dc] sm:$0xff] %v278_v26   ;;  %283 = vst [vmem:[#allocation2 + $0x1e4] sm:$0xf] %v282_v27  ;;  %v284_v28 = vld [vmem:[%s14484_s4 + $0x1e4] sm:$0xf] }
  0x35   :  { %v290_v30 = vld [vmem:[%s14484_s4 + $0x1f8] sm:$0xf]  ;;  %285 = vst [vmem:[#allocation2 + $0x1e8] sm:$0xf] %v284_v28  ;;  %287 = vst [vmem:[#allocation2 + $0x1ec] sm:$0xff] %v286_v29  }
  0x36   :  { %291 = vst [vmem:[#allocation2 + $0x1f4] sm:$0xf] %v290_v30  ;;  %v292_v31 = vld [vmem:[%s14484_s4 + $0x1f4] sm:$0xf]  ;;  %v294_v32 = vld [vmem:[%s14484_s4 + $0x1fc] sm:$0xf] }
  0x37   :  { %293 = vst [vmem:[#allocation2 + $0x1f8] sm:$0xf] %v292_v31  ;;  %295 = vst [vmem:[#allocation2 + $0x1fc] sm:$0xf] %v294_v32 }
  0x38   :  { %582 = vsyncadd [#allocation6], 8192  ;;  %v616_v33 = vld [vmem:[%s14485_s5] sm:$0xff] }
  0x39   :  { %617 = vst [vmem:[#allocation3] sm:$0xff] %v616_v33 }
  0x3a   :  { %625 = vsyncadd [#allocation6 + $0x1], 128  ;;  %v676_v34 = vld [vmem:[%s14487_s7] sm:$0xff]  ;;  %v678_v35 = vld [vmem:[%s14487_s7 + $0x8] sm:$0xff]  ;;  %s9130_s29 = smov [#allocation4]   ;;  %s9076_s21 = scalar_lea.hbm %s14486_s6, 2048 }
  0x3b   :  { %s634_s30 = sshll.u32 %s9130_s29, 4  ;;  %677 = vst [vmem:[#allocation5] sm:$0xff] %v676_v34  ;;  %679 = vst [vmem:[#allocation5 + $0x8] sm:$0xff] %v678_v35  ;;  %v680_v36 = vld [vmem:[%s14487_s7 + $0x10] sm:$0xff]  ;;  %v682_v37 = vld [vmem:[%s14487_s7 + $0x18] sm:$0xff]  ;;  %p9077_p0 = scmp.ne.s32.totalorder %s14486_s6, %s9076_s21  ;;  %s635_s30 = int_to_ptr.vmem [resolvable:$true] %s634_s30 }
  0x3c   :  { %v684_v38 = vld [vmem:[%s14487_s7 + $0x20] sm:$0xff]  ;;  %681 = vst [vmem:[#allocation5 + $0x10] sm:$0xff] %v680_v36  ;;  %683 = vst [vmem:[#allocation5 + $0x18] sm:$0xff] %v682_v37  ;;  %v686_v39 = vld [vmem:[%s14487_s7 + $0x28] sm:$0xff]  ;;  %p9080_p1 = scmp.lt.u32.totalorder %s9076_s21, %s14486_s6 }
  0x3d   :  { %685 = vst [vmem:[#allocation5 + $0x20] sm:$0xff] %v684_v38  ;;  %v688_v40 = vld [vmem:[%s14487_s7 + $0x30] sm:$0xff]  ;;  %v690_v41 = vld [vmem:[%s14487_s7 + $0x38] sm:$0xff] }
  0x3e   :  { %p9082_p2 = pnand %p9080_p1, %p9077_p0 }
  0x40   :  { %9085 = shalt.err (!%p9082_p2)  }
  0x41   :  { %s9086_s26 = scalar_lea.vmem %s635_s30, 2048  ;;  %p9091_p4 = scmp.lt.s32.totalorder %s635_s30, %s635_s30 }
  0x42   :  { %p9087_p3 = scmp.ne.s32.totalorder %s635_s30, %s9086_s26  ;;  %p9092_p5 = scmp.lt.s32.totalorder %s9086_s26, %s9086_s26 }
  0x44   :  { %p9093_p6 = por %p9092_p5, %p9091_p4 }
  0x46   :  { %p9094_p7 = pnand %p9093_p6, %p9087_p3 }
  0x48   :  { %9097 = shalt.err (!%p9094_p7)  }
  0x49   :  { %637 = dma.hbm_to_vmem [thread:$0]  %s14486_s6, 2048, %s635_s30, [#allocation6 + $0x2]  ;;  %687 = vst [vmem:[#allocation5 + $0x28] sm:$0xff] %v686_v39  ;;  %689 = vst [vmem:[#allocation5 + $0x30] sm:$0xff] %v688_v40  ;;  %v692_v42 = vld [vmem:[%s14487_s7 + $0x40] sm:$0xff]  ;;  %v694_v43 = vld [vmem:[%s14487_s7 + $0x48] sm:$0xff] }
  0x4a   :  { %691 = vst [vmem:[#allocation5 + $0x38] sm:$0xff] %v690_v41  ;;  %v696_v44 = vld [vmem:[%s14487_s7 + $0x50] sm:$0xff]  ;;  %693 = vst [vmem:[#allocation5 + $0x40] sm:$0xff] %v692_v42  ;;  %v698_v45 = vld [vmem:[%s14487_s7 + $0x58] sm:$0xff] }
  0x4b   :  { %695 = vst [vmem:[#allocation5 + $0x48] sm:$0xff] %v694_v43  ;;  %697 = vst [vmem:[#allocation5 + $0x50] sm:$0xff] %v696_v44  ;;  %v700_v46 = vld [vmem:[%s14487_s7 + $0x60] sm:$0xff]  ;;  %v702_v47 = vld [vmem:[%s14487_s7 + $0x68] sm:$0xff] }
  0x4c   :  { %699 = vst [vmem:[#allocation5 + $0x58] sm:$0xff] %v698_v45  ;;  %701 = vst [vmem:[#allocation5 + $0x60] sm:$0xff] %v700_v46  ;;  %v704_v48 = vld [vmem:[%s14487_s7 + $0x70] sm:$0xff]  ;;  %v706_v49 = vld [vmem:[%s14487_s7 + $0x78] sm:$0xff] }
  0x4d   :  { %703 = vst [vmem:[#allocation5 + $0x68] sm:$0xff] %v702_v47  ;;  %v7074_v50 = vld [vmem:[%s14487_s7 + $0x80] sm:$0xf]  ;;  %705 = vst [vmem:[#allocation5 + $0x70] sm:$0xff] %v704_v48 }
  0x4e   :  { %707 = vst [vmem:[#allocation5 + $0x78] sm:$0xff] %v706_v49  ;;  %718 = vst [vmem:[#allocation5 + $0x80] sm:$0xf] %v7074_v50 }
  0x4f   :  { %722 = vsyncadd [#allocation6 + $0x3], 2112  ;;  %v774_v51 = vld [vmem:[%s14481_s1] sm:$0xff]  ;;  %vm775_vm0 = vcmask 64512   ;;  %v743_v53 = vld [vmem:[%s14480_s0 + $0x88] sm:$0xff]  ;;  %v14489_v4 = vlaneseq  ;;  %vm1725_vm2 = vcmask 261120  }
  0x50   :  { %v742_v52 = vld [vmem:[%s14480_s0 + $0x80] sm:$0xff]  ;;  %7969 = vmatprep.subr.mxu0 %v774_v51  ;;  %v744_v54 = vld [vmem:[%s14480_s0 + $0x90] sm:$0xff]  ;;  %v745_v55 = vld [vmem:[%s14480_s0 + $0x98] sm:$0xff] }
  0x51   :  { %7971 = vmatprep.mubr.msk.f32.mxu0 %vm775_vm0, %v742_v52  ;;  %7970 = vmatpush3.msra.mxu0 %v774_v51  ;;  %v746_v56 = vld [vmem:[%s14480_s0 + $0xa0] sm:$0xff]  ;;  %v747_v57 = vld [vmem:[%s14480_s0 + $0xa8] sm:$0xff]  ;;  %v748_v58 = vld [vmem:[%s14480_s0 + $0xb0] sm:$0xff]  ;;  %v9610_v5 = vand.u32 127, %v14489_v4 }
  0x52   :  { %7972 = vmatmul.mubr.msk.f32.vlgmr.msra.gmra.mrb[0].mxu0 %vm775_vm0, %v743_v53  ;;  %v749_v59 = vld [vmem:[%s14480_s0 + $0xb8] sm:$0xff]  ;;  %v750_v60 = vld [vmem:[%s14480_s0 + $0xc0] sm:$0xff]  ;;  %v751_v61 = vld [vmem:[%s14480_s0 + $0xc8] sm:$0xff] }
  0x53   :  { %7974 = vmatprep.mubr.msk.f32.mxu0 %vm775_vm0, %v744_v54  ;;  %v752_v62 = vld [vmem:[%s14480_s0 + $0xd0] sm:$0xff]  ;;  %v753_v63 = vld [vmem:[%s14480_s0 + $0xd8] sm:$0xff]  ;;  %v754_v0 = vld [vmem:[%s14480_s0 + $0xe0] sm:$0xff]  ;;  %14887 = vst [vmem:[#allocation21_spill] sm:$0xff] %v9610_v5  ;;  %vm725_vm1 = vcmp.lt.s32.totalorder %v9610_v5, 3  ;;  %vm1339_vm4 = vcmp.eq.s32.totalorder %v9610_v5, 4 }
  0x54   :  { %v755_v1 = vld [vmem:[%s14480_s0 + $0xe8] sm:$0xff]  ;;  %v756_v2 = vld [vmem:[%s14480_s0 + $0xf0] sm:$0xff]  ;;  %v757_v3 = vld [vmem:[%s14480_s0 + $0xf8] sm:$0xff]  ;;  %vm1338_vm5 = vcmp.eq.s32.totalorder %v9610_v5, 3 }
  0x55   :  { %v726_v6 = vld [vmem:[%s14480_s0] sm:$0xff]  ;;  %v727_v7 = vld [vmem:[%s14480_s0 + $0x8] sm:$0xff]  ;;  %v728_v10 = vld [vmem:[%s14480_s0 + $0x10] sm:$0xff] }
  0x56   :  { %7975 = vmatmul.mubr.msk.f32.gmra.mrb[2].mxu0 %vm775_vm0, %v745_v55  ;;  %v9621_v8 = vsel %vm725_vm1, %v726_v6, 0.0  ;;  %v9625_v9 = vsel %vm725_vm1, %v727_v7, 0.0  ;;  %v9636_v13 = vsel %vm725_vm1, %v728_v10, 0.0  ;;  %v729_v14 = vld [vmem:[%s14480_s0 + $0x18] sm:$0xff]  ;;  %v730_v18 = vld [vmem:[%s14480_s0 + $0x20] sm:$0xff]  ;;  %v731_v22 = vld [vmem:[%s14480_s0 + $0x28] sm:$0xff] }
  0x57   :  { %7977 = vmatprep.mubr.msk.f32.mxu0 %vm775_vm0, %v746_v56  ;;  %v985_v11 = vsel %vm775_vm0, %v9621_v8, 0.0  ;;  %v986_v12 = vsel %vm775_vm0, %v9625_v9, 0.0  ;;  %v988_v16 = vsel %vm775_vm0, %v9636_v13, 0.0  ;;  %v9645_v17 = vsel %vm725_vm1, %v729_v14, 0.0  ;;  %v732_v26 = vld [vmem:[%s14480_s0 + $0x30] sm:$0xff]  ;;  %v733_v30 = vld [vmem:[%s14480_s0 + $0x38] sm:$0xff]  ;;  %vm10063_vm3 = vmpackc.low %vm1725_vm2, %vm1725_vm2 }
  0x58   :  { %v987_v15 = vadd.f32 %v986_v12, %v985_v11  ;;  %v990_v20 = vsel %vm775_vm0, %v9645_v17, 0.0  ;;  %v9654_v21 = vsel %vm725_vm1, %v730_v18, 0.0  ;;  %v9663_v25 = vsel %vm725_vm1, %v731_v22, 0.0  ;;  %v734_v34 = vld [vmem:[%s14480_s0 + $0x40] sm:$0xff]  ;;  %v735_v38 = vld [vmem:[%s14480_s0 + $0x48] sm:$0xff]  ;;  %v736_v42 = vld [vmem:[%s14480_s0 + $0x50] sm:$0xff] }
  0x59   :  { %v992_v24 = vsel %vm775_vm0, %v9654_v21, 0.0  ;;  %v994_v28 = vsel %vm775_vm0, %v9663_v25, 0.0  ;;  %v9672_v29 = vsel %vm725_vm1, %v732_v26, 0.0  ;;  %v9681_v33 = vsel %vm725_vm1, %v733_v30, 0.0  ;;  %v737_v46 = vld [vmem:[%s14480_s0 + $0x58] sm:$0xff]  ;;  %v738_v50 = vld [vmem:[%s14480_s0 + $0x60] sm:$0xff]  ;;  %vm10427_vm6 = vmpackc.low %vm775_vm0, %vm775_vm0 }
  0x5a   :  { %7978 = vmatmul.mubr.msk.f32.gmra.mrb[4].mxu0 %vm775_vm0, %v747_v57  ;;  %v989_v19 = vadd.f32 %v988_v16, %v987_v15  ;;  %v996_v32 = vsel %vm775_vm0, %v9672_v29, 0.0  ;;  %v998_v36 = vsel %vm775_vm0, %v9681_v33, 0.0  ;;  %v9690_v37 = vsel %vm725_vm1, %v734_v34, 0.0  ;;  %v740_v10 = vld [vmem:[%s14480_s0 + $0x70] sm:$0xff]  ;;  %v741_v26 = vld [vmem:[%s14480_s0 + $0x78] sm:$0xff]  ;;  %v1722_v4 = vld [vmem:[%s14483_s3 + $0x68] sm:$0xff] }
  0x5b   :  { %7980 = vmatprep.mubr.msk.f32.mxu0 %vm775_vm0, %v748_v58  ;;  %v1000_v40 = vsel %vm775_vm0, %v9690_v37, 0.0  ;;  %v9699_v41 = vsel %vm725_vm1, %v735_v38, 0.0  ;;  %v9708_v45 = vsel %vm725_vm1, %v736_v42, 0.0  ;;  %v9717_v49 = vsel %vm725_vm1, %v737_v46, 0.0 }
  0x5c   :  { %v991_v23 = vadd.f32 %v990_v20, %v989_v19  ;;  %v1002_v44 = vsel %vm775_vm0, %v9699_v41, 0.0  ;;  %v1004_v48 = vsel %vm775_vm0, %v9708_v45, 0.0  ;;  %v1006_v55 = vsel %vm775_vm0, %v9717_v49, 0.0 }
  0x5d   :  { %v9736_v58 = vsel %vm725_vm1, %v738_v50, 0.0 }
  0x5e   :  { %7981 = vmatmul.mubr.msk.f32.gmra.mrb[6].mxu0 %vm775_vm0, %v749_v59  ;;  %v993_v27 = vadd.f32 %v992_v24, %v991_v23  ;;  %v9776_v23 = vsel %vm725_vm1, %v740_v10, 0.0 }
  0x5f   :  { %7983 = vmatprep.mubr.msk.f32.mxu0 %vm775_vm0, %v750_v60  ;;  %v739_v60 = vld [vmem:[%s14480_s0 + $0x68] sm:$0xff]  ;;  %v1012_v34 = vsel %vm775_vm0, %v9776_v23, 0.0 }
  0x60   :  { %v995_v31 = vadd.f32 %v994_v28, %v993_v27  ;;  %v9755_v6 = vsel %vm725_vm1, %v739_v60, 0.0 }
  0x61   :  { %v1010_v18 = vsel %vm775_vm0, %v9755_v6, 0.0 }
  0x62   :  { %7984 = vmatmul.mubr.msk.f32.gmra.mrb[8].mxu0 %vm775_vm0, %v751_v61  ;;  %v997_v35 = vadd.f32 %v996_v32, %v995_v31 }
  0x63   :  { %7986 = vmatprep.mubr.msk.f32.mxu0 %vm775_vm0, %v752_v62 }
  0x64   :  { %v999_v39 = vadd.f32 %v998_v36, %v997_v35 }
  0x66   :  { %7987 = vmatmul.mubr.msk.f32.gmra.mrb[10].mxu0 %vm775_vm0, %v753_v63  ;;  %v1001_v43 = vadd.f32 %v1000_v40, %v999_v39  ;;  %v9797_v39 = vsel %vm725_vm1, %v741_v26, 0.0 }
  0x67   :  { %7989 = vmatprep.mubr.msk.f32.mxu0 %vm775_vm0, %v754_v0 }
  0x68   :  { %v1003_v47 = vadd.f32 %v1002_v44, %v1001_v43 }
  0x6a   :  { %7990 = vmatmul.mubr.msk.f32.gmra.mrb[12].mxu0 %vm775_vm0, %v755_v1  ;;  %v1005_v52 = vadd.f32 %v1004_v48, %v1003_v47  ;;  %v1008_v1 = vsel %vm775_vm0, %v9736_v58, 0.0  ;;  %v1014_v48 = vsel %vm775_vm0, %v9797_v39, 0.0 }
  0x6b   :  { %7992 = vmatprep.mubr.msk.f32.mxu0 %vm775_vm0, %v756_v2 }
  0x6c   :  { %v1007_v63 = vadd.f32 %v1006_v55, %v1005_v52 }
  0x6e   :  { %7993 = vmatmul.mubr.msk.f32.gmra.mrb[14].mxu0 %vm775_vm0, %v757_v3  ;;  %v1009_v14 = vadd.f32 %v1008_v1, %v1007_v63 }
  0x70   :  { %v1011_v30 = vadd.f32 %v1010_v18, %v1009_v14 }
  0x72   :  { %v1013_v44 = vadd.f32 %v1012_v34, %v1011_v30 }
 0x125   :  { %v7973_v51 = vpop.f32.mrb[0].mxu0 }
 0x126   :  { %v9724_v53 = vsel %vm725_vm1, %v7973_v51, 0.0  ;;  %v890_v54 = vpop.f32.mrb[1].mxu0 }
 0x127   :  { %v1023_v56 = vsel %vm775_vm0, %v9724_v53, 0.0  ;;  %v9732_v57 = vsel %vm725_vm1, %v890_v54, 0.0 }
 0x128   :  { %v1022_v59 = vsel %vm775_vm0, %v9732_v57, 0.0 }
 0x129   :  { %v1024_v61 = vadd.f32 %v1023_v56, %v1022_v59  ;;  %v7976_v62 = vpop.f32.mrb[2].mxu0  ;;  %v1015_v59 = vadd.f32 %v1014_v48, %v1013_v44 }
 0x12a   :  { %v900_v0 = vpop.f32.mrb[3].mxu0  ;;  %v9747_v2 = vsel %vm725_vm1, %v7976_v62, 0.0 }
 0x12b   :  { %v9751_v3 = vsel %vm725_vm1, %v900_v0, 0.0  ;;  %v1027_v15 = vsel %vm775_vm0, %v9747_v2, 0.0 }
 0x12c   :  { %v1025_v7 = vsel %vm775_vm0, %v9751_v3, 0.0 }
 0x12d   :  { %v1026_v11 = vadd.f32 %v1025_v7, %v1024_v61  ;;  %v7979_v12 = vpop.f32.mrb[4].mxu0 }
 0x12e   :  { %v910_v16 = vpop.f32.mrb[5].mxu0  ;;  %v9768_v19 = vsel %vm725_vm1, %v7979_v12, 0.0 }
 0x12f   :  { %v9772_v20 = vsel %vm725_vm1, %v910_v16, 0.0  ;;  %v1028_v22 = vadd.f32 %v1027_v15, %v1026_v11  ;;  %v1031_v31 = vsel %vm775_vm0, %v9768_v19, 0.0  ;;  %v1016_v11 = vrot.slane %v1015_v59, 4 }
 0x130   :  { %v1029_v24 = vsel %vm775_vm0, %v9772_v20, 0.0 }
 0x131   :  { %v1030_v27 = vadd.f32 %v1029_v24, %v1028_v22  ;;  %v7982_v28 = vpop.f32.mrb[6].mxu0 }
 0x132   :  { %v920_v32 = vpop.f32.mrb[7].mxu0  ;;  %v9789_v35 = vsel %vm725_vm1, %v7982_v28, 0.0 }
 0x133   :  { %v9793_v36 = vsel %vm725_vm1, %v920_v32, 0.0  ;;  %v1032_v38 = vadd.f32 %v1031_v31, %v1030_v27  ;;  %v1035_v46 = vsel %vm775_vm0, %v9789_v35, 0.0  ;;  %v1017_v27 = vadd.f32 %v1016_v11, %v1015_v59 }
 0x134   :  { %v1033_v40 = vsel %vm775_vm0, %v9793_v36, 0.0 }
 0x135   :  { %v1034_v42 = vadd.f32 %v1033_v40, %v1032_v38  ;;  %v7985_v43 = vpop.f32.mrb[8].mxu0  ;;  %v1018_v40 = vrot.slane %v1017_v27, 2 }
 0x136   :  { %v930_v47 = vpop.f32.mrb[9].mxu0  ;;  %v978_v50 = vsel %vm725_vm1, %v7985_v43, 0.0 }
 0x137   :  { %v977_v51 = vsel %vm725_vm1, %v930_v47, 0.0  ;;  %v1036_v52 = vadd.f32 %v1035_v46, %v1034_v42  ;;  %v1039_v60 = vsel %vm775_vm0, %v978_v50, 0.0  ;;  %v1019_v46 = vadd.f32 %v1018_v40, %v1017_v27 }
 0x138   :  { %v1037_v54 = vsel %vm775_vm0, %v977_v51, 0.0 }
 0x139   :  { %v1038_v55 = vadd.f32 %v1037_v54, %v1036_v52  ;;  %v7988_v56 = vpop.f32.mrb[10].mxu0  ;;  %v1020_v52 = vrot.slane %v1019_v46, 1 }
 0x13a   :  { %v940_v61 = vpop.f32.mrb[11].mxu0  ;;  %v980_v62 = vsel %vm725_vm1, %v7988_v56, 0.0 }
 0x13b   :  { %v979_v63 = vsel %vm725_vm1, %v940_v61, 0.0  ;;  %v1040_v0 = vadd.f32 %v1039_v60, %v1038_v55  ;;  %v1043_v12 = vsel %vm775_vm0, %v980_v62, 0.0  ;;  %v1021_v56 = vadd.f32 %v1020_v52, %v1019_v46 }
 0x13c   :  { %v1041_v1 = vsel %vm775_vm0, %v979_v63, 0.0 }
 0x13d   :  { %v1042_v7 = vadd.f32 %v1041_v1, %v1040_v0  ;;  %v7991_v10 = vpop.f32.mrb[12].mxu0 }
 0x13e   :  { %v950_v14 = vpop.f32.mrb[13].mxu0  ;;  %v982_v15 = vsel %vm725_vm1, %v7991_v10, 0.0 }
 0x13f   :  { %v981_v16 = vsel %vm725_vm1, %v950_v14, 0.0  ;;  %v1044_v18 = vadd.f32 %v1043_v12, %v1042_v7  ;;  %v1047_v28 = vsel %vm775_vm0, %v982_v15, 0.0 }
 0x140   :  { %v1045_v22 = vsel %vm775_vm0, %v981_v16, 0.0 }
 0x141   :  { %v1046_v24 = vadd.f32 %v1045_v22, %v1044_v18  ;;  %v7994_v26 = vpop.f32.mrb[14].mxu0 }
 0x142   :  { %v960_v30 = vpop.f32.mrb[15].mxu0  ;;  %v984_v31 = vsel %vm725_vm1, %v7994_v26, 0.0 }
 0x143   :  { %v983_v32 = vsel %vm725_vm1, %v960_v30, 0.0  ;;  %v1048_v34 = vadd.f32 %v1047_v28, %v1046_v24  ;;  %v1051_v43 = vsel %vm775_vm0, %v984_v31, 0.0 }
 0x144   :  { %v1049_v38 = vsel %vm775_vm0, %v983_v32, 0.0 }
 0x145   :  { %v1050_v42 = vadd.f32 %v1049_v38, %v1048_v34 }
 0x147   :  { %v1052_v44 = vadd.f32 %v1051_v43, %v1050_v42 }
 0x149   :  { %v1053_v47 = vrot.slane %v1052_v44, 4 }
 0x14b   :  { %v1054_v48 = vadd.f32 %v1053_v47, %v1052_v44 }
 0x14d   :  { %v1055_v54 = vrot.slane %v1054_v48, 2 }
 0x14f   :  { %v1056_v55 = vadd.f32 %v1055_v54, %v1054_v48 }
 0x151   :  { %v1057_v59 = vrot.slane %v1056_v55, 1 }
 0x153   :  { %v1058_v60 = vadd.f32 %v1057_v59, %v1056_v55 }
 0x155   :  { %v1059_v61 = vadd.f32 %v1058_v60, %v1021_v56 }
 0x157   :  { %v9829_v0 = vmul.f32 0.00390625, %v1059_v61 }
 0x159   :  { %v9832_v1 = vsub.f32 %v983_v32, %v9829_v0  ;;  %v9836_v7 = vsub.f32 %v9732_v57, %v9829_v0  ;;  %v9840_v10 = vsub.f32 %v9724_v53, %v9829_v0  ;;  %v9844_v11 = vsub.f32 %v9751_v3, %v9829_v0 }
 0x15a   :  { %v9848_v12 = vsub.f32 %v9747_v2, %v9829_v0  ;;  %v9852_v14 = vsub.f32 %v9772_v20, %v9829_v0  ;;  %v9856_v57 = vsub.f32 %v9768_v19, %v9829_v0  ;;  %v9860_v53 = vsub.f32 %v9793_v36, %v9829_v0 }
 0x15b   :  { %14888 = vst [vmem:[#allocation22_spill] sm:$0xff] %v9832_v1  ;;  %v9864_v3 = vsub.f32 %v9789_v35, %v9829_v0  ;;  %v9867_v18 = vsub.f32 %v977_v51, %v9829_v0  ;;  %v9870_v2 = vsub.f32 %v978_v50, %v9829_v0  ;;  %v9873_v20 = vsub.f32 %v979_v63, %v9829_v0 }
 0x15c   :  { %v9876_v19 = vsub.f32 %v980_v62, %v9829_v0  ;;  %v9879_v22 = vsub.f32 %v981_v16, %v9829_v0  ;;  %v9882_v36 = vsub.f32 %v982_v15, %v9829_v0  ;;  %v9885_v35 = vsub.f32 %v984_v31, %v9829_v0 }
 0x15d   :  { %14889 = vst [vmem:[#allocation23_spill] sm:$0xff] %v9870_v2  ;;  %14890 = vst [vmem:[#allocation24_spill] sm:$0xff] %v9873_v20  ;;  %v9889_v51 = vsub.f32 %v9636_v13, %v9829_v0  ;;  %v9893_v50 = vsub.f32 %v9621_v8, %v9829_v0  ;;  %v9897_v62 = vsub.f32 %v9645_v17, %v9829_v0 }
 0x15e   :  { %14891 = vst [vmem:[#allocation25_spill] sm:$0xff] %v9876_v19  ;;  %14892 = vst [vmem:[#allocation26_spill] sm:$0xff] %v9879_v22  ;;  %v9901_v63 = vsub.f32 %v9625_v9, %v9829_v0  ;;  %v9909_v13 = vsub.f32 %v9663_v25, %v9829_v0  ;;  %v9913_v8 = vsub.f32 %v9654_v21, %v9829_v0 }
 0x15f   :  { %14893 = vst [vmem:[#allocation27_spill] sm:$0xff] %v9882_v36  ;;  %14894 = vst [vmem:[#allocation28_spill] sm:$0xff] %v9885_v35  ;;  %v1095_v15 = vmul.f32 %v9889_v51, %v9889_v51  ;;  %v1093_v16 = vmul.f32 %v9893_v50, %v9893_v50  ;;  %v1096_v9 = vmul.f32 %v9897_v62, %v9897_v62 }
 0x160   :  { %14895 = vst [vmem:[#allocation29_spill] sm:$0xff] %v9893_v50  ;;  %v1094_v26 = vmul.f32 %v9901_v63, %v9901_v63  ;;  %v9923_v25 = vsub.f32 %v9681_v33, %v9829_v0  ;;  %v9927_v21 = vsub.f32 %v9672_v29, %v9829_v0  ;;  %v1098_v30 = vmul.f32 %v9909_v13, %v9909_v13 }
 0x161   :  { %v1115_v17 = vsel %vm775_vm0, %v1095_v15, 0.0  ;;  %v1109_v24 = vsel %vm775_vm0, %v1093_v16, 0.0  ;;  %v1118_v27 = vsel %vm775_vm0, %v1096_v9, 0.0  ;;  %v1097_v31 = vmul.f32 %v9913_v8, %v9913_v8 }
 0x162   :  { %1116 = vadd.xlane.f32.xlu1 %v1115_v17  ;;  %1110 = vadd.xlane.f32.xlu0 %v1109_v24  ;;  %v1112_v28 = vsel %vm775_vm0, %v1094_v26, 0.0  ;;  %v1124_v32 = vsel %vm775_vm0, %v1098_v30, 0.0  ;;  %v1100_v29 = vmul.f32 %v9923_v25, %v9923_v25  ;;  %v1099_v34 = vmul.f32 %v9927_v21, %v9927_v21 }
 0x163   :  { %v1121_v33 = vsel %vm775_vm0, %v1097_v31, 0.0  ;;  %v1158_v42 = vmul.f32 %v9840_v10, %v9840_v10  ;;  %v1157_v43 = vmul.f32 %v9836_v7, %v9836_v7  ;;  %v1160_v47 = vmul.f32 %v9848_v12, %v9848_v12 }
 0x164   :  { %v1130_v38 = vsel %vm775_vm0, %v1100_v29, 0.0  ;;  %v1127_v40 = vsel %vm775_vm0, %v1099_v34, 0.0  ;;  %v1159_v48 = vmul.f32 %v9844_v11, %v9844_v11  ;;  %v1162_v55 = vmul.f32 %v9856_v57, %v9856_v57 }
 0x165   :  { %v1176_v44 = vsel %vm775_vm0, %v1158_v42, 0.0  ;;  %v1173_v46 = vsel %vm775_vm0, %v1157_v43, 0.0  ;;  %v1182_v52 = vsel %vm775_vm0, %v1160_v47, 0.0  ;;  %v1161_v56 = vmul.f32 %v9852_v14, %v9852_v14 }
 0x166   :  { %1119 = vadd.xlane.f32.xlu1 %v1118_v27  ;;  %1113 = vadd.xlane.f32.xlu0 %v1112_v28  ;;  %v1179_v54 = vsel %vm775_vm0, %v1159_v48, 0.0  ;;  %v1164_v59 = vmul.f32 %v9864_v3, %v9864_v3  ;;  %v1163_v60 = vmul.f32 %v9860_v53, %v9860_v53  ;;  %v1188_v61 = vsel %vm775_vm0, %v1162_v55, 0.0 }
 0x167   :  { %v1185_v15 = vsel %vm775_vm0, %v1161_v56, 0.0  ;;  %v9967_v16 = vsub.f32 %v9699_v41, %v9829_v0  ;;  %v9971_v17 = vsub.f32 %v9690_v37, %v9829_v0  ;;  %v9981_v41 = vsub.f32 %v9717_v49, %v9829_v0 }
 0x168   :  { %v1194_v24 = vsel %vm775_vm0, %v1164_v59, 0.0  ;;  %v1191_v9 = vsel %vm775_vm0, %v1163_v60, 0.0  ;;  %v9985_v37 = vsub.f32 %v9708_v45, %v9829_v0  ;;  %v1166_v45 = vmul.f32 %v9870_v2, %v9870_v2 }
 0x169   :  { %v1102_v26 = vmul.f32 %v9967_v16, %v9967_v16  ;;  %v1101_v27 = vmul.f32 %v9971_v17, %v9971_v17  ;;  %v1104_v31 = vmul.f32 %v9981_v41, %v9981_v41  ;;  %v1165_v29 = vmul.f32 %v9867_v18, %v9867_v18 }
 0x16a   :  { %1125 = vadd.xlane.f32.xlu1 %v1124_v32  ;;  %1122 = vadd.xlane.f32.xlu0 %v1121_v33  ;;  %v1103_v32 = vmul.f32 %v9985_v37, %v9985_v37  ;;  %v1168_v34 = vmul.f32 %v9876_v19, %v9876_v19  ;;  %v10007_v43 = vsub.f32 %v9755_v6, %v9829_v0 }
 0x16b   :  { %v1136_v28 = vsel %vm775_vm0, %v1102_v26, 0.0  ;;  %v1133_v30 = vsel %vm775_vm0, %v1101_v27, 0.0  ;;  %v1142_v49 = vsel %vm775_vm0, %v1104_v31, 0.0  ;;  %v1197_v42 = vsel %vm775_vm0, %v1165_v29, 0.0  ;;  %v1696_v29 = vld [vmem:[%s14482_s2 + $0x18] sm:$0xff] }
 0x16c   :  { %v1139_v33 = vsel %vm775_vm0, %v1103_v32, 0.0  ;;  %v1106_v48 = vmul.f32 %v10007_v43, %v10007_v43  ;;  %v10021_v6 = vsub.f32 %v9797_v39, %v9829_v0 }
 0x16e   :  { %1131 = vadd.xlane.f32.xlu1 %v1130_v38  ;;  %1128 = vadd.xlane.f32.xlu0 %v1127_v40  ;;  %v1167_v38 = vmul.f32 %v9873_v20, %v9873_v20  ;;  %v1200_v40 = vsel %vm775_vm0, %v1166_v45, 0.0  ;;  %v1108_v56 = vmul.f32 %v10021_v6, %v10021_v6 }
 0x170   :  { %v1203_v47 = vsel %vm775_vm0, %v1167_v38, 0.0  ;;  %v1154_v39 = vsel %vm775_vm0, %v1108_v56, 0.0  ;;  %v1714_v56 = vld [vmem:[%s14483_s3 + $0x28] sm:$0xff] }
 0x172   :  { %1177 = vadd.xlane.f32.xlu1 %v1176_v44  ;;  %1174 = vadd.xlane.f32.xlu0 %v1173_v46  ;;  %v10011_v44 = vsub.f32 %v9736_v58, %v9829_v0  ;;  %v1206_v46 = vsel %vm775_vm0, %v1168_v34, 0.0  ;;  %v10025_v58 = vsub.f32 %v9776_v23, %v9829_v0  ;;  %v1170_v23 = vmul.f32 %v9882_v36, %v9882_v36 }
 0x173   :  { %v1169_v0 = vmul.f32 %v9879_v22, %v9879_v22 }
 0x174   :  { %v1107_v59 = vmul.f32 %v10025_v58, %v10025_v58 }
 0x176   :  { %1183 = vadd.xlane.f32.xlu1 %v1182_v52  ;;  %1180 = vadd.xlane.f32.xlu0 %v1179_v54  ;;  %v1105_v52 = vmul.f32 %v10011_v44, %v10011_v44  ;;  %v1148_v54 = vsel %vm775_vm0, %v1106_v48, 0.0  ;;  %v1151_v60 = vsel %vm775_vm0, %v1107_v59, 0.0  ;;  %v1713_v48 = vld [vmem:[%s14483_s3 + $0x20] sm:$0xff] }
 0x177   :  { %v8352_v59 = vpack.c.bf16 %v1714_v56, %v1713_v48  ;;  %v1720_v56 = vld [vmem:[%s14483_s3 + $0x58] sm:$0xff] }
 0x178   :  { %v1145_v55 = vsel %vm775_vm0, %v1105_v52, 0.0 }
 0x17a   :  { %1189 = vadd.xlane.f32.xlu1 %v1188_v61  ;;  %1186 = vadd.xlane.f32.xlu0 %v1185_v15  ;;  %v1212_v61 = vsel %vm775_vm0, %v1170_v23, 0.0  ;;  %v1209_v15 = vsel %vm775_vm0, %v1169_v0, 0.0  ;;  %v1715_v23 = vld [vmem:[%s14483_s3 + $0x30] sm:$0xff]  ;;  %v1716_v0 = vld [vmem:[%s14483_s3 + $0x38] sm:$0xff] }
 0x17e   :  { %1195 = vadd.xlane.f32.xlu1 %v1194_v24  ;;  %1192 = vadd.xlane.f32.xlu0 %v1191_v9  ;;  %v1172_v24 = vmul.f32 %v9885_v35, %v9885_v35  ;;  %v1171_v9 = vmul.f32 %v9832_v1, %v9832_v1 }
 0x180   :  { %v1218_v26 = vsel %vm775_vm0, %v1172_v24, 0.0  ;;  %v1215_v27 = vsel %vm775_vm0, %v1171_v9, 0.0  ;;  %v8358_v24 = vpack.c.bf16 %v1716_v0, %v1715_v23 }
 0x182   :  { %1137 = vadd.xlane.f32.xlu1 %v1136_v28  ;;  %1134 = vadd.xlane.f32.xlu0 %v1133_v30 }
 0x186   :  { %1143 = vadd.xlane.f32.xlu1 %v1142_v49  ;;  %1140 = vadd.xlane.f32.xlu0 %v1139_v33  ;;  %v1709_v49 = vld [vmem:[%s14483_s3] sm:$0xff]  ;;  %v1710_v33 = vld [vmem:[%s14483_s3 + $0x8] sm:$0xff] }
 0x187   :  { %v8340_v45 = vpack.c.bf16 %v1710_v33, %v1709_v49  ;;  %v1718_v49 = vld [vmem:[%s14483_s3 + $0x48] sm:$0xff] }
 0x189   :  { %8342 = vmatprep.subr.msk.bf16.mxu0 %vm10063_vm3, %v8340_v45 }
 0x18a   :  { %1201 = vadd.xlane.f32.xlu1 %v1200_v40  ;;  %1198 = vadd.xlane.f32.xlu0 %v1197_v42 }
 0x18b   :  { %8345 = vmatpush3.bf16.xpose.msk.msra.mxu0 %vm10063_vm3, %v8340_v45 }
 0x18e   :  { %1207 = vadd.xlane.f32.xlu1 %v1206_v46  ;;  %1204 = vadd.xlane.f32.xlu0 %v1203_v47  ;;  %v1711_v46 = vld [vmem:[%s14483_s3 + $0x10] sm:$0xff]  ;;  %v1712_v47 = vld [vmem:[%s14483_s3 + $0x18] sm:$0xff] }
 0x192   :  { %1149 = vadd.xlane.f32.xlu1 %v1148_v54  ;;  %1146 = vadd.xlane.f32.xlu0 %v1145_v55  ;;  %v8346_v55 = vpack.c.bf16 %v1712_v47, %v1711_v46 }
 0x194   :  { %8348 = vmatprep.subr.msk.bf16.mxu0 %vm10063_vm3, %v8346_v55 }
 0x195   :  { %8351 = vmatpush3.bf16.xpose.msk.msra.mxu0 %vm10063_vm3, %v8346_v55  ;;  %v1719_v55 = vld [vmem:[%s14483_s3 + $0x50] sm:$0xff] }
 0x196   :  { %1155 = vadd.xlane.f32.xlu1 %v1154_v39  ;;  %1152 = vadd.xlane.f32.xlu0 %v1151_v60  ;;  %v8370_v0 = vpack.c.bf16 %v1720_v56, %v1719_v55 }
 0x197   :  { %8354 = vmatprep.subr.msk.bf16.mxu0 %vm10063_vm3, %v8352_v59 }
 0x19a   :  { %1213 = vadd.xlane.f32.xlu1 %v1212_v61  ;;  %1210 = vadd.xlane.f32.xlu0 %v1209_v15 }
 0x19d   :  { %8357 = vmatpush3.bf16.xpose.msk.msra.mxu0 %vm10063_vm3, %v8352_v59 }
 0x19e   :  { %1219 = vadd.xlane.f32.xlu1 %v1218_v26  ;;  %1216 = vadd.xlane.f32.xlu0 %v1215_v27  ;;  %v1717_v27 = vld [vmem:[%s14483_s3 + $0x40] sm:$0xff] }
 0x19f   :  { %8360 = vmatprep.subr.msk.bf16.mxu0 %vm10063_vm3, %v8358_v24  ;;  %v8364_v46 = vpack.c.bf16 %v1718_v49, %v1717_v27  ;;  %v1721_v49 = vld [vmem:[%s14483_s3 + $0x60] sm:$0xff] }
 0x1a0   :  { %v8376_v1 = vpack.c.bf16 %v1722_v4, %v1721_v49 }
 0x1a5   :  { %8363 = vmatpush3.bf16.xpose.msk.msra.mxu0 %vm10063_vm3, %v8358_v24 }
 0x1a6   :  { %8366 = vmatprep.subr.msk.bf16.mxu0 %vm10063_vm3, %v8364_v46 }
 0x1ad   :  { %8369 = vmatpush3.bf16.xpose.msk.msra.mxu0 %vm10063_vm3, %v8364_v46 }
 0x1ae   :  { %8372 = vmatprep.subr.msk.bf16.mxu0 %vm10063_vm3, %v8370_v0 }
 0x1b5   :  { %8375 = vmatpush3.bf16.xpose.msk.msra.mxu0 %vm10063_vm3, %v8370_v0 }
 0x1b6   :  { %8378 = vmatprep.subr.msk.bf16.mxu0 %vm10063_vm3, %v8376_v1 }
 0x1bd   :  { %8381 = vmatpush3.bf16.xpose.msk.msra.mxu0 %vm10063_vm3, %v8376_v1 }
 0x1ef   :  { %v10047_v28 = vpop.xlane.xlu1 %1116  ;;  %v10049_v30 = vpop.xlane.xlu0 %1110 }
 0x1f3   :  { %v10051_v31 = vpop.xlane.xlu1 %1119  ;;  %v10053_v32 = vpop.xlane.xlu0 %1113 }
 0x1f7   :  { %v10069_v34 = vpop.xlane.xlu1 %1125  ;;  %v10071_v38 = vpop.xlane.xlu0 %1122 }
 0x1f8   :  { %14898 = vst [vmem:[#allocation30_spill] sm:$0xff] %v10069_v34  ;;  %14899 = vst [vmem:[#allocation31_spill] sm:$0xff] %v10071_v38  ;;  %v1222_v55 = vmax.f32 %v10053_v32, %v10069_v34  ;;  %v1221_v46 = vmax.f32 %v10049_v30, %v10071_v38 }
 0x1fb   :  { %v10075_v40 = vpop.xlane.xlu1 %1131  ;;  %v10077_v42 = vpop.xlane.xlu0 %1128 }
 0x1fc   :  { %v1224_v36 = vmax.f32 %v10051_v31, %v10075_v40  ;;  %v1223_v22 = vmax.f32 %v10047_v28, %v10077_v42 }
 0x1ff   :  { %v10088_v52 = vpop.xlane.xlu1 %1177  ;;  %v10090_v54 = vpop.xlane.xlu0 %1174 }
 0x203   :  { %v10099_v39 = vpop.xlane.xlu1 %1183  ;;  %v10101_v60 = vpop.xlane.xlu0 %1180 }
 0x207   :  { %v10111_v61 = vpop.xlane.xlu1 %1189  ;;  %v10113_v15 = vpop.xlane.xlu0 %1186 }
 0x20b   :  { %v10117_v9 = vpop.xlane.xlu1 %1195  ;;  %v10119_v26 = vpop.xlane.xlu0 %1192 }
 0x20c   :  { %14900 = vst [vmem:[#allocation32_spill] sm:$0xff] %v10117_v9  ;;  %14901 = vst [vmem:[#allocation33_spill] sm:$0xff] %v10119_v26  ;;  %v1246_v0 = vmax.f32 %v10099_v39, %v10117_v9 }
 0x20f   :  { %v10129_v33 = vpop.xlane.xlu1 %1137  ;;  %v10131_v45 = vpop.xlane.xlu0 %1134 }
 0x210   :  { %v1226_v19 = vmax.f32 %v1222_v55, %v10129_v33  ;;  %v1225_v20 = vmax.f32 %v1221_v46, %v10131_v45 }
 0x213   :  { %v10135_v47 = vpop.xlane.xlu1 %1143  ;;  %v10137_v48 = vpop.xlane.xlu0 %1140 }
 0x214   :  { %14902 = vst [vmem:[#allocation34_spill] sm:$0xff] %v10135_v47  ;;  %14903 = vst [vmem:[#allocation35_spill] sm:$0xff] %v10137_v48  ;;  %v1228_v2 = vmax.f32 %v1224_v36, %v10135_v47  ;;  %v1227_v50 = vmax.f32 %v1223_v22, %v10137_v48  ;;  %v1244_v22 = vmax.f32 %v10088_v52, %v10111_v61 }
 0x217   :  { %v10147_v59 = vpop.xlane.xlu1 %1201  ;;  %v10149_v23 = vpop.xlane.xlu0 %1198 }
 0x218   :  { %14904 = vst [vmem:[#allocation36_spill] sm:$0xff] %v10147_v59  ;;  %14905 = vst [vmem:[#allocation37_spill] sm:$0xff] %v10149_v23 }
 0x21b   :  { %v10153_v24 = vpop.xlane.xlu1 %1207  ;;  %v10155_v27 = vpop.xlane.xlu0 %1204 }
 0x21c   :  { %14906 = vst [vmem:[#allocation38_spill] sm:$0xff] %v10153_v24  ;;  %14907 = vst [vmem:[#allocation39_spill] sm:$0xff] %v10155_v27  ;;  %v1250_v47 = vmax.f32 %v1246_v0, %v10153_v24 }
 0x21f   :  { %v10169_v56 = vpop.xlane.xlu1 %1149  ;;  %v10171_v35 = vpop.xlane.xlu0 %1146 }
 0x220   :  { %14908 = vst [vmem:[#allocation40_spill] sm:$0xff] %v10169_v56  ;;  %14909 = vst [vmem:[#allocation41_spill] sm:$0xff] %v10171_v35  ;;  %v1230_v34 = vmax.f32 %v1226_v19, %v10169_v56  ;;  %v1229_v38 = vmax.f32 %v1225_v20, %v10171_v35  ;;  %v1243_v20 = vmax.f32 %v10090_v54, %v10113_v15 }
 0x222   :  { %v1233_v19 = vmax.f32 %v1229_v38, %v1230_v34 }
 0x223   :  { %v10185_v4 = vpop.xlane.xlu1 %1155  ;;  %v10187_v49 = vpop.xlane.xlu0 %1152 }
 0x224   :  { %14910 = vst [vmem:[#allocation42_spill] sm:$0xff] %v10185_v4  ;;  %14911 = vst [vmem:[#allocation43_spill] sm:$0xff] %v10187_v49  ;;  %v1232_v55 = vmax.f32 %v1228_v2, %v10185_v4  ;;  %v1231_v36 = vmax.f32 %v1227_v50, %v10187_v49  ;;  %v1245_v2 = vmax.f32 %v10101_v60, %v10119_v26 }
 0x225   :  { %v1248_v50 = vmax.f32 %v1244_v22, %v10147_v59  ;;  %v1247_v4 = vmax.f32 %v1243_v20, %v10149_v23 }
 0x226   :  { %v1234_v46 = vmax.f32 %v1231_v36, %v1232_v55  ;;  %v1249_v34 = vmax.f32 %v1245_v2, %v10155_v27 }
 0x227   :  { %v10199_v56 = vpop.xlane.xlu1 %1213  ;;  %v10201_v35 = vpop.xlane.xlu0 %1210 }
 0x228   :  { %14912 = vst [vmem:[#allocation44_spill] sm:$0xff] %v10199_v56  ;;  %14913 = vst [vmem:[#allocation45_spill] sm:$0xff] %v10201_v35  ;;  %v1235_v49 = vmax.f32 %v1233_v19, %v1234_v46  ;;  %v1252_v38 = vmax.f32 %v1248_v50, %v10199_v56  ;;  %v1251_v55 = vmax.f32 %v1247_v4, %v10201_v35 }
 0x22a   :  { %v1236_v36 = vrot.slane %v1235_v49, 4  ;;  %v1255_v46 = vmax.f32 %v1251_v55, %v1252_v38  ;;  %v1701_v38 = vld [vmem:[%s14482_s2 + $0x40] sm:$0xff]  ;;  %v1702_v55 = vld [vmem:[%s14482_s2 + $0x48] sm:$0xff] }
 0x22b   :  { %v10213_v9 = vpop.xlane.xlu1 %1219  ;;  %v10215_v26 = vpop.xlane.xlu0 %1216 }
 0x22c   :  { %v1254_v22 = vmax.f32 %v1250_v47, %v10213_v9  ;;  %v1253_v20 = vmax.f32 %v1249_v34, %v10215_v26  ;;  %v1237_v19 = vmax.f32 %v1235_v49, %v1236_v36  ;;  %v1723_v47 = vld [vmem:[%s14483_s3 + $0x70] sm:$0xff]  ;;  %v1724_v49 = vld [vmem:[%s14483_s3 + $0x78] sm:$0xff] }
 0x22d   :  { %v8382_v34 = vpack.c.bf16 %v1724_v49, %v1723_v47  ;;  %v1703_v36 = vld [vmem:[%s14482_s2 + $0x50] sm:$0xff] }
 0x22e   :  { %v1256_v0 = vmax.f32 %v1253_v20, %v1254_v22  ;;  %v1238_v2 = vrot.slane %v1237_v19, 2  ;;  %v1704_v22 = vld [vmem:[%s14482_s2 + $0x58] sm:$0xff]  ;;  %v1705_v20 = vld [vmem:[%s14482_s2 + $0x60] sm:$0xff] }
 0x22f   :  { %8384 = vmatprep.subr.msk.bf16.mxu0 %vm10063_vm3, %v8382_v34 }
 0x230   :  { %v1239_v24 = vmax.f32 %v1237_v19, %v1238_v2  ;;  %v1257_v50 = vmax.f32 %v1255_v46, %v1256_v0  ;;  %8387 = vmatpush3.bf16.xpose.msk.msra.mxu0 %vm10063_vm3, %v8382_v34  ;;  %v1706_v19 = vld [vmem:[%s14482_s2 + $0x68] sm:$0xff]  ;;  %v1707_v46 = vld [vmem:[%s14482_s2 + $0x70] sm:$0xff]  ;;  %v1708_v0 = vld [vmem:[%s14482_s2 + $0x78] sm:$0xff] }
 0x232   :  { %v1240_v56 = vrot.slane %v1239_v24, 1  ;;  %v1258_v4 = vrot.slane %v1257_v50, 4 }
 0x234   :  { %v1241_v35 = vmax.f32 %v1239_v24, %v1240_v56  ;;  %v1259_v27 = vmax.f32 %v1257_v50, %v1258_v4  ;;  %v1698_v24 = vld [vmem:[%s14482_s2 + $0x28] sm:$0xff]  ;;  %v1700_v56 = vld [vmem:[%s14482_s2 + $0x38] sm:$0xff] }
 0x236   :  { %8850 = vpush %v1241_v35  ;;  %v1260_v1 = vrot.slane %v1259_v27, 2  ;;  %v1693_v35 = vld [vmem:[%s14482_s2] sm:$0xff] }
 0x237   :  { %8083 = vmatprep.mubr.msk.f32.mxu0 %vm1725_vm2, %v1693_v35 }
 0x238   :  { %v1261_v59 = vmax.f32 %v1259_v27, %v1260_v1  ;;  %v1699_v27 = vld [vmem:[%s14482_s2 + $0x30] sm:$0xff] }
 0x23a   :  { %v1262_v23 = vrot.slane %v1261_v59, 1 }
 0x23c   :  { %v1263_v48 = vmax.f32 %v1261_v59, %v1262_v23  ;;  %v1694_v59 = vld [vmem:[%s14482_s2 + $0x8] sm:$0xff]  ;;  %v1697_v23 = vld [vmem:[%s14482_s2 + $0x20] sm:$0xff] }
 0x23d   :  { %8084 = vmatmul.mubr.msk.f32.vlgmr.msra.gmra.mrb[16].mxu0 %vm1725_vm2, %v1694_v59 }
 0x23e   :  { %8852 = vpush %v1263_v48  ;;  %v1695_v48 = vld [vmem:[%s14482_s2 + $0x10] sm:$0xff] }
 0x23f   :  { %8086 = vmatprep.mubr.msk.f32.mxu0 %vm1725_vm2, %v1695_v48 }
 0x241   :  { %8087 = vmatmul.mubr.msk.f32.gmra.mrb[18].mxu0 %vm1725_vm2, %v1696_v29 }
 0x242   :  { %8089 = vmatprep.mubr.msk.f32.mxu0 %vm1725_vm2, %v1697_v23 }
 0x245   :  { %8090 = vmatmul.mubr.msk.f32.gmra.mrb[20].mxu0 %vm1725_vm2, %v1698_v24 }
 0x246   :  { %8092 = vmatprep.mubr.msk.f32.mxu0 %vm1725_vm2, %v1699_v27 }
 0x249   :  { %8093 = vmatmul.mubr.msk.f32.gmra.mrb[22].mxu0 %vm1725_vm2, %v1700_v56 }
 0x24a   :  { %8095 = vmatprep.mubr.msk.f32.mxu0 %vm1725_vm2, %v1701_v38 }
 0x24d   :  { %8096 = vmatmul.mubr.msk.f32.gmra.mrb[24].mxu0 %vm1725_vm2, %v1702_v55  ;;  %v14914_v55 = vld [vmem:[#allocation31_spill] sm:$0xff] }
 0x24e   :  { %8098 = vmatprep.mubr.msk.f32.mxu0 %vm1725_vm2, %v1703_v36 }
 0x251   :  { %8099 = vmatmul.mubr.msk.f32.gmra.mrb[26].mxu0 %vm1725_vm2, %v1704_v22 }
 0x252   :  { %8101 = vmatprep.mubr.msk.f32.mxu0 %vm1725_vm2, %v1705_v20  ;;  %v14915_v20 = vld [vmem:[#allocation30_spill] sm:$0xff] }
 0x255   :  { %8102 = vmatmul.mubr.msk.f32.gmra.mrb[28].mxu0 %vm1725_vm2, %v1706_v19 }
 0x256   :  { %8104 = vmatprep.mubr.msk.f32.mxu0 %vm1725_vm2, %v1707_v46  ;;  %v14916_v46 = vld [vmem:[#allocation29_spill] sm:$0xff] }
 0x259   :  { %8105 = vmatmul.mubr.msk.f32.gmra.mrb[30].mxu0 %vm1725_vm2, %v1708_v0 }
 0x267   :  { %s8851_s13 = spop %8850 }
 0x26f   :  { %s8853_s3 = spop %8852 }
 0x270   :  { %s1265_s14 = smax.f32 %s8853_s3, %s8851_s13 }
 0x271   :  { %v1266_v2 = vstv %s1265_s14 }
 0x272   :  { %8998 = vrsqrt.f32 %v1266_v2 }
 0x273   :  { %9000 = vrcp.f32 %v1266_v2 }
 0x27c   :  { %v8999_v50 = vpop.eup %8998 }
 0x27d   :  { %v9001_v4 = vpop.eup %9000  ;;  %8854 = vpush %v8999_v50 }
 0x27e   :  { %8856 = vpush %v9001_v4 }
 0x2ae   :  { %s8855_s15 = spop %8854 }
 0x2af   :  { %v10293_v1 = vstv %s8855_s15  ;;  %s8857_s2 = spop %8856 }
 0x2b0   :  { %v10297_v47 = vmul.f32 %v10293_v1, %v9901_v63  ;;  %v10301_v49 = vmul.f32 %v10293_v1, %v9889_v51  ;;  %v10305_v34 = vmul.f32 %v10293_v1, %v9897_v62  ;;  %v10309_v35 = vmul.f32 %v10293_v1, %v9913_v8 }
 0x2b1   :  { %v10314_v59 = vmul.f32 %v10293_v1, %v9909_v13  ;;  %v10318_v63 = vmul.f32 %v10293_v1, %v9927_v21  ;;  %v10322_v51 = vmul.f32 %v10293_v1, %v9923_v25  ;;  %v10326_v62 = vmul.f32 %v10293_v1, %v9971_v17 }
 0x2b2   :  { %v10330_v8 = vmul.f32 %v10293_v1, %v9967_v16  ;;  %v10334_v13 = vmul.f32 %v10293_v1, %v9985_v37  ;;  %v1291_v21 = vmul.f32 %v10293_v1, %v9844_v11  ;;  %v1292_v48 = vmul.f32 %v10293_v1, %v9848_v12 }
 0x2b3   :  { %v10342_v25 = vmul.f32 %v10293_v1, %v9981_v41  ;;  %v10346_v17 = vmul.f32 %v10293_v1, %v10011_v44  ;;  %v1289_v16 = vmul.f32 %v10293_v1, %v9836_v7  ;;  %v10350_v29 = vstv %s8857_s2 }
 0x2b4   :  { %v10355_v11 = vmul.f32 %v10293_v1, %v10007_v43  ;;  %v1290_v12 = vmul.f32 %v10293_v1, %v9840_v10  ;;  %v1293_v41 = vmul.f32 %v10293_v1, %v9852_v14  ;;  %v1294_v37 = vmul.f32 %v10293_v1, %v9856_v57 }
 0x2b5   :  { %v10365_v7 = vmul.f32 %v10293_v1, %v10025_v58  ;;  %v10369_v44 = vmul.f32 %v10293_v1, %v10021_v6  ;;  %v1295_v43 = vmul.f32 %v10293_v1, %v9860_v53  ;;  %v1296_v10 = vmul.f32 %v10293_v1, %v9864_v3 }
 0x2b6   :  { %v10377_v14 = vmul.f32 %v10293_v1, %v9867_v18  ;;  %v1306_v57 = vmul.f32 %v10350_v29, %v10049_v30  ;;  %v1374_v23 = vmul.f32 -2.0, %v1291_v21  ;;  %v1375_v58 = vmul.f32 -2.0, %v1292_v48 }
 0x2b7   :  { %v1307_v24 = vmul.f32 %v10350_v29, %v10053_v32  ;;  %v1308_v6 = vmul.f32 %v10350_v29, %v10047_v28  ;;  %v1324_v53 = vmul.f32 %v10350_v29, %v10101_v60  ;;  %v1372_v27 = vmul.f32 -2.0, %v1289_v16 }
 0x2b8   :  { %v1325_v3 = vmul.f32 %v10350_v29, %v10099_v39  ;;  %v1373_v18 = vmul.f32 -2.0, %v1290_v12  ;;  %v1376_v56 = vmul.f32 -2.0, %v1293_v41  ;;  %v1377_v38 = vmul.f32 -2.0, %v1294_v37 }
 0x2b9   :  { %v1309_v30 = vmul.f32 %v10350_v29, %v10051_v31  ;;  %v1310_v36 = vmul.f32 %v10350_v29, %v14914_v55  ;;  %v1322_v32 = vmul.f32 %v10350_v29, %v10090_v54  ;;  %v1323_v28 = vmul.f32 %v10350_v29, %v10088_v52 }
 0x2ba   :  { %v1326_v60 = vmul.f32 %v10350_v29, %v10113_v15  ;;  %v1327_v39 = vmul.f32 %v10350_v29, %v10111_v61  ;;  %v1390_v22 = vsel %vm1339_vm4, %v1324_v53, %v1374_v23  ;;  %v1391_v31 = vsel %vm1339_vm4, %v1325_v3, %v1375_v58  ;;  %v14919_v53 = vld [vmem:[#allocation35_spill] sm:$0xff]  ;;  %v14920_v3 = vld [vmem:[#allocation34_spill] sm:$0xff] }
 0x2bb   :  { %v1311_v19 = vmul.f32 %v10350_v29, %v14915_v20  ;;  %v1312_v54 = vmul.f32 %v10350_v29, %v10077_v42  ;;  %v1273_v52 = vmul.f32 %v10293_v1, %v14916_v46  ;;  %v1388_v15 = vsel %vm1339_vm4, %v1322_v32, %v1372_v27  ;;  %v14923_v32 = vld [vmem:[#allocation43_spill] sm:$0xff]  ;;  %v14926_v20 = vld [vmem:[#allocation32_spill] sm:$0xff] }
 0x2bc   :  { %v1392_v61 = vsel %vm1339_vm4, %v1326_v60, %v1376_v56  ;;  %v1393_v0 = vsel %vm1339_vm4, %v1327_v39, %v1377_v38  ;;  %v1389_v2 = vsel %vm1339_vm4, %v1323_v28, %v1373_v18  ;;  %v1404_v50 = vsel %vm1338_vm5, 1.0, %v1388_v15  ;;  %v14921_v56 = vld [vmem:[#allocation41_spill] sm:$0xff]  ;;  %v14924_v60 = vld [vmem:[#allocation42_spill] sm:$0xff] }
 0x2bd   :  { %v1340_v42 = vsel %vm1339_vm4, 1.0, %v1273_v52  ;;  %v1405_v4 = vsel %vm1338_vm5, 1.0, %v1389_v2  ;;  %v1406_v48 = vsel %vm1338_vm5, 1.0, %v1390_v22  ;;  %v1407_v16 = vsel %vm1338_vm5, 1.0, %v1391_v31  ;;  %v14925_v22 = vld [vmem:[#allocation33_spill] sm:$0xff] }
 0x2be   :  { %v1313_v12 = vmul.f32 %v10350_v29, %v10075_v40  ;;  %v1314_v41 = vmul.f32 %v10350_v29, %v10131_v45  ;;  %v1356_v37 = vsel %vm1338_vm5, %v1306_v57, %v1340_v42  ;;  %v8292_v23 = vpack.c.bf16 %v1405_v4, %v1404_v50  ;;  %v14922_v40 = vld [vmem:[#allocation40_spill] sm:$0xff] }
 0x2bf   :  { %v1315_v58 = vmul.f32 %v10350_v29, %v10129_v33  ;;  %v1316_v27 = vmul.f32 %v10350_v29, %v14919_v53  ;;  %v1317_v18 = vmul.f32 %v10350_v29, %v14920_v3  ;;  %v1318_v38 = vmul.f32 %v10350_v29, %v14921_v56  ;;  %8027 = vmatprep.mubr.msk.f32.mxu1 %vm775_vm0, %v1356_v37 }
 0x2c0   :  { %v1319_v45 = vmul.f32 %v10350_v29, %v14922_v40  ;;  %8294 = vmatprep.subr.msk.bf16.mxu1 %vm10427_vm6, %v8292_v23  ;;  %v8298_v57 = vpack.c.bf16 %v1407_v16, %v1406_v48  ;;  %v1408_v33 = vsel %vm1338_vm5, 1.0, %v1392_v61  ;;  %v1409_v55 = vsel %vm1338_vm5, 1.0, %v1393_v0 }
 0x2c1   :  { %v1320_v28 = vmul.f32 %v10350_v29, %v14923_v32  ;;  %v1321_v39 = vmul.f32 %v10350_v29, %v14924_v60  ;;  %v1328_v31 = vmul.f32 %v10350_v29, %v14925_v22  ;;  %v1329_v46 = vmul.f32 %v10350_v29, %v14926_v20  ;;  %8297 = vmatpush3.bf16.xpose.msk.msra.mxu1 %vm10427_vm6, %v8292_v23  ;;  %v14932_v20 = vld [vmem:[#allocation39_spill] sm:$0xff] }
 0x2c2   :  { %v1378_v52 = vmul.f32 -2.0, %v1295_v43  ;;  %v1379_v15 = vmul.f32 -2.0, %v1296_v10  ;;  %8300 = vmatprep.subr.msk.bf16.mxu1 %vm10427_vm6, %v8298_v57  ;;  %v1341_v61 = vsel %vm1339_vm4, 1.0, %v10297_v47  ;;  %v1342_v0 = vsel %vm1339_vm4, 1.0, %v10301_v49 }
 0x2c3   :  { %v8304_v2 = vpack.c.bf16 %v1409_v55, %v1408_v33  ;;  %v10478_v50 = vsel %vm1338_vm5, %v1307_v24, %v1341_v61  ;;  %v10482_v43 = vsel %vm1338_vm5, %v1308_v6, %v1342_v0  ;;  %v1343_v10 = vsel %vm1339_vm4, 1.0, %v10305_v34  ;;  %v14931_v55 = vld [vmem:[#allocation25_spill] sm:$0xff]  ;;  %v14934_v0 = vld [vmem:[#allocation26_spill] sm:$0xff] }
 0x2c4   :  { %v10489_v47 = vsel %vm1338_vm5, %v1309_v30, %v1343_v10  ;;  %v1344_v49 = vsel %vm1339_vm4, 1.0, %v10309_v35  ;;  %v1345_v24 = vsel %vm1339_vm4, 1.0, %v10314_v59  ;;  %v1346_v6 = vsel %vm1339_vm4, 1.0, %v10318_v63  ;;  %v14935_v10 = vld [vmem:[#allocation27_spill] sm:$0xff] }
 0x2c5   :  { %v10502_v42 = vsel %vm1338_vm5, %v1310_v36, %v1344_v49  ;;  %v10506_v34 = vsel %vm1338_vm5, %v1311_v19, %v1345_v24  ;;  %v10510_v30 = vsel %vm1338_vm5, %v1312_v54, %v1346_v6  ;;  %v1347_v35 = vsel %vm1339_vm4, 1.0, %v10322_v51 }
 0x2c6   :  { %v10517_v59 = vsel %vm1338_vm5, %v1313_v12, %v1347_v35  ;;  %v1348_v63 = vsel %vm1339_vm4, 1.0, %v10326_v62  ;;  %v1349_v36 = vsel %vm1339_vm4, 1.0, %v10330_v8  ;;  %v1350_v19 = vsel %vm1339_vm4, 1.0, %v10334_v13 }
 0x2c7   :  { %v10530_v54 = vsel %vm1338_vm5, %v1314_v41, %v1348_v63  ;;  %v10534_v51 = vsel %vm1338_vm5, %v1315_v58, %v1349_v36  ;;  %v10538_v4 = vsel %vm1338_vm5, %v1316_v27, %v1350_v19  ;;  %v1351_v62 = vsel %vm1339_vm4, 1.0, %v10342_v25 }
 0x2c8   :  { %v10545_v8 = vsel %vm1338_vm5, %v1317_v18, %v1351_v62  ;;  %v1352_v13 = vsel %vm1339_vm4, 1.0, %v10346_v17  ;;  %v1353_v48 = vsel %vm1339_vm4, 1.0, %v10355_v11  ;;  %v1354_v16 = vsel %vm1339_vm4, 1.0, %v10365_v7  ;;  %v14927_v7 = vld [vmem:[#allocation23_spill] sm:$0xff]  ;;  %v14928_v18 = vld [vmem:[#allocation37_spill] sm:$0xff] }
 0x2c9   :  { %8303 = vmatpush3.bf16.xpose.msk.msra.mxu1 %vm10427_vm6, %v8298_v57  ;;  %v10560_v25 = vsel %vm1338_vm5, %v1318_v38, %v1352_v13  ;;  %v10564_v12 = vsel %vm1338_vm5, %v1319_v45, %v1353_v48  ;;  %v10568_v17 = vsel %vm1338_vm5, %v1320_v28, %v1354_v16  ;;  %v1355_v11 = vsel %vm1339_vm4, 1.0, %v10369_v44  ;;  %v14929_v38 = vld [vmem:[#allocation36_spill] sm:$0xff]  ;;  %v14936_v62 = vld [vmem:[#allocation45_spill] sm:$0xff] }
 0x2ca   :  { %v1298_v41 = vmul.f32 %v10293_v1, %v14927_v7  ;;  %v1394_v37 = vsel %vm1339_vm4, %v1328_v31, %v1378_v52  ;;  %v1395_v23 = vsel %vm1339_vm4, %v1329_v46, %v1379_v15  ;;  %8306 = vmatprep.subr.msk.bf16.mxu1 %vm10427_vm6, %v8304_v2  ;;  %v10583_v58 = vsel %vm1338_vm5, %v1321_v39, %v1355_v11  ;;  %v14930_v57 = vld [vmem:[#allocation24_spill] sm:$0xff]  ;;  %v14933_v52 = vld [vmem:[#allocation38_spill] sm:$0xff] }
 0x2cb   :  { %v1410_v53 = vsel %vm1338_vm5, 1.0, %v1394_v37  ;;  %v1411_v44 = vsel %vm1338_vm5, 1.0, %v1395_v23  ;;  %v1380_v27 = vmul.f32 -2.0, %v10377_v14  ;;  %v1330_v56 = vmul.f32 %v10350_v29, %v14928_v18  ;;  %v14937_v48 = vld [vmem:[#allocation44_spill] sm:$0xff]  ;;  %v14938_v7 = vld [vmem:[#allocation22_spill] sm:$0xff] }
 0x2cc   :  { %v1381_v3 = vmul.f32 -2.0, %v1298_v41  ;;  %v1331_v40 = vmul.f32 %v10350_v29, %v14929_v38  ;;  %v8310_v45 = vpack.c.bf16 %v1411_v44, %v1410_v53  ;;  %v1299_v33 = vmul.f32 %v10293_v1, %v14930_v57  ;;  %v14939_v37 = vld [vmem:[#allocation28_spill] sm:$0xff] }
 0x2cd   :  { %v1300_v32 = vmul.f32 %v10293_v1, %v14931_v55  ;;  %v1396_v14 = vsel %vm1339_vm4, %v1330_v56, %v1380_v27  ;;  %v1332_v46 = vmul.f32 %v10350_v29, %v14932_v20  ;;  %v1333_v15 = vmul.f32 %v10350_v29, %v14933_v52 }
 0x2ce   :  { %v1397_v28 = vsel %vm1339_vm4, %v1331_v40, %v1381_v3  ;;  %v1412_v60 = vsel %vm1338_vm5, 1.0, %v1396_v14  ;;  %v1382_v22 = vmul.f32 -2.0, %v1299_v33  ;;  %v1302_v49 = vmul.f32 %v10293_v1, %v14935_v10 }
 0x2cf   :  { %v1413_v39 = vsel %vm1338_vm5, 1.0, %v1397_v28  ;;  %v1383_v31 = vmul.f32 -2.0, %v1300_v32  ;;  %v1334_v13 = vmul.f32 %v10350_v29, %v14936_v62  ;;  %v1335_v16 = vmul.f32 %v10350_v29, %v14937_v48 }
 0x2d0   :  { %v8316_v61 = vpack.c.bf16 %v1413_v39, %v1412_v60  ;;  %v1398_v24 = vsel %vm1339_vm4, %v1332_v46, %v1382_v22  ;;  %v1385_v19 = vmul.f32 -2.0, %v1302_v49  ;;  %v1303_v41 = vmul.f32 %v10293_v1, %v14938_v7 }
 0x2d1   :  { %8309 = vmatpush3.bf16.xpose.msk.msra.mxu1 %vm10427_vm6, %v8304_v2  ;;  %v1301_v2 = vmul.f32 %v10293_v1, %v14934_v0  ;;  %v1399_v6 = vsel %vm1339_vm4, %v1333_v15, %v1383_v31  ;;  %v1414_v35 = vsel %vm1338_vm5, 1.0, %v1398_v24  ;;  %v1304_v23 = vmul.f32 %v10293_v1, %v14939_v37 }
 0x2d2   :  { %8312 = vmatprep.subr.msk.bf16.mxu1 %vm10427_vm6, %v8310_v45  ;;  %v1415_v63 = vsel %vm1338_vm5, 1.0, %v1399_v6  ;;  %v1401_v44 = vsel %vm1339_vm4, %v1335_v16, %v1385_v19  ;;  %v1386_v18 = vmul.f32 -2.0, %v1303_v41  ;;  %v1336_v1 = vmul.f32 %v10350_v29, %v10215_v26 }
 0x2d3   :  { %v1384_v36 = vmul.f32 -2.0, %v1301_v2  ;;  %v8322_v11 = vpack.c.bf16 %v1415_v63, %v1414_v35  ;;  %v1417_v3 = vsel %vm1338_vm5, 1.0, %v1401_v44  ;;  %v1387_v56 = vmul.f32 -2.0, %v1304_v23 }
 0x2d4   :  { %v1337_v38 = vmul.f32 %v10350_v29, %v10213_v9 }
 0x2d5   :  { %v1400_v53 = vsel %vm1339_vm4, %v1334_v13, %v1384_v36  ;;  %v14956_v13 = vlaneseq }
 0x2d6   :  { %v1416_v27 = vsel %vm1338_vm5, 1.0, %v1400_v53  ;;  %v1403_v57 = vsel %vm1339_vm4, %v1337_v38, %v1387_v56 }
 0x2d7   :  { %v8328_v40 = vpack.c.bf16 %v1417_v3, %v1416_v27  ;;  %v1419_v26 = vsel %vm1338_vm5, 1.0, %v1403_v57  ;;  %v10767_v48 = vshrl.u32 %v14956_v13, 7 }
 0x2d9   :  { %8315 = vmatpush3.bf16.xpose.msk.msra.mxu1 %vm10427_vm6, %v8310_v45  ;;  %v1402_v45 = vsel %vm1339_vm4, %v1336_v1, %v1386_v18  ;;  %14957 = vst [vmem:[#allocation39_spill] sm:$0xff] %v10767_v48  ;;  %v10770_v7 = vadd.s32 8, %v10767_v48  ;;  %v10773_v41 = vadd.s32 24, %v10767_v48  ;;  %v10776_v37 = vadd.s32 16, %v10767_v48 }
 0x2da   :  { %8318 = vmatprep.subr.msk.bf16.mxu1 %vm10427_vm6, %v8316_v61  ;;  %v1418_v33 = vsel %vm1338_vm5, 1.0, %v1402_v45  ;;  %v10779_v23 = vadd.s32 40, %v10767_v48  ;;  %v10782_v44 = vadd.s32 32, %v10767_v48  ;;  %v10785_v27 = vadd.s32 56, %v10767_v48 }
 0x2db   :  { %v8334_v9 = vpack.c.bf16 %v1419_v26, %v1418_v33  ;;  %14958 = vst [vmem:[#allocation38_spill] sm:$0xff] %v10770_v7  ;;  %14959 = vst [vmem:[#allocation26_spill] sm:$0xff] %v10773_v41  ;;  %v10788_v3 = vadd.s32 48, %v10767_v48  ;;  %v10791_v18 = vadd.s32 72, %v10767_v48  ;;  %v10794_v56 = vadd.s32 64, %v10767_v48 }
 0x2dc   :  { %14960 = vst [vmem:[#allocation27_spill] sm:$0xff] %v10776_v37  ;;  %14961 = vst [vmem:[#allocation45_spill] sm:$0xff] %v10779_v23  ;;  %v10797_v1 = vadd.s32 88, %v10767_v48  ;;  %v10800_v38 = vadd.s32 80, %v10767_v48  ;;  %v10805_v45 = vadd.s32 104, %v10767_v48  ;;  %v10808_v57 = vadd.s32 96, %v10767_v48 }
 0x2dd   :  { %14962 = vst [vmem:[#allocation44_spill] sm:$0xff] %v10782_v44  ;;  %14963 = vst [vmem:[#allocation22_spill] sm:$0xff] %v10785_v27  ;;  %v10811_v33 = vadd.s32 120, %v10767_v48  ;;  %v10814_v26 = vadd.s32 112, %v10767_v48 }
 0x2de   :  { %14964 = vst [vmem:[#allocation28_spill] sm:$0xff] %v10788_v3  ;;  %14965 = vst [vmem:[#allocation46_spill] sm:$0xff] %v10791_v18 }
 0x2df   :  { %14966 = vst [vmem:[#allocation47_spill] sm:$0xff] %v10794_v56  ;;  %14967 = vst [vmem:[#allocation48_spill] sm:$0xff] %v10797_v1 }
 0x2e0   :  { %14968 = vst [vmem:[#allocation49_spill] sm:$0xff] %v10800_v38  ;;  %14970 = vst [vmem:[#allocation51_spill] sm:$0xff] %v10805_v45 }
 0x2e1   :  { %8321 = vmatpush3.bf16.xpose.msk.msra.mxu1 %vm10427_vm6, %v8316_v61  ;;  %14971 = vst [vmem:[#allocation52_spill] sm:$0xff] %v10808_v57  ;;  %14972 = vst [vmem:[#allocation53_spill] sm:$0xff] %v10811_v33 }
 0x2e2   :  { %8324 = vmatprep.subr.msk.bf16.mxu1 %vm10427_vm6, %v8322_v11  ;;  %14973 = vst [vmem:[#allocation54_spill] sm:$0xff] %v10814_v26 }
 0x2e9   :  { %8327 = vmatpush3.bf16.xpose.msk.msra.mxu1 %vm10427_vm6, %v8322_v11 }
 0x2ea   :  { %8330 = vmatprep.subr.msk.bf16.mxu1 %vm10427_vm6, %v8328_v40 }
 0x2f1   :  { %8333 = vmatpush3.bf16.xpose.msk.msra.mxu1 %vm10427_vm6, %v8328_v40 }
 0x2f2   :  { %8336 = vmatprep.subr.msk.bf16.mxu1 %vm10427_vm6, %v8334_v9 }
 0x2f9   :  { %8339 = vmatpush3.bf16.xpose.msk.msra.mxu1 %vm10427_vm6, %v8334_v9 }
 0x300   :  { %8028 = vmatmul.mubr.msk.f32.vlgmr.msra.gmra.mrb[0].mxu1 %vm775_vm0, %v10478_v50 }
 0x301   :  { %8030 = vmatprep.mubr.msk.f32.mxu1 %vm775_vm0, %v10482_v43 }
 0x304   :  { %8031 = vmatmul.mubr.msk.f32.gmra.mrb[2].mxu1 %vm775_vm0, %v10489_v47 }
 0x305   :  { %8033 = vmatprep.mubr.msk.f32.mxu1 %vm775_vm0, %v10502_v42 }
 0x308   :  { %8034 = vmatmul.mubr.msk.f32.gmra.mrb[4].mxu1 %vm775_vm0, %v10506_v34 }
 0x309   :  { %8036 = vmatprep.mubr.msk.f32.mxu1 %vm775_vm0, %v10510_v30 }
 0x30c   :  { %8037 = vmatmul.mubr.msk.f32.gmra.mrb[6].mxu1 %vm775_vm0, %v10517_v59 }
 0x30d   :  { %8039 = vmatprep.mubr.msk.f32.mxu1 %vm775_vm0, %v10530_v54 }
 0x310   :  { %8040 = vmatmul.mubr.msk.f32.gmra.mrb[8].mxu1 %vm775_vm0, %v10534_v51  ;;  %v10694_v29 = vpop.f32.mrb[16].mxu0 }
 0x311   :  { %8042 = vmatprep.mubr.msk.f32.mxu1 %vm775_vm0, %v10538_v4  ;;  %14940 = vst [vmem:[#allocation31_spill] sm:$0xff] %v10694_v29  ;;  %v10698_v21 = vpop.f32.mrb[17].mxu0 }
 0x312   :  { %14941 = vst [vmem:[#allocation30_spill] sm:$0xff] %v10698_v21 }
 0x314   :  { %8043 = vmatmul.mubr.msk.f32.gmra.mrb[10].mxu1 %vm775_vm0, %v10545_v8  ;;  %v10704_v43 = vpop.f32.mrb[18].mxu0 }
 0x315   :  { %8045 = vmatprep.mubr.msk.f32.mxu1 %vm775_vm0, %v10560_v25  ;;  %14942 = vst [vmem:[#allocation29_spill] sm:$0xff] %v10704_v43  ;;  %v10708_v47 = vpop.f32.mrb[19].mxu0 }
 0x316   :  { %14943 = vst [vmem:[#allocation35_spill] sm:$0xff] %v10708_v47 }
 0x318   :  { %8046 = vmatmul.mubr.msk.f32.gmra.mrb[12].mxu1 %vm775_vm0, %v10564_v12  ;;  %v10714_v34 = vpop.f32.mrb[20].mxu0 }
 0x319   :  { %8048 = vmatprep.mubr.msk.f32.mxu1 %vm775_vm0, %v10568_v17  ;;  %14944 = vst [vmem:[#allocation34_spill] sm:$0xff] %v10714_v34  ;;  %v2070_v30 = vmax.f32 %v10694_v29, %v10714_v34  ;;  %v10718_v59 = vpop.f32.mrb[21].mxu0 }
 0x31a   :  { %14945 = vst [vmem:[#allocation41_spill] sm:$0xff] %v10718_v59  ;;  %v2069_v54 = vmax.f32 %v10698_v21, %v10718_v59 }
 0x31c   :  { %8049 = vmatmul.mubr.msk.f32.gmra.mrb[14].mxu1 %vm775_vm0, %v10583_v58  ;;  %v10724_v4 = vpop.f32.mrb[22].mxu0 }
 0x31d   :  { %14946 = vst [vmem:[#allocation40_spill] sm:$0xff] %v10724_v4  ;;  %v2072_v8 = vmax.f32 %v10704_v43, %v10724_v4  ;;  %v10728_v25 = vpop.f32.mrb[23].mxu0 }
 0x31e   :  { %14947 = vst [vmem:[#allocation43_spill] sm:$0xff] %v10728_v25  ;;  %v2071_v12 = vmax.f32 %v10708_v47, %v10728_v25 }
 0x320   :  { %v10734_v58 = vpop.f32.mrb[24].mxu0 }
 0x321   :  { %14948 = vst [vmem:[#allocation42_spill] sm:$0xff] %v10734_v58  ;;  %v2074_v55 = vmax.f32 %v2070_v30, %v10734_v58  ;;  %v10737_v32 = vpop.f32.mrb[25].mxu0 }
 0x322   :  { %14949 = vst [vmem:[#allocation33_spill] sm:$0xff] %v10737_v32  ;;  %v2073_v14 = vmax.f32 %v2069_v54, %v10737_v32 }
 0x324   :  { %v10742_v60 = vpop.f32.mrb[26].mxu0 }
 0x325   :  { %14950 = vst [vmem:[#allocation32_spill] sm:$0xff] %v10742_v60  ;;  %v2076_v39 = vmax.f32 %v2072_v8, %v10742_v60  ;;  %v10745_v22 = vpop.f32.mrb[27].mxu0 }
 0x326   :  { %14951 = vst [vmem:[#allocation23_spill] sm:$0xff] %v10745_v22  ;;  %v2075_v31 = vmax.f32 %v2071_v12, %v10745_v22 }
 0x328   :  { %v10750_v46 = vpop.f32.mrb[28].mxu0 }
 0x329   :  { %14952 = vst [vmem:[#allocation37_spill] sm:$0xff] %v10750_v46  ;;  %v2078_v52 = vmax.f32 %v2074_v55, %v10750_v46  ;;  %v10753_v15 = vpop.f32.mrb[29].mxu0 }
 0x32a   :  { %14953 = vst [vmem:[#allocation36_spill] sm:$0xff] %v10753_v15  ;;  %v2077_v61 = vmax.f32 %v2073_v14, %v10753_v15 }
 0x32c   :  { %v2081_v2 = vmax.f32 %v2077_v61, %v2078_v52  ;;  %v10758_v10 = vpop.f32.mrb[30].mxu0 }
 0x32d   :  { %14954 = vst [vmem:[#allocation24_spill] sm:$0xff] %v10758_v10  ;;  %v2080_v49 = vmax.f32 %v2076_v39, %v10758_v10  ;;  %v10761_v24 = vpop.f32.mrb[31].mxu0 }
 0x32e   :  { %14955 = vst [vmem:[#allocation25_spill] sm:$0xff] %v10761_v24  ;;  %v2079_v6 = vmax.f32 %v2075_v31, %v10761_v24 }
 0x330   :  { %v2082_v63 = vmax.f32 %v2079_v6, %v2080_v49 }
 0x332   :  { %v2083_v36 = vmax.f32 %v2081_v2, %v2082_v63 }
 0x334   :  { %v2084_v19 = vrot.slane %v2083_v36, 4 }
 0x336   :  { %v2085_v62 = vmax.f32 %v2083_v36, %v2084_v19 }
 0x338   :  { %v2086_v16 = vrot.slane %v2085_v62, 2 }
 0x33a   :  { %v2087_v11 = vmax.f32 %v2085_v62, %v2086_v16 }
 0x33c   :  { %v2088_v53 = vrot.slane %v2087_v11, 1 }
 0x33e   :  { %v10802_v40 = vmax.f32 %v2087_v11, %v2088_v53 }
 0x340   :  { %14969 = vst [vmem:[#allocation50_spill] sm:$0xff] %v10802_v40  ;;  %vm2673_vm7 = vcmp.eq.f32.partialorder %v10698_v21, %v10802_v40  ;;  %vm2674_vm8 = vcmp.eq.f32.partialorder %v10694_v29, %v10802_v40  ;;  %vm2675_vm9 = vcmp.eq.f32.partialorder %v10708_v47, %v10802_v40  ;;  %vm2676_vm10 = vcmp.eq.f32.partialorder %v10704_v43, %v10802_v40 }
 0x341   :  { %vm2677_vm11 = vcmp.eq.f32.partialorder %v10718_v59, %v10802_v40  ;;  %vm2678_vm12 = vcmp.eq.f32.partialorder %v10714_v34, %v10802_v40  ;;  %vm2679_vm13 = vcmp.eq.f32.partialorder %v10728_v25, %v10802_v40  ;;  %vm2680_vm14 = vcmp.eq.f32.partialorder %v10724_v4, %v10802_v40 }
 0x342   :  { %vm2681_vm15 = vcmp.eq.f32.partialorder %v10737_v32, %v10802_v40  ;;  %vm2682_vm0 = vcmp.eq.f32.partialorder %v10734_v58, %v10802_v40  ;;  %vm2683_vm1 = vcmp.eq.f32.partialorder %v10745_v22, %v10802_v40  ;;  %vm2684_vm2 = vcmp.eq.f32.partialorder %v10742_v60, %v10802_v40 }
 0x343   :  { %vm2685_vm3 = vcmp.eq.f32.partialorder %v10753_v15, %v10802_v40  ;;  %vm2686_vm4 = vcmp.eq.f32.partialorder %v10750_v46, %v10802_v40  ;;  %vm2687_vm5 = vcmp.eq.f32.partialorder %v10761_v24, %v10802_v40  ;;  %vm2688_vm6 = vcmp.eq.f32.partialorder %v10758_v10, %v10802_v40 }
 0x344   :  { %v2689_v9 = vsel %vm2673_vm7, %v10767_v48, 128  ;;  %v2690_v30 = vsel %vm2674_vm8, %v10770_v7, 128  ;;  %v2691_v54 = vsel %vm2675_vm9, %v10776_v37, 128  ;;  %v2692_v8 = vsel %vm2676_vm10, %v10773_v41, 128 }
 0x345   :  { %v2693_v12 = vsel %vm2677_vm11, %v10782_v44, 128  ;;  %v2694_v55 = vsel %vm2678_vm12, %v10779_v23, 128  ;;  %v2695_v14 = vsel %vm2679_vm13, %v10788_v3, 128  ;;  %v2696_v39 = vsel %vm2680_vm14, %v10785_v27, 128 }
 0x346   :  { %v2697_v31 = vsel %vm2681_vm15, %v10794_v56, 128  ;;  %v2698_v52 = vsel %vm2682_vm0, %v10791_v18, 128  ;;  %v2699_v61 = vsel %vm2683_vm1, %v10800_v38, 128  ;;  %v2700_v2 = vsel %vm2684_vm2, %v10797_v1, 128 }
 0x347   :  { %v2701_v49 = vsel %vm2685_vm3, %v10808_v57, 128  ;;  %v2702_v6 = vsel %vm2686_vm4, %v10805_v45, 128  ;;  %v2703_v63 = vsel %vm2687_vm5, %v10814_v26, 128  ;;  %v2704_v36 = vsel %vm2688_vm6, %v10811_v33, 128 }
 0x348   :  { %vm2705_vm7 = vcmp.lt.s32.totalorder %v2689_v9, %v2693_v12  ;;  %vm2707_vm8 = vcmp.lt.s32.totalorder %v2690_v30, %v2694_v55  ;;  %vm2709_vm9 = vcmp.lt.s32.totalorder %v2691_v54, %v2695_v14  ;;  %vm2711_vm10 = vcmp.lt.s32.totalorder %v2692_v8, %v2696_v39 }
 0x349   :  { %v2706_v19 = vsel %vm2705_vm7, %v2689_v9, %v2693_v12  ;;  %v2708_v62 = vsel %vm2707_vm8, %v2690_v30, %v2694_v55  ;;  %v2710_v13 = vsel %vm2709_vm9, %v2691_v54, %v2695_v14  ;;  %v2712_v16 = vsel %vm2711_vm10, %v2692_v8, %v2696_v39 }
 0x34a   :  { %vm2713_vm11 = vcmp.lt.s32.totalorder %v2706_v19, %v2697_v31  ;;  %vm2715_vm12 = vcmp.lt.s32.totalorder %v2708_v62, %v2698_v52  ;;  %vm2717_vm13 = vcmp.lt.s32.totalorder %v2710_v13, %v2699_v61  ;;  %vm2719_vm14 = vcmp.lt.s32.totalorder %v2712_v16, %v2700_v2 }
 0x34b   :  { %v2714_v11 = vsel %vm2713_vm11, %v2706_v19, %v2697_v31  ;;  %v2716_v53 = vsel %vm2715_vm12, %v2708_v62, %v2698_v52  ;;  %v2718_v35 = vsel %vm2717_vm13, %v2710_v13, %v2699_v61  ;;  %v2720_v0 = vsel %vm2719_vm14, %v2712_v16, %v2700_v2 }
 0x34c   :  { %vm2721_vm15 = vcmp.lt.s32.totalorder %v2714_v11, %v2701_v49  ;;  %vm2723_vm0 = vcmp.lt.s32.totalorder %v2716_v53, %v2702_v6  ;;  %vm2725_vm1 = vcmp.lt.s32.totalorder %v2718_v35, %v2703_v63  ;;  %vm2727_vm2 = vcmp.lt.s32.totalorder %v2720_v0, %v2704_v36 }
 0x34d   :  { %v2722_v20 = vsel %vm2721_vm15, %v2714_v11, %v2701_v49  ;;  %v2724_v28 = vsel %vm2723_vm0, %v2716_v53, %v2702_v6  ;;  %v2726_v17 = vsel %vm2725_vm1, %v2718_v35, %v2703_v63  ;;  %v2728_v51 = vsel %vm2727_vm2, %v2720_v0, %v2704_v36 }
 0x34e   :  { %vm2729_vm3 = vcmp.lt.s32.totalorder %v2722_v20, %v2724_v28  ;;  %vm2731_vm4 = vcmp.lt.s32.totalorder %v2726_v17, %v2728_v51  ;;  %v14514_v14 = vmov 0.0  }
 0x34f   :  { %v2730_v9 = vsel %vm2729_vm3, %v2722_v20, %v2724_v28  ;;  %v2732_v30 = vsel %vm2731_vm4, %v2726_v17, %v2728_v51  ;;  %3161 = vmatprep.mubr.f32.mxu0 %v14514_v14 }
 0x350   :  { %vm2733_vm5 = vcmp.lt.s32.totalorder %v2730_v9, %v2732_v30 }
 0x351   :  { %v2734_v54 = vsel %vm2733_vm5, %v2730_v9, %v2732_v30 }
 0x352   :  { %v2735_v8 = vrot.slane %v2734_v54, 4 }
 0x354   :  { %vm2736_vm6 = vcmp.lt.s32.totalorder %v2734_v54, %v2735_v8 }
 0x355   :  { %v2737_v12 = vsel %vm2736_vm6, %v2734_v54, %v2735_v8 }
 0x356   :  { %v2738_v55 = vrot.slane %v2737_v12, 2 }
 0x358   :  { %vm2739_vm7 = vcmp.lt.s32.totalorder %v2737_v12, %v2738_v55 }
 0x359   :  { %v2740_v39 = vsel %vm2739_vm7, %v2737_v12, %v2738_v55 }
 0x35a   :  { %v2741_v31 = vrot.slane %v2740_v39, 1 }
 0x35c   :  { %vm2742_vm8 = vcmp.lt.s32.totalorder %v2740_v39, %v2741_v31 }
 0x35d   :  { %v10913_v52 = vsel %vm2742_vm8, %v2740_v39, %v2741_v31 }
 0x35e   :  { %vm3065_vm9 = vcmp.eq.s32.totalorder %v10767_v48, %v10913_v52  ;;  %vm3066_vm10 = vcmp.eq.s32.totalorder %v10770_v7, %v10913_v52 }
 0x35f   :  { %vm8405_vm11 = vmpackc.low %vm3066_vm10, %vm3065_vm9 }
 0x3d3   :  { %v8029_v0 = vpop.f32.mrb[0].mxu1 }
 0x3d4   :  { %v1662_v35 = vsub.f32 0.0, %v8029_v0  ;;  %v1582_v61 = vpop.f32.mrb[1].mxu1 }
 0x3d5   :  { %v1661_v28 = vsub.f32 0.0, %v1582_v61 }
 0x3d6   :  { %v10919_v51 = vmin.f32 %v1662_v35, 0.0 }
 0x3d7   :  { %v10921_v17 = vmin.f32 %v1661_v28, 0.0  ;;  %v8032_v20 = vpop.f32.mrb[2].mxu1 }
 0x3d8   :  { %14974 = vst [vmem:[#allocation55_spill] sm:$0xff] %v10919_v51  ;;  %v1664_v2 = vsub.f32 0.0, %v8032_v20  ;;  %1986 = vmax.xlane.f32.xlu1 %v10919_v51  ;;  %v1592_v49 = vpop.f32.mrb[3].mxu1 }
 0x3d9   :  { %14975 = vst [vmem:[#allocation56_spill] sm:$0xff] %v10921_v17  ;;  %v1663_v6 = vsub.f32 0.0, %v1592_v49  ;;  %1984 = vmax.xlane.f32.xlu0 %v10921_v17  ;;  %v8404_v63 = vpack.c.bf16 %v10919_v51, %v10921_v17 }
 0x3da   :  { %v10927_v36 = vmin.f32 %v1664_v2, 0.0 }
 0x3db   :  { %v10929_v19 = vmin.f32 %v1663_v6, 0.0  ;;  %v8035_v62 = vpop.f32.mrb[4].mxu1  ;;  %8406 = vmatprep.subr.msk.bf16.mxu0 %vm8405_vm11, %v8404_v63 }
 0x3dc   :  { %14976 = vst [vmem:[#allocation57_spill] sm:$0xff] %v10927_v36  ;;  %v1666_v13 = vsub.f32 0.0, %v8035_v62  ;;  %1990 = vmax.xlane.f32.xlu1 %v10927_v36  ;;  %v1602_v16 = vpop.f32.mrb[5].mxu1 }
 0x3dd   :  { %14977 = vst [vmem:[#allocation58_spill] sm:$0xff] %v10929_v19  ;;  %v1665_v11 = vsub.f32 0.0, %v1602_v16  ;;  %1988 = vmax.xlane.f32.xlu0 %v10929_v19 }
 0x3de   :  { %v10933_v53 = vmin.f32 %v1666_v13, 0.0 }
 0x3df   :  { %v10935_v9 = vmin.f32 %v1665_v11, 0.0  ;;  %v8038_v30 = vpop.f32.mrb[6].mxu1 }
 0x3e0   :  { %14978 = vst [vmem:[#allocation59_spill] sm:$0xff] %v10933_v53  ;;  %v1668_v54 = vsub.f32 0.0, %v8038_v30  ;;  %1994 = vmax.xlane.f32.xlu1 %v10933_v53  ;;  %v1612_v8 = vpop.f32.mrb[7].mxu1 }
 0x3e1   :  { %14979 = vst [vmem:[#allocation60_spill] sm:$0xff] %v10935_v9  ;;  %v1667_v12 = vsub.f32 0.0, %v1612_v8  ;;  %1992 = vmax.xlane.f32.xlu0 %v10935_v9 }
 0x3e2   :  { %v10939_v55 = vmin.f32 %v1668_v54, 0.0 }
 0x3e3   :  { %v10941_v39 = vmin.f32 %v1667_v12, 0.0  ;;  %v8041_v31 = vpop.f32.mrb[8].mxu1  ;;  %v2017_v12 = vmax.f32 %v10919_v51, %v10933_v53 }
 0x3e4   :  { %14980 = vst [vmem:[#allocation61_spill] sm:$0xff] %v10939_v55  ;;  %v1670_v0 = vsub.f32 0.0, %v8041_v31  ;;  %1998 = vmax.xlane.f32.xlu1 %v10939_v55  ;;  %v1622_v35 = vpop.f32.mrb[9].mxu1  ;;  %v2016_v31 = vmax.f32 %v10921_v17, %v10935_v9 }
 0x3e5   :  { %14981 = vst [vmem:[#allocation62_spill] sm:$0xff] %v10941_v39  ;;  %v1669_v61 = vsub.f32 0.0, %v1622_v35  ;;  %1996 = vmax.xlane.f32.xlu0 %v10941_v39 }
 0x3e6   :  { %v10945_v28 = vmin.f32 %v1670_v0, 0.0 }
 0x3e7   :  { %v10947_v20 = vmin.f32 %v1669_v61, 0.0  ;;  %v8044_v2 = vpop.f32.mrb[10].mxu1  ;;  %v2019_v61 = vmax.f32 %v10927_v36, %v10939_v55 }
 0x3e8   :  { %14982 = vst [vmem:[#allocation63_spill] sm:$0xff] %v10945_v28  ;;  %v1672_v49 = vsub.f32 0.0, %v8044_v2  ;;  %2002 = vmax.xlane.f32.xlu1 %v10945_v28  ;;  %v1632_v6 = vpop.f32.mrb[11].mxu1 }
 0x3e9   :  { %14983 = vst [vmem:[#allocation64_spill] sm:$0xff] %v10947_v20  ;;  %v1671_v63 = vsub.f32 0.0, %v1632_v6  ;;  %2000 = vmax.xlane.f32.xlu0 %v10947_v20  ;;  %v2018_v6 = vmax.f32 %v10929_v19, %v10941_v39 }
 0x3ea   :  { %v10951_v62 = vmin.f32 %v1672_v49, 0.0 }
 0x3eb   :  { %v10953_v13 = vmin.f32 %v1671_v63, 0.0  ;;  %v8047_v16 = vpop.f32.mrb[12].mxu1  ;;  %v2021_v63 = vmax.f32 %v2017_v12, %v10945_v28 }
 0x3ec   :  { %14984 = vst [vmem:[#allocation65_spill] sm:$0xff] %v10951_v62  ;;  %v1674_v11 = vsub.f32 0.0, %v8047_v16  ;;  %2006 = vmax.xlane.f32.xlu1 %v10951_v62  ;;  %v1642_v30 = vpop.f32.mrb[13].mxu1  ;;  %v2020_v16 = vmax.f32 %v2016_v31, %v10947_v20 }
 0x3ed   :  { %14985 = vst [vmem:[#allocation66_spill] sm:$0xff] %v10953_v13  ;;  %v1673_v54 = vsub.f32 0.0, %v1642_v30  ;;  %2004 = vmax.xlane.f32.xlu0 %v10953_v13  ;;  %v2023_v30 = vmax.f32 %v2019_v61, %v10951_v62  ;;  %v2022_v14 = vmax.f32 %v2018_v6, %v10953_v13 }
 0x3ee   :  { %v10957_v8 = vmin.f32 %v1674_v11, 0.0 }
 0x3ef   :  { %v10963_v0 = vmin.f32 %v1673_v54, 0.0  ;;  %v8050_v35 = vpop.f32.mrb[14].mxu1 }
 0x3f0   :  { %14986 = vst [vmem:[#allocation67_spill] sm:$0xff] %v10957_v8  ;;  %v1676_v2 = vsub.f32 0.0, %v8050_v35  ;;  %2010 = vmax.xlane.f32.xlu1 %v10957_v8  ;;  %v1652_v49 = vpop.f32.mrb[15].mxu1  ;;  %v2025_v35 = vmax.f32 %v2021_v63, %v10957_v8 }
 0x3f1   :  { %14987 = vst [vmem:[#allocation68_spill] sm:$0xff] %v10963_v0  ;;  %v1675_v11 = vsub.f32 0.0, %v1652_v49  ;;  %2008 = vmax.xlane.f32.xlu0 %v10963_v0  ;;  %v2024_v42 = vmax.f32 %v2020_v16, %v10963_v0 }
 0x3f2   :  { %v10974_v54 = vmin.f32 %v1676_v2, 0.0 }
 0x3f3   :  { %v10979_v50 = vmin.f32 %v1675_v11, 0.0  ;;  %v2028_v31 = vmax.f32 %v2024_v42, %v2025_v35 }
 0x3f4   :  { %14988 = vst [vmem:[#allocation69_spill] sm:$0xff] %v10974_v54  ;;  %v2027_v40 = vmax.f32 %v2023_v30, %v10974_v54  ;;  %2014 = vmax.xlane.f32.xlu1 %v10974_v54 }
 0x3f5   :  { %14989 = vst [vmem:[#allocation70_spill] sm:$0xff] %v10979_v50  ;;  %v2026_v12 = vmax.f32 %v2022_v14, %v10979_v50  ;;  %2012 = vmax.xlane.f32.xlu0 %v10979_v50 }
 0x3f7   :  { %v2029_v61 = vmax.f32 %v2026_v12, %v2027_v40 }
 0x3f8   :  { %2039 = vmax.xlane.f32.xlu1 %v10694_v29 }
 0x3f9   :  { %v2030_v2 = vmax.f32 %v2028_v31, %v2029_v61  ;;  %2037 = vmax.xlane.f32.xlu0 %v10698_v21 }
 0x3fb   :  { %v2031_v49 = vrot.slane %v2030_v2, 4 }
 0x3fc   :  { %2043 = vmax.xlane.f32.xlu1 %v10704_v43 }
 0x3fd   :  { %v2032_v6 = vmax.f32 %v2030_v2, %v2031_v49  ;;  %2041 = vmax.xlane.f32.xlu0 %v10708_v47 }
 0x3ff   :  { %v2033_v63 = vrot.slane %v2032_v6, 2 }
 0x400   :  { %2047 = vmax.xlane.f32.xlu1 %v10714_v34 }
 0x401   :  { %v2034_v16 = vmax.f32 %v2032_v6, %v2033_v63  ;;  %2045 = vmax.xlane.f32.xlu0 %v10718_v59 }
 0x403   :  { %v2035_v14 = vrot.slane %v2034_v16, 1 }
 0x404   :  { %2051 = vmax.xlane.f32.xlu1 %v10724_v4 }
 0x405   :  { %v10992_v42 = vmax.f32 %v2034_v16, %v2035_v14  ;;  %2049 = vmax.xlane.f32.xlu0 %v10728_v25 }
 0x407   :  { %14990 = vst [vmem:[#allocation71_spill] sm:$0xff] %v10992_v42  ;;  %vm2346_vm12 = vcmp.eq.f32.partialorder %v10921_v17, %v10992_v42  ;;  %vm2347_vm13 = vcmp.eq.f32.partialorder %v10919_v51, %v10992_v42  ;;  %vm2348_vm14 = vcmp.eq.f32.partialorder %v10929_v19, %v10992_v42  ;;  %vm2349_vm15 = vcmp.eq.f32.partialorder %v10927_v36, %v10992_v42 }
 0x408   :  { %vm2350_vm0 = vcmp.eq.f32.partialorder %v10935_v9, %v10992_v42  ;;  %vm2351_vm1 = vcmp.eq.f32.partialorder %v10933_v53, %v10992_v42  ;;  %vm2352_vm2 = vcmp.eq.f32.partialorder %v10941_v39, %v10992_v42  ;;  %vm2353_vm3 = vcmp.eq.f32.partialorder %v10939_v55, %v10992_v42  ;;  %2055 = vmax.xlane.f32.xlu1 %v10734_v58 }
 0x409   :  { %vm2354_vm4 = vcmp.eq.f32.partialorder %v10947_v20, %v10992_v42  ;;  %vm2355_vm5 = vcmp.eq.f32.partialorder %v10945_v28, %v10992_v42  ;;  %vm2356_vm6 = vcmp.eq.f32.partialorder %v10953_v13, %v10992_v42  ;;  %vm2357_vm7 = vcmp.eq.f32.partialorder %v10951_v62, %v10992_v42  ;;  %2053 = vmax.xlane.f32.xlu0 %v10737_v32 }
 0x40a   :  { %vm2358_vm8 = vcmp.eq.f32.partialorder %v10963_v0, %v10992_v42  ;;  %vm2359_vm9 = vcmp.eq.f32.partialorder %v10957_v8, %v10992_v42  ;;  %vm2360_vm10 = vcmp.eq.f32.partialorder %v10979_v50, %v10992_v42  ;;  %vm2361_vm11 = vcmp.eq.f32.partialorder %v10974_v54, %v10992_v42 }
 0x40b   :  { %v2362_v40 = vsel %vm2346_vm12, %v10767_v48, 128  ;;  %v2363_v11 = vsel %vm2347_vm13, %v10770_v7, 128  ;;  %v2364_v30 = vsel %vm2348_vm14, %v10776_v37, 128  ;;  %v2365_v35 = vsel %vm2349_vm15, %v10773_v41, 128 }
 0x40c   :  { %v2366_v12 = vsel %vm2350_vm0, %v10782_v44, 128  ;;  %v2367_v31 = vsel %vm2351_vm1, %v10779_v23, 128  ;;  %v2368_v61 = vsel %vm2352_vm2, %v10788_v3, 128  ;;  %v2369_v2 = vsel %vm2353_vm3, %v10785_v27, 128  ;;  %2059 = vmax.xlane.f32.xlu1 %v10742_v60 }
 0x40d   :  { %v2370_v49 = vsel %vm2354_vm4, %v10794_v56, 128  ;;  %v2371_v6 = vsel %vm2355_vm5, %v10791_v18, 128  ;;  %v2372_v63 = vsel %vm2356_vm6, %v10800_v38, 128  ;;  %v2373_v16 = vsel %vm2357_vm7, %v10797_v1, 128  ;;  %2057 = vmax.xlane.f32.xlu0 %v10745_v22 }
 0x40e   :  { %v2374_v14 = vsel %vm2358_vm8, %v10808_v57, 128  ;;  %v2375_v5 = vsel %vm2359_vm9, %v10805_v45, 128  ;;  %v2376_v17 = vsel %vm2360_vm10, %v10814_v26, 128  ;;  %v2377_v51 = vsel %vm2361_vm11, %v10811_v33, 128 }
 0x40f   :  { %vm2378_vm12 = vcmp.lt.s32.totalorder %v2362_v40, %v2366_v12  ;;  %vm2380_vm13 = vcmp.lt.s32.totalorder %v2363_v11, %v2367_v31  ;;  %vm2382_vm14 = vcmp.lt.s32.totalorder %v2364_v30, %v2368_v61  ;;  %vm2384_vm15 = vcmp.lt.s32.totalorder %v2365_v35, %v2369_v2 }
 0x410   :  { %v2379_v22 = vsel %vm2378_vm12, %v2362_v40, %v2366_v12  ;;  %v2381_v60 = vsel %vm2380_vm13, %v2363_v11, %v2367_v31  ;;  %v2383_v0 = vsel %vm2382_vm14, %v2364_v30, %v2368_v61  ;;  %v2385_v57 = vsel %vm2384_vm15, %v2365_v35, %v2369_v2  ;;  %2063 = vmax.xlane.f32.xlu1 %v10750_v46 }
 0x411   :  { %vm2386_vm0 = vcmp.lt.s32.totalorder %v2379_v22, %v2370_v49  ;;  %vm2388_vm1 = vcmp.lt.s32.totalorder %v2381_v60, %v2371_v6  ;;  %vm2390_vm2 = vcmp.lt.s32.totalorder %v2383_v0, %v2372_v63  ;;  %vm2392_vm3 = vcmp.lt.s32.totalorder %v2385_v57, %v2373_v16  ;;  %2061 = vmax.xlane.f32.xlu0 %v10753_v15 }
 0x412   :  { %v2387_v50 = vsel %vm2386_vm0, %v2379_v22, %v2370_v49  ;;  %v2389_v26 = vsel %vm2388_vm1, %v2381_v60, %v2371_v6  ;;  %v2391_v42 = vsel %vm2390_vm2, %v2383_v0, %v2372_v63  ;;  %v2393_v54 = vsel %vm2392_vm3, %v2385_v57, %v2373_v16 }
 0x413   :  { %vm2394_vm4 = vcmp.lt.s32.totalorder %v2387_v50, %v2374_v14  ;;  %vm2396_vm5 = vcmp.lt.s32.totalorder %v2389_v26, %v2375_v5  ;;  %vm2398_vm6 = vcmp.lt.s32.totalorder %v2391_v42, %v2376_v17  ;;  %vm2400_vm7 = vcmp.lt.s32.totalorder %v2393_v54, %v2377_v51 }
 0x414   :  { %v2395_v40 = vsel %vm2394_vm4, %v2387_v50, %v2374_v14  ;;  %v2397_v11 = vsel %vm2396_vm5, %v2389_v26, %v2375_v5  ;;  %v2399_v30 = vsel %vm2398_vm6, %v2391_v42, %v2376_v17  ;;  %v2401_v35 = vsel %vm2400_vm7, %v2393_v54, %v2377_v51  ;;  %2067 = vmax.xlane.f32.xlu1 %v10758_v10  ;;  %v14996_v14 = vld [vmem:[#allocation52_spill] sm:$0xff] }
 0x415   :  { %vm2402_vm8 = vcmp.lt.s32.totalorder %v2395_v40, %v2397_v11  ;;  %vm2404_vm9 = vcmp.lt.s32.totalorder %v2399_v30, %v2401_v35  ;;  %2065 = vmax.xlane.f32.xlu0 %v10761_v24  ;;  %vm3067_vm14 = vcmp.eq.s32.totalorder %v10776_v37, %v10913_v52  ;;  %vm3068_vm15 = vcmp.eq.s32.totalorder %v10773_v41, %v10913_v52 }
 0x416   :  { %v2403_v12 = vsel %vm2402_vm8, %v2395_v40, %v2397_v11  ;;  %v2405_v31 = vsel %vm2404_vm9, %v2399_v30, %v2401_v35  ;;  %v8410_v26 = vpack.c.bf16 %v10927_v36, %v10929_v19  ;;  %v14991_v51 = vpack.c.bf16 %v10694_v29, %v10698_v21  ;;  %vm8411_vm3 = vmpackc.low %vm3068_vm15, %vm3067_vm14  ;;  %v14997_v40 = vld [vmem:[#allocation68_spill] sm:$0xff]  ;;  %v14999_v35 = vld [vmem:[#allocation23_spill] sm:$0xff] }
 0x417   :  { %vm2406_vm10 = vcmp.lt.s32.totalorder %v2403_v12, %v2405_v31  ;;  %vm3069_vm6 = vcmp.eq.s32.totalorder %v10782_v44, %v10913_v52  ;;  %vm3070_vm7 = vcmp.eq.s32.totalorder %v10779_v23, %v10913_v52  ;;  %v8416_v17 = vpack.c.bf16 %v10933_v53, %v10935_v9  ;;  %v14998_v30 = vld [vmem:[#allocation32_spill] sm:$0xff] }
 0x418   :  { %v2407_v60 = vsel %vm2406_vm10, %v2403_v12, %v2405_v31  ;;  %v14992_v54 = vpack.c.bf16 %v10704_v43, %v10708_v47  ;;  %vm8417_vm9 = vmpackc.low %vm3070_vm7, %vm3069_vm6  ;;  %v8422_v42 = vpack.c.bf16 %v10939_v55, %v10941_v39  ;;  %v14993_v2 = vpack.c.bf16 %v10714_v34, %v10718_v59  ;;  %v15001_v31 = vld [vmem:[#allocation54_spill] sm:$0xff] }
 0x419   :  { %v2408_v22 = vrot.slane %v2407_v60, 4  ;;  %v8428_v49 = vpack.c.bf16 %v10945_v28, %v10947_v20  ;;  %v14994_v6 = vpack.c.bf16 %v10724_v4, %v10728_v25  ;;  %v8434_v63 = vpack.c.bf16 %v10951_v62, %v10953_v13 }
 0x41a   :  { %v14995_v16 = vpack.c.bf16 %v10734_v58, %v10737_v32  ;;  %v8440_v11 = vpack.c.bf16 %v10957_v8, %v14997_v40  ;;  %v15000_v12 = vpack.c.bf16 %v14998_v30, %v14999_v35 }
 0x41b   :  { %vm2409_vm11 = vcmp.lt.s32.totalorder %v2407_v60, %v2408_v22 }
 0x41c   :  { %v2410_v57 = vsel %vm2409_vm11, %v2407_v60, %v2408_v22  ;;  %v15002_v60 = vld [vmem:[#allocation70_spill] sm:$0xff]  ;;  %v15003_v22 = vld [vmem:[#allocation69_spill] sm:$0xff] }
 0x41d   :  { %v2411_v0 = vrot.slane %v2410_v57, 2 }
 0x41f   :  { %vm2412_vm12 = vcmp.lt.s32.totalorder %v2410_v57, %v2411_v0 }
 0x420   :  { %v2413_v61 = vsel %vm2412_vm12, %v2410_v57, %v2411_v0  ;;  %vm3071_vm12 = vcmp.eq.s32.totalorder %v10788_v3, %v10913_v52  ;;  %v8446_v57 = vpack.c.bf16 %v15003_v22, %v15002_v60  ;;  %v15004_v0 = vpack.c.bf16 %v10750_v46, %v10753_v15 }
 0x421   :  { %v2414_v50 = vrot.slane %v2413_v61, 1 }
 0x423   :  { %vm2415_vm13 = vcmp.lt.s32.totalorder %v2413_v61, %v2414_v50 }
 0x424   :  { %v11099_v5 = vsel %vm2415_vm13, %v2413_v61, %v2414_v50  ;;  %vm3072_vm13 = vcmp.eq.s32.totalorder %v10785_v27, %v10913_v52  ;;  %v14539_v61 = vmov 1.0  }
 0x425   :  { %vm3033_vm0 = vcmp.eq.s32.totalorder %v10767_v48, %v11099_v5  ;;  %vm3034_vm1 = vcmp.eq.s32.totalorder %v10770_v7, %v11099_v5  ;;  %vm3035_vm4 = vcmp.eq.s32.totalorder %v10776_v37, %v11099_v5  ;;  %vm3036_vm5 = vcmp.eq.s32.totalorder %v10773_v41, %v11099_v5  ;;  %vm8423_vm15 = vmpackc.low %vm3072_vm13, %vm3071_vm12 }
 0x426   :  { %vm8408_vm2 = vmpackc.low %vm3034_vm1, %vm3033_vm0  ;;  %vm3037_vm10 = vcmp.eq.s32.totalorder %v10782_v44, %v11099_v5  ;;  %vm3038_vm11 = vcmp.eq.s32.totalorder %v10779_v23, %v11099_v5  ;;  %vm3039_vm0 = vcmp.eq.s32.totalorder %v10788_v3, %v11099_v5  ;;  %vm3040_vm1 = vcmp.eq.s32.totalorder %v10785_v27, %v11099_v5 }
 0x427   :  { %8409 = vmatpush1.bf16.msk.msra.mxu0 %vm8408_vm2, %v14991_v51  ;;  %vm8414_vm8 = vmpackc.low %vm3036_vm5, %vm3035_vm4  ;;  %vm3073_vm2 = vcmp.eq.s32.totalorder %v10794_v56, %v10913_v52  ;;  %vm3041_vm6 = vcmp.eq.s32.totalorder %v10794_v56, %v11099_v5  ;;  %vm3042_vm7 = vcmp.eq.s32.totalorder %v10791_v18, %v11099_v5  ;;  %vm3043_vm12 = vcmp.eq.s32.totalorder %v10800_v38, %v11099_v5 }
 0x428   :  { %8412 = vmatprep.subr.msk.bf16.mxu0 %vm8411_vm3, %v8410_v26  ;;  %vm8420_vm14 = vmpackc.low %vm3038_vm11, %vm3037_vm10  ;;  %vm3074_vm3 = vcmp.eq.s32.totalorder %v10791_v18, %v10913_v52  ;;  %vm3044_vm13 = vcmp.eq.s32.totalorder %v10797_v1, %v11099_v5 }
 0x429   :  { %vm8426_vm4 = vmpackc.low %vm3040_vm1, %vm3039_vm0 }
 0x42a   :  { %vm8429_vm5 = vmpackc.low %vm3074_vm3, %vm3073_vm2  ;;  %vm3045_vm2 = vcmp.eq.s32.totalorder %v14996_v14, %v11099_v5  ;;  %vm3046_vm3 = vcmp.eq.s32.totalorder %v10805_v45, %v11099_v5 }
 0x42b   :  { %8415 = vmatpush1.bf16.msk.msra.mxu0 %vm8414_vm8, %v14992_v54  ;;  %vm3075_vm8 = vcmp.eq.s32.totalorder %v10800_v38, %v10913_v52  ;;  %vm8432_vm10 = vmpackc.low %vm3042_vm7, %vm3041_vm6 }
 0x42c   :  { %8418 = vmatprep.subr.msk.bf16.mxu0 %vm8417_vm9, %v8416_v17  ;;  %vm3076_vm9 = vcmp.eq.s32.totalorder %v10797_v1, %v10913_v52  ;;  %vm8438_vm0 = vmpackc.low %vm3044_vm13, %vm3043_vm12 }
 0x42d   :  { %vm8435_vm11 = vmpackc.low %vm3076_vm9, %vm3075_vm8  ;;  %vm3047_vm8 = vcmp.eq.s32.totalorder %v15001_v31, %v11099_v5  ;;  %vm3048_vm9 = vcmp.eq.s32.totalorder %v10811_v33, %v11099_v5 }
 0x42e   :  { %vm8444_vm6 = vmpackc.low %vm3046_vm3, %vm3045_vm2 }
 0x42f   :  { %8421 = vmatpush1.bf16.msk.msra.mxu0 %vm8420_vm14, %v14993_v2  ;;  %vm3077_vm14 = vcmp.eq.s32.totalorder %v14996_v14, %v10913_v52 }
 0x430   :  { %8424 = vmatprep.subr.msk.bf16.mxu0 %vm8423_vm15, %v8422_v42  ;;  %vm3078_vm15 = vcmp.eq.s32.totalorder %v10805_v45, %v10913_v52  ;;  %v15026_v45 = vld [vmem:[#allocation21_spill] sm:$0xff] }
 0x431   :  { %vm8441_vm1 = vmpackc.low %vm3078_vm15, %vm3077_vm14 }
 0x433   :  { %8427 = vmatpush1.bf16.msk.msra.mxu0 %vm8426_vm4, %v14994_v6  ;;  %vm3079_vm4 = vcmp.eq.s32.totalorder %v15001_v31, %v10913_v52 }
 0x434   :  { %8430 = vmatprep.subr.msk.bf16.mxu0 %vm8429_vm5, %v8428_v49  ;;  %vm3080_vm5 = vcmp.eq.s32.totalorder %v10811_v33, %v10913_v52  ;;  %v15005_v52 = vpack.c.bf16 %v10758_v10, %v10761_v24 }
 0x435   :  { %vm8447_vm7 = vmpackc.low %vm3080_vm5, %vm3079_vm4 }
 0x437   :  { %8433 = vmatpush1.bf16.msk.msra.mxu0 %vm8432_vm10, %v14995_v16  ;;  %vm8450_vm10 = vmpackc.low %vm3048_vm9, %vm3047_vm8 }
 0x438   :  { %8436 = vmatprep.subr.msk.bf16.mxu0 %vm8435_vm11, %v8434_v63 }
 0x43b   :  { %8439 = vmatpush1.bf16.msk.msra.mxu0 %vm8438_vm0, %v15000_v12 }
 0x43c   :  { %8442 = vmatprep.subr.msk.bf16.mxu0 %vm8441_vm1, %v8440_v11 }
 0x43f   :  { %8445 = vmatpush1.bf16.msk.msra.mxu0 %vm8444_vm6, %v15004_v0 }
 0x440   :  { %8448 = vmatprep.subr.msk.bf16.mxu0 %vm8447_vm7, %v8446_v57 }
 0x443   :  { %8451 = vmatpush1.bf16.msk.msra.mxu0 %vm8450_vm10, %v15005_v52  ;;  %v15022_v52 = vld [vmem:[#allocation55_spill] sm:$0xff] }
 0x446   :  { %3162 = vmatmul.mubr.f32.vlgmr.msra.gmra.mrb[32].mxu0 %v14539_v61  ;;  %v15023_v61 = vld [vmem:[#allocation56_spill] sm:$0xff] }
 0x465   :  { %v11200_v50 = vpop.xlane.xlu1 %1986 }
 0x466   :  { %15006 = vst [vmem:[#allocation72_spill] sm:$0xff] %v11200_v50  ;;  %v11202_v26 = vpop.xlane.xlu0 %1984  ;;  %vm2091_vm11 = vcmp.eq.f32.partialorder %v15022_v52, %v11200_v50 }
 0x467   :  { %15007 = vst [vmem:[#allocation73_spill] sm:$0xff] %v11202_v26  ;;  %vm2090_vm12 = vcmp.eq.f32.partialorder %v15023_v61, %v11202_v26  ;;  %v11248_v1 = vsel %vm2091_vm11, %v15026_v45, 128 }
 0x468   :  { %v11257_v56 = vsel %vm2090_vm12, %v15026_v45, 128  ;;  %v2137_v27 = vshra.s32 %v11248_v1, 16 }
 0x469   :  { %v11204_v51 = vpop.xlane.xlu1 %1990  ;;  %v2123_v23 = vshra.s32 %v11257_v56, 16 }
 0x46a   :  { %15008 = vst [vmem:[#allocation74_spill] sm:$0xff] %v11204_v51  ;;  %v11206_v17 = vpop.xlane.xlu0 %1988  ;;  %vm2093_vm15 = vcmp.eq.f32.partialorder %v10927_v36, %v11204_v51 }
 0x46b   :  { %15009 = vst [vmem:[#allocation75_spill] sm:$0xff] %v11206_v17  ;;  %vm2092_vm0 = vcmp.eq.f32.partialorder %v10929_v19, %v11206_v17  ;;  %v11269_v44 = vsel %vm2093_vm15, %v15026_v45, 128  ;;  %v11283_v37 = vcvt.s32.f32 %v2123_v23 }
 0x46c   :  { %v11275_v41 = vsel %vm2092_vm0, %v15026_v45, 128 }
 0x46d   :  { %v11208_v54 = vpop.xlane.xlu1 %1994  ;;  %v2151_v7 = vshra.s32 %v11275_v41, 16 }
 0x46e   :  { %15010 = vst [vmem:[#allocation76_spill] sm:$0xff] %v11208_v54  ;;  %v11210_v5 = vpop.xlane.xlu0 %1992  ;;  %vm2095_vm1 = vcmp.eq.f32.partialorder %v10933_v53, %v11208_v54 }
 0x46f   :  { %15011 = vst [vmem:[#allocation77_spill] sm:$0xff] %v11210_v5  ;;  %vm2094_vm2 = vcmp.eq.f32.partialorder %v10935_v9, %v11210_v5  ;;  %v11287_v53 = vsel %vm2095_vm1, %v15026_v45, 128  ;;  %v11301_v36 = vcvt.s32.f32 %v2151_v7 }
 0x470   :  { %v11293_v9 = vsel %vm2094_vm2, %v15026_v45, 128 }
 0x471   :  { %v11212_v42 = vpop.xlane.xlu1 %1998  ;;  %v2179_v19 = vshra.s32 %v11293_v9, 16 }
 0x472   :  { %15012 = vst [vmem:[#allocation78_spill] sm:$0xff] %v11212_v42  ;;  %v11214_v2 = vpop.xlane.xlu0 %1996  ;;  %vm2097_vm3 = vcmp.eq.f32.partialorder %v10939_v55, %v11212_v42 }
 0x473   :  { %15013 = vst [vmem:[#allocation79_spill] sm:$0xff] %v11214_v2  ;;  %vm2096_vm4 = vcmp.eq.f32.partialorder %v10941_v39, %v11214_v2  ;;  %v11305_v55 = vsel %vm2097_vm3, %v15026_v45, 128  ;;  %v11323_v48 = vcvt.s32.f32 %v2179_v19 }
 0x474   :  { %v11311_v39 = vsel %vm2096_vm4, %v15026_v45, 128  ;;  %v2221_v61 = vshra.s32 %v11305_v55, 16 }
 0x475   :  { %v11216_v49 = vpop.xlane.xlu1 %2002 }
 0x476   :  { %15014 = vst [vmem:[#allocation80_spill] sm:$0xff] %v11216_v49  ;;  %v11218_v6 = vpop.xlane.xlu0 %2000  ;;  %vm2099_vm5 = vcmp.eq.f32.partialorder %v10945_v28, %v11216_v49  ;;  %v2207_v28 = vshra.s32 %v11311_v39, 16  ;;  %v11338_v19 = vcvt.s32.f32 %v2221_v61 }
 0x477   :  { %15015 = vst [vmem:[#allocation81_spill] sm:$0xff] %v11218_v6  ;;  %vm2098_vm6 = vcmp.eq.f32.partialorder %v10947_v20, %v11218_v6 }
 0x478   :  { %v11333_v20 = vsel %vm2098_vm6, %v15026_v45, 128  ;;  %v11343_v49 = vcvt.s32.f32 %v2207_v28 }
 0x479   :  { %v11220_v63 = vpop.xlane.xlu1 %2006 }
 0x47a   :  { %15016 = vst [vmem:[#allocation82_spill] sm:$0xff] %v11220_v63  ;;  %v11222_v16 = vpop.xlane.xlu0 %2004  ;;  %vm2101_vm7 = vcmp.eq.f32.partialorder %v10951_v62, %v11220_v63  ;;  %v2235_v62 = vshra.s32 %v11333_v20, 16 }
 0x47b   :  { %15017 = vst [vmem:[#allocation83_spill] sm:$0xff] %v11222_v16  ;;  %vm2100_vm8 = vcmp.eq.f32.partialorder %v10953_v13, %v11222_v16  ;;  %v11347_v63 = vsel %vm2101_vm7, %v15026_v45, 128 }
 0x47c   :  { %v11355_v61 = vsel %vm2100_vm8, %v15026_v45, 128  ;;  %v2277_v13 = vshra.s32 %v11347_v63, 16  ;;  %v11363_v16 = vcvt.s32.f32 %v2235_v62 }
 0x47d   :  { %v11224_v11 = vpop.xlane.xlu1 %2010 }
 0x47e   :  { %15018 = vst [vmem:[#allocation84_spill] sm:$0xff] %v11224_v11  ;;  %v11226_v12 = vpop.xlane.xlu0 %2008  ;;  %vm2103_vm9 = vcmp.eq.f32.partialorder %v10957_v8, %v11224_v11  ;;  %v2263_v8 = vshra.s32 %v11355_v61, 16 }
 0x47f   :  { %15019 = vst [vmem:[#allocation85_spill] sm:$0xff] %v11226_v12  ;;  %vm2102_vm10 = vcmp.eq.f32.partialorder %v14997_v40, %v11226_v12  ;;  %v11367_v11 = vsel %vm2103_vm9, %v15026_v45, 128  ;;  %v11382_v12 = vcvt.s32.f32 %v2277_v13 }
 0x480   :  { %v11373_v40 = vsel %vm2102_vm10, %v15026_v45, 128  ;;  %v2305_v6 = vshra.s32 %v11367_v11, 16  ;;  %v11385_v42 = vcvt.s32.f32 %v2263_v8 }
 0x481   :  { %v11228_v57 = vpop.xlane.xlu1 %2014 }
 0x482   :  { %15020 = vst [vmem:[#allocation86_spill] sm:$0xff] %v11228_v57  ;;  %v11230_v0 = vpop.xlane.xlu0 %2012  ;;  %vm2105_vm11 = vcmp.eq.f32.partialorder %v15003_v22, %v11228_v57  ;;  %v2291_v22 = vshra.s32 %v11373_v40, 16  ;;  %v11400_v13 = vcvt.s32.f32 %v2305_v6 }
 0x483   :  { %15021 = vst [vmem:[#allocation87_spill] sm:$0xff] %v11230_v0  ;;  %vm2104_vm12 = vcmp.eq.f32.partialorder %v15002_v60, %v11230_v0  ;;  %v11389_v57 = vsel %vm2105_vm11, %v15026_v45, 128 }
 0x484   :  { %v11393_v60 = vsel %vm2104_vm12, %v15026_v45, 128  ;;  %v2333_v8 = vshra.s32 %v11389_v57, 16  ;;  %v11405_v51 = vcvt.s32.f32 %v2291_v22 }
 0x485   :  { %v11236_v33 = vpop.xlane.xlu1 %2039  ;;  %15033 = vst [vmem:[#allocation96_spill] sm:$0xff] %v11393_v60  ;;  %v2319_v2 = vshra.s32 %v11393_v60, 16 }
 0x486   :  { %15024 = vst [vmem:[#allocation88_spill] sm:$0xff] %v11236_v33  ;;  %v11238_v31 = vpop.xlane.xlu0 %2037  ;;  %vm2418_vm13 = vcmp.eq.f32.partialorder %v10694_v29, %v11236_v33  ;;  %v11327_v29 = vsel %vm2099_vm5, %v15026_v45, 128  ;;  %15035 = vst [vmem:[#allocation98_spill] sm:$0xff] %v11405_v51  ;;  %v11422_v22 = vcvt.s32.f32 %v2333_v8 }
 0x487   :  { %15025 = vst [vmem:[#allocation89_spill] sm:$0xff] %v11238_v31  ;;  %v11243_v14 = vsel %vm2418_vm13, %v15026_v45, 128  ;;  %vm2417_vm14 = vcmp.eq.f32.partialorder %v10698_v21, %v11238_v31 }
 0x488   :  { %v2464_v38 = vshra.s32 %v11243_v14, 16  ;;  %v11254_v18 = vsel %vm2417_vm14, %v15026_v45, 128  ;;  %15037 = vst [vmem:[#allocation100_spill] sm:$0xff] %v11422_v22 }
 0x489   :  { %v2450_v33 = vshra.s32 %v11254_v18, 16 }
 0x48a   :  { %v11262_v31 = vcvt.s32.f32 %v2464_v38  ;;  %v11280_v38 = vcvt.s32.f32 %v2137_v27  ;;  %v2193_v27 = vshra.s32 %v11287_v53, 16  ;;  %v11318_v7 = vpop.xlane.xlu0 %2041 }
 0x48b   :  { %v11265_v3 = vcvt.s32.f32 %v2450_v33  ;;  %v2165_v33 = vshra.s32 %v11269_v44, 16  ;;  %15028 = vst [vmem:[#allocation91_spill] sm:$0xff] %v11318_v7  ;;  %vm2419_vm14 = vcmp.eq.f32.partialorder %v10708_v47, %v11318_v7  ;;  %v11425_v7 = vcvt.s32.f32 %v2319_v2 }
 0x48c   :  { %2467 = vmin.xlane.f32.xlu1 %v11262_v31  ;;  %v11320_v52 = vcvt.s32.f32 %v2193_v27  ;;  %v2249_v27 = vshra.s32 %v11327_v29, 16 }
 0x48d   :  { %2453 = vmin.xlane.f32.xlu0 %v11265_v3  ;;  %v11298_v23 = vcvt.s32.f32 %v2165_v33  ;;  %v11315_v33 = vpop.xlane.xlu1 %2043  ;;  %15038 = vst [vmem:[#allocation101_spill] sm:$0xff] %v11425_v7 }
 0x48e   :  { %15027 = vst [vmem:[#allocation90_spill] sm:$0xff] %v11315_v33  ;;  %v11351_v5 = vpop.xlane.xlu0 %2045  ;;  %v11360_v28 = vcvt.s32.f32 %v2249_v27  ;;  %vm2420_vm13 = vcmp.eq.f32.partialorder %v10704_v43, %v11315_v33  ;;  %v11415_v33 = vsel %vm2419_vm14, %v15026_v45, 128 }
 0x48f   :  { %15030 = vst [vmem:[#allocation93_spill] sm:$0xff] %v11351_v5  ;;  %v11409_v54 = vsel %vm2420_vm13, %v15026_v45, 128  ;;  %vm2421_vm0 = vcmp.eq.f32.partialorder %v10718_v59, %v11351_v5  ;;  %v2478_v43 = vshra.s32 %v11415_v33, 16 }
 0x490   :  { %2140 = vmin.xlane.f32.xlu1 %v11280_v38  ;;  %v2492_v6 = vshra.s32 %v11409_v54, 16 }
 0x491   :  { %2126 = vmin.xlane.f32.xlu0 %v11283_v37  ;;  %v11341_v21 = vpop.xlane.xlu1 %2047  ;;  %v11447_v59 = vcvt.s32.f32 %v2478_v43 }
 0x492   :  { %15029 = vst [vmem:[#allocation92_spill] sm:$0xff] %v11341_v21  ;;  %v11380_v62 = vpop.xlane.xlu0 %2049  ;;  %vm2422_vm15 = vcmp.eq.f32.partialorder %v10714_v34, %v11341_v21  ;;  %v11433_v21 = vsel %vm2421_vm0, %v15026_v45, 128  ;;  %v11444_v8 = vcvt.s32.f32 %v2492_v6 }
 0x493   :  { %15032 = vst [vmem:[#allocation95_spill] sm:$0xff] %v11380_v62  ;;  %v11429_v47 = vsel %vm2422_vm15, %v15026_v45, 128  ;;  %vm2423_vm2 = vcmp.eq.f32.partialorder %v10728_v25, %v11380_v62  ;;  %v2506_v26 = vshra.s32 %v11433_v21, 16 }
 0x494   :  { %2168 = vmin.xlane.f32.xlu1 %v11298_v23  ;;  %v2520_v34 = vshra.s32 %v11429_v47, 16 }
 0x495   :  { %2154 = vmin.xlane.f32.xlu0 %v11301_v36  ;;  %v11377_v27 = vpop.xlane.xlu1 %2051 }
 0x496   :  { %15031 = vst [vmem:[#allocation94_spill] sm:$0xff] %v11377_v27  ;;  %v11411_v17 = vpop.xlane.xlu0 %2053  ;;  %vm2424_vm1 = vcmp.eq.f32.partialorder %v10724_v4, %v11377_v27  ;;  %v11455_v27 = vsel %vm2423_vm2, %v15026_v45, 128  ;;  %v11462_v43 = vcvt.s32.f32 %v2520_v34  ;;  %v11467_v4 = vcvt.s32.f32 %v2506_v26 }
 0x497   :  { %15036 = vst [vmem:[#allocation99_spill] sm:$0xff] %v11411_v17  ;;  %v11451_v50 = vsel %vm2424_vm1, %v15026_v45, 128  ;;  %vm2425_vm4 = vcmp.eq.f32.partialorder %v10737_v32, %v11411_v17  ;;  %v2534_v25 = vshra.s32 %v11455_v27, 16 }
 0x498   :  { %2196 = vmin.xlane.f32.xlu1 %v11320_v52  ;;  %v2548_v6 = vshra.s32 %v11451_v50, 16 }
 0x499   :  { %2182 = vmin.xlane.f32.xlu0 %v11323_v48  ;;  %v11403_v0 = vpop.xlane.xlu1 %2055  ;;  %v11487_v17 = vcvt.s32.f32 %v2534_v25 }
 0x49a   :  { %15034 = vst [vmem:[#allocation97_spill] sm:$0xff] %v11403_v0  ;;  %v11442_v2 = vpop.xlane.xlu0 %2057  ;;  %vm2426_vm3 = vcmp.eq.f32.partialorder %v10734_v58, %v11403_v0  ;;  %v11477_v0 = vsel %vm2425_vm4, %v15026_v45, 128  ;;  %v11484_v34 = vcvt.s32.f32 %v2548_v6 }
 0x49b   :  { %15040 = vst [vmem:[#allocation103_spill] sm:$0xff] %v11442_v2  ;;  %15044 = vst [vmem:[#allocation107_spill] sm:$0xff] %v11477_v0  ;;  %vm2427_vm6 = vcmp.eq.f32.partialorder %v14999_v35, %v11442_v2  ;;  %v2562_v58 = vshra.s32 %v11477_v0, 16 }
 0x49c   :  { %2224 = vmin.xlane.f32.xlu1 %v11338_v19 }
 0x49d   :  { %2210 = vmin.xlane.f32.xlu0 %v11343_v49  ;;  %v11437_v5 = vpop.xlane.xlu1 %2059  ;;  %v11509_v35 = vcvt.s32.f32 %v2562_v58 }
 0x49e   :  { %15039 = vst [vmem:[#allocation102_spill] sm:$0xff] %v11437_v5  ;;  %vm2428_vm5 = vcmp.eq.f32.partialorder %v14998_v30, %v11437_v5  ;;  %v11495_v5 = vsel %vm2427_vm6, %v15026_v45, 128 }
 0x49f   :  { %v11491_v32 = vsel %vm2428_vm5, %v15026_v45, 128  ;;  %15046 = vst [vmem:[#allocation109_spill] sm:$0xff] %v11495_v5  ;;  %15050 = vst [vmem:[#allocation113_spill] sm:$0xff] %v11509_v35  ;;  %v2590_v0 = vshra.s32 %v11495_v5, 16  ;;  %v2519_v5 = vand.u32 65535, %v11429_v47 }
 0x4a0   :  { %2252 = vmin.xlane.f32.xlu1 %v11360_v28  ;;  %15045 = vst [vmem:[#allocation108_spill] sm:$0xff] %v11491_v32  ;;  %v2604_v30 = vshra.s32 %v11491_v32, 16 }
 0x4a1   :  { %2238 = vmin.xlane.f32.xlu0 %v11363_v16  ;;  %v11465_v62 = vpop.xlane.xlu1 %2063 }
 0x4a2   :  { %15041 = vst [vmem:[#allocation104_spill] sm:$0xff] %v11465_v62  ;;  %vm2430_vm7 = vcmp.eq.f32.partialorder %v10750_v46, %v11465_v62  ;;  %v11524_v58 = vcvt.s32.f32 %v2604_v30 }
 0x4a4   :  { %2280 = vmin.xlane.f32.xlu1 %v11382_v12  ;;  %15053 = vst [vmem:[#allocation116_spill] sm:$0xff] %v11524_v58 }
 0x4a5   :  { %2266 = vmin.xlane.f32.xlu0 %v11385_v42  ;;  %v11499_v2 = vpop.xlane.xlu1 %2067 }
 0x4a6   :  { %15047 = vst [vmem:[#allocation110_spill] sm:$0xff] %v11499_v2  ;;  %vm2432_vm9 = vcmp.eq.f32.partialorder %v10758_v10, %v11499_v2 }
 0x4a8   :  { %2308 = vmin.xlane.f32.xlu1 %v11400_v13 }
 0x4a9   :  { %2294 = vmin.xlane.f32.xlu0 %v11405_v51 }
 0x4ac   :  { %2336 = vmin.xlane.f32.xlu1 %v11422_v22  ;;  %v11473_v22 = vpop.xlane.xlu0 %2061 }
 0x4ad   :  { %2322 = vmin.xlane.f32.xlu0 %v11425_v7  ;;  %v11471_v7 = vsel %vm2426_vm3, %v15026_v45, 128  ;;  %15043 = vst [vmem:[#allocation106_spill] sm:$0xff] %v11473_v22  ;;  %vm2429_vm8 = vcmp.eq.f32.partialorder %v10753_v15, %v11473_v22  ;;  %v11527_v22 = vcvt.s32.f32 %v2590_v0  ;;  %v11531_v15 = vsel %vm2432_vm9, %v15026_v45, 128 }
 0x4ae   :  { %15042 = vst [vmem:[#allocation105_spill] sm:$0xff] %v11471_v7  ;;  %v2576_v26 = vshra.s32 %v11471_v7, 16  ;;  %v11513_v7 = vsel %vm2430_vm7, %v15026_v45, 128  ;;  %v11517_v62 = vsel %vm2429_vm8, %v15026_v45, 128  ;;  %15055 = vst [vmem:[#allocation118_spill] sm:$0xff] %v11531_v15  ;;  %v2660_v30 = vshra.s32 %v11531_v15, 16 }
 0x4af   :  { %15051 = vst [vmem:[#allocation114_spill] sm:$0xff] %v11513_v7  ;;  %15052 = vst [vmem:[#allocation115_spill] sm:$0xff] %v11517_v62  ;;  %v2618_v46 = vshra.s32 %v11517_v62, 16  ;;  %v2449_v15 = vand.u32 65535, %v11254_v18 }
 0x4b0   :  { %2495 = vmin.xlane.f32.xlu1 %v11444_v8  ;;  %v11504_v25 = vpop.xlane.xlu0 %2065  ;;  %v11506_v6 = vcvt.s32.f32 %v2576_v26  ;;  %v2632_v26 = vshra.s32 %v11513_v7, 16  ;;  %15054 = vst [vmem:[#allocation117_spill] sm:$0xff] %v11527_v22  ;;  %v2477_v7 = vand.u32 65535, %v11415_v33 }
 0x4b1   :  { %2481 = vmin.xlane.f32.xlu0 %v11447_v59  ;;  %15048 = vst [vmem:[#allocation111_spill] sm:$0xff] %v11504_v25  ;;  %vm2431_vm10 = vcmp.eq.f32.partialorder %v10761_v24, %v11504_v25  ;;  %v11541_v25 = vcvt.s32.f32 %v2618_v46  ;;  %v11546_v24 = vcvt.s32.f32 %v2660_v30 }
 0x4b2   :  { %15049 = vst [vmem:[#allocation112_spill] sm:$0xff] %v11506_v6  ;;  %v11535_v2 = vsel %vm2431_vm10, %v15026_v45, 128  ;;  %v11538_v10 = vcvt.s32.f32 %v2632_v26  ;;  %v9133_v26 = vmov 0   ;;  %v15061_v45 = vld [vmem:[#allocation71_spill] sm:$0xff]  ;;  %v2479_v51 = vcvt.s32.f32 %v2477_v7 }
 0x4b3   :  { %15056 = vst [vmem:[#allocation119_spill] sm:$0xff] %v11535_v2  ;;  %15058 = vst [vmem:[#allocation121_spill] sm:$0xff] %v11541_v25  ;;  %v2646_v0 = vshra.s32 %v11535_v2, 16  ;;  %8997 = vset.pattern.permute.xlu1 %v9133_v26  ;;  %8996 = vset.pattern.permute.xlu0 %v9133_v26  ;;  %v3200_v46 = vmul.f32 1.442695, %v15061_v45  ;;  %v2463_v2 = vand.u32 65535, %v11243_v14  ;;  %v2451_v45 = vcvt.s32.f32 %v2449_v15 }
 0x4b4   :  { %2523 = vmin.xlane.f32.xlu1 %v11462_v43  ;;  %15057 = vst [vmem:[#allocation120_spill] sm:$0xff] %v11538_v10  ;;  %15059 = vst [vmem:[#allocation122_spill] sm:$0xff] %v11546_v24  ;;  %v2533_v7 = vand.u32 65535, %v11455_v27  ;;  %v2122_v27 = vand.u32 65535, %v11257_v56  ;;  %v2164_v56 = vand.u32 65535, %v11269_v44  ;;  %v2192_v44 = vand.u32 65535, %v11287_v53 }
 0x4b5   :  { %2509 = vmin.xlane.f32.xlu0 %v11467_v4  ;;  %v11548_v62 = vcvt.s32.f32 %v2646_v0  ;;  %9002 = vpow2.f32 %v3200_v46  ;;  %v2465_v0 = vcvt.s32.f32 %v2463_v2  ;;  %v2220_v53 = vand.u32 65535, %v11305_v55 }
 0x4b6   :  { %v2248_v55 = vand.u32 65535, %v11327_v29  ;;  %v2276_v29 = vand.u32 65535, %v11347_v63 }
 0x4b7   :  { %15060 = vst [vmem:[#allocation123_spill] sm:$0xff] %v11548_v62 }
 0x4b8   :  { %2551 = vmin.xlane.f32.xlu1 %v11484_v34  ;;  %v2278_v63 = vcvt.s32.f32 %v2276_v29 }
 0x4b9   :  { %2537 = vmin.xlane.f32.xlu0 %v11487_v17 }
 0x4bc   :  { %2579 = vmin.xlane.f32.xlu1 %v11506_v6  ;;  %v2505_v6 = vand.u32 65535, %v11433_v21  ;;  %v2547_v21 = vand.u32 65535, %v11451_v50  ;;  %v2136_v50 = vand.u32 65535, %v11248_v1 }
 0x4bd   :  { %2565 = vmin.xlane.f32.xlu0 %v11509_v35 }
 0x4c0   :  { %2607 = vmin.xlane.f32.xlu1 %v11524_v58 }
 0x4c1   :  { %2593 = vmin.xlane.f32.xlu0 %v11527_v22 }
 0x4c4   :  { %2635 = vmin.xlane.f32.xlu1 %v11538_v10  ;;  %v11555_v10 = vpop.eup %9002 }
 0x4c5   :  { %2621 = vmin.xlane.f32.xlu0 %v11541_v25  ;;  %15062 = vst [vmem:[#allocation71_spill] sm:$0xff] %v11555_v10 }
 0x4c8   :  { %2663 = vmin.xlane.f32.xlu1 %v11546_v24 }
 0x4c9   :  { %2649 = vmin.xlane.f32.xlu0 %v11548_v62 }
 0x519   :  { %v3163_v30 = vpop.f32.mrb[32].mxu0  ;;  %v11557_v25 = vpop.xlane.xlu1 %2467 }
 0x51a   :  { %15063 = vst [vmem:[#allocation124_spill] sm:$0xff] %v11557_v25  ;;  %v3890_v24 = vmul.f32 %v11555_v10, %v3163_v30  ;;  %v11560_v22 = vpop.f32.mrb[33].mxu0  ;;  %v11562_v62 = vpop.xlane.xlu0 %2453  ;;  %vm2469_vm11 = vcmp.eq.f32.partialorder %v11262_v31, %v11557_v25 }
 0x51b   :  { %15064 = vst [vmem:[#allocation125_spill] sm:$0xff] %v11560_v22  ;;  %15065 = vst [vmem:[#allocation126_spill] sm:$0xff] %v11562_v62  ;;  %v2470_v26 = vsel %vm2469_vm11, %v2465_v0, inf  ;;  %vm2455_vm12 = vcmp.eq.f32.partialorder %v11265_v3, %v11562_v62  ;;  %v2491_v62 = vand.u32 65535, %v11409_v54  ;;  %v14677_v54 = vmov 1.0|1.0  }
 0x51c   :  { %5036 = vmatprep.mubr.f32.mxu0 %v3890_v24  ;;  %2471 = vmin.xlane.f32.xlu1 %v2470_v26  ;;  %v2456_v18 = vsel %vm2455_vm12, %v2451_v45, inf }
 0x51d   :  { %v11568_v14 = vpop.xlane.xlu1 %2140  ;;  %2457 = vmin.xlane.f32.xlu0 %v2456_v18  ;;  %v2493_v32 = vcvt.s32.f32 %v2491_v62  ;;  %8388 = vmatprep.subr.bf16.mxu1 %v14677_v54  ;;  %v2521_v62 = vcvt.s32.f32 %v2519_v5  ;;  %v2549_v5 = vcvt.s32.f32 %v2547_v21  ;;  %v2124_v21 = vcvt.s32.f32 %v2122_v27 }
 0x51e   :  { %v11570_v2 = vpop.xlane.xlu0 %2126  ;;  %8389 = vmatpush3.bf16.msra.mxu1 %v14677_v54  ;;  %vm2142_vm3 = vcmp.eq.f32.partialorder %v11280_v38, %v11568_v14  ;;  %v2166_v38 = vcvt.s32.f32 %v2164_v56 }
 0x51f   :  { %8390 = vmatprep.subr.bf16.mxu1 %v14677_v54  ;;  %vm2128_vm4 = vcmp.eq.f32.partialorder %v11283_v37, %v11570_v2 }
 0x521   :  { %v11572_v46 = vpop.xlane.xlu1 %2168 }
 0x522   :  { %v11574_v30 = vpop.xlane.xlu0 %2154  ;;  %8391 = vmatpush3.bf16.msra.mxu1 %v14677_v54  ;;  %vm2170_vm5 = vcmp.eq.f32.partialorder %v11298_v23, %v11572_v46  ;;  %v2194_v23 = vcvt.s32.f32 %v2192_v44 }
 0x523   :  { %8392 = vmatprep.subr.bf16.mxu1 %v14677_v54  ;;  %vm2156_vm6 = vcmp.eq.f32.partialorder %v11301_v36, %v11574_v30  ;;  %v2206_v36 = vand.u32 65535, %v11311_v39 }
 0x525   :  { %v11576_v22 = vpop.xlane.xlu1 %2196  ;;  %v2208_v39 = vcvt.s32.f32 %v2206_v36 }
 0x526   :  { %v11578_v31 = vpop.xlane.xlu0 %2182  ;;  %8393 = vmatpush3.bf16.msra.mxu1 %v14677_v54  ;;  %vm2198_vm7 = vcmp.eq.f32.partialorder %v11320_v52, %v11576_v22  ;;  %v2222_v52 = vcvt.s32.f32 %v2220_v53  ;;  %v15074_v53 = vld [vmem:[#allocation107_spill] sm:$0xff] }
 0x527   :  { %8394 = vmatprep.subr.bf16.mxu1 %v14677_v54  ;;  %vm2184_vm8 = vcmp.eq.f32.partialorder %v11323_v48, %v11578_v31  ;;  %v2234_v48 = vand.u32 65535, %v11333_v20  ;;  %v2262_v20 = vand.u32 65535, %v11355_v61 }
 0x529   :  { %v11580_v15 = vpop.xlane.xlu1 %2224 }
 0x52a   :  { %v11582_v0 = vpop.xlane.xlu0 %2210  ;;  %8395 = vmatpush3.bf16.msra.mxu1 %v14677_v54  ;;  %vm2226_vm9 = vcmp.eq.f32.partialorder %v11338_v19, %v11580_v15  ;;  %v2250_v19 = vcvt.s32.f32 %v2248_v55  ;;  %v15075_v55 = vld [vmem:[#allocation112_spill] sm:$0xff] }
 0x52b   :  { %8396 = vmatprep.subr.bf16.mxu1 %v14677_v54  ;;  %vm2212_vm10 = vcmp.eq.f32.partialorder %v11343_v49, %v11582_v0  ;;  %v2236_v49 = vcvt.s32.f32 %v2234_v48 }
 0x52d   :  { %v11584_v24 = vpop.xlane.xlu1 %2252 }
 0x52e   :  { %v11586_v3 = vpop.xlane.xlu0 %2238  ;;  %8397 = vmatpush3.bf16.msra.mxu1 %v14677_v54  ;;  %vm2254_vm11 = vcmp.eq.f32.partialorder %v11360_v28, %v11584_v24  ;;  %v2304_v28 = vand.u32 65535, %v11367_v11  ;;  %v2332_v11 = vand.u32 65535, %v11389_v57 }
 0x52f   :  { %8398 = vmatprep.subr.bf16.mxu1 %v14677_v54  ;;  %vm2240_vm12 = vcmp.eq.f32.partialorder %v11363_v16, %v11586_v3  ;;  %v2255_v27 = vsel %vm2254_vm11, %v2250_v19, inf  ;;  %v2290_v16 = vand.u32 65535, %v11373_v40 }
 0x531   :  { %v11588_v45 = vpop.xlane.xlu1 %2280 }
 0x532   :  { %v11590_v26 = vpop.xlane.xlu0 %2266  ;;  %8399 = vmatpush3.bf16.msra.mxu1 %v14677_v54 }
 0x533   :  { %8400 = vmatprep.subr.bf16.mxu1 %v14677_v54 }
 0x535   :  { %v11592_v18 = vpop.xlane.xlu1 %2308 }
 0x536   :  { %v11594_v25 = vpop.xlane.xlu0 %2294  ;;  %8401 = vmatpush3.bf16.msra.mxu1 %v14677_v54 }
 0x537   :  { %8402 = vmatprep.subr.bf16.mxu1 %v14677_v54 }
 0x539   :  { %v11597_v10 = vpop.xlane.xlu1 %2336 }
 0x53a   :  { %15066 = vst [vmem:[#allocation127_spill] sm:$0xff] %v11597_v10  ;;  %v11600_v58 = vpop.xlane.xlu0 %2322  ;;  %8403 = vmatpush3.bf16.msra.mxu1 %v14677_v54  ;;  %v2161_v54 = vcvt.f32.s32 %v11574_v30 }
 0x53d   :  { %v11603_v35 = vpop.xlane.xlu1 %2495 }
 0x53e   :  { %v11606_v60 = vpop.xlane.xlu0 %2481  ;;  %vm2497_vm13 = vcmp.eq.f32.partialorder %v11444_v8, %v11603_v35 }
 0x53f   :  { %v2498_v10 = vsel %vm2497_vm13, %v2493_v32, inf  ;;  %vm2483_vm14 = vcmp.eq.f32.partialorder %v11447_v59, %v11606_v60  ;;  %v2507_v59 = vcvt.s32.f32 %v2505_v6  ;;  %vm2282_vm13 = vcmp.eq.f32.partialorder %v11382_v12, %v11588_v45 }
 0x540   :  { %2499 = vmin.xlane.f32.xlu1 %v2498_v10  ;;  %v2484_v47 = vsel %vm2483_vm14, %v2479_v51, inf  ;;  %vm2268_vm14 = vcmp.eq.f32.partialorder %v11385_v42, %v11590_v26  ;;  %v2306_v12 = vcvt.s32.f32 %v2304_v28  ;;  %v15068_v42 = vld [vmem:[#allocation96_spill] sm:$0xff] }
 0x541   :  { %v11616_v33 = vpop.xlane.xlu1 %2523  ;;  %2485 = vmin.xlane.f32.xlu0 %v2484_v47  ;;  %v2138_v47 = vcvt.s32.f32 %v2136_v50  ;;  %v2227_v50 = vsel %vm2226_vm9, %v2222_v52, inf  ;;  %v2318_v40 = vand.u32 65535, %v15068_v42  ;;  %v15076_v52 = vld [vmem:[#allocation108_spill] sm:$0xff] }
 0x542   :  { %v11619_v8 = vpop.xlane.xlu0 %2509  ;;  %vm2525_vm15 = vcmp.eq.f32.partialorder %v11462_v43, %v11616_v33  ;;  %v2603_v48 = vand.u32 65535, %v15076_v52  ;;  %v15081_v28 = vld [vmem:[#allocation116_spill] sm:$0xff] }
 0x543   :  { %v2526_v32 = vsel %vm2525_vm15, %v2521_v62, inf  ;;  %vm2511_vm0 = vcmp.eq.f32.partialorder %v11467_v4, %v11619_v8  ;;  %v2535_v4 = vcvt.s32.f32 %v2533_v7  ;;  %v2129_v62 = vsel %vm2128_vm4, %v2124_v21, inf }
 0x544   :  { %2527 = vmin.xlane.f32.xlu1 %v2526_v32  ;;  %v2512_v10 = vsel %vm2511_vm0, %v2507_v59, inf  ;;  %v2171_v7 = vsel %vm2170_vm5, %v2166_v38, inf  ;;  %v2199_v32 = vsel %vm2198_vm7, %v2194_v23, inf  ;;  %vm2310_vm15 = vcmp.eq.f32.partialorder %v11400_v13, %v11592_v18  ;;  %v15069_v38 = vld [vmem:[#allocation127_spill] sm:$0xff]  ;;  %v15071_v13 = vld [vmem:[#allocation105_spill] sm:$0xff] }
 0x545   :  { %v11628_v51 = vpop.xlane.xlu1 %2551  ;;  %2513 = vmin.xlane.f32.xlu0 %v2512_v10  ;;  %v2292_v21 = vcvt.s32.f32 %v2290_v16  ;;  %v2561_v23 = vand.u32 65535, %v15074_v53 }
 0x546   :  { %v11631_v43 = vpop.xlane.xlu0 %2537  ;;  %vm2553_vm1 = vcmp.eq.f32.partialorder %v11484_v34, %v11628_v51  ;;  %v2150_v34 = vand.u32 65535, %v11275_v41  ;;  %v2178_v41 = vand.u32 65535, %v11293_v9 }
 0x547   :  { %v2554_v6 = vsel %vm2553_vm1, %v2549_v5, inf  ;;  %vm2539_vm2 = vcmp.eq.f32.partialorder %v11487_v17, %v11631_v43  ;;  %v2143_v17 = vsel %vm2142_vm3, %v2138_v47, inf  ;;  %v2213_v5 = vsel %vm2212_vm10, %v2208_v39, inf }
 0x548   :  { %2555 = vmin.xlane.f32.xlu1 %v2554_v6  ;;  %v2540_v1 = vsel %vm2539_vm2, %v2535_v4, inf  ;;  %v2152_v37 = vcvt.s32.f32 %v2150_v34  ;;  %v2180_v9 = vcvt.s32.f32 %v2178_v41  ;;  %v2241_v4 = vsel %vm2240_vm12, %v2236_v49, inf  ;;  %v15067_v34 = vld [vmem:[#allocation98_spill] sm:$0xff]  ;;  %v15070_v41 = vld [vmem:[#allocation100_spill] sm:$0xff] }
 0x549   :  { %2541 = vmin.xlane.f32.xlu0 %v2540_v1  ;;  %v2264_v6 = vcvt.s32.f32 %v2262_v20  ;;  %v11684_v61 = vpop.xlane.xlu1 %2579  ;;  %v2283_v1 = vsel %vm2282_vm13, %v2278_v63, inf  ;;  %vm2296_vm0 = vcmp.eq.f32.partialorder %v15067_v34, %v11594_v25  ;;  %vm2338_vm1 = vcmp.eq.f32.partialorder %v15070_v41, %v15069_v38  ;;  %v15082_v63 = vld [vmem:[#allocation114_spill] sm:$0xff] }
 0x54a   :  { %v2157_v59 = vsel %vm2156_vm6, %v2152_v37, inf  ;;  %v2185_v10 = vsel %vm2184_vm8, %v2180_v9, inf  ;;  %v11686_v56 = vpop.xlane.xlu0 %2565  ;;  %v2297_v44 = vsel %vm2296_vm0, %v2292_v21, inf  ;;  %v2575_v37 = vand.u32 65535, %v15071_v13  ;;  %v15086_v21 = vld [vmem:[#allocation118_spill] sm:$0xff]  ;;  %v15088_v13 = vld [vmem:[#allocation121_spill] sm:$0xff] }
 0x54b   :  { %v2269_v47 = vsel %vm2268_vm14, %v2264_v6, inf  ;;  %v2320_v9 = vcvt.s32.f32 %v2318_v40  ;;  %vm2581_vm3 = vcmp.eq.f32.partialorder %v15075_v55, %v11684_v61  ;;  %v2563_v19 = vcvt.s32.f32 %v2561_v23  ;;  %v15085_v40 = vld [vmem:[#allocation120_spill] sm:$0xff]  ;;  %v15092_v55 = vld [vmem:[#allocation123_spill] sm:$0xff] }
 0x54c   :  { %2144 = vmin.xlane.f32.xlu1 %v2143_v17  ;;  %v14675_v17 = vmov 0.0|0.0   ;;  %v2577_v39 = vcvt.s32.f32 %v2575_v37  ;;  %v2631_v16 = vand.u32 65535, %v15082_v63  ;;  %v2605_v6 = vcvt.s32.f32 %v2603_v48  ;;  %v15089_v37 = vld [vmem:[#allocation119_spill] sm:$0xff] }
 0x54d   :  { %2130 = vmin.xlane.f32.xlu0 %v2129_v62  ;;  %8452 = vmatprep.subr.bf16.mxu1 %v14675_v17  ;;  %v2311_v62 = vsel %vm2310_vm15, %v2306_v12, inf  ;;  %v11698_v57 = vpop.xlane.xlu1 %2607 }
 0x54e   :  { %15072 = vst [vmem:[#allocation98_spill] sm:$0xff] %v11698_v57  ;;  %v11703_v36 = vpop.xlane.xlu0 %2593  ;;  %v2582_v49 = vsel %vm2581_vm3, %v2577_v39, inf  ;;  %vm2609_vm5 = vcmp.eq.f32.partialorder %v15081_v28, %v11698_v57  ;;  %v2633_v41 = vcvt.s32.f32 %v2631_v16  ;;  %v15096_v28 = vld [vmem:[#allocation76_spill] sm:$0xff]  ;;  %vm3261_vm3 = vcmask 130112  }
 0x54f   :  { %v2610_v34 = vsel %vm2609_vm5, %v2605_v6, inf  ;;  %v3178_v63 = vmul.f32 1.442695, %v15096_v28  ;;  %v15097_v6 = vld [vmem:[#allocation79_spill] sm:$0xff] }
 0x550   :  { %2172 = vmin.xlane.f32.xlu1 %v2171_v7  ;;  %v2334_v7 = vcvt.s32.f32 %v2332_v11 }
 0x551   :  { %2158 = vmin.xlane.f32.xlu0 %v2157_v59  ;;  %v15073_v59 = vld [vmem:[#allocation101_spill] sm:$0xff]  ;;  %v11711_v20 = vpop.xlane.xlu1 %2635 }
 0x552   :  { %vm2324_vm2 = vcmp.eq.f32.partialorder %v15073_v59, %v11600_v58  ;;  %15079 = vst [vmem:[#allocation96_spill] sm:$0xff] %v11711_v20  ;;  %vm2637_vm7 = vcmp.eq.f32.partialorder %v15085_v40, %v11711_v20 }
 0x553   :  { %v2638_v23 = vsel %vm2637_vm7, %v2633_v41, inf  ;;  %vm14781_vm7 = vcmask 261312  }
 0x554   :  { %2200 = vmin.xlane.f32.xlu1 %v2199_v32  ;;  %v2339_v32 = vsel %vm2338_vm1, %v2334_v7, inf  ;;  %v2645_v7 = vand.u32 65535, %v15089_v37  ;;  %v15102_v37 = vld [vmem:[#allocation77_spill] sm:$0xff] }
 0x555   :  { %2186 = vmin.xlane.f32.xlu0 %v2185_v10  ;;  %v2325_v10 = vsel %vm2324_vm2, %v2320_v9, inf }
 0x556   :  { %v2647_v52 = vcvt.s32.f32 %v2645_v7  ;;  %v3176_v7 = vmul.f32 1.442695, %v15102_v37 }
 0x558   :  { %2228 = vmin.xlane.f32.xlu1 %v2227_v50  ;;  %v15077_v50 = vld [vmem:[#allocation113_spill] sm:$0xff] }
 0x559   :  { %2214 = vmin.xlane.f32.xlu0 %v2213_v5  ;;  %vm2567_vm4 = vcmp.eq.f32.partialorder %v15077_v50, %v11686_v56  ;;  %v15078_v5 = vld [vmem:[#allocation109_spill] sm:$0xff]  ;;  %v15093_v50 = vld [vmem:[#allocation72_spill] sm:$0xff] }
 0x55a   :  { %v2589_v29 = vand.u32 65535, %v15078_v5  ;;  %v3170_v5 = vmul.f32 1.442695, %v15093_v50 }
 0x55c   :  { %2256 = vmin.xlane.f32.xlu1 %v2255_v27  ;;  %v11713_v27 = vpop.xlane.xlu0 %2621  ;;  %v2591_v12 = vcvt.s32.f32 %v2589_v29  ;;  %9004 = vpow2.f32 %v3170_v5  ;;  %v15094_v29 = vld [vmem:[#allocation73_spill] sm:$0xff] }
 0x55d   :  { %2242 = vmin.xlane.f32.xlu0 %v2241_v4  ;;  %15080 = vst [vmem:[#allocation127_spill] sm:$0xff] %v11713_v27  ;;  %v2568_v4 = vsel %vm2567_vm4, %v2563_v19, inf  ;;  %vm2623_vm8 = vcmp.eq.f32.partialorder %v15088_v13, %v11713_v27  ;;  %v3168_v19 = vmul.f32 1.442695, %v15094_v29  ;;  %v15106_v29 = vld [vmem:[#allocation85_spill] sm:$0xff]  ;;  %v2162_v27 = vshll.u32 %v2161_v54, 16 }
 0x55e   :  { %vm3268_vm4 = vcmask 195712  }
 0x55f   :  { %9006 = vpow2.f32 %v3168_v19  ;;  %v3192_v19 = vmul.f32 1.442695, %v15106_v29  ;;  %v2147_v29 = vcvt.f32.s32 %v11568_v14  ;;  %v2203_v14 = vcvt.f32.s32 %v11576_v22 }
 0x560   :  { %2284 = vmin.xlane.f32.xlu1 %v2283_v1  ;;  %v15083_v1 = vld [vmem:[#allocation117_spill] sm:$0xff]  ;;  %v11729_v59 = vpop.xlane.xlu0 %2649 }
 0x561   :  { %2270 = vmin.xlane.f32.xlu0 %v2269_v47  ;;  %vm2595_vm6 = vcmp.eq.f32.partialorder %v15083_v1, %v11703_v36  ;;  %v15084_v47 = vld [vmem:[#allocation115_spill] sm:$0xff]  ;;  %15090 = vst [vmem:[#allocation105_spill] sm:$0xff] %v11729_v59  ;;  %vm2651_vm10 = vcmp.eq.f32.partialorder %v15092_v55, %v11729_v59  ;;  %v3180_v1 = vmul.f32 1.442695, %v15097_v6  ;;  %v2204_v22 = vshll.u32 %v2203_v14, 16  ;;  %v15120_v14 = vld [vmem:[#allocation29_spill] sm:$0xff] }
 0x562   :  { %v2617_v11 = vand.u32 65535, %v15084_v47  ;;  %v2596_v42 = vsel %vm2595_vm6, %v2591_v12, inf  ;;  %v2652_v39 = vsel %vm2651_vm10, %v2647_v52, inf  ;;  %v15098_v47 = vld [vmem:[#allocation74_spill] sm:$0xff]  ;;  %v15108_v6 = vld [vmem:[#allocation87_spill] sm:$0xff] }
 0x563   :  { %v15099_v12 = vld [vmem:[#allocation78_spill] sm:$0xff] }
 0x564   :  { %2312 = vmin.xlane.f32.xlu1 %v2311_v62  ;;  %v2659_v62 = vand.u32 65535, %v15086_v21  ;;  %v2619_v53 = vcvt.s32.f32 %v2617_v11  ;;  %v3174_v11 = vmul.f32 1.442695, %v15098_v47 }
 0x565   :  { %2298 = vmin.xlane.f32.xlu0 %v2297_v44  ;;  %v11724_v44 = vpop.xlane.xlu1 %2663 }
 0x566   :  { %15087 = vst [vmem:[#allocation100_spill] sm:$0xff] %v11724_v44  ;;  %v2624_v9 = vsel %vm2623_vm8, %v2619_v53, inf  ;;  %v11739_v16 = vpop.eup %9004  ;;  %v15103_v53 = vld [vmem:[#allocation80_spill] sm:$0xff]  ;;  %vm14780_vm8 = vcmask 326912  }
 0x568   :  { %2340 = vmin.xlane.f32.xlu1 %v2339_v32  ;;  %v15091_v32 = vld [vmem:[#allocation122_spill] sm:$0xff] }
 0x569   :  { %2326 = vmin.xlane.f32.xlu0 %v2325_v10  ;;  %vm2665_vm9 = vcmp.eq.f32.partialorder %v15091_v32, %v11724_v44  ;;  %v2661_v10 = vcvt.s32.f32 %v2659_v62  ;;  %v11746_v40 = vpop.eup %9006  ;;  %v15101_v62 = vld [vmem:[#allocation81_spill] sm:$0xff] }
 0x56a   :  { %v3184_v41 = vmul.f32 1.442695, %v15101_v62 }
 0x56b   :  { %v2666_v48 = vsel %vm2665_vm9, %v2661_v10, inf  ;;  %v15104_v10 = vld [vmem:[#allocation83_spill] sm:$0xff] }
 0x56c   :  { %2583 = vmin.xlane.f32.xlu1 %v2582_v49  ;;  %v15095_v49 = vld [vmem:[#allocation75_spill] sm:$0xff]  ;;  %v3188_v55 = vmul.f32 1.442695, %v15104_v10 }
 0x56d   :  { %2569 = vmin.xlane.f32.xlu0 %v2568_v4  ;;  %v3172_v4 = vmul.f32 1.442695, %v15095_v49 }
 0x56f   :  { %9008 = vpow2.f32 %v3172_v4  ;;  %v15107_v4 = vld [vmem:[#allocation84_spill] sm:$0xff] }
 0x570   :  { %2611 = vmin.xlane.f32.xlu1 %v2610_v34  ;;  %9010 = vpow2.f32 %v3178_v63  ;;  %v3182_v34 = vmul.f32 1.442695, %v15099_v12  ;;  %v3194_v28 = vmul.f32 1.442695, %v15107_v4  ;;  %v2133_v4 = vcvt.f32.s32 %v11570_v2 }
 0x571   :  { %2597 = vmin.xlane.f32.xlu0 %v2596_v42  ;;  %9012 = vpow2.f32 %v3180_v1  ;;  %v15100_v42 = vld [vmem:[#allocation71_spill] sm:$0xff]  ;;  %v3196_v1 = vmul.f32 1.442695, %v15108_v6  ;;  %v2148_v6 = vshll.u32 %v2147_v29, 16  ;;  %v2189_v2 = vcvt.f32.s32 %v11578_v31 }
 0x572   :  { %9014 = vpow2.f32 %v3174_v11  ;;  %v15110_v11 = vld [vmem:[#allocation86_spill] sm:$0xff]  ;;  %v2134_v17 = vshll.u32 %v2133_v4, 16 }
 0x573   :  { %9016 = vpow2.f32 %v3182_v34  ;;  %v3198_v12 = vmul.f32 1.442695, %v15110_v11  ;;  %v15115_v4 = vld [vmem:[#allocation30_spill] sm:$0xff] }
 0x574   :  { %2639 = vmin.xlane.f32.xlu1 %v2638_v23  ;;  %v3186_v23 = vmul.f32 1.442695, %v15103_v53  ;;  %9018 = vpow2.f32 %v3184_v41 }
 0x575   :  { %2625 = vmin.xlane.f32.xlu0 %v2624_v9  ;;  %9020 = vpow2.f32 %v3176_v7 }
 0x576   :  { %9022 = vpow2.f32 %v3186_v23 }
 0x577   :  { %9024 = vpow2.f32 %v3188_v55 }
 0x578   :  { %2667 = vmin.xlane.f32.xlu1 %v2666_v48  ;;  %v15105_v48 = vld [vmem:[#allocation82_spill] sm:$0xff] }
 0x579   :  { %2653 = vmin.xlane.f32.xlu0 %v2652_v39  ;;  %v11749_v21 = vpop.eup %9008  ;;  %v3190_v39 = vmul.f32 1.442695, %v15105_v48 }
 0x57a   :  { %v11753_v13 = vpop.eup %9010 }
 0x57b   :  { %v11759_v9 = vpop.eup %9012  ;;  %9026 = vpow2.f32 %v3190_v39 }
 0x57c   :  { %v11762_v32 = vpop.eup %9014  ;;  %9028 = vpow2.f32 %v3192_v19 }
 0x57d   :  { %v11766_v52 = vpop.eup %9016  ;;  %9030 = vpow2.f32 %v3194_v28 }
 0x57e   :  { %v11771_v50 = vpop.eup %9018  ;;  %9032 = vpow2.f32 %v3196_v1  ;;  %v2175_v1 = vcvt.f32.s32 %v11572_v46 }
 0x57f   :  { %v11774_v5 = vpop.eup %9020  ;;  %9034 = vpow2.f32 %v3198_v12 }
 0x580   :  { %v11778_v49 = vpop.eup %9022 }
 0x581   :  { %v11783_v63 = vpop.eup %9024 }
 0x585   :  { %v11788_v47 = vpop.eup %9026 }
 0x586   :  { %15109 = vst [vmem:[#allocation101_spill] sm:$0xff] %v11788_v47  ;;  %v11793_v34 = vpop.eup %9028 }
 0x587   :  { %v11797_v62 = vpop.eup %9030 }
 0x588   :  { %15111 = vst [vmem:[#allocation107_spill] sm:$0xff] %v11797_v62  ;;  %v11801_v41 = vpop.eup %9032 }
 0x589   :  { %3904 = vperm.xlu1 %8997, %v11739_v16   ;;  %15112 = vst [vmem:[#allocation112_spill] sm:$0xff] %v11801_v41  ;;  %v11805_v37 = vpop.eup %9034 }
 0x58a   :  { %15113 = vst [vmem:[#allocation108_spill] sm:$0xff] %v11805_v37 }
 0x58d   :  { %3363 = vbcast.lane.b32.xlu1 %v15100_v42, 256 }
 0x58f   :  { %3900 = vperm.xlu0 %8996, %v11746_v40  }
 0x591   :  { %3908 = vperm.xlu1 %8997, %v11749_v21  }
 0x593   :  { %3920 = vperm.xlu0 %8996, %v11753_v13  }
 0x595   :  { %3367 = vbcast.lane.b32.xlu1 %v15100_v42, 264 }
 0x597   :  { %3924 = vperm.xlu0 %8996, %v11759_v9  }
 0x599   :  { %3912 = vperm.xlu1 %8997, %v11762_v32  }
 0x59b   :  { %3928 = vperm.xlu0 %8996, %v11766_v52  }
 0x59d   :  { %3371 = vbcast.lane.b32.xlu1 %v15100_v42, 272 }
 0x59f   :  { %3932 = vperm.xlu0 %8996, %v11771_v50  }
 0x5a1   :  { %3916 = vperm.xlu1 %8997, %v11774_v5  }
 0x5a3   :  { %3936 = vperm.xlu0 %8996, %v11778_v49  }
 0x5a5   :  { %3375 = vbcast.lane.b32.xlu1 %v15100_v42, 280 }
 0x5a7   :  { %3940 = vperm.xlu0 %8996, %v11783_v63  }
 0x5a9   :  { %3379 = vbcast.lane.b32.xlu1 %v15100_v42, 288  ;;  %v11811_v7 = vpop.xlane.xlu1 %2471 }
 0x5aa   :  { %v11814_v53 = vpop.xlane.xlu0 %2457 }
 0x5ab   :  { %3944 = vperm.xlu0 %8996, %v11788_v47   ;;  %v15114_v47 = vld [vmem:[#allocation21_spill] sm:$0xff] }
 0x5ad   :  { %3383 = vbcast.lane.b32.xlu1 %v15100_v42, 296 }
 0x5af   :  { %3948 = vperm.xlu0 %8996, %v11793_v34  }
 0x5b1   :  { %3387 = vbcast.lane.b32.xlu1 %v15100_v42, 304 }
 0x5b3   :  { %3952 = vperm.xlu0 %8996, %v11797_v62  }
 0x5b5   :  { %3391 = vbcast.lane.b32.xlu1 %v15100_v42, 312 }
 0x5b7   :  { %3956 = vperm.xlu0 %8996, %v11801_v41  }
 0x5b9   :  { %3395 = vbcast.lane.b32.xlu1 %v15100_v42, 320 }
 0x5bb   :  { %3960 = vperm.xlu0 %8996, %v11805_v37  }
 0x5bd   :  { %3399 = vbcast.lane.b32.xlu1 %v15100_v42, 328 }
 0x5c1   :  { %3403 = vbcast.lane.b32.xlu1 %v15100_v42, 336 }
 0x5c5   :  { %3407 = vbcast.lane.b32.xlu1 %v15100_v42, 344 }
 0x5c9   :  { %3411 = vbcast.lane.b32.xlu1 %v15100_v42, 352 }
 0x5cd   :  { %v11816_v23 = vpop.xlane.xlu1 %2499  ;;  %3415 = vbcast.lane.b32.xlu1 %v15100_v42, 360 }
 0x5ce   :  { %v11819_v10 = vpop.xlane.xlu0 %2485 }
 0x5d1   :  { %v11821_v55 = vpop.xlane.xlu1 %2527  ;;  %3419 = vbcast.lane.b32.xlu1 %v15100_v42, 368 }
 0x5d2   :  { %v11824_v48 = vpop.xlane.xlu0 %2513 }
 0x5d5   :  { %v11826_v39 = vpop.xlane.xlu1 %2555  ;;  %3423 = vbcast.lane.b32.xlu1 %v15100_v42, 376  ;;  %v2176_v42 = vshll.u32 %v2175_v1, 16  ;;  %v3270_v1 = vadd.s32 4294967272, %v15114_v47 }
 0x5d6   :  { %v11830_v19 = vpop.xlane.xlu0 %2541 }
 0x5d9   :  { %v2145_v28 = vpop.xlane.xlu1 %2144 }
 0x5da   :  { %v2146_v11 = vcvt.f32.s32 %v2145_v28  ;;  %v2131_v12 = vpop.xlane.xlu0 %2130 }
 0x5db   :  { %v2132_v37 = vcvt.f32.s32 %v2131_v12 }
 0x5dc   :  { %v2149_v44 = vadd.s32 %v2148_v6, %v2146_v11  ;;  %v15117_v6 = vmov 1.0|1.0  }
 0x5dd   :  { %v2135_v59 = vadd.s32 %v2134_v17, %v2132_v37  ;;  %v2173_v62 = vpop.xlane.xlu1 %2172  ;;  %v15116_v17 = vld [vmem:[#allocation31_spill] sm:$0xff]  ;;  %v3256_v37 = vadd.s32 4294967288, %v15114_v47 }
 0x5de   :  { %v2174_v20 = vcvt.f32.s32 %v2173_v62  ;;  %v2159_v41 = vpop.xlane.xlu0 %2158  ;;  %vm2745_vm12 = vcmp.eq.s32.totalorder %v15114_v47, %v2149_v44  ;;  %v2231_v62 = vcvt.f32.s32 %v11580_v15  ;;  %v3263_v15 = vadd.s32 4294967280, %v15114_v47 }
 0x5df   :  { %v2160_v29 = vcvt.f32.s32 %v2159_v41  ;;  %vm2744_vm11 = vcmp.eq.s32.totalorder %v15114_v47, %v2135_v59  ;;  %v2190_v41 = vshll.u32 %v2189_v2, 16  ;;  %v2217_v59 = vcvt.f32.s32 %v11582_v0  ;;  %v15121_v2 = vld [vmem:[#allocation39_spill] sm:$0xff] }
 0x5e0   :  { %v2177_v46 = vadd.s32 %v2176_v42, %v2174_v20  ;;  %8139 = vmatprep.mubr.msk.f32.mxu1 %vm2744_vm11, %v15115_v4  ;;  %v15118_v20 = vmov 0.0|0.0   ;;  %v15119_v42 = vld [vmem:[#allocation35_spill] sm:$0xff]  ;;  %v11853_v0 = vsub.s32 %v3256_v37, %v15121_v2  ;;  %v2259_v4 = vcvt.f32.s32 %v11584_v24  ;;  %v15122_v24 = vld [vmem:[#allocation41_spill] sm:$0xff] }
 0x5e1   :  { %v2163_v30 = vadd.s32 %v2162_v27, %v2160_v29  ;;  %v2201_v28 = vpop.xlane.xlu1 %2200  ;;  %8140 = vmatmul.mubr.msk.f32.vlgmr.msra.gmra.mrb[16].mxu1 %vm2745_vm12, %v15116_v17  ;;  %v2232_v29 = vshll.u32 %v2231_v62, 16  ;;  %v2218_v17 = vshll.u32 %v2217_v59, 16  ;;  %v3284_v37 = vadd.s32 4294967256, %v15114_v47 }
 0x5e2   :  { %v2202_v54 = vcvt.f32.s32 %v2201_v28  ;;  %8453 = vmatpush1.bf16.msra.mxu1 %v15117_v6  ;;  %v2187_v31 = vpop.xlane.xlu0 %2186  ;;  %vm2747_vm14 = vcmp.eq.s32.totalorder %v15114_v47, %v2177_v46  ;;  %v2245_v46 = vcvt.f32.s32 %v11586_v3  ;;  %v11871_v3 = vsub.s32 %v3263_v15, %v15121_v2 }
 0x5e3   :  { %v2188_v44 = vcvt.f32.s32 %v2187_v31  ;;  %vm2746_vm13 = vcmp.eq.s32.totalorder %v15114_v47, %v2163_v30  ;;  %8454 = vmatprep.subr.bf16.mxu1 %v15118_v20  ;;  %v11868_v31 = vsub.s32 %v3270_v1, %v15121_v2  ;;  %vm14715_vm11 = vcmask 392512  }
 0x5e4   :  { %v2205_v27 = vadd.s32 %v2204_v22, %v2202_v54  ;;  %8142 = vmatprep.mubr.msk.f32.mxu1 %vm2746_vm13, %v15119_v42  ;;  %v11862_v54 = vsub.s32 %v15114_v47, %v15121_v2  ;;  %v15123_v42 = vld [vmem:[#allocation34_spill] sm:$0xff]  ;;  %v2246_v1 = vshll.u32 %v2245_v46, 16  ;;  %v3305_v46 = vadd.s32 4294967232, %v15114_v47 }
 0x5e5   :  { %v2191_v11 = vadd.s32 %v2190_v41, %v2188_v44  ;;  %v2229_v12 = vpop.xlane.xlu1 %2228  ;;  %8143 = vmatmul.mubr.msk.f32.gmra.mrb[18].mxu1 %vm2747_vm14, %v15120_v14  ;;  %v3277_v41 = vadd.s32 4294967264, %v15114_v47  ;;  %v2287_v14 = vcvt.f32.s32 %v11588_v45  ;;  %vm14712_vm12 = vcmask 458112  }
 0x5e6   :  { %v2230_v30 = vcvt.f32.s32 %v2229_v12  ;;  %8455 = vmatpush1.bf16.msra.mxu1 %v15117_v6  ;;  %v2215_v28 = vpop.xlane.xlu0 %2214  ;;  %vm2749_vm0 = vcmp.eq.s32.totalorder %v15114_v47, %v2205_v27  ;;  %v2260_v12 = vshll.u32 %v2259_v4, 16 }
 0x5e7   :  { %v2216_v22 = vcvt.f32.s32 %v2215_v28  ;;  %vm2748_vm15 = vcmp.eq.s32.totalorder %v15114_v47, %v2191_v11  ;;  %8456 = vmatprep.subr.bf16.mxu1 %v15118_v20  ;;  %v3298_v11 = vadd.s32 4294967240, %v15114_v47  ;;  %v11882_v28 = vsub.s32 %v3284_v37, %v15121_v2 }
 0x5e8   :  { %v2233_v62 = vadd.s32 %v2232_v29, %v2230_v30  ;;  %8145 = vmatprep.mubr.msk.f32.mxu1 %vm2748_vm15, %v15122_v24  ;;  %v2273_v30 = vcvt.f32.s32 %v11590_v26  ;;  %v11888_v45 = vsub.s32 %v3277_v41, %v15121_v2  ;;  %v3312_v26 = vadd.s32 4294967224, %v15114_v47 }
 0x5e9   :  { %v2219_v59 = vadd.s32 %v2218_v17, %v2216_v22  ;;  %v2257_v44 = vpop.xlane.xlu1 %2256  ;;  %8146 = vmatmul.mubr.msk.f32.gmra.mrb[20].mxu1 %vm2749_vm0, %v15123_v42  ;;  %v3291_v17 = vadd.s32 4294967248, %v15114_v47  ;;  %v15124_v22 = vld [vmem:[#allocation43_spill] sm:$0xff]  ;;  %v11894_v37 = vsub.s32 %v3298_v11, %v15121_v2  ;;  %v2288_v42 = vshll.u32 %v2287_v14, 16 }
 0x5ea   :  { %v2258_v29 = vcvt.f32.s32 %v2257_v44  ;;  %8457 = vmatpush1.bf16.msra.mxu1 %v15117_v6  ;;  %v2243_v27 = vpop.xlane.xlu0 %2242  ;;  %vm2751_vm2 = vcmp.eq.s32.totalorder %v15114_v47, %v2233_v62  ;;  %v15125_v44 = vld [vmem:[#allocation40_spill] sm:$0xff]  ;;  %v2274_v41 = vshll.u32 %v2273_v30, 16  ;;  %v3326_v11 = vadd.s32 4294967208, %v15114_v47 }
 0x5eb   :  { %v2244_v15 = vcvt.f32.s32 %v2243_v27  ;;  %vm2750_vm1 = vcmp.eq.s32.totalorder %v15114_v47, %v2219_v59  ;;  %8458 = vmatprep.subr.bf16.mxu1 %v15118_v20  ;;  %v2301_v27 = vcvt.f32.s32 %v11594_v25  ;;  %v11911_v25 = vsub.s32 %v3305_v46, %v15121_v2 }
 0x5ec   :  { %v2261_v4 = vadd.s32 %v2260_v12, %v2258_v29  ;;  %8148 = vmatprep.mubr.msk.f32.mxu1 %vm2750_vm1, %v15124_v22  ;;  %v2315_v12 = vcvt.f32.s32 %v11592_v18  ;;  %v15126_v18 = vld [vmem:[#allocation33_spill] sm:$0xff]  ;;  %v11914_v30 = vadd.s32 4294967216, %v15114_v47  ;;  %vm14698_vm15 = vcmask 523712  }
 0x5ed   :  { %v2247_v24 = vadd.s32 %v2246_v1, %v2244_v15  ;;  %v2285_v59 = vpop.xlane.xlu1 %2284  ;;  %8149 = vmatmul.mubr.msk.f32.gmra.mrb[22].mxu1 %vm2751_vm2, %v15125_v44  ;;  %v11902_v1 = vsub.s32 %v3291_v17, %v15121_v2  ;;  %v11908_v15 = vsub.s32 %v3312_v26, %v15121_v2  ;;  %v15127_v17 = vld [vmem:[#allocation42_spill] sm:$0xff]  ;;  %v2302_v46 = vshll.u32 %v2301_v27, 16 }
 0x5ee   :  { %v2286_v29 = vcvt.f32.s32 %v2285_v59  ;;  %8459 = vmatpush1.bf16.msra.mxu1 %v15117_v6  ;;  %v2271_v62 = vpop.xlane.xlu0 %2270  ;;  %vm2753_vm6 = vcmp.eq.s32.totalorder %v15114_v47, %v2261_v4  ;;  %v15128_v44 = vld [vmem:[#allocation126_spill] sm:$0xff]  ;;  %v3255_v27 = vrot.slane %v11746_v40, %v11862_v54  ;;  %vm14696_vm0 = vcmask 589312  }
 0x5ef   :  { %v2272_v22 = vcvt.f32.s32 %v2271_v62  ;;  %vm2752_vm5 = vcmp.eq.s32.totalorder %v15114_v47, %v2247_v24  ;;  %8460 = vmatprep.subr.bf16.mxu1 %v15118_v20  ;;  %v2343_v62 = vcvt.f32.s32 %v15069_v38 }
 0x5f0   :  { %v2289_v14 = vadd.s32 %v2288_v42, %v2286_v29  ;;  %8151 = vmatprep.mubr.msk.f32.mxu1 %vm2752_vm5, %v15126_v18  ;;  %v2460_v42 = vcvt.f32.s32 %v15128_v44  ;;  %v2316_v29 = vshll.u32 %v2315_v12, 16  ;;  %v2329_v18 = vcvt.f32.s32 %v11600_v58  ;;  %v15130_v44 = vld [vmem:[#allocation32_spill] sm:$0xff] }
 0x5f1   :  { %v2275_v24 = vadd.s32 %v2274_v41, %v2272_v22  ;;  %v2313_v59 = vpop.xlane.xlu1 %2312  ;;  %8152 = vmatmul.mubr.msk.f32.gmra.mrb[24].mxu1 %vm2753_vm6, %v15127_v17  ;;  %v3260_v41 = vrot.slane %v11739_v16, %v11853_v0  ;;  %v11926_v12 = vsub.s32 %v3326_v11, %v15121_v2  ;;  %v15129_v22 = vld [vmem:[#allocation23_spill] sm:$0xff]  ;;  %v3267_v58 = vrot.slane %v11749_v21, %v11871_v3  ;;  %v15131_v16 = vld [vmem:[#allocation124_spill] sm:$0xff] }
 0x5f2   :  { %v2314_v4 = vcvt.f32.s32 %v2313_v59  ;;  %8461 = vmatpush1.bf16.msra.mxu1 %v15117_v6  ;;  %v2299_v26 = vpop.xlane.xlu0 %2298  ;;  %vm2755_vm10 = vcmp.eq.s32.totalorder %v15114_v47, %v2289_v14  ;;  %v2474_v11 = vcvt.f32.s32 %v15131_v16  ;;  %v2330_v40 = vshll.u32 %v2329_v18, 16 }
 0x5f3   :  { %v2300_v57 = vcvt.f32.s32 %v2299_v26  ;;  %vm2754_vm9 = vcmp.eq.s32.totalorder %v15114_v47, %v2275_v24  ;;  %8462 = vmatprep.subr.bf16.mxu1 %v15118_v20  ;;  %v2459_v24 = vcvt.f32.s32 %v11814_v53  ;;  %v2473_v53 = vcvt.f32.s32 %v11811_v7 }
 0x5f4   :  { %v2317_v38 = vadd.s32 %v2316_v29, %v2314_v4  ;;  %8154 = vmatprep.mubr.msk.f32.mxu1 %vm2754_vm9, %v15129_v22  ;;  %v2461_v29 = vshll.u32 %v2460_v42, 16  ;;  %v2344_v4 = vshll.u32 %v2343_v62, 16  ;;  %v2488_v22 = vcvt.f32.s32 %v11606_v60  ;;  %v15132_v42 = vld [vmem:[#allocation36_spill] sm:$0xff] }
 0x5f5   :  { %v2303_v59 = vadd.s32 %v2302_v46, %v2300_v57  ;;  %v2341_v17 = vpop.xlane.xlu1 %2340  ;;  %8155 = vmatmul.mubr.msk.f32.gmra.mrb[26].mxu1 %vm2755_vm10, %v15130_v44  ;;  %v3340_v57 = vadd.s32 4294967192, %v15114_v47  ;;  %v3262_v62 = vsel %vm3261_vm3, %v3260_v41, %v3255_v27  ;;  %v2487_v18 = vcvt.f32.s32 %v11819_v10 }
 0x5f6   :  { %v2342_v26 = vcvt.f32.s32 %v2341_v17  ;;  %8463 = vmatpush1.bf16.msra.mxu1 %v15117_v6  ;;  %v2327_v14 = vpop.xlane.xlu0 %2326  ;;  %vm2757_vm14 = vcmp.eq.s32.totalorder %v15114_v47, %v2317_v38  ;;  %v2462_v17 = vadd.s32 %v2461_v29, %v2459_v24  ;;  %v3269_v16 = vsel %vm3268_vm4, %v3267_v58, %v3262_v62  ;;  %v15134_v24 = vld [vmem:[#allocation25_spill] sm:$0xff] }
 0x5f7   :  { %v2328_v21 = vcvt.f32.s32 %v2327_v14  ;;  %vm2756_vm13 = vcmp.eq.s32.totalorder %v15114_v47, %v2303_v59  ;;  %8464 = vmatprep.subr.bf16.mxu1 %v15118_v20  ;;  %v15133_v59 = vld [vmem:[#allocation37_spill] sm:$0xff]  ;;  %v3281_v7 = vrot.slane %v11774_v5, %v11888_v45  ;;  %v3274_v41 = vrot.slane %v11762_v32, %v11868_v31  ;;  %v15135_v14 = vld [vmem:[#allocation24_spill] sm:$0xff] }
 0x5f8   :  { %v2345_v46 = vadd.s32 %v2344_v4, %v2342_v26  ;;  %8157 = vmatprep.mubr.msk.f32.mxu1 %vm2756_vm13, %v15132_v42  ;;  %v2475_v4 = vshll.u32 %v2474_v11, 16  ;;  %v2502_v26 = vcvt.f32.s32 %v11603_v35  ;;  %v2489_v10 = vshll.u32 %v2488_v22, 16 }
 0x5f9   :  { %v2331_v60 = vadd.s32 %v2330_v40, %v2328_v21  ;;  %v11947_v44 = vpop.xlane.xlu1 %2583  ;;  %8158 = vmatmul.mubr.msk.f32.gmra.mrb[28].mxu1 %vm2757_vm14, %v15133_v59  ;;  %v2516_v38 = vcvt.f32.s32 %v11619_v8  ;;  %v11964_v5 = vsub.s32 %v11914_v30, %v15121_v2  ;;  %v2501_v58 = vcvt.f32.s32 %v11816_v23  ;;  %v15136_v21 = vld [vmem:[#allocation56_spill] sm:$0xff] }
 0x5fa   :  { %8465 = vmatpush1.bf16.msra.mxu1 %v15117_v6  ;;  %v11958_v27 = vpop.xlane.xlu0 %2569  ;;  %v2476_v35 = vadd.s32 %v2475_v4, %v2473_v53  ;;  %vm2759_vm2 = vcmp.eq.s32.totalorder %v15114_v47, %v2345_v46  ;;  %v3276_v32 = vsel %vm14781_vm7, %v3274_v41, %v3269_v16  ;;  %v2490_v8 = vadd.s32 %v2489_v10, %v2487_v18  ;;  %v15138_v4 = vld [vmem:[#allocation58_spill] sm:$0xff] }
 0x5fb   :  { %vm2758_vm1 = vcmp.eq.s32.totalorder %v15114_v47, %v2331_v60  ;;  %8466 = vmatprep.subr.bf16.mxu1 %v15118_v20  ;;  %v2515_v11 = vcvt.f32.s32 %v11824_v48  ;;  %vm2776_vm5 = vcmp.eq.s32.totalorder %v15114_v47, %v2462_v17  ;;  %v3283_v30 = vsel %vm14780_vm8, %v3281_v7, %v3276_v32  ;;  %v15139_v32 = vld [vmem:[#allocation57_spill] sm:$0xff] }
 0x5fc   :  { %8160 = vmatprep.mubr.msk.f32.mxu1 %vm2758_vm1, %v15134_v24  ;;  %v3295_v23 = vrot.slane %v11759_v9, %v11902_v1  ;;  %vm14695_vm6 = vcmask 654912   ;;  %v2503_v40 = vshll.u32 %v2502_v26, 16  ;;  %v2530_v22 = vcvt.f32.s32 %v11616_v33 }
 0x5fd   :  { %v11971_v29 = vpop.xlane.xlu1 %2611  ;;  %8161 = vmatmul.mubr.msk.f32.gmra.mrb[30].mxu1 %vm2759_vm2, %v15135_v14  ;;  %v3288_v48 = vrot.slane %v11753_v13, %v11882_v28  ;;  %vm14694_vm9 = vcmask 720512   ;;  %v3333_v53 = vadd.s32 4294967200, %v15114_v47  ;;  %v2517_v46 = vshll.u32 %v2516_v38, 16  ;;  %v15140_v14 = vld [vmem:[#allocation60_spill] sm:$0xff] }
 0x5fe   :  { %8163 = vmatprep.mubr.msk.f32.mxu1 %vm2776_vm5, %v15136_v21  ;;  %8467 = vmatpush1.bf16.msra.mxu1 %v15117_v6  ;;  %v2544_v42 = vcvt.f32.s32 %v11631_v43  ;;  %v11987_v9 = vsub.s32 %v3340_v57, %v15121_v2  ;;  %v2504_v62 = vadd.s32 %v2503_v40, %v2501_v58  ;;  %v2529_v33 = vcvt.f32.s32 %v11821_v55  ;;  %v11993_v60 = vpop.xlane.xlu0 %2597  ;;  %v15137_v43 = vld [vmem:[#allocation55_spill] sm:$0xff] }
 0x5ff   :  { %8468 = vmatprep.subr.bf16.mxu1 %v15118_v20  ;;  %vm2777_vm10 = vcmp.eq.s32.totalorder %v15114_v47, %v2476_v35  ;;  %v3290_v17 = vsel %vm14715_vm11, %v3288_v48, %v3283_v30  ;;  %v2518_v18 = vadd.s32 %v2517_v46, %v2515_v11  ;;  %v2543_v13 = vcvt.f32.s32 %v11830_v19 }
 0x600   :  { %vm2778_vm13 = vcmp.eq.s32.totalorder %v15114_v47, %v2490_v8  ;;  %v3297_v57 = vsel %vm14712_vm12, %v3295_v23, %v3290_v17  ;;  %v3309_v55 = vrot.slane %v11771_v50, %v11911_v25  ;;  %vm14693_vm14 = vcmask 786112  }
 0x601   :  { %v11995_v59 = vpop.xlane.xlu1 %2639  ;;  %8164 = vmatmul.mubr.msk.f32.gmra.mrb[32].mxu1 %vm2777_vm10, %v15137_v43  ;;  %v2531_v16 = vshll.u32 %v2530_v22, 16  ;;  %v2558_v7 = vcvt.f32.s32 %v11628_v51  ;;  %v3302_v19 = vrot.slane %v11766_v52, %v11894_v37  ;;  %v12008_v26 = vsub.s32 %v3333_v53, %v15121_v2 }
 0x602   :  { %8166 = vmatprep.mubr.msk.f32.mxu1 %vm2778_vm13, %v15138_v4  ;;  %8469 = vmatpush1.bf16.msra.mxu1 %v15117_v6  ;;  %vm14689_vm1 = vcmask 851712   ;;  %v2545_v41 = vshll.u32 %v2544_v42, 16  ;;  %v2572_v10 = vcvt.f32.s32 %v11686_v56  ;;  %v3347_v50 = vadd.s32 4294967184, %v15114_v47  ;;  %v2626_v22 = vpop.xlane.xlu0 %2625  ;;  %v15141_v42 = vld [vmem:[#allocation59_spill] sm:$0xff] }
 0x603   :  { %8470 = vmatprep.subr.bf16.mxu1 %v15118_v20  ;;  %v2532_v38 = vadd.s32 %v2531_v16, %v2529_v33  ;;  %v2557_v51 = vcvt.f32.s32 %v11826_v39  ;;  %vm2779_vm2 = vcmp.eq.s32.totalorder %v15114_v47, %v2504_v62  ;;  %v3304_v35 = vsel %vm14698_vm15, %v3302_v19, %v3297_v57  ;;  %v15145_v57 = vld [vmem:[#allocation127_spill] sm:$0xff] }
 0x604   :  { %v2546_v58 = vadd.s32 %v2545_v41, %v2543_v13  ;;  %v2571_v52 = vcvt.f32.s32 %v11958_v27  ;;  %vm2780_vm5 = vcmp.eq.s32.totalorder %v15114_v47, %v2518_v18  ;;  %v3311_v56 = vsel %vm14696_vm0, %v3309_v55, %v3304_v35  ;;  %v15143_v18 = vld [vmem:[#allocation62_spill] sm:$0xff]  ;;  %v15144_v13 = vld [vmem:[#allocation101_spill] sm:$0xff] }
 0x605   :  { %v12017_v24 = vpop.xlane.xlu1 %2667  ;;  %8167 = vmatmul.mubr.msk.f32.gmra.mrb[34].mxu1 %vm2779_vm2, %v15139_v32  ;;  %v3323_v8 = vrot.slane %v11783_v63, %v11964_v5  ;;  %v2559_v11 = vshll.u32 %v2558_v7, 16  ;;  %v2586_v39 = vcvt.f32.s32 %v11684_v61  ;;  %v3316_v27 = vrot.slane %v11778_v49, %v11908_v15  ;;  %v15149_v32 = vld [vmem:[#allocation64_spill] sm:$0xff] }
 0x606   :  { %8169 = vmatprep.mubr.msk.f32.mxu1 %vm2780_vm5, %v15140_v14  ;;  %8471 = vmatpush1.bf16.msra.mxu1 %v15117_v6  ;;  %v3354_v30 = vadd.s32 4294967176, %v15114_v47  ;;  %v2573_v23 = vshll.u32 %v2572_v10, 16  ;;  %v2600_v40 = vcvt.f32.s32 %v11703_v36  ;;  %v12033_v63 = vsub.s32 %v3347_v50, %v15121_v2  ;;  %v2654_v41 = vpop.xlane.xlu0 %2653  ;;  %v15146_v10 = vld [vmem:[#allocation61_spill] sm:$0xff] }
 0x607   :  { %8472 = vmatprep.subr.bf16.mxu1 %v15118_v20  ;;  %v2560_v21 = vadd.s32 %v2559_v11, %v2557_v51  ;;  %v2585_v61 = vcvt.f32.s32 %v11947_v44  ;;  %vm2781_vm10 = vcmp.eq.s32.totalorder %v15114_v47, %v2532_v38  ;;  %v3318_v48 = vsel %vm14695_vm6, %v3316_v27, %v3311_v56  ;;  %v15142_v44 = vld [vmem:[#allocation98_spill] sm:$0xff]  ;;  %v15147_v51 = vld [vmem:[#allocation112_spill] sm:$0xff]  ;;  %v15150_v56 = vld [vmem:[#allocation107_spill] sm:$0xff] }
 0x608   :  { %v2574_v53 = vadd.s32 %v2573_v23, %v2571_v52  ;;  %v2599_v49 = vcvt.f32.s32 %v11993_v60  ;;  %vm2782_vm13 = vcmp.eq.s32.totalorder %v15114_v47, %v2546_v58  ;;  %v3325_v36 = vsel %vm14694_vm9, %v3323_v8, %v3318_v48  ;;  %v15148_v52 = vld [vmem:[#allocation96_spill] sm:$0xff]  ;;  %v15151_v14 = vld [vmem:[#allocation105_spill] sm:$0xff] }
 0x609   :  { %v12039_v46 = vpop.permute.xlu1 %3904  ;;  %8170 = vmatmul.mubr.msk.f32.gmra.mrb[36].mxu1 %vm2781_vm10, %v15141_v42  ;;  %v3337_v62 = vrot.slane %v11793_v34, %v12008_v26  ;;  %v2587_v33 = vshll.u32 %v2586_v39, 16  ;;  %v2614_v17 = vcvt.f32.s32 %v15142_v44  ;;  %v3330_v60 = vrot.slane %v15144_v13, %v11926_v12 }
 0x60a   :  { %8172 = vmatprep.mubr.msk.f32.mxu1 %vm2782_vm13, %v15143_v18  ;;  %8473 = vmatpush1.bf16.msra.mxu1 %v15117_v6  ;;  %vm14692_vm2 = vcmask 917312   ;;  %v2601_v43 = vshll.u32 %v2600_v40, 16  ;;  %v2628_v55 = vcvt.f32.s32 %v15145_v57  ;;  %vm14691_vm5 = vcmask 982912   ;;  %v15156_v57 = vld [vmem:[#allocation65_spill] sm:$0xff] }
 0x60b   :  { %8474 = vmatprep.subr.bf16.mxu1 %v15118_v20  ;;  %v2588_v16 = vadd.s32 %v2587_v33, %v2585_v61  ;;  %v2613_v34 = vcvt.f32.s32 %v11971_v29  ;;  %vm2783_vm10 = vcmp.eq.s32.totalorder %v15114_v47, %v2560_v21  ;;  %v3332_v7 = vsel %vm14693_vm14, %v3330_v60, %v3325_v36  ;;  %v15153_v36 = vld [vmem:[#allocation100_spill] sm:$0xff] }
 0x60c   :  { %v2602_v4 = vadd.s32 %v2601_v43, %v2599_v49  ;;  %v2627_v19 = vcvt.f32.s32 %v2626_v22  ;;  %vm2784_vm13 = vcmp.eq.s32.totalorder %v15114_v47, %v2574_v53  ;;  %v3339_v38 = vsel %vm14689_vm1, %v3337_v62, %v3332_v7  ;;  %v15152_v53 = vld [vmem:[#allocation63_spill] sm:$0xff]  ;;  %v15155_v33 = vld [vmem:[#allocation108_spill] sm:$0xff] }
 0x60d   :  { %8173 = vmatmul.mubr.msk.f32.gmra.mrb[38].mxu1 %vm2783_vm10, %v15146_v10  ;;  %v3364_v50 = vpop.permute.xlu1 %3363  ;;  %v3351_v35 = vrot.slane %v15147_v51, %v12033_v63  ;;  %v2615_v58 = vshll.u32 %v2614_v17, 16  ;;  %v2642_v29 = vcvt.f32.s32 %v15148_v52  ;;  %v3344_v8 = vrot.slane %v15150_v56, %v11987_v9  ;;  %v15158_v7 = vld [vmem:[#allocation68_spill] sm:$0xff] }
 0x60e   :  { %8175 = vmatprep.mubr.msk.f32.mxu1 %vm2784_vm13, %v15149_v32  ;;  %8475 = vmatpush1.bf16.msra.mxu1 %v15117_v6  ;;  %v12067_v11 = vsub.s32 %v3354_v30, %v15121_v2  ;;  %v2629_v39 = vshll.u32 %v2628_v55, 16  ;;  %v2656_v27 = vcvt.f32.s32 %v15151_v14  ;;  %v2641_v40 = vcvt.f32.s32 %v11995_v59  ;;  %v3901_v48 = vpop.permute.xlu0 %3900  ;;  %v15154_v59 = vld [vmem:[#allocation66_spill] sm:$0xff] }
 0x60f   :  { %3965 = vperm.xlu0 %8996, %v3364_v50   ;;  %8476 = vmatprep.subr.bf16.mxu1 %v15118_v20  ;;  %v2616_v23 = vadd.s32 %v2615_v58, %v2613_v34  ;;  %vm2785_vm10 = vcmp.eq.s32.totalorder %v15114_v47, %v2588_v16  ;;  %v3346_v22 = vsel %vm14692_vm2, %v3344_v8, %v3339_v38  ;;  %v2655_v61 = vcvt.f32.s32 %v2654_v41  ;;  %v15159_v41 = vld [vmem:[#allocation67_spill] sm:$0xff]  ;;  %v15160_v50 = vld [vmem:[#allocation70_spill] sm:$0xff]  ;;  %v15162_v58 = vld [vmem:[#allocation69_spill] sm:$0xff] }
 0x610   :  { %v2630_v21 = vadd.s32 %v2629_v39, %v2627_v19  ;;  %vm2786_vm13 = vcmp.eq.s32.totalorder %v15114_v47, %v2602_v4  ;;  %v3353_v49 = vsel %vm14691_vm5, %v3351_v35, %v3346_v22  ;;  %vm14690_vm1 = vcmask 1048512   ;;  %v15161_v38 = vld [vmem:[#allocation71_spill] sm:$0xff] }
 0x611   :  { %8176 = vmatmul.mubr.msk.f32.gmra.mrb[40].mxu1 %vm2785_vm10, %v15152_v53  ;;  %v12075_v30 = vpop.permute.xlu1 %3908  ;;  %v2643_v42 = vshll.u32 %v2642_v29, 16  ;;  %v2670_v62 = vcvt.f32.s32 %v15153_v36  ;;  %v3358_v44 = vrot.slane %v15155_v33, %v12067_v11  ;;  %v2657_v17 = vshll.u32 %v2656_v27, 16  ;;  %v15163_v29 = vld [vmem:[#allocation38_spill] sm:$0xff]  ;;  %v15165_v8 = vld [vmem:[#allocation27_spill] sm:$0xff]  ;;  %v15169_v53 = vld [vmem:[#allocation28_spill] sm:$0xff] }
 0x612   :  { %8178 = vmatprep.mubr.msk.f32.mxu1 %vm2786_vm13, %v15154_v59  ;;  %8477 = vmatpush1.bf16.msra.mxu1 %v15117_v6  ;;  %v2669_v13 = vcvt.f32.s32 %v12017_v24  ;;  %vm2787_vm10 = vcmp.eq.s32.totalorder %v15114_v47, %v2616_v23  ;;  %vm2788_vm13 = vcmp.eq.s32.totalorder %v15114_v47, %v2630_v21  ;;  %v12093_v16 = vsub.s32 0, %v15121_v2  ;;  %v12097_v24 = vpop.permute.xlu0 %3920  ;;  %v15168_v21 = vld [vmem:[#allocation45_spill] sm:$0xff] }
 0x613   :  { %8478 = vmatprep.subr.bf16.mxu1 %v15118_v20  ;;  %v2644_v18 = vadd.s32 %v2643_v42, %v2641_v40  ;;  %v12088_v60 = vsel %vm14690_vm1, %v3358_v44, %v3353_v49  ;;  %v2658_v43 = vadd.s32 %v2657_v17, %v2655_v61  ;;  %v2671_v34 = vshll.u32 %v2670_v62, 16  ;;  %v15167_v40 = vld [vmem:[#allocation44_spill] sm:$0xff]  ;;  %v15170_v42 = vld [vmem:[#allocation22_spill] sm:$0xff]  ;;  %v15171_v62 = vld [vmem:[#allocation47_spill] sm:$0xff] }
 0x614   :  { %15157 = vst [vmem:[#allocation113_spill] sm:$0xff] %v12093_v16  ;;  %v12102_v4 = vrot.slane %v12088_v60, %v12093_v16  ;;  %v12115_v51 = vrot.slane %v15161_v38, %v12093_v16  ;;  %vm14699_vm6 = vcmp.lt.s32.totalorder %v15114_v47, %v15163_v29  ;;  %v15164_v32 = vmov 1.0   ;;  %v15172_v44 = vld [vmem:[#allocation46_spill] sm:$0xff] }
 0x615   :  { %8179 = vmatmul.mubr.msk.f32.gmra.mrb[42].mxu1 %vm2787_vm10, %v15156_v57  ;;  %v3368_v55 = vpop.permute.xlu1 %3367  ;;  %v2672_v19 = vadd.s32 %v2671_v34, %v2669_v13  ;;  %vm2789_vm10 = vcmp.eq.s32.totalorder %v15114_v47, %v2644_v18  ;;  %vm2790_vm1 = vcmp.eq.s32.totalorder %v15114_v47, %v2658_v43  ;;  %v15173_v13 = vld [vmem:[#allocation49_spill] sm:$0xff]  ;;  %v15174_v57 = vld [vmem:[#allocation48_spill] sm:$0xff] }
 0x616   :  { %8181 = vmatprep.mubr.msk.f32.mxu1 %vm2788_vm13, %v15158_v7  ;;  %8479 = vmatpush1.bf16.msra.mxu1 %v15117_v6  ;;  %vm14697_vm13 = vcmp.lt.s32.totalorder %v15114_v47, %v15121_v2  ;;  %vm4107_vm5 = vcmp.eq.f32.partialorder %v12102_v4, %v3901_v48  ;;  %vm4043_vm2 = vcmp.gt.f32.partialorder %v12102_v4, %v3901_v48  ;;  %v12122_v35 = vpop.permute.xlu0 %3924  ;;  %v15175_v7 = vld [vmem:[#allocation52_spill] sm:$0xff] }
 0x617   :  { %3970 = vperm.xlu0 %8996, %v3368_v55   ;;  %8480 = vmatprep.subr.bf16.mxu1 %v15118_v20  ;;  %vm4235_vm14 = vmand %vm4107_vm5, %vm14697_vm13  ;;  %vm4109_vm9 = vcmp.eq.f32.partialorder %v12102_v4, %v12039_v46  ;;  %vm4046_vm5 = vcmp.gt.f32.partialorder %v12115_v51, %v12039_v46  ;;  %vm4111_vm15 = vcmp.eq.f32.partialorder %v12102_v4, %v12075_v30 }
 0x618   :  { %vm4299_vm0 = vmor %vm4043_vm2, %vm4235_vm14  ;;  %vm14700_vm14 = vcmp.lt.s32.totalorder %v15114_v47, %v15165_v8  ;;  %vm4048_vm2 = vcmp.gt.f32.partialorder %v12115_v51, %v12075_v30 }
 0x619   :  { %8182 = vmatmul.mubr.msk.f32.gmra.mrb[44].mxu1 %vm2789_vm10, %v15159_v41  ;;  %v3913_v10 = vpop.permute.xlu1 %3912  ;;  %vm2791_vm10 = vcmp.eq.s32.totalorder %v15114_v47, %v2672_v19  ;;  %vm4237_vm13 = vmand %vm4109_vm9, %vm14699_vm6  ;;  %vm4047_vm9 = vcmp.gt.f32.partialorder %v12102_v4, %v12075_v30  ;;  %v15176_v41 = vld [vmem:[#allocation51_spill] sm:$0xff] }
 0x61a   :  { %8184 = vmatprep.mubr.msk.f32.mxu1 %vm2790_vm1, %v15160_v50  ;;  %8481 = vmatpush1.bf16.msra.mxu1 %v15117_v6  ;;  %vm4044_vm1 = vcmp.gt.f32.partialorder %v12115_v51, %v3901_v48  ;;  %v12145_v39 = vpop.permute.xlu0 %3928  ;;  %vm4049_vm6 = vcmp.gt.f32.partialorder %v12102_v4, %v3913_v10  ;;  %v15177_v50 = vld [vmem:[#allocation54_spill] sm:$0xff] }
 0x61b   :  { %8482 = vmatprep.subr.bf16.mxu1 %v15118_v20 }
 0x61d   :  { %8185 = vmatmul.mubr.msk.f32.gmra.mrb[46].mxu1 %vm2791_vm10, %v15162_v58  ;;  %v3372_v52 = vpop.permute.xlu1 %3371  ;;  %vm4045_vm10 = vcmp.gt.f32.partialorder %v12102_v4, %v12039_v46  ;;  %v15166_v46 = vld [vmem:[#allocation26_spill] sm:$0xff]  ;;  %v15178_v58 = vld [vmem:[#allocation53_spill] sm:$0xff] }
 0x61e   :  { %8483 = vmatpush1.bf16.msra.mxu1 %v15117_v6  ;;  %3975 = vperm.xlu1 %8997, %v3372_v52   ;;  %v12159_v27 = vpop.permute.xlu0 %3932  ;;  %v12302_v52 = vadd.s32 128, %v15121_v2 }
 0x61f   :  { %7219 = vmatprep.mubr.msk.f32.mxu1 %vm4044_vm1, %v15164_v32  ;;  %vm4239_vm1 = vmand %vm4111_vm15, %vm14700_vm14 }
 0x620   :  { %15179 = vst [vmem:[#allocation109_spill] sm:$0xff] %v12302_v52 }
 0x621   :  { %v3917_v56 = vpop.permute.xlu1 %3916  ;;  %7220 = vmatmul.mubr.msk.f32.vlgmr.msra.gmra.mrb[48].mxu1 %vm4299_vm0, %v15164_v32  ;;  %vm4301_vm0 = vmor %vm4045_vm10, %vm4237_vm13  ;;  %vm14703_vm13 = vcmp.lt.s32.totalorder %v15114_v47, %v15166_v46 }
 0x622   :  { %7221 = vmatprep.mubr.msk.f32.mxu1 %vm4046_vm5, %v15164_v32  ;;  %vm4113_vm5 = vcmp.eq.f32.partialorder %v12102_v4, %v3913_v10  ;;  %vm4303_vm10 = vmor %vm4047_vm9, %vm4239_vm1  ;;  %vm14701_vm9 = vcmp.lt.s32.totalorder %v15114_v47, %v15167_v40  ;;  %vm4051_vm14 = vcmp.gt.f32.partialorder %v12102_v4, %v3917_v56  ;;  %v3937_v61 = vpop.permute.xlu0 %3936 }
 0x623   :  { %vm4241_vm15 = vmand %vm4113_vm5, %vm14703_vm13  ;;  %vm4057_vm13 = vcmp.gt.f32.partialorder %v12102_v4, %v12145_v39 }
 0x624   :  { %vm4305_vm1 = vmor %vm4049_vm6, %vm4241_vm15  ;;  %vm14702_vm6 = vcmp.lt.s32.totalorder %v15114_v47, %v15168_v21 }
 0x625   :  { %v3376_v14 = vpop.permute.xlu1 %3375  ;;  %7222 = vmatmul.mubr.msk.f32.gmra.mrb[50].mxu1 %vm4301_vm0, %v15164_v32  ;;  %vm4050_vm0 = vcmp.gt.f32.partialorder %v12115_v51, %v3913_v10 }
 0x626   :  { %3980 = vperm.xlu0 %8996, %v3376_v14   ;;  %7223 = vmatprep.mubr.msk.f32.mxu1 %vm4048_vm2, %v15164_v32  ;;  %vm4115_vm2 = vcmp.eq.f32.partialorder %v12102_v4, %v3917_v56  ;;  %v3941_v30 = vpop.permute.xlu0 %3940  ;;  %v12317_v14 = vadd.s32 136, %v15121_v2 }
 0x627   :  { %vm4243_vm5 = vmand %vm4115_vm2, %vm14701_vm9  ;;  %vm4053_vm2 = vcmp.gt.f32.partialorder %v12102_v4, %v12097_v24  ;;  %vm4119_vm9 = vcmp.eq.f32.partialorder %v12102_v4, %v12122_v35 }
 0x628   :  { %vm4307_vm15 = vmor %vm4051_vm14, %vm4243_vm5  ;;  %vm14705_vm14 = vcmp.lt.s32.totalorder %v15114_v47, %v15169_v53  ;;  %15180 = vst [vmem:[#allocation116_spill] sm:$0xff] %v12317_v14 }
 0x629   :  { %v3380_v23 = vpop.permute.xlu1 %3379  ;;  %7224 = vmatmul.mubr.msk.f32.gmra.mrb[52].mxu1 %vm4303_vm10, %v15164_v32  ;;  %vm4052_vm10 = vcmp.gt.f32.partialorder %v12115_v51, %v3917_v56  ;;  %v12305_v56 = vadd.s32 128, %v15114_v47 }
 0x62a   :  { %3985 = vperm.xlu1 %8997, %v3380_v23   ;;  %7225 = vmatprep.mubr.msk.f32.mxu1 %vm4050_vm0, %v15164_v32  ;;  %vm4117_vm0 = vcmp.eq.f32.partialorder %v12102_v4, %v12097_v24  ;;  %v3945_v59 = vpop.permute.xlu0 %3944  ;;  %v12331_v23 = vadd.s32 144, %v15121_v2 }
 0x62c   :  { %15181 = vst [vmem:[#allocation114_spill] sm:$0xff] %v12331_v23 }
 0x62d   :  { %v3384_v22 = vpop.permute.xlu1 %3383  ;;  %7226 = vmatmul.mubr.msk.f32.gmra.mrb[54].mxu1 %vm4305_vm1, %v15164_v32  ;;  %vm4054_vm1 = vcmp.gt.f32.partialorder %v12115_v51, %v12097_v24 }
 0x62e   :  { %3990 = vperm.xlu0 %8996, %v3384_v22   ;;  %7227 = vmatprep.mubr.msk.f32.mxu1 %vm4052_vm10, %v15164_v32  ;;  %vm4245_vm10 = vmand %vm4117_vm0, %vm14702_vm6  ;;  %vm4055_vm0 = vcmp.gt.f32.partialorder %v12102_v4, %v12122_v35  ;;  %vm4058_vm6 = vcmp.gt.f32.partialorder %v12115_v51, %v12145_v39  ;;  %v3949_v17 = vpop.permute.xlu0 %3948 }
 0x62f   :  { %vm4309_vm5 = vmor %vm4053_vm2, %vm4245_vm10  ;;  %vm4121_vm2 = vcmp.eq.f32.partialorder %v12102_v4, %v12145_v39  ;;  %vm14704_vm10 = vcmp.lt.s32.totalorder %v15114_v47, %v15170_v42 }
 0x631   :  { %v3388_v48 = vpop.permute.xlu1 %3387  ;;  %7228 = vmatmul.mubr.msk.f32.gmra.mrb[56].mxu1 %vm4307_vm15, %v15164_v32  ;;  %vm4056_vm15 = vcmp.gt.f32.partialorder %v12115_v51, %v12122_v35 }
 0x632   :  { %3995 = vperm.xlu1 %8997, %v3388_v48   ;;  %7229 = vmatprep.mubr.msk.f32.mxu1 %vm4054_vm1, %v15164_v32  ;;  %vm4247_vm1 = vmand %vm4119_vm9, %vm14705_vm14  ;;  %vm4061_vm14 = vcmp.gt.f32.partialorder %v12102_v4, %v3937_v61  ;;  %v3953_v55 = vpop.permute.xlu0 %3952  ;;  %v12352_v48 = vadd.s32 160, %v15121_v2 }
 0x633   :  { %vm4249_vm9 = vmand %vm4121_vm2, %vm14704_vm10  ;;  %vm4059_vm2 = vcmp.gt.f32.partialorder %v12102_v4, %v12159_v27  ;;  %vm4125_vm10 = vcmp.eq.f32.partialorder %v12102_v4, %v3937_v61 }
 0x634   :  { %15183 = vst [vmem:[#allocation115_spill] sm:$0xff] %v12352_v48 }
 0x635   :  { %v3392_v49 = vpop.permute.xlu1 %3391  ;;  %7230 = vmatmul.mubr.msk.f32.gmra.mrb[58].mxu1 %vm4309_vm5, %v15164_v32  ;;  %vm4311_vm5 = vmor %vm4055_vm0, %vm4247_vm1  ;;  %vm14706_vm0 = vcmp.lt.s32.totalorder %v15114_v47, %v15171_v62 }
 0x636   :  { %4000 = vperm.xlu0 %8996, %v3392_v49   ;;  %7231 = vmatprep.mubr.msk.f32.mxu1 %vm4056_vm15, %v15164_v32  ;;  %vm4123_vm15 = vcmp.eq.f32.partialorder %v12102_v4, %v12159_v27  ;;  %vm4313_vm1 = vmor %vm4057_vm13, %vm4249_vm9  ;;  %vm14707_vm13 = vcmp.lt.s32.totalorder %v15114_v47, %v15172_v44  ;;  %v3957_v24 = vpop.permute.xlu0 %3956  ;;  %v12364_v49 = vadd.s32 168, %v15121_v2 }
 0x638   :  { %15184 = vst [vmem:[#allocation120_spill] sm:$0xff] %v12364_v49 }
 0x639   :  { %v3396_v36 = vpop.permute.xlu1 %3395  ;;  %7232 = vmatmul.mubr.msk.f32.gmra.mrb[60].mxu1 %vm4311_vm5, %v15164_v32  ;;  %vm4060_vm5 = vcmp.gt.f32.partialorder %v12115_v51, %v12159_v27 }
 0x63a   :  { %4005 = vperm.xlu1 %8997, %v3396_v36   ;;  %7233 = vmatprep.mubr.msk.f32.mxu1 %vm4058_vm6, %v15164_v32  ;;  %vm4251_vm6 = vmand %vm4123_vm15, %vm14706_vm0  ;;  %vm4063_vm0 = vcmp.gt.f32.partialorder %v12102_v4, %v3941_v30  ;;  %v3961_v38 = vpop.permute.xlu0 %3960 }
 0x63b   :  { %vm4315_vm9 = vmor %vm4059_vm2, %vm4251_vm6  ;;  %vm14708_vm2 = vcmp.lt.s32.totalorder %v15114_v47, %v15173_v13 }
 0x63c   :  { %vm4253_vm15 = vmand %vm4125_vm10, %vm14707_vm13  ;;  %vm14709_vm13 = vcmp.lt.s32.totalorder %v15114_v47, %v15174_v57 }
 0x63d   :  { %v3400_v33 = vpop.permute.xlu1 %3399  ;;  %7234 = vmatmul.mubr.msk.f32.gmra.mrb[62].mxu1 %vm4313_vm1, %v15164_v32  ;;  %vm4062_vm1 = vcmp.gt.f32.partialorder %v12115_v51, %v3937_v61  ;;  %vm4317_vm6 = vmor %vm4061_vm14, %vm4253_vm15  ;;  %vm4066_vm15 = vcmp.gt.f32.partialorder %v12115_v51, %v3945_v59  ;;  %v12345_v61 = vadd.s32 152, %v15121_v2 }
 0x63e   :  { %4010 = vperm.xlu0 %8996, %v3400_v33   ;;  %7235 = vmatprep.mubr.msk.f32.mxu1 %vm4060_vm5, %v15164_v32  ;;  %vm4127_vm5 = vcmp.eq.f32.partialorder %v12102_v4, %v3941_v30 }
 0x63f   :  { %vm4255_vm10 = vmand %vm4127_vm5, %vm14708_vm2  ;;  %vm14710_vm2 = vcmp.lt.s32.totalorder %v15114_v47, %v15175_v7  ;;  %15182 = vst [vmem:[#allocation117_spill] sm:$0xff] %v12345_v61 }
 0x640   :  { %vm4319_vm14 = vmor %vm4063_vm0, %vm4255_vm10  ;;  %vm4068_vm10 = vcmp.gt.f32.partialorder %v12115_v51, %v3949_v17 }
 0x641   :  { %v3404_v18 = vpop.permute.xlu1 %3403  ;;  %7236 = vmatmul.mubr.msk.f32.gmra.mrb[64].mxu1 %vm4315_vm9, %v15164_v32  ;;  %vm4064_vm9 = vcmp.gt.f32.partialorder %v12115_v51, %v3941_v30 }
 0x642   :  { %4015 = vperm.xlu1 %8997, %v3404_v18   ;;  %7237 = vmatprep.mubr.msk.f32.mxu1 %vm4062_vm1, %v15164_v32  ;;  %vm4129_vm1 = vcmp.eq.f32.partialorder %v12102_v4, %v3945_v59 }
 0x643   :  { %vm4257_vm5 = vmand %vm4129_vm1, %vm14709_vm13  ;;  %vm4069_vm13 = vcmp.gt.f32.partialorder %v12102_v4, %v3953_v55 }
 0x645   :  { %v3408_v43 = vpop.permute.xlu1 %3407  ;;  %7238 = vmatmul.mubr.msk.f32.gmra.mrb[66].mxu1 %vm4317_vm6, %v15164_v32  ;;  %vm4065_vm6 = vcmp.gt.f32.partialorder %v12102_v4, %v3945_v59  ;;  %v12378_v59 = vadd.s32 176, %v15121_v2 }
 0x646   :  { %4020 = vperm.xlu0 %8996, %v3408_v43   ;;  %7239 = vmatprep.mubr.msk.f32.mxu1 %vm4064_vm9, %v15164_v32  ;;  %vm4131_vm9 = vcmp.eq.f32.partialorder %v12102_v4, %v3949_v17  ;;  %vm4321_vm0 = vmor %vm4065_vm6, %vm4257_vm5  ;;  %vm14711_vm6 = vcmp.lt.s32.totalorder %v15114_v47, %v15176_v41 }
 0x647   :  { %vm4259_vm1 = vmand %vm4131_vm9, %vm14710_vm2  ;;  %vm14714_vm2 = vcmp.lt.s32.totalorder %v15114_v47, %v15177_v50  ;;  %15185 = vst [vmem:[#allocation118_spill] sm:$0xff] %v12378_v59 }
 0x649   :  { %v3412_v34 = vpop.permute.xlu1 %3411  ;;  %7240 = vmatmul.mubr.msk.f32.gmra.mrb[68].mxu1 %vm4319_vm14, %v15164_v32  ;;  %vm4067_vm14 = vcmp.gt.f32.partialorder %v12102_v4, %v3949_v17  ;;  %v12392_v17 = vadd.s32 184, %v15121_v2 }
 0x64a   :  { %4025 = vperm.xlu1 %8997, %v3412_v34   ;;  %7241 = vmatprep.mubr.msk.f32.mxu1 %vm4066_vm15, %v15164_v32  ;;  %vm4133_vm15 = vcmp.eq.f32.partialorder %v12102_v4, %v3953_v55  ;;  %vm4323_vm5 = vmor %vm4067_vm14, %vm4259_vm1  ;;  %vm4072_vm1 = vcmp.gt.f32.partialorder %v12115_v51, %v3957_v24 }
 0x64b   :  { %vm4261_vm9 = vmand %vm4133_vm15, %vm14711_vm6  ;;  %vm14713_vm6 = vcmp.lt.s32.totalorder %v15114_v47, %v15178_v58  ;;  %15186 = vst [vmem:[#allocation121_spill] sm:$0xff] %v12392_v17 }
 0x64c   :  { %vm4325_vm14 = vmor %vm4069_vm13, %vm4261_vm9  ;;  %vm4074_vm9 = vcmp.gt.f32.partialorder %v12115_v51, %v3961_v38 }
 0x64d   :  { %v3416_v19 = vpop.permute.xlu1 %3415  ;;  %7242 = vmatmul.mubr.msk.f32.gmra.mrb[70].mxu1 %vm4321_vm0, %v15164_v32  ;;  %vm4070_vm0 = vcmp.gt.f32.partialorder %v12115_v51, %v3953_v55  ;;  %v12406_v55 = vadd.s32 192, %v15121_v2 }
 0x64e   :  { %4030 = vperm.xlu0 %8996, %v3416_v19   ;;  %7243 = vmatprep.mubr.msk.f32.mxu1 %vm4068_vm10, %v15164_v32  ;;  %vm4135_vm10 = vcmp.eq.f32.partialorder %v12102_v4, %v3957_v24 }
 0x64f   :  { %vm4263_vm15 = vmand %vm4135_vm10, %vm14714_vm2  ;;  %15187 = vst [vmem:[#allocation119_spill] sm:$0xff] %v12406_v55 }
 0x651   :  { %v3420_v10 = vpop.permute.xlu1 %3419  ;;  %7244 = vmatmul.mubr.msk.f32.gmra.mrb[72].mxu1 %vm4323_vm5, %v15164_v32  ;;  %vm4071_vm5 = vcmp.gt.f32.partialorder %v12102_v4, %v3957_v24 }
 0x652   :  { %4035 = vperm.xlu1 %8997, %v3420_v10   ;;  %7245 = vmatprep.mubr.msk.f32.mxu1 %vm4070_vm0, %v15164_v32  ;;  %vm4137_vm0 = vcmp.eq.f32.partialorder %v12102_v4, %v3961_v38  ;;  %vm4327_vm13 = vmor %vm4071_vm5, %vm4263_vm15  ;;  %v12420_v10 = vadd.s32 200, %v15121_v2 }
 0x653   :  { %vm4265_vm12 = vmand %vm4137_vm0, %vm14713_vm6 }
 0x654   :  { %15188 = vst [vmem:[#allocation122_spill] sm:$0xff] %v12420_v10 }
 0x655   :  { %v3424_v35 = vpop.permute.xlu1 %3423  ;;  %7246 = vmatmul.mubr.msk.f32.gmra.mrb[74].mxu1 %vm4325_vm14, %v15164_v32  ;;  %vm4073_vm14 = vcmp.gt.f32.partialorder %v12102_v4, %v3961_v38 }
 0x656   :  { %4040 = vperm.xlu0 %8996, %v3424_v35   ;;  %7247 = vmatprep.mubr.msk.f32.mxu1 %vm4072_vm1, %v15164_v32  ;;  %vm4329_vm10 = vmor %vm4073_vm14, %vm4265_vm12  ;;  %vm14716_vm1 = vcmp.lt.s32.totalorder %v12305_v56, %v12302_v52 }
 0x659   :  { %7248 = vmatmul.mubr.msk.f32.gmra.mrb[76].mxu1 %vm4327_vm13, %v15164_v32 }
 0x65a   :  { %7249 = vmatprep.mubr.msk.f32.mxu1 %vm4074_vm9, %v15164_v32 }
 0x65d   :  { %7250 = vmatmul.mubr.msk.f32.gmra.mrb[78].mxu1 %vm4329_vm10, %v15164_v32  ;;  %vm14718_vm10 = vcmp.lt.s32.totalorder %v12305_v56, %v12317_v14 }
 0x68e   :  { %v3966_v39 = vpop.permute.xlu0 %3965 }
 0x68f   :  { %vm4076_vm5 = vcmp.gt.f32.partialorder %v12115_v51, %v3966_v39  ;;  %vm4140_vm15 = vcmp.eq.f32.partialorder %v12115_v51, %v3966_v39  ;;  %vm4075_vm0 = vcmp.gt.f32.partialorder %v12102_v4, %v3966_v39  ;;  %vm4139_vm12 = vcmp.eq.f32.partialorder %v12102_v4, %v3966_v39 }
 0x690   :  { %vm4268_vm13 = vmand %vm4140_vm15, %vm14716_vm1 }
 0x691   :  { %vm4332_vm9 = vmor %vm4076_vm5, %vm4268_vm13  ;;  %vm14717_vm13 = vcmp.lt.s32.totalorder %v12305_v56, %v12331_v23 }
 0x692   :  { %7251 = vmatprep.mubr.msk.f32.mxu1 %vm4332_vm9, %v15164_v32  ;;  %vm4331_vm14 = vmor %vm4075_vm0, %vm4139_vm12 }
 0x693   :  { %7252 = vmatmul.mubr.msk.f32.gmra.mrb[80].mxu1 %vm4331_vm14, %v15164_v32 }
 0x696   :  { %v3971_v27 = vpop.permute.xlu0 %3970 }
 0x697   :  { %vm4078_vm6 = vcmp.gt.f32.partialorder %v12115_v51, %v3971_v27  ;;  %vm4142_vm2 = vcmp.eq.f32.partialorder %v12115_v51, %v3971_v27  ;;  %vm4077_vm11 = vcmp.gt.f32.partialorder %v12102_v4, %v3971_v27  ;;  %vm4141_vm5 = vcmp.eq.f32.partialorder %v12102_v4, %v3971_v27 }
 0x698   :  { %vm4270_vm15 = vmand %vm4142_vm2, %vm14718_vm10  ;;  %v12434_v27 = vadd.s32 208, %v15121_v2 }
 0x699   :  { %vm4334_vm0 = vmor %vm4078_vm6, %vm4270_vm15 }
 0x69a   :  { %7253 = vmatprep.mubr.msk.f32.mxu1 %vm4334_vm0, %v15164_v32  ;;  %vm4333_vm12 = vmor %vm4077_vm11, %vm4141_vm5  ;;  %vm14719_vm5 = vcmp.lt.s32.totalorder %v12305_v56, %v12345_v61  ;;  %15189 = vst [vmem:[#allocation123_spill] sm:$0xff] %v12434_v27 }
 0x69b   :  { %7254 = vmatmul.mubr.msk.f32.gmra.mrb[82].mxu1 %vm4333_vm12, %v15164_v32 }
 0x69d   :  { %v3976_v22 = vpop.permute.xlu1 %3975 }
 0x69e   :  { %vm4080_vm9 = vcmp.gt.f32.partialorder %v12115_v51, %v3976_v22  ;;  %vm4144_vm14 = vcmp.eq.f32.partialorder %v12115_v51, %v3976_v22  ;;  %vm4079_vm1 = vcmp.gt.f32.partialorder %v12102_v4, %v3976_v22  ;;  %vm4143_vm2 = vcmp.eq.f32.partialorder %v12102_v4, %v3976_v22 }
 0x69f   :  { %vm4272_vm6 = vmand %vm4144_vm14, %vm14717_vm13 }
 0x6a0   :  { %vm4336_vm15 = vmor %vm4080_vm9, %vm4272_vm6  ;;  %vm14720_vm6 = vcmp.lt.s32.totalorder %v12305_v56, %v12352_v48 }
 0x6a1   :  { %7255 = vmatprep.mubr.msk.f32.mxu1 %vm4336_vm15, %v15164_v32  ;;  %vm4335_vm11 = vmor %vm4079_vm1, %vm4143_vm2 }
 0x6a2   :  { %7256 = vmatmul.mubr.msk.f32.gmra.mrb[84].mxu1 %vm4335_vm11, %v15164_v32 }
 0x6a5   :  { %v3981_v30 = vpop.permute.xlu0 %3980 }
 0x6a6   :  { %vm4082_vm0 = vcmp.gt.f32.partialorder %v12115_v51, %v3981_v30  ;;  %vm4146_vm12 = vcmp.eq.f32.partialorder %v12115_v51, %v3981_v30  ;;  %vm4081_vm9 = vcmp.gt.f32.partialorder %v12102_v4, %v3981_v30  ;;  %vm4145_vm14 = vcmp.eq.f32.partialorder %v12102_v4, %v3981_v30 }
 0x6a7   :  { %vm4274_vm1 = vmand %vm4146_vm12, %vm14719_vm5  ;;  %vm14779_vm5 = vcmp.lt.s32.totalorder %v12305_v56, %v12364_v49 }
 0x6a8   :  { %vm4338_vm2 = vmor %vm4082_vm0, %vm4274_vm1 }
 0x6a9   :  { %v3986_v36 = vpop.permute.xlu1 %3985  ;;  %7257 = vmatprep.mubr.msk.f32.mxu1 %vm4338_vm2, %v15164_v32  ;;  %vm4337_vm15 = vmor %vm4081_vm9, %vm4145_vm14 }
 0x6aa   :  { %7258 = vmatmul.mubr.msk.f32.gmra.mrb[86].mxu1 %vm4337_vm15, %v15164_v32  ;;  %vm4084_vm11 = vcmp.gt.f32.partialorder %v12115_v51, %v3986_v36  ;;  %vm4148_vm13 = vcmp.eq.f32.partialorder %v12115_v51, %v3986_v36  ;;  %vm4083_vm10 = vcmp.gt.f32.partialorder %v12102_v4, %v3986_v36  ;;  %vm4147_vm0 = vcmp.eq.f32.partialorder %v12102_v4, %v3986_v36 }
 0x6ab   :  { %vm4276_vm12 = vmand %vm4148_vm13, %vm14720_vm6  ;;  %vm14721_vm6 = vcmp.lt.s32.totalorder %v12305_v56, %v12378_v59 }
 0x6ac   :  { %vm4340_vm1 = vmor %vm4084_vm11, %vm4276_vm12 }
 0x6ad   :  { %v3991_v33 = vpop.permute.xlu0 %3990  ;;  %7259 = vmatprep.mubr.msk.f32.mxu1 %vm4340_vm1, %v15164_v32  ;;  %vm4339_vm9 = vmor %vm4083_vm10, %vm4147_vm0 }
 0x6ae   :  { %7260 = vmatmul.mubr.msk.f32.gmra.mrb[88].mxu1 %vm4339_vm9, %v15164_v32  ;;  %vm4086_vm14 = vcmp.gt.f32.partialorder %v12115_v51, %v3991_v33  ;;  %vm4150_vm2 = vcmp.eq.f32.partialorder %v12115_v51, %v3991_v33  ;;  %vm4085_vm15 = vcmp.gt.f32.partialorder %v12102_v4, %v3991_v33  ;;  %vm4149_vm13 = vcmp.eq.f32.partialorder %v12102_v4, %v3991_v33 }
 0x6af   :  { %vm4278_vm11 = vmand %vm4150_vm2, %vm14779_vm5  ;;  %v12448_v33 = vadd.s32 216, %v15121_v2 }
 0x6b0   :  { %vm4342_vm12 = vmor %vm4086_vm14, %vm4278_vm11 }
 0x6b1   :  { %v3996_v18 = vpop.permute.xlu1 %3995  ;;  %7261 = vmatprep.mubr.msk.f32.mxu1 %vm4342_vm12, %v15164_v32  ;;  %vm4341_vm10 = vmor %vm4085_vm15, %vm4149_vm13  ;;  %vm14722_vm12 = vcmp.lt.s32.totalorder %v12305_v56, %v12392_v17  ;;  %15190 = vst [vmem:[#allocation72_spill] sm:$0xff] %v12448_v33 }
 0x6b2   :  { %7262 = vmatmul.mubr.msk.f32.gmra.mrb[90].mxu1 %vm4341_vm10, %v15164_v32  ;;  %vm4088_vm0 = vcmp.gt.f32.partialorder %v12115_v51, %v3996_v18  ;;  %vm4152_vm1 = vcmp.eq.f32.partialorder %v12115_v51, %v3996_v18  ;;  %vm4087_vm9 = vcmp.gt.f32.partialorder %v12102_v4, %v3996_v18  ;;  %vm4151_vm14 = vcmp.eq.f32.partialorder %v12102_v4, %v3996_v18 }
 0x6b3   :  { %vm4280_vm2 = vmand %vm4152_vm1, %vm14721_vm6 }
 0x6b4   :  { %v8141_v43 = vpop.f32.mrb[16].mxu1  ;;  %vm4344_vm11 = vmor %vm4088_vm0, %vm4280_vm2 }
 0x6b5   :  { %v2874_v34 = vpop.f32.mrb[17].mxu1  ;;  %v4001_v24 = vpop.permute.xlu0 %4000  ;;  %3445 = vperm.xlu0 %8996, %v8141_v43   ;;  %7263 = vmatprep.mubr.msk.f32.mxu1 %vm4344_vm11, %v15164_v32  ;;  %vm4343_vm15 = vmor %vm4087_vm9, %vm4151_vm14  ;;  %vm14723_vm9 = vcmp.lt.s32.totalorder %v12305_v56, %v12406_v55 }
 0x6b6   :  { %3442 = vperm.xlu1 %8997, %v2874_v34   ;;  %7264 = vmatmul.mubr.msk.f32.gmra.mrb[92].mxu1 %vm4343_vm15, %v15164_v32  ;;  %vm4090_vm13 = vcmp.gt.f32.partialorder %v12115_v51, %v4001_v24  ;;  %vm4154_vm10 = vcmp.eq.f32.partialorder %v12115_v51, %v4001_v24  ;;  %vm4089_vm0 = vcmp.gt.f32.partialorder %v12102_v4, %v4001_v24 }
 0x6b7   :  { %vm4282_vm1 = vmand %vm4154_vm10, %vm14722_vm12  ;;  %vm4153_vm2 = vcmp.eq.f32.partialorder %v12102_v4, %v4001_v24  ;;  %v12462_v24 = vadd.s32 224, %v15121_v2 }
 0x6b8   :  { %v8144_v19 = vpop.f32.mrb[18].mxu1  ;;  %vm4346_vm6 = vmor %vm4090_vm13, %vm4282_vm1 }
 0x6b9   :  { %v2884_v38 = vpop.f32.mrb[19].mxu1  ;;  %3451 = vperm.xlu0 %8996, %v8144_v19   ;;  %v4006_v35 = vpop.permute.xlu1 %4005  ;;  %7265 = vmatprep.mubr.msk.f32.mxu1 %vm4346_vm6, %v15164_v32  ;;  %vm4345_vm14 = vmor %vm4089_vm0, %vm4153_vm2  ;;  %vm14724_vm6 = vcmp.lt.s32.totalorder %v12305_v56, %v12420_v10  ;;  %15191 = vst [vmem:[#allocation73_spill] sm:$0xff] %v12462_v24 }
 0x6ba   :  { %3448 = vperm.xlu1 %8997, %v2884_v38   ;;  %7266 = vmatmul.mubr.msk.f32.gmra.mrb[94].mxu1 %vm4345_vm14, %v15164_v32  ;;  %vm4092_vm11 = vcmp.gt.f32.partialorder %v12115_v51, %v4006_v35  ;;  %vm4156_vm15 = vcmp.eq.f32.partialorder %v12115_v51, %v4006_v35  ;;  %vm4091_vm13 = vcmp.gt.f32.partialorder %v12102_v4, %v4006_v35 }
 0x6bb   :  { %vm4284_vm10 = vmand %vm4156_vm15, %vm14723_vm9  ;;  %vm4155_vm1 = vcmp.eq.f32.partialorder %v12102_v4, %v4006_v35  ;;  %v15192_v35 = vld [vmem:[#allocation125_spill] sm:$0xff] }
 0x6bc   :  { %v8147_v39 = vpop.f32.mrb[20].mxu1  ;;  %vm4348_vm12 = vmor %vm4092_vm11, %vm4284_vm10 }
 0x6bd   :  { %v2894_v22 = vpop.f32.mrb[21].mxu1  ;;  %v4011_v30 = vpop.permute.xlu0 %4010  ;;  %3457 = vperm.xlu0 %8996, %v8147_v39   ;;  %7267 = vmatprep.mubr.msk.f32.mxu1 %vm4348_vm12, %v15164_v32  ;;  %vm4347_vm0 = vmor %vm4091_vm13, %vm4155_vm1  ;;  %vm14726_vm12 = vcmp.lt.s32.totalorder %v12305_v56, %v12434_v27  ;;  %v3234_v39 = vmul.f32 1.442695, %v15192_v35 }
 0x6be   :  { %3454 = vperm.xlu1 %8997, %v2894_v22   ;;  %7268 = vmatmul.mubr.msk.f32.gmra.mrb[96].mxu1 %vm4347_vm0, %v15164_v32  ;;  %vm4094_vm2 = vcmp.gt.f32.partialorder %v12115_v51, %v4011_v30  ;;  %vm4158_vm14 = vcmp.eq.f32.partialorder %v12115_v51, %v4011_v30  ;;  %vm4093_vm11 = vcmp.gt.f32.partialorder %v12102_v4, %v4011_v30 }
 0x6bf   :  { %vm4286_vm15 = vmand %vm4158_vm14, %vm14724_vm6  ;;  %vm4157_vm10 = vcmp.eq.f32.partialorder %v12102_v4, %v4011_v30  ;;  %v12477_v30 = vadd.s32 232, %v15121_v2  ;;  %9036 = vpow2.f32 %v3234_v39  ;;  %v12507_v39 = vadd.s32 248, %v15121_v2 }
 0x6c0   :  { %v8150_v36 = vpop.f32.mrb[22].mxu1  ;;  %vm4350_vm9 = vmor %vm4094_vm2, %vm4286_vm15 }
 0x6c1   :  { %v2904_v18 = vpop.f32.mrb[23].mxu1  ;;  %3463 = vperm.xlu0 %8996, %v8150_v36   ;;  %v4016_v43 = vpop.permute.xlu1 %4015  ;;  %7269 = vmatprep.mubr.msk.f32.mxu1 %vm4350_vm9, %v15164_v32  ;;  %vm4349_vm13 = vmor %vm4093_vm11, %vm4157_vm10  ;;  %vm14725_vm9 = vcmp.lt.s32.totalorder %v12305_v56, %v12448_v33  ;;  %15193 = vst [vmem:[#allocation75_spill] sm:$0xff] %v12477_v30 }
 0x6c2   :  { %3460 = vperm.xlu1 %8997, %v2904_v18   ;;  %7270 = vmatmul.mubr.msk.f32.gmra.mrb[98].mxu1 %vm4349_vm13, %v15164_v32  ;;  %vm4096_vm1 = vcmp.gt.f32.partialorder %v12115_v51, %v4016_v43  ;;  %vm4160_vm0 = vcmp.eq.f32.partialorder %v12115_v51, %v4016_v43  ;;  %vm4095_vm2 = vcmp.gt.f32.partialorder %v12102_v4, %v4016_v43 }
 0x6c3   :  { %vm4288_vm14 = vmand %vm4160_vm0, %vm14726_vm12  ;;  %vm4159_vm15 = vcmp.eq.f32.partialorder %v12102_v4, %v4016_v43  ;;  %15195 = vst [vmem:[#allocation79_spill] sm:$0xff] %v12507_v39 }
 0x6c4   :  { %v8153_v34 = vpop.f32.mrb[24].mxu1  ;;  %vm4352_vm6 = vmor %vm4096_vm1, %vm4288_vm14 }
 0x6c5   :  { %v2914_v19 = vpop.f32.mrb[25].mxu1  ;;  %v4021_v38 = vpop.permute.xlu0 %4020  ;;  %3469 = vperm.xlu0 %8996, %v8153_v34   ;;  %7271 = vmatprep.mubr.msk.f32.mxu1 %vm4352_vm6, %v15164_v32  ;;  %vm4351_vm11 = vmor %vm4095_vm2, %vm4159_vm15  ;;  %vm14727_vm2 = vcmp.lt.s32.totalorder %v12305_v56, %v12462_v24  ;;  %v12491_v34 = vadd.s32 240, %v15121_v2 }
 0x6c6   :  { %3466 = vperm.xlu1 %8997, %v2914_v19   ;;  %7272 = vmatmul.mubr.msk.f32.gmra.mrb[100].mxu1 %vm4351_vm11, %v15164_v32  ;;  %vm4098_vm10 = vcmp.gt.f32.partialorder %v12115_v51, %v4021_v38  ;;  %vm4162_vm13 = vcmp.eq.f32.partialorder %v12115_v51, %v4021_v38  ;;  %vm4097_vm1 = vcmp.gt.f32.partialorder %v12102_v4, %v4021_v38 }
 0x6c7   :  { %vm4290_vm0 = vmand %vm4162_vm13, %vm14725_vm9  ;;  %vm4161_vm14 = vcmp.eq.f32.partialorder %v12102_v4, %v4021_v38  ;;  %15194 = vst [vmem:[#allocation76_spill] sm:$0xff] %v12491_v34 }
 0x6c8   :  { %v8156_v22 = vpop.f32.mrb[26].mxu1  ;;  %vm4354_vm6 = vmor %vm4098_vm10, %vm4290_vm0 }
 0x6c9   :  { %v2924_v36 = vpop.f32.mrb[27].mxu1  ;;  %3475 = vperm.xlu0 %8996, %v8156_v22   ;;  %v4026_v18 = vpop.permute.xlu1 %4025  ;;  %7273 = vmatprep.mubr.msk.f32.mxu1 %vm4354_vm6, %v15164_v32  ;;  %vm4353_vm15 = vmor %vm4097_vm1, %vm4161_vm14  ;;  %vm14728_vm1 = vcmp.lt.s32.totalorder %v12305_v56, %v12477_v30  ;;  %v15197_v30 = vld [vmem:[#allocation50_spill] sm:$0xff] }
 0x6ca   :  { %3472 = vperm.xlu1 %8997, %v2924_v36   ;;  %7274 = vmatmul.mubr.msk.f32.gmra.mrb[102].mxu1 %vm4353_vm15, %v15164_v32  ;;  %vm4100_vm11 = vcmp.gt.f32.partialorder %v12115_v51, %v4026_v18  ;;  %vm4164_vm13 = vcmp.eq.f32.partialorder %v12115_v51, %v4026_v18  ;;  %vm4099_vm10 = vcmp.gt.f32.partialorder %v12102_v4, %v4026_v18 }
 0x6cb   :  { %vm4292_vm0 = vmand %vm4164_vm13, %vm14727_vm2  ;;  %vm4163_vm9 = vcmp.eq.f32.partialorder %v12102_v4, %v4026_v18 }
 0x6cc   :  { %v8159_v43 = vpop.f32.mrb[28].mxu1  ;;  %vm4356_vm12 = vmor %vm4100_vm11, %vm4292_vm0 }
 0x6cd   :  { %v2934_v19 = vpop.f32.mrb[29].mxu1  ;;  %v4031_v38 = vpop.permute.xlu0 %4030  ;;  %3481 = vperm.xlu0 %8996, %v8159_v43   ;;  %7275 = vmatprep.mubr.msk.f32.mxu1 %vm4356_vm12, %v15164_v32  ;;  %vm4355_vm14 = vmor %vm4099_vm10, %vm4163_vm9  ;;  %vm14729_vm12 = vcmp.lt.s32.totalorder %v12305_v56, %v12491_v34 }
 0x6ce   :  { %3478 = vperm.xlu1 %8997, %v2934_v19   ;;  %7276 = vmatmul.mubr.msk.f32.gmra.mrb[104].mxu1 %vm4355_vm14, %v15164_v32  ;;  %vm4102_vm6 = vcmp.gt.f32.partialorder %v12115_v51, %v4031_v38  ;;  %vm4166_vm15 = vcmp.eq.f32.partialorder %v12115_v51, %v4031_v38  ;;  %vm4101_vm11 = vcmp.gt.f32.partialorder %v12102_v4, %v4031_v38 }
 0x6cf   :  { %vm4294_vm13 = vmand %vm4166_vm15, %vm14728_vm1  ;;  %vm4165_vm0 = vcmp.eq.f32.partialorder %v12102_v4, %v4031_v38  ;;  %v9037_v38 = vpop.eup %9036 }
 0x6d0   :  { %v12502_v35 = vpop.f32.mrb[30].mxu1  ;;  %vm4358_vm2 = vmor %vm4102_vm6, %vm4294_vm13  ;;  %v5044_v24 = vmul.f32 %v9037_v38, %v15197_v30 }
 0x6d1   :  { %v12509_v22 = vpop.f32.mrb[31].mxu1  ;;  %v4036_v36 = vpop.permute.xlu1 %4035  ;;  %7277 = vmatprep.mubr.msk.f32.mxu1 %vm4358_vm2, %v15164_v32  ;;  %vm4357_vm9 = vmor %vm4101_vm11, %vm4165_vm0  ;;  %vm14778_vm2 = vcmp.lt.s32.totalorder %v12305_v56, %v12507_v39 }
 0x6d2   :  { %7278 = vmatmul.mubr.msk.f32.gmra.mrb[106].mxu1 %vm4357_vm9, %v15164_v32  ;;  %vm4104_vm10 = vcmp.gt.f32.partialorder %v12115_v51, %v4036_v36  ;;  %vm4168_vm14 = vcmp.eq.f32.partialorder %v12115_v51, %v4036_v36  ;;  %vm4103_vm6 = vcmp.gt.f32.partialorder %v12102_v4, %v4036_v36  ;;  %vm4167_vm15 = vcmp.eq.f32.partialorder %v12102_v4, %v4036_v36 }
 0x6d3   :  { %vm4296_vm13 = vmand %vm4168_vm14, %vm14729_vm12 }
 0x6d4   :  { %v12520_v18 = vpop.f32.mrb[32].mxu1  ;;  %vm4360_vm1 = vmor %vm4104_vm10, %vm4296_vm13 }
 0x6d5   :  { %v12524_v43 = vpop.f32.mrb[33].mxu1  ;;  %v4041_v19 = vpop.permute.xlu0 %4040  ;;  %7279 = vmatprep.mubr.msk.f32.mxu1 %vm4360_vm1, %v15164_v32  ;;  %vm4359_vm11 = vmor %vm4103_vm6, %vm4167_vm15 }
 0x6d6   :  { %7280 = vmatmul.mubr.msk.f32.gmra.mrb[108].mxu1 %vm4359_vm11, %v15164_v32  ;;  %vm4106_vm0 = vcmp.gt.f32.partialorder %v12115_v51, %v4041_v19  ;;  %vm4170_vm9 = vcmp.eq.f32.partialorder %v12115_v51, %v4041_v19  ;;  %vm4105_vm14 = vcmp.gt.f32.partialorder %v12102_v4, %v4041_v19  ;;  %vm4169_vm13 = vcmp.eq.f32.partialorder %v12102_v4, %v4041_v19 }
 0x6d7   :  { %vm4298_vm10 = vmand %vm4170_vm9, %vm14778_vm2 }
 0x6d8   :  { %v12535_v36 = vpop.f32.mrb[34].mxu1  ;;  %vm4362_vm12 = vmor %vm4106_vm0, %vm4298_vm10 }
 0x6d9   :  { %15196 = vst [vmem:[#allocation74_spill] sm:$0xff] %v12535_v36  ;;  %v12537_v34 = vpop.f32.mrb[35].mxu1  ;;  %7281 = vmatprep.mubr.msk.f32.mxu1 %vm4362_vm12, %v15164_v32  ;;  %vm4361_vm1 = vmor %vm4105_vm14, %vm4169_vm13 }
 0x6da   :  { %7282 = vmatmul.mubr.msk.f32.gmra.mrb[110].mxu1 %vm4361_vm1, %v15164_v32 }
 0x6db   :  { %6126 = vmatprep.mubr.f32.mxu1 %v5044_v24 }
 0x6dc   :  { %v12542_v51 = vpop.f32.mrb[36].mxu1 }
 0x6dd   :  { %15198 = vst [vmem:[#allocation78_spill] sm:$0xff] %v12542_v51  ;;  %v12544_v33 = vpop.f32.mrb[37].mxu1 }
 0x6de   :  { %15199 = vst [vmem:[#allocation81_spill] sm:$0xff] %v12544_v33 }
 0x6e0   :  { %v12546_v39 = vpop.f32.mrb[38].mxu1 }
 0x6e1   :  { %15200 = vst [vmem:[#allocation77_spill] sm:$0xff] %v12546_v39  ;;  %v12548_v4 = vpop.f32.mrb[39].mxu1 }
 0x6e2   :  { %15201 = vst [vmem:[#allocation80_spill] sm:$0xff] %v12548_v4 }
 0x6e4   :  { %v12550_v19 = vpop.f32.mrb[40].mxu1 }
 0x6e5   :  { %15202 = vst [vmem:[#allocation83_spill] sm:$0xff] %v12550_v19  ;;  %v12552_v27 = vpop.f32.mrb[41].mxu1 }
 0x6e6   :  { %15203 = vst [vmem:[#allocation82_spill] sm:$0xff] %v12552_v27  ;;  %v15225_v27 = vld [vmem:[#allocation110_spill] sm:$0xff] }
 0x6e8   :  { %v12554_v10 = vpop.f32.mrb[42].mxu1 }
 0x6e9   :  { %15204 = vst [vmem:[#allocation85_spill] sm:$0xff] %v12554_v10  ;;  %v12556_v55 = vpop.f32.mrb[43].mxu1 }
 0x6ea   :  { %15205 = vst [vmem:[#allocation84_spill] sm:$0xff] %v12556_v55  ;;  %v15224_v55 = vld [vmem:[#allocation111_spill] sm:$0xff] }
 0x6ec   :  { %v12558_v38 = vpop.f32.mrb[44].mxu1 }
 0x6ed   :  { %15206 = vst [vmem:[#allocation87_spill] sm:$0xff] %v12558_v38  ;;  %v12560_v17 = vpop.f32.mrb[45].mxu1 }
 0x6ee   :  { %15207 = vst [vmem:[#allocation86_spill] sm:$0xff] %v12560_v17 }
 0x6f0   :  { %v12562_v24 = vpop.f32.mrb[46].mxu1 }
 0x6f1   :  { %15208 = vst [vmem:[#allocation30_spill] sm:$0xff] %v12562_v24  ;;  %v12564_v59 = vpop.f32.mrb[47].mxu1 }
 0x6f2   :  { %15209 = vst [vmem:[#allocation31_spill] sm:$0xff] %v12564_v59 }
 0x6f4   :  { %v4493_v49 = vpop.f32.mrb[48].mxu1 }
 0x6f5   :  { %v8858_v48 = vtrunc.f32 %v4493_v49  ;;  %v4495_v61 = vpop.f32.mrb[49].mxu1 }
 0x6f7   :  { %v8859_v23 = vcvt.f32.s32 %v8858_v48 }
 0x6f8   :  { %v4498_v14 = vpop.f32.mrb[50].mxu1 }
 0x6f9   :  { %v8860_v52 = vtrunc.f32 %v4498_v14  ;;  %4685 = vperm.xlu1 %8997, %v8859_v23   ;;  %v4500_v58 = vpop.f32.mrb[51].mxu1 }
 0x6fb   :  { %v8861_v50 = vcvt.f32.s32 %v8860_v52 }
 0x6fc   :  { %v4503_v41 = vpop.f32.mrb[52].mxu1 }
 0x6fd   :  { %v8862_v7 = vtrunc.f32 %v4503_v41  ;;  %4688 = vperm.xlu0 %8996, %v8861_v50   ;;  %v4505_v57 = vpop.f32.mrb[53].mxu1 }
 0x6ff   :  { %v8863_v13 = vcvt.f32.s32 %v8862_v7 }
 0x700   :  { %v4508_v44 = vpop.f32.mrb[54].mxu1 }
 0x701   :  { %v8864_v62 = vtrunc.f32 %v4508_v44  ;;  %4691 = vperm.xlu1 %8997, %v8863_v13   ;;  %v4510_v24 = vpop.f32.mrb[55].mxu1 }
 0x703   :  { %v8865_v42 = vcvt.f32.s32 %v8864_v62 }
 0x704   :  { %v4513_v53 = vpop.f32.mrb[56].mxu1 }
 0x705   :  { %v8866_v21 = vtrunc.f32 %v4513_v53  ;;  %4694 = vperm.xlu0 %8996, %v8865_v42   ;;  %v4515_v61 = vpop.f32.mrb[57].mxu1 }
 0x707   :  { %v8867_v48 = vcvt.f32.s32 %v8866_v21 }
 0x708   :  { %v4518_v49 = vpop.f32.mrb[58].mxu1 }
 0x709   :  { %v8868_v14 = vtrunc.f32 %v4518_v49  ;;  %4697 = vperm.xlu1 %8997, %v8867_v48   ;;  %v4520_v58 = vpop.f32.mrb[59].mxu1 }
 0x70b   :  { %v8869_v52 = vcvt.f32.s32 %v8868_v14 }
 0x70c   :  { %v4523_v23 = vpop.f32.mrb[60].mxu1 }
 0x70d   :  { %v8870_v41 = vtrunc.f32 %v4523_v23  ;;  %4700 = vperm.xlu0 %8996, %v8869_v52   ;;  %v4525_v57 = vpop.f32.mrb[61].mxu1 }
 0x70f   :  { %v8871_v7 = vcvt.f32.s32 %v8870_v41 }
 0x710   :  { %v4528_v50 = vpop.f32.mrb[62].mxu1 }
 0x711   :  { %v8872_v44 = vtrunc.f32 %v4528_v50  ;;  %4703 = vperm.xlu1 %8997, %v8871_v7   ;;  %v4530_v13 = vpop.f32.mrb[63].mxu1 }
 0x713   :  { %v8873_v62 = vcvt.f32.s32 %v8872_v44 }
 0x714   :  { %v4533_v24 = vpop.f32.mrb[64].mxu1 }
 0x715   :  { %v8874_v53 = vtrunc.f32 %v4533_v24  ;;  %4706 = vperm.xlu0 %8996, %v8873_v62   ;;  %v4535_v42 = vpop.f32.mrb[65].mxu1 }
 0x717   :  { %v8875_v21 = vcvt.f32.s32 %v8874_v53 }
 0x718   :  { %v4538_v61 = vpop.f32.mrb[66].mxu1 }
 0x719   :  { %v8876_v49 = vtrunc.f32 %v4538_v61  ;;  %4709 = vperm.xlu1 %8997, %v8875_v21   ;;  %v4540_v48 = vpop.f32.mrb[67].mxu1 }
 0x71b   :  { %v8877_v14 = vcvt.f32.s32 %v8876_v49 }
 0x71c   :  { %v4543_v58 = vpop.f32.mrb[68].mxu1 }
 0x71d   :  { %v8878_v23 = vtrunc.f32 %v4543_v58  ;;  %4712 = vperm.xlu0 %8996, %v8877_v14   ;;  %v4545_v52 = vpop.f32.mrb[69].mxu1 }
 0x71f   :  { %v8879_v41 = vcvt.f32.s32 %v8878_v23 }
 0x720   :  { %v4548_v57 = vpop.f32.mrb[70].mxu1 }
 0x721   :  { %v8880_v50 = vtrunc.f32 %v4548_v57  ;;  %4715 = vperm.xlu1 %8997, %v8879_v41   ;;  %v4550_v7 = vpop.f32.mrb[71].mxu1 }
 0x723   :  { %v8881_v44 = vcvt.f32.s32 %v8880_v50 }
 0x724   :  { %v4553_v13 = vpop.f32.mrb[72].mxu1 }
 0x725   :  { %v8882_v24 = vtrunc.f32 %v4553_v13  ;;  %4718 = vperm.xlu0 %8996, %v8881_v44   ;;  %v4555_v62 = vpop.f32.mrb[73].mxu1 }
 0x727   :  { %v8883_v53 = vcvt.f32.s32 %v8882_v24 }
 0x728   :  { %v4558_v42 = vpop.f32.mrb[74].mxu1 }
 0x729   :  { %v8884_v61 = vtrunc.f32 %v4558_v42  ;;  %4721 = vperm.xlu1 %8997, %v8883_v53   ;;  %v4560_v21 = vpop.f32.mrb[75].mxu1 }
 0x72b   :  { %v8885_v49 = vcvt.f32.s32 %v8884_v61 }
 0x72c   :  { %v4563_v48 = vpop.f32.mrb[76].mxu1 }
 0x72d   :  { %v8886_v58 = vtrunc.f32 %v4563_v48  ;;  %4724 = vperm.xlu0 %8996, %v8885_v49   ;;  %v4565_v14 = vpop.f32.mrb[77].mxu1 }
 0x72f   :  { %v8887_v23 = vcvt.f32.s32 %v8886_v58 }
 0x730   :  { %v4568_v52 = vpop.f32.mrb[78].mxu1 }
 0x731   :  { %v8888_v57 = vtrunc.f32 %v4568_v52  ;;  %4727 = vperm.xlu1 %8997, %v8887_v23   ;;  %v4570_v41 = vpop.f32.mrb[79].mxu1 }
 0x733   :  { %v8889_v50 = vcvt.f32.s32 %v8888_v57 }
 0x734   :  { %v12568_v44 = vpop.permute.xlu0 %3445 }
 0x735   :  { %4730 = vperm.xlu0 %8996, %v8889_v50   ;;  %v12566_v7 = vpop.permute.xlu1 %3442 }
 0x736   :  { %v3492_v33 = vrot.slane %v12566_v7, %v11862_v54 }
 0x738   :  { %v12572_v24 = vpop.permute.xlu0 %3451 }
 0x739   :  { %v12570_v13 = vpop.permute.xlu1 %3448 }
 0x73c   :  { %v12576_v53 = vpop.permute.xlu0 %3457 }
 0x73d   :  { %v12574_v62 = vpop.permute.xlu1 %3454 }
 0x740   :  { %v12580_v61 = vpop.permute.xlu0 %3463 }
 0x741   :  { %v12578_v42 = vpop.permute.xlu1 %3460 }
 0x744   :  { %v12584_v23 = vpop.permute.xlu0 %3469 }
 0x745   :  { %v12582_v14 = vpop.permute.xlu1 %3466 }
 0x748   :  { %v12588_v46 = vpop.permute.xlu0 %3475 }
 0x749   :  { %v12586_v50 = vpop.permute.xlu1 %3472 }
 0x74d   :  { %v12590_v38 = vpop.permute.xlu1 %3478 }
 0x766   :  { %v4573_v21 = vpop.f32.mrb[80].mxu1 }
 0x767   :  { %v8890_v49 = vtrunc.f32 %v4573_v21  ;;  %v4575_v48 = vpop.f32.mrb[81].mxu1 }
 0x769   :  { %v8891_v58 = vcvt.f32.s32 %v8890_v49  ;;  %v12592_v49 = vpop.permute.xlu0 %3481 }
 0x76b   :  { %4733 = vperm.xlu1 %8997, %v8891_v58  }
 0x76e   :  { %v4578_v52 = vpop.f32.mrb[82].mxu1 }
 0x76f   :  { %v8892_v57 = vtrunc.f32 %v4578_v52  ;;  %v4580_v41 = vpop.f32.mrb[83].mxu1 }
 0x771   :  { %v8893_v40 = vcvt.f32.s32 %v8892_v57 }
 0x773   :  { %4736 = vperm.xlu0 %8996, %v8893_v40  }
 0x775   :  { %v4583_v59 = vpop.f32.mrb[84].mxu1 }
 0x776   :  { %v8894_v21 = vtrunc.f32 %v4583_v59  ;;  %v4585_v48 = vpop.f32.mrb[85].mxu1 }
 0x778   :  { %v8895_v8 = vcvt.f32.s32 %v8894_v21  ;;  %v4686_v58 = vpop.permute.xlu1 %4685 }
 0x779   :  { %vm4780_vm12 = vcmp.eq.s32.totalorder %v4686_v58, %v15114_v47  ;;  %vm4781_vm11 = vcmp.eq.s32.totalorder %v4686_v58, %v12305_v56 }
 0x77a   :  { %4739 = vperm.xlu1 %8997, %v8895_v8  }
 0x77c   :  { %v4689_v17 = vpop.permute.xlu0 %4688 }
 0x77d   :  { %vm4782_vm6 = vcmp.eq.s32.totalorder %v4689_v17, %v15114_v47  ;;  %vm4783_vm15 = vcmp.eq.s32.totalorder %v4689_v17, %v12305_v56  ;;  %v4588_v52 = vpop.f32.mrb[86].mxu1 }
 0x77e   :  { %vm8486_vm0 = vmpackc.low %vm4782_vm6, %vm4780_vm12  ;;  %v8896_v40 = vtrunc.f32 %v4588_v52  ;;  %v4590_v57 = vpop.f32.mrb[87].mxu1 }
 0x77f   :  { %vm8484_vm9 = vmpackc.low %vm4783_vm15, %vm4781_vm11 }
 0x780   :  { %v8897_v59 = vcvt.f32.s32 %v8896_v40  ;;  %8485 = vmatprep.subr.msk.bf16.mxu0 %vm8484_vm9, %v15117_v6  ;;  %v4692_v41 = vpop.permute.xlu1 %4691 }
 0x781   :  { %8487 = vmatpush1.bf16.msk.msra.mxu0 %vm8486_vm0, %v15117_v6  ;;  %v4593_v8 = vpop.f32.mrb[88].mxu1  ;;  %vm4784_vm14 = vcmp.eq.s32.totalorder %v4692_v41, %v15114_v47  ;;  %vm4785_vm1 = vcmp.eq.s32.totalorder %v4692_v41, %v12305_v56 }
 0x782   :  { %v8898_v21 = vtrunc.f32 %v4593_v8  ;;  %4742 = vperm.xlu0 %8996, %v8897_v59   ;;  %v4595_v48 = vpop.f32.mrb[89].mxu1 }
 0x784   :  { %v8899_v10 = vcvt.f32.s32 %v8898_v21  ;;  %v4695_v29 = vpop.permute.xlu0 %4694 }
 0x785   :  { %vm4786_vm10 = vcmp.eq.s32.totalorder %v4695_v29, %v15114_v47  ;;  %vm4787_vm13 = vcmp.eq.s32.totalorder %v4695_v29, %v12305_v56  ;;  %v4598_v17 = vpop.f32.mrb[90].mxu1 }
 0x786   :  { %vm8490_vm12 = vmpackc.low %vm4786_vm10, %vm4784_vm14  ;;  %v8900_v58 = vtrunc.f32 %v4598_v17  ;;  %4745 = vperm.xlu1 %8997, %v8899_v10   ;;  %v4600_v52 = vpop.f32.mrb[91].mxu1 }
 0x787   :  { %vm8488_vm6 = vmpackc.low %vm4787_vm13, %vm4785_vm1 }
 0x788   :  { %v8901_v40 = vcvt.f32.s32 %v8900_v58  ;;  %8489 = vmatprep.subr.msk.bf16.mxu0 %vm8488_vm6, %v15117_v6  ;;  %v4698_v59 = vpop.permute.xlu1 %4697 }
 0x789   :  { %8491 = vmatpush1.bf16.msk.msra.mxu0 %vm8490_vm12, %v15117_v6  ;;  %v4603_v57 = vpop.f32.mrb[92].mxu1  ;;  %vm4788_vm15 = vcmp.eq.s32.totalorder %v4698_v59, %v15114_v47  ;;  %vm4789_vm9 = vcmp.eq.s32.totalorder %v4698_v59, %v12305_v56 }
 0x78a   :  { %v8902_v8 = vtrunc.f32 %v4603_v57  ;;  %4748 = vperm.xlu0 %8996, %v8901_v40   ;;  %v4605_v21 = vpop.f32.mrb[93].mxu1 }
 0x78c   :  { %v8903_v48 = vcvt.f32.s32 %v8902_v8  ;;  %v4701_v29 = vpop.permute.xlu0 %4700 }
 0x78d   :  { %vm4790_vm11 = vcmp.eq.s32.totalorder %v4701_v29, %v15114_v47  ;;  %vm4791_vm0 = vcmp.eq.s32.totalorder %v4701_v29, %v12305_v56  ;;  %v4608_v10 = vpop.f32.mrb[94].mxu1 }
 0x78e   :  { %vm8494_vm14 = vmpackc.low %vm4790_vm11, %vm4788_vm15  ;;  %v8904_v41 = vtrunc.f32 %v4608_v10  ;;  %4751 = vperm.xlu1 %8997, %v8903_v48   ;;  %v4610_v17 = vpop.f32.mrb[95].mxu1 }
 0x78f   :  { %vm8492_vm10 = vmpackc.low %vm4791_vm0, %vm4789_vm9 }
 0x790   :  { %v8905_v58 = vcvt.f32.s32 %v8904_v41  ;;  %8493 = vmatprep.subr.msk.bf16.mxu0 %vm8492_vm10, %v15117_v6  ;;  %v4704_v40 = vpop.permute.xlu1 %4703 }
 0x791   :  { %8495 = vmatpush1.bf16.msk.msra.mxu0 %vm8494_vm14, %v15117_v6  ;;  %v4613_v52 = vpop.f32.mrb[96].mxu1  ;;  %vm4792_vm13 = vcmp.eq.s32.totalorder %v4704_v40, %v15114_v47  ;;  %vm4793_vm6 = vcmp.eq.s32.totalorder %v4704_v40, %v12305_v56 }
 0x792   :  { %v8906_v57 = vtrunc.f32 %v4613_v52  ;;  %4754 = vperm.xlu0 %8996, %v8905_v58   ;;  %v4615_v8 = vpop.f32.mrb[97].mxu1 }
 0x794   :  { %v8907_v21 = vcvt.f32.s32 %v8906_v57  ;;  %v4707_v29 = vpop.permute.xlu0 %4706 }
 0x795   :  { %vm4794_vm1 = vcmp.eq.s32.totalorder %v4707_v29, %v15114_v47  ;;  %vm4795_vm12 = vcmp.eq.s32.totalorder %v4707_v29, %v12305_v56  ;;  %v4618_v59 = vpop.f32.mrb[98].mxu1 }
 0x796   :  { %vm8498_vm15 = vmpackc.low %vm4794_vm1, %vm4792_vm13  ;;  %v8908_v48 = vtrunc.f32 %v4618_v59  ;;  %4757 = vperm.xlu1 %8997, %v8907_v21   ;;  %v4620_v10 = vpop.f32.mrb[99].mxu1 }
 0x797   :  { %vm8496_vm11 = vmpackc.low %vm4795_vm12, %vm4793_vm6 }
 0x798   :  { %v8909_v41 = vcvt.f32.s32 %v8908_v48  ;;  %8497 = vmatprep.subr.msk.bf16.mxu0 %vm8496_vm11, %v15117_v6  ;;  %v4710_v58 = vpop.permute.xlu1 %4709 }
 0x799   :  { %8499 = vmatpush1.bf16.msk.msra.mxu0 %vm8498_vm15, %v15117_v6  ;;  %v4623_v17 = vpop.f32.mrb[100].mxu1  ;;  %vm4796_vm0 = vcmp.eq.s32.totalorder %v4710_v58, %v15114_v47  ;;  %vm4797_vm10 = vcmp.eq.s32.totalorder %v4710_v58, %v12305_v56 }
 0x79a   :  { %v8910_v52 = vtrunc.f32 %v4623_v17  ;;  %4760 = vperm.xlu0 %8996, %v8909_v41   ;;  %v4625_v57 = vpop.f32.mrb[101].mxu1 }
 0x79c   :  { %v8911_v8 = vcvt.f32.s32 %v8910_v52  ;;  %v4713_v29 = vpop.permute.xlu0 %4712 }
 0x79d   :  { %vm4798_vm9 = vcmp.eq.s32.totalorder %v4713_v29, %v15114_v47  ;;  %vm4799_vm14 = vcmp.eq.s32.totalorder %v4713_v29, %v12305_v56  ;;  %v4628_v40 = vpop.f32.mrb[102].mxu1 }
 0x79e   :  { %vm8502_vm13 = vmpackc.low %vm4798_vm9, %vm4796_vm0  ;;  %v8912_v21 = vtrunc.f32 %v4628_v40  ;;  %4763 = vperm.xlu1 %8997, %v8911_v8   ;;  %v4630_v59 = vpop.f32.mrb[103].mxu1 }
 0x79f   :  { %vm8500_vm1 = vmpackc.low %vm4799_vm14, %vm4797_vm10 }
 0x7a0   :  { %v8913_v48 = vcvt.f32.s32 %v8912_v21  ;;  %8501 = vmatprep.subr.msk.bf16.mxu0 %vm8500_vm1, %v15117_v6  ;;  %v4716_v41 = vpop.permute.xlu1 %4715 }
 0x7a1   :  { %8503 = vmatpush1.bf16.msk.msra.mxu0 %vm8502_vm13, %v15117_v6  ;;  %v4633_v10 = vpop.f32.mrb[104].mxu1  ;;  %vm4800_vm12 = vcmp.eq.s32.totalorder %v4716_v41, %v15114_v47  ;;  %vm4801_vm11 = vcmp.eq.s32.totalorder %v4716_v41, %v12305_v56 }
 0x7a2   :  { %v8914_v17 = vtrunc.f32 %v4633_v10  ;;  %4766 = vperm.xlu0 %8996, %v8913_v48   ;;  %v4635_v52 = vpop.f32.mrb[105].mxu1 }
 0x7a4   :  { %v8915_v57 = vcvt.f32.s32 %v8914_v17  ;;  %v4719_v29 = vpop.permute.xlu0 %4718 }
 0x7a5   :  { %vm4802_vm6 = vcmp.eq.s32.totalorder %v4719_v29, %v15114_v47  ;;  %vm4803_vm15 = vcmp.eq.s32.totalorder %v4719_v29, %v12305_v56  ;;  %v4638_v58 = vpop.f32.mrb[106].mxu1 }
 0x7a6   :  { %vm8506_vm0 = vmpackc.low %vm4802_vm6, %vm4800_vm12  ;;  %v8916_v8 = vtrunc.f32 %v4638_v58  ;;  %4769 = vperm.xlu1 %8997, %v8915_v57   ;;  %v4640_v40 = vpop.f32.mrb[107].mxu1 }
 0x7a7   :  { %vm8504_vm9 = vmpackc.low %vm4803_vm15, %vm4801_vm11 }
 0x7a8   :  { %v8917_v21 = vcvt.f32.s32 %v8916_v8  ;;  %8505 = vmatprep.subr.msk.bf16.mxu0 %vm8504_vm9, %v15117_v6  ;;  %v4722_v48 = vpop.permute.xlu1 %4721 }
 0x7a9   :  { %8507 = vmatpush1.bf16.msk.msra.mxu0 %vm8506_vm0, %v15117_v6  ;;  %v4643_v59 = vpop.f32.mrb[108].mxu1  ;;  %vm4804_vm14 = vcmp.eq.s32.totalorder %v4722_v48, %v15114_v47  ;;  %vm4805_vm1 = vcmp.eq.s32.totalorder %v4722_v48, %v12305_v56  ;;  %v15212_v48 = vld [vmem:[#allocation91_spill] sm:$0xff] }
 0x7aa   :  { %v8918_v10 = vtrunc.f32 %v4643_v59  ;;  %4772 = vperm.xlu0 %8996, %v8917_v21   ;;  %v4645_v17 = vpop.f32.mrb[109].mxu1  ;;  %v15210_v59 = vld [vmem:[#allocation89_spill] sm:$0xff] }
 0x7ab   :  { %v15215_v17 = vld [vmem:[#allocation92_spill] sm:$0xff] }
 0x7ac   :  { %v8919_v52 = vcvt.f32.s32 %v8918_v10  ;;  %v4725_v29 = vpop.permute.xlu0 %4724  ;;  %v15213_v10 = vld [vmem:[#allocation90_spill] sm:$0xff] }
 0x7ad   :  { %vm4806_vm10 = vcmp.eq.s32.totalorder %v4725_v29, %v15114_v47  ;;  %vm4807_vm13 = vcmp.eq.s32.totalorder %v4725_v29, %v12305_v56  ;;  %v4648_v41 = vpop.f32.mrb[110].mxu1  ;;  %v15217_v29 = vld [vmem:[#allocation94_spill] sm:$0xff] }
 0x7ae   :  { %vm8510_vm12 = vmpackc.low %vm4806_vm10, %vm4804_vm14  ;;  %v8920_v57 = vtrunc.f32 %v4648_v41  ;;  %4775 = vperm.xlu1 %8997, %v8919_v52   ;;  %v4650_v58 = vpop.f32.mrb[111].mxu1  ;;  %v15216_v52 = vld [vmem:[#allocation95_spill] sm:$0xff] }
 0x7af   :  { %vm8508_vm6 = vmpackc.low %vm4807_vm13, %vm4805_vm1  ;;  %v15218_v41 = vld [vmem:[#allocation99_spill] sm:$0xff] }
 0x7b0   :  { %v8921_v8 = vcvt.f32.s32 %v8920_v57  ;;  %8509 = vmatprep.subr.msk.bf16.mxu0 %vm8508_vm6, %v15117_v6  ;;  %v4728_v40 = vpop.permute.xlu1 %4727  ;;  %v15219_v57 = vld [vmem:[#allocation97_spill] sm:$0xff]  ;;  %v15220_v58 = vld [vmem:[#allocation103_spill] sm:$0xff] }
 0x7b1   :  { %8511 = vmatpush1.bf16.msk.msra.mxu0 %vm8510_vm12, %v15117_v6  ;;  %vm4808_vm15 = vcmp.eq.s32.totalorder %v4728_v40, %v15114_v47  ;;  %vm4809_vm9 = vcmp.eq.s32.totalorder %v4728_v40, %v12305_v56  ;;  %v15222_v40 = vld [vmem:[#allocation106_spill] sm:$0xff] }
 0x7b2   :  { %3484 = vperm.xlu1 %8997, %v12509_v22   ;;  %4778 = vperm.xlu0 %8996, %v8921_v8   ;;  %v15211_v22 = vld [vmem:[#allocation88_spill] sm:$0xff]  ;;  %v15221_v8 = vld [vmem:[#allocation102_spill] sm:$0xff] }
 0x7b4   :  { %v4731_v21 = vpop.permute.xlu0 %4730 }
 0x7b5   :  { %vm4810_vm11 = vcmp.eq.s32.totalorder %v4731_v21, %v15114_v47  ;;  %vm4811_vm0 = vcmp.eq.s32.totalorder %v4731_v21, %v12305_v56  ;;  %v15223_v21 = vld [vmem:[#allocation104_spill] sm:$0xff] }
 0x7b6   :  { %vm8514_vm14 = vmpackc.low %vm4810_vm11, %vm4808_vm15  ;;  %5054 = vperm.xlu1 %8997, %v15210_v59   ;;  %3487 = vperm.xlu0 %8996, %v12502_v35   ;;  %v15214_v35 = vld [vmem:[#allocation93_spill] sm:$0xff] }
 0x7b7   :  { %vm8512_vm10 = vmpackc.low %vm4811_vm0, %vm4809_vm9 }
 0x7b8   :  { %8513 = vmatprep.subr.msk.bf16.mxu0 %vm8512_vm10, %v15117_v6 }
 0x7b9   :  { %8515 = vmatpush1.bf16.msk.msra.mxu0 %vm8514_vm14, %v15117_v6 }
 0x7ba   :  { %3666 = vbcast.lane.b32.xlu1 %v15197_v30, 256  ;;  %5058 = vperm.xlu0 %8996, %v15211_v22  }
 0x7be   :  { %3670 = vbcast.lane.b32.xlu1 %v15197_v30, 264  ;;  %5062 = vperm.xlu0 %8996, %v15212_v48  }
 0x7c2   :  { %3674 = vbcast.lane.b32.xlu1 %v15197_v30, 272  ;;  %5066 = vperm.xlu0 %8996, %v15213_v10  }
 0x7c6   :  { %3678 = vbcast.lane.b32.xlu1 %v15197_v30, 280  ;;  %5070 = vperm.xlu0 %8996, %v15214_v35  }
 0x7ca   :  { %3682 = vbcast.lane.b32.xlu1 %v15197_v30, 288  ;;  %5074 = vperm.xlu0 %8996, %v15215_v17  }
 0x7ce   :  { %3686 = vbcast.lane.b32.xlu1 %v15197_v30, 296  ;;  %5078 = vperm.xlu0 %8996, %v15216_v52  }
 0x7d2   :  { %3690 = vbcast.lane.b32.xlu1 %v15197_v30, 304  ;;  %5082 = vperm.xlu0 %8996, %v15217_v29  }
 0x7d6   :  { %3694 = vbcast.lane.b32.xlu1 %v15197_v30, 312  ;;  %5086 = vperm.xlu0 %8996, %v15218_v41  }
 0x7da   :  { %3698 = vbcast.lane.b32.xlu1 %v15197_v30, 320  ;;  %5090 = vperm.xlu0 %8996, %v15219_v57  }
 0x7de   :  { %3702 = vbcast.lane.b32.xlu1 %v15197_v30, 328  ;;  %5094 = vperm.xlu0 %8996, %v15220_v58  }
 0x7e2   :  { %3706 = vbcast.lane.b32.xlu1 %v15197_v30, 336  ;;  %5098 = vperm.xlu0 %8996, %v15221_v8  }
 0x7e6   :  { %3710 = vbcast.lane.b32.xlu1 %v15197_v30, 344  ;;  %5102 = vperm.xlu0 %8996, %v15222_v40  }
 0x7ea   :  { %3714 = vbcast.lane.b32.xlu1 %v15197_v30, 352  ;;  %5106 = vperm.xlu0 %8996, %v15223_v21   ;;  %v4734_v19 = vpop.permute.xlu1 %4733 }
 0x7eb   :  { %vm4812_vm13 = vcmp.eq.s32.totalorder %v4734_v19, %v15114_v47  ;;  %vm4813_vm6 = vcmp.eq.s32.totalorder %v4734_v19, %v12305_v56 }
 0x7ee   :  { %3718 = vbcast.lane.b32.xlu1 %v15197_v30, 360  ;;  %5110 = vperm.xlu0 %8996, %v15224_v55  }
 0x7f2   :  { %v4737_v2 = vpop.permute.xlu0 %4736  ;;  %3722 = vbcast.lane.b32.xlu1 %v15197_v30, 368  ;;  %5114 = vperm.xlu0 %8996, %v15225_v27  }
 0x7f3   :  { %vm4814_vm1 = vcmp.eq.s32.totalorder %v4737_v2, %v15114_v47  ;;  %vm4815_vm12 = vcmp.eq.s32.totalorder %v4737_v2, %v12305_v56 }
 0x7f4   :  { %vm8518_vm15 = vmpackc.low %vm4814_vm1, %vm4812_vm13 }
 0x7f5   :  { %vm8516_vm11 = vmpackc.low %vm4815_vm12, %vm4813_vm6 }
 0x7f6   :  { %8517 = vmatprep.subr.msk.bf16.mxu0 %vm8516_vm11, %v15117_v6  ;;  %3726 = vbcast.lane.b32.xlu1 %v15197_v30, 376 }
 0x7f7   :  { %8519 = vmatpush1.bf16.msk.msra.mxu0 %vm8518_vm15, %v15117_v6 }
 0x7f9   :  { %v4740_v39 = vpop.permute.xlu1 %4739 }
 0x7fa   :  { %vm4816_vm0 = vcmp.eq.s32.totalorder %v4740_v39, %v15114_v47  ;;  %vm4817_vm10 = vcmp.eq.s32.totalorder %v4740_v39, %v12305_v56 }
 0x801   :  { %v4743_v4 = vpop.permute.xlu0 %4742 }
 0x802   :  { %vm4818_vm9 = vcmp.eq.s32.totalorder %v4743_v4, %v15114_v47  ;;  %vm4819_vm14 = vcmp.eq.s32.totalorder %v4743_v4, %v12305_v56 }
 0x803   :  { %vm8522_vm2 = vmpackc.low %vm4818_vm9, %vm4816_vm0 }
 0x804   :  { %vm8520_vm5 = vmpackc.low %vm4819_vm14, %vm4817_vm10 }
 0x805   :  { %8521 = vmatprep.subr.msk.bf16.mxu0 %vm8520_vm5, %v15117_v6  ;;  %v4746_v2 = vpop.permute.xlu1 %4745 }
 0x806   :  { %8523 = vmatpush1.bf16.msk.msra.mxu0 %vm8522_vm2, %v15117_v6  ;;  %vm4820_vm13 = vcmp.eq.s32.totalorder %v4746_v2, %v15114_v47  ;;  %vm4821_vm6 = vcmp.eq.s32.totalorder %v4746_v2, %v12305_v56 }
 0x809   :  { %v4749_v19 = vpop.permute.xlu0 %4748 }
 0x80a   :  { %vm4822_vm1 = vcmp.eq.s32.totalorder %v4749_v19, %v15114_v47  ;;  %vm4823_vm12 = vcmp.eq.s32.totalorder %v4749_v19, %v12305_v56  ;;  %v3496_v19 = vrot.slane %v12568_v44, %v11853_v0 }
 0x80b   :  { %vm8526_vm15 = vmpackc.low %vm4822_vm1, %vm4820_vm13 }
 0x80c   :  { %vm8524_vm11 = vmpackc.low %vm4823_vm12, %vm4821_vm6  ;;  %v3497_v44 = vsel %vm3261_vm3, %v3496_v19, %v3492_v33  ;;  %v3521_v19 = vrot.slane %v12578_v42, %v11902_v1 }
 0x80d   :  { %8525 = vmatprep.subr.msk.bf16.mxu0 %vm8524_vm11, %v15117_v6  ;;  %v4752_v39 = vpop.permute.xlu1 %4751 }
 0x80e   :  { %8527 = vmatpush1.bf16.msk.msra.mxu0 %vm8526_vm15, %v15117_v6  ;;  %vm4824_vm5 = vcmp.eq.s32.totalorder %v4752_v39, %v15114_v47  ;;  %vm4825_vm9 = vcmp.eq.s32.totalorder %v4752_v39, %v12305_v56  ;;  %v3501_v39 = vrot.slane %v12570_v13, %v11871_v3 }
 0x810   :  { %v3502_v7 = vsel %vm3268_vm4, %v3501_v39, %v3497_v44  ;;  %v3531_v44 = vrot.slane %v12582_v14, %v11911_v25 }
 0x811   :  { %v4755_v4 = vpop.permute.xlu0 %4754 }
 0x812   :  { %vm4826_vm2 = vcmp.eq.s32.totalorder %v4755_v4, %v15114_v47  ;;  %vm4827_vm0 = vcmp.eq.s32.totalorder %v4755_v4, %v12305_v56  ;;  %v3511_v4 = vrot.slane %v12574_v62, %v11888_v45 }
 0x813   :  { %vm8530_vm14 = vmpackc.low %vm4826_vm2, %vm4824_vm5 }
 0x814   :  { %vm8528_vm10 = vmpackc.low %vm4827_vm0, %vm4825_vm9 }
 0x815   :  { %8529 = vmatprep.subr.msk.bf16.mxu0 %vm8528_vm10, %v15117_v6  ;;  %v4758_v2 = vpop.permute.xlu1 %4757 }
 0x816   :  { %8531 = vmatpush1.bf16.msk.msra.mxu0 %vm8530_vm14, %v15117_v6  ;;  %vm4828_vm13 = vcmp.eq.s32.totalorder %v4758_v2, %v15114_v47  ;;  %vm4829_vm6 = vcmp.eq.s32.totalorder %v4758_v2, %v12305_v56 }
 0x819   :  { %v4761_v51 = vpop.permute.xlu0 %4760 }
 0x81a   :  { %vm4830_vm1 = vcmp.eq.s32.totalorder %v4761_v51, %v15114_v47  ;;  %vm4831_vm12 = vcmp.eq.s32.totalorder %v4761_v51, %v12305_v56  ;;  %v3506_v51 = vrot.slane %v12572_v24, %v11868_v31  ;;  %v3516_v24 = vrot.slane %v12576_v53, %v11882_v28 }
 0x81b   :  { %vm8534_vm15 = vmpackc.low %vm4830_vm1, %vm4828_vm13  ;;  %vm15226_vm13 = vcmask 392512   ;;  %vm15227_vm1 = vcmask 458112  }
 0x81c   :  { %vm8532_vm11 = vmpackc.low %vm4831_vm12, %vm4829_vm6  ;;  %v3507_v2 = vsel %vm14781_vm7, %v3506_v51, %v3502_v7  ;;  %vm15228_vm12 = vcmask 523712   ;;  %v3541_v51 = vrot.slane %v12586_v50, %v11964_v5  ;;  %v3546_v50 = vrot.slane %v12588_v46, %v11926_v12 }
 0x81d   :  { %8533 = vmatprep.subr.msk.bf16.mxu0 %vm8532_vm11, %v15117_v6  ;;  %v4764_v36 = vpop.permute.xlu1 %4763  ;;  %v3512_v33 = vsel %vm14780_vm8, %v3511_v4, %v3507_v2  ;;  %v3556_v46 = vrot.slane %v12592_v49, %v11987_v9 }
 0x81e   :  { %8535 = vmatpush1.bf16.msk.msra.mxu0 %vm8534_vm15, %v15117_v6  ;;  %vm4832_vm5 = vcmp.eq.s32.totalorder %v4764_v36, %v15114_v47  ;;  %vm4833_vm9 = vcmp.eq.s32.totalorder %v4764_v36, %v12305_v56  ;;  %v3517_v62 = vsel %vm15226_vm13, %v3516_v24, %v3512_v33  ;;  %v3526_v36 = vrot.slane %v12580_v61, %v11894_v37 }
 0x81f   :  { %v3522_v39 = vsel %vm15227_vm1, %v3521_v19, %v3517_v62  ;;  %v3536_v61 = vrot.slane %v12584_v23, %v11908_v15  ;;  %v3551_v33 = vrot.slane %v12590_v38, %v12008_v26  ;;  %vm15232_vm13 = vcmask 786112  }
 0x820   :  { %v3527_v4 = vsel %vm15228_vm12, %v3526_v36, %v3522_v39 }
 0x821   :  { %v4767_v13 = vpop.permute.xlu0 %4766 }
 0x822   :  { %vm4834_vm2 = vcmp.eq.s32.totalorder %v4767_v13, %v15114_v47  ;;  %vm4835_vm0 = vcmp.eq.s32.totalorder %v4767_v13, %v12305_v56 }
 0x823   :  { %vm8538_vm14 = vmpackc.low %vm4834_vm2, %vm4832_vm5  ;;  %vm15229_vm5 = vcmask 589312  }
 0x824   :  { %vm8536_vm10 = vmpackc.low %vm4835_vm0, %vm4833_vm9  ;;  %v3532_v53 = vsel %vm15229_vm5, %v3531_v44, %v3527_v4 }
 0x825   :  { %8537 = vmatprep.subr.msk.bf16.mxu0 %vm8536_vm10, %v15117_v6  ;;  %v4770_v7 = vpop.permute.xlu1 %4769  ;;  %vm15231_vm10 = vcmask 720512  }
 0x826   :  { %8539 = vmatpush1.bf16.msk.msra.mxu0 %vm8538_vm14, %v15117_v6  ;;  %vm4836_vm6 = vcmp.eq.s32.totalorder %v4770_v7, %v15114_v47  ;;  %vm4837_vm2 = vcmp.eq.s32.totalorder %v4770_v7, %v12305_v56  ;;  %vm15230_vm14 = vcmask 654912  }
 0x827   :  { %v3537_v13 = vsel %vm15230_vm14, %v3536_v61, %v3532_v53  ;;  %vm15236_vm14 = vcmask 1048512  }
 0x828   :  { %v3542_v2 = vsel %vm15231_vm10, %v3541_v51, %v3537_v13  ;;  %v12775_v51 = vrot.slane %v15197_v30, %v12093_v16 }
 0x829   :  { %v4773_v42 = vpop.permute.xlu0 %4772  ;;  %v3547_v23 = vsel %vm15232_vm13, %v3546_v50, %v3542_v2  ;;  %v3592_v2 = vrot.slane %v15211_v22, %v11853_v0  ;;  %v3597_v50 = vrot.slane %v15212_v48, %v11871_v3  ;;  %v3607_v22 = vrot.slane %v15214_v35, %v11888_v45 }
 0x82a   :  { %vm4838_vm15 = vcmp.eq.s32.totalorder %v4773_v42, %v15114_v47  ;;  %vm4839_vm11 = vcmp.eq.s32.totalorder %v4773_v42, %v12305_v56  ;;  %v3612_v48 = vrot.slane %v15215_v17, %v11882_v28  ;;  %vm15237_vm13 = vcmask 392512  }
 0x82b   :  { %vm8542_vm0 = vmpackc.low %vm4838_vm15, %vm4836_vm6  ;;  %vm15233_vm15 = vcmask 851712  }
 0x82c   :  { %vm8540_vm9 = vmpackc.low %vm4839_vm11, %vm4837_vm2  ;;  %v3552_v62 = vsel %vm15233_vm15, %v3551_v33, %v3547_v23  ;;  %v3588_v33 = vrot.slane %v15210_v59, %v11862_v54  ;;  %v3602_v23 = vrot.slane %v15213_v10, %v11868_v31  ;;  %v3617_v10 = vrot.slane %v15216_v52, %v11902_v1 }
 0x82d   :  { %8541 = vmatprep.subr.msk.bf16.mxu0 %vm8540_vm9, %v15117_v6  ;;  %v4776_v14 = vpop.permute.xlu1 %4775  ;;  %vm15235_vm9 = vcmask 982912   ;;  %vm15241_vm15 = vcmask 654912  }
 0x82e   :  { %8543 = vmatpush1.bf16.msk.msra.mxu0 %vm8542_vm0, %v15117_v6  ;;  %vm4840_vm1 = vcmp.eq.s32.totalorder %v4776_v14, %v15114_v47  ;;  %vm4841_vm11 = vcmp.eq.s32.totalorder %v4776_v14, %v12305_v56  ;;  %vm15234_vm0 = vcmask 917312  }
 0x82f   :  { %v3557_v7 = vsel %vm15234_vm0, %v3556_v46, %v3552_v62 }
 0x831   :  { %v3485_v19 = vpop.permute.xlu1 %3484  ;;  %v4779_v24 = vpop.permute.xlu0 %4778 }
 0x832   :  { %vm4842_vm12 = vcmp.eq.s32.totalorder %v4779_v24, %v15114_v47  ;;  %vm4843_vm6 = vcmp.eq.s32.totalorder %v4779_v24, %v12305_v56  ;;  %v3561_v39 = vrot.slane %v3485_v19, %v12033_v63  ;;  %v3593_v24 = vsel %vm3261_vm3, %v3592_v2, %v3588_v33 }
 0x833   :  { %vm8546_vm5 = vmpackc.low %vm4842_vm12, %vm4840_vm1  ;;  %v3598_v62 = vsel %vm3268_vm4, %v3597_v50, %v3593_v24  ;;  %vm15238_vm1 = vcmask 458112   ;;  %vm15239_vm12 = vcmask 523712   ;;  %v3652_v2 = vrot.slane %v15223_v21, %v11987_v9 }
 0x834   :  { %vm8544_vm2 = vmpackc.low %vm4843_vm6, %vm4841_vm11  ;;  %v3562_v42 = vsel %vm15235_vm9, %v3561_v39, %v3557_v7  ;;  %v3603_v39 = vsel %vm14781_vm7, %v3602_v23, %v3598_v62  ;;  %v3622_v7 = vrot.slane %v15217_v29, %v11894_v37  ;;  %vm15240_vm6 = vcmask 589312  }
 0x835   :  { %8545 = vmatprep.subr.msk.bf16.mxu0 %vm8544_vm2, %v15117_v6  ;;  %v12764_v38 = vpop.permute.xlu1 %5054  ;;  %v3488_v44 = vpop.permute.xlu0 %3487  ;;  %v3608_v46 = vsel %vm14780_vm8, %v3607_v22, %v3603_v39  ;;  %vm15242_vm11 = vcmask 720512   ;;  %v3202_v33 = vmul.f32 1.442695, %v12524_v43  ;;  %vm15244_vm2 = vcmask 851712  }
 0x836   :  { %v3566_v36 = vrot.slane %v3488_v44, %v12067_v11  ;;  %8547 = vmatpush1.bf16.msk.msra.mxu0 %vm8546_vm5, %v15117_v6  ;;  %vm5198_vm10 = vcmp.gt.f32.partialorder %v12775_v51, %v12764_v38  ;;  %v3613_v17 = vsel %vm15237_vm13, %v3612_v48, %v3608_v46  ;;  %vm15243_vm5 = vcmask 786112   ;;  %v15246_v48 = vld [vmem:[#allocation81_spill] sm:$0xff] }
 0x837   :  { %8548 = vmatprep.subr.bf16.mxu0 %v15118_v20  ;;  %v3204_v24 = vmul.f32 1.442695, %v12520_v18  ;;  %v3662_v21 = vrot.slane %v15225_v27, %v12067_v11  ;;  %9038 = vpow2.f32 %v3202_v33  ;;  %v3206_v43 = vmul.f32 1.442695, %v12537_v34  ;;  %v15245_v18 = vld [vmem:[#allocation74_spill] sm:$0xff] }
 0x838   :  { %v3567_v4 = vsel %vm15236_vm14, %v3566_v36, %v3562_v42  ;;  %v3618_v36 = vsel %vm15238_vm1, %v3617_v10, %v3613_v17  ;;  %v3627_v42 = vrot.slane %v15218_v41, %v11911_v25  ;;  %v3210_v39 = vmul.f32 1.442695, %v15246_v48  ;;  %v15248_v17 = vld [vmem:[#allocation80_spill] sm:$0xff] }
 0x839   :  { %v3889_v49 = vmul.f32 %v3567_v4, %v12088_v60  ;;  %v3667_v53 = vpop.permute.xlu1 %3666  ;;  %v12813_v44 = vpop.permute.xlu0 %5058  ;;  %v3632_v4 = vrot.slane %v15219_v57, %v11908_v15  ;;  %9040 = vpow2.f32 %v3204_v24 }
 0x83a   :  { %5119 = vperm.xlu0 %8996, %v3667_v53   ;;  %9042 = vpow2.f32 %v3206_v43 }
 0x83b   :  { %5037 = vmatmul.mubr.f32.vlgmr.msra.gmra.mrb[34].mxu0 %v3889_v49  ;;  %v3623_v49 = vsel %vm15239_vm12, %v3622_v7, %v3618_v36  ;;  %v3214_v36 = vmul.f32 1.442695, %v15248_v17 }
 0x83c   :  { %8549 = vmatpush1.bf16.msra.mxu0 %v15117_v6  ;;  %7411 = vmatprep.mubr.msk.f32.mxu0 %vm5198_vm10, %v15164_v32  ;;  %v3628_v29 = vsel %vm15240_vm6, %v3627_v42, %v3623_v49 }
 0x83d   :  { %v3671_v61 = vpop.permute.xlu1 %3670  ;;  %8550 = vmatprep.subr.bf16.mxu0 %v15118_v20  ;;  %v12827_v53 = vpop.permute.xlu0 %5062  ;;  %v3633_v57 = vsel %vm15241_vm15, %v3632_v4, %v3628_v29  ;;  %v15249_v4 = vld [vmem:[#allocation77_spill] sm:$0xff]  ;;  %v15250_v29 = vld [vmem:[#allocation82_spill] sm:$0xff] }
 0x83e   :  { %5124 = vperm.xlu0 %8996, %v3671_v61   ;;  %v3637_v61 = vrot.slane %v15220_v58, %v11964_v5  ;;  %v3216_v49 = vmul.f32 1.442695, %v15249_v4 }
 0x840   :  { %8551 = vmatpush1.bf16.msra.mxu0 %v15117_v6 }
 0x841   :  { %v3675_v60 = vpop.permute.xlu1 %3674  ;;  %8552 = vmatprep.subr.bf16.mxu0 %v15118_v20  ;;  %v9039_v42 = vpop.eup %9038 }
 0x842   :  { %5129 = vperm.xlu1 %8997, %v3675_v60   ;;  %v3642_v60 = vrot.slane %v15221_v8, %v11926_v12 }
 0x844   :  { %8553 = vmatpush1.bf16.msra.mxu0 %v15117_v6 }
 0x845   :  { %v3679_v30 = vpop.permute.xlu1 %3678  ;;  %8554 = vmatprep.subr.bf16.mxu0 %v15118_v20 }
 0x846   :  { %5134 = vperm.xlu0 %8996, %v3679_v30   ;;  %v3638_v30 = vsel %vm15242_vm11, %v3637_v61, %v3633_v57  ;;  %v3218_v61 = vmul.f32 1.442695, %v15250_v29  ;;  %v9041_v57 = vpop.eup %9040 }
 0x847   :  { %v3643_v8 = vsel %vm15243_vm5, %v3642_v60, %v3638_v30  ;;  %v9043_v30 = vpop.eup %9042  ;;  %vm5200_vm5 = vcmp.gt.f32.partialorder %v12775_v51, %v12813_v44 }
 0x848   :  { %8555 = vmatpush1.bf16.msra.mxu0 %v15117_v6 }
 0x849   :  { %v3683_v14 = vpop.permute.xlu1 %3682  ;;  %8556 = vmatprep.subr.bf16.mxu0 %v15118_v20 }
 0x84a   :  { %5139 = vperm.xlu1 %8997, %v3683_v14   ;;  %v3647_v14 = vrot.slane %v15222_v40, %v12008_v26  ;;  %v3657_v40 = vrot.slane %v15224_v55, %v12033_v63 }
 0x84c   :  { %8557 = vmatpush1.bf16.msra.mxu0 %v15117_v6  ;;  %v3648_v50 = vsel %vm15244_vm2, %v3647_v14, %v3643_v8  ;;  %v15253_v14 = vld [vmem:[#allocation83_spill] sm:$0xff]  ;;  %v15255_v8 = vld [vmem:[#allocation38_spill] sm:$0xff] }
 0x84d   :  { %v3687_v13 = vpop.permute.xlu1 %3686  ;;  %8558 = vmatprep.subr.bf16.mxu0 %v15118_v20  ;;  %v3653_v23 = vsel %vm15234_vm0, %v3652_v2, %v3648_v50  ;;  %vm15256_vm2 = vcmp.lt.s32.totalorder %v15114_v47, %v15255_v8 }
 0x84e   :  { %5144 = vperm.xlu0 %8996, %v3687_v13   ;;  %v12841_v13 = vpop.permute.xlu0 %5066  ;;  %v3658_v55 = vsel %vm15235_vm9, %v3657_v40, %v3653_v23  ;;  %v15259_v23 = vld [vmem:[#allocation27_spill] sm:$0xff] }
 0x84f   :  { %v12865_v27 = vsel %vm15236_vm14, %v3662_v21, %v3658_v55 }
 0x850   :  { %8559 = vmatpush1.bf16.msra.mxu0 %v15117_v6  ;;  %v12874_v10 = vrot.slane %v12865_v27, %v12093_v16 }
 0x851   :  { %v3691_v19 = vpop.permute.xlu1 %3690  ;;  %8560 = vmatprep.subr.bf16.mxu0 %v15118_v20 }
 0x852   :  { %5149 = vperm.xlu1 %8997, %v3691_v19   ;;  %v12858_v62 = vpop.permute.xlu0 %5070  ;;  %vm5261_vm10 = vcmp.eq.f32.partialorder %v12874_v10, %v12764_v38  ;;  %vm5197_vm13 = vcmp.gt.f32.partialorder %v12874_v10, %v12764_v38  ;;  %vm5263_vm6 = vcmp.eq.f32.partialorder %v12874_v10, %v12813_v44  ;;  %v15254_v38 = vld [vmem:[#allocation84_spill] sm:$0xff]  ;;  %vm5199_vm11 = vcmp.gt.f32.partialorder %v12874_v10, %v12813_v44  ;;  %v15258_v44 = vld [vmem:[#allocation86_spill] sm:$0xff] }
 0x853   :  { %v3222_v2 = vmul.f32 1.442695, %v15254_v38  ;;  %vm5327_vm0 = vmand %vm5263_vm6, %vm15256_vm2  ;;  %vm5265_vm9 = vcmp.eq.f32.partialorder %v12874_v10, %v12827_v53  ;;  %v3226_v21 = vmul.f32 1.442695, %v15258_v44  ;;  %vm5267_vm6 = vcmp.eq.f32.partialorder %v12874_v10, %v12841_v13  ;;  %v15287_v44 = vld [vmem:[#allocation53_spill] sm:$0xff] }
 0x854   :  { %8561 = vmatpush1.bf16.msra.mxu0 %v15117_v6  ;;  %vm5391_vm14 = vmor %vm5199_vm11, %vm5327_vm0  ;;  %vm5203_vm11 = vcmp.gt.f32.partialorder %v12874_v10, %v12841_v13 }
 0x855   :  { %v3695_v59 = vpop.permute.xlu1 %3694  ;;  %8562 = vmatprep.subr.bf16.mxu0 %v15118_v20 }
 0x856   :  { %5154 = vperm.xlu0 %8996, %v3695_v59   ;;  %v3208_v59 = vmul.f32 1.442695, %v15245_v18  ;;  %v12869_v34 = vpop.permute.xlu0 %5074 }
 0x858   :  { %8563 = vmatpush1.bf16.msra.mxu0 %v15117_v6  ;;  %9044 = vpow2.f32 %v3208_v59  ;;  %v15262_v59 = vld [vmem:[#allocation31_spill] sm:$0xff] }
 0x859   :  { %v3699_v35 = vpop.permute.xlu1 %3698  ;;  %8564 = vmatprep.subr.bf16.mxu0 %v15118_v20  ;;  %9046 = vpow2.f32 %v3210_v39  ;;  %v15263_v39 = vld [vmem:[#allocation26_spill] sm:$0xff] }
 0x85a   :  { %5159 = vperm.xlu1 %8997, %v3699_v35   ;;  %v15247_v35 = vld [vmem:[#allocation78_spill] sm:$0xff]  ;;  %v12889_v60 = vpop.permute.xlu0 %5078  ;;  %vm15264_vm2 = vcmp.lt.s32.totalorder %v15114_v47, %v15263_v39 }
 0x85b   :  { %v3212_v7 = vmul.f32 1.442695, %v15247_v35  ;;  %vm5331_vm0 = vmand %vm5267_vm6, %vm15264_vm2  ;;  %vm5271_vm6 = vcmp.eq.f32.partialorder %v12874_v10, %v12869_v34 }
 0x85c   :  { %8565 = vmatpush1.bf16.msra.mxu0 %v15117_v6 }
 0x85d   :  { %v3703_v52 = vpop.permute.xlu1 %3702  ;;  %8566 = vmatprep.subr.bf16.mxu0 %v15118_v20  ;;  %9048 = vpow2.f32 %v3212_v7 }
 0x85e   :  { %5164 = vperm.xlu0 %8996, %v3703_v52   ;;  %9050 = vpow2.f32 %v3214_v36  ;;  %v12907_v40 = vpop.permute.xlu0 %5082 }
 0x85f   :  { %9052 = vpow2.f32 %v3216_v49 }
 0x860   :  { %8567 = vmatpush1.bf16.msra.mxu0 %v15117_v6  ;;  %9054 = vpow2.f32 %v3218_v61  ;;  %v15271_v61 = vld [vmem:[#allocation22_spill] sm:$0xff] }
 0x861   :  { %v3707_v41 = vpop.permute.xlu1 %3706  ;;  %8568 = vmatprep.subr.bf16.mxu0 %v15118_v20 }
 0x862   :  { %5169 = vperm.xlu1 %8997, %v3707_v41   ;;  %v15251_v41 = vld [vmem:[#allocation39_spill] sm:$0xff]  ;;  %v9045_v33 = vpop.eup %9044  ;;  %v5087_v48 = vpop.permute.xlu0 %5086 }
 0x863   :  { %vm15252_vm1 = vcmp.lt.s32.totalorder %v15114_v47, %v15251_v41  ;;  %v9047_v50 = vpop.eup %9046 }
 0x864   :  { %8569 = vmatpush1.bf16.msra.mxu0 %v15117_v6  ;;  %vm5325_vm12 = vmand %vm5261_vm10, %vm15252_vm1  ;;  %vm5201_vm10 = vcmp.gt.f32.partialorder %v12874_v10, %v12827_v53  ;;  %vm15260_vm1 = vcmp.lt.s32.totalorder %v15114_v47, %v15259_v23 }
 0x865   :  { %v3711_v58 = vpop.permute.xlu1 %3710  ;;  %8570 = vmatprep.subr.bf16.mxu0 %v15118_v20  ;;  %vm5389_vm15 = vmor %vm5197_vm13, %vm5325_vm12  ;;  %vm5202_vm13 = vcmp.gt.f32.partialorder %v12775_v51, %v12827_v53  ;;  %v3230_v53 = vmul.f32 1.442695, %v15262_v59  ;;  %v15293_v59 = vld [vmem:[#allocation114_spill] sm:$0xff] }
 0x866   :  { %5174 = vperm.xlu0 %8996, %v3711_v58   ;;  %v3220_v58 = vmul.f32 1.442695, %v15253_v14  ;;  %vm5329_vm12 = vmand %vm5265_vm9, %vm15260_vm1  ;;  %vm5269_vm9 = vcmp.eq.f32.partialorder %v12874_v10, %v12858_v62  ;;  %v5091_v36 = vpop.permute.xlu0 %5090  ;;  %v15275_v14 = vld [vmem:[#allocation46_spill] sm:$0xff] }
 0x867   :  { %v9049_v43 = vpop.eup %9048 }
 0x868   :  { %8571 = vmatpush1.bf16.msra.mxu0 %v15117_v6  ;;  %9056 = vpow2.f32 %v3220_v58  ;;  %v9051_v55 = vpop.eup %9050  ;;  %v15277_v58 = vld [vmem:[#allocation49_spill] sm:$0xff] }
 0x869   :  { %v3715_v19 = vpop.permute.xlu1 %3714  ;;  %8572 = vmatprep.subr.bf16.mxu0 %v15118_v20  ;;  %9058 = vpow2.f32 %v3222_v2  ;;  %v15279_v2 = vld [vmem:[#allocation48_spill] sm:$0xff] }
 0x86a   :  { %5179 = vperm.xlu1 %8997, %v3715_v19   ;;  %v15257_v19 = vld [vmem:[#allocation85_spill] sm:$0xff]  ;;  %v5095_v4 = vpop.permute.xlu0 %5094 }
 0x86b   :  { %v3224_v24 = vmul.f32 1.442695, %v15257_v19 }
 0x86c   :  { %8573 = vmatpush1.bf16.msra.mxu0 %v15117_v6 }
 0x86d   :  { %v3719_v22 = vpop.permute.xlu1 %3718  ;;  %8574 = vmatprep.subr.bf16.mxu0 %v15118_v20  ;;  %9060 = vpow2.f32 %v3224_v24  ;;  %v15285_v24 = vld [vmem:[#allocation54_spill] sm:$0xff] }
 0x86e   :  { %5184 = vperm.xlu0 %8996, %v3719_v22   ;;  %v15261_v22 = vld [vmem:[#allocation87_spill] sm:$0xff]  ;;  %9062 = vpow2.f32 %v3226_v21 }
 0x86f   :  { %v3228_v18 = vmul.f32 1.442695, %v15261_v22  ;;  %v15291_v22 = vld [vmem:[#allocation116_spill] sm:$0xff] }
 0x870   :  { %8575 = vmatpush1.bf16.msra.mxu0 %v15117_v6 }
 0x871   :  { %v3723_v46 = vpop.permute.xlu1 %3722  ;;  %8576 = vmatprep.subr.bf16.mxu0 %v15118_v20  ;;  %9064 = vpow2.f32 %v3228_v18 }
 0x872   :  { %5189 = vperm.xlu1 %8997, %v3723_v46   ;;  %v9053_v46 = vpop.eup %9052  ;;  %9066 = vpow2.f32 %v3230_v53 }
 0x873   :  { %v9055_v35 = vpop.eup %9054 }
 0x874   :  { %8577 = vmatpush1.bf16.msra.mxu0 %v15117_v6  ;;  %v9057_v7 = vpop.eup %9056 }
 0x875   :  { %v3727_v52 = vpop.permute.xlu1 %3726  ;;  %8578 = vmatprep.subr.bf16.mxu0 %v15118_v20  ;;  %v9059_v17 = vpop.eup %9058 }
 0x876   :  { %3745 = vperm.xlu1 %8997, %v9039_v42   ;;  %5194 = vperm.xlu0 %8996, %v3727_v52  }
 0x877   :  { %v9061_v42 = vpop.eup %9060 }
 0x878   :  { %8579 = vmatpush1.bf16.msra.mxu0 %v15117_v6  ;;  %v9063_v52 = vpop.eup %9062 }
 0x87a   :  { %3751 = vperm.xlu1 %8997, %v9043_v30   ;;  %3748 = vperm.xlu0 %8996, %v9041_v57   ;;  %v15273_v57 = vld [vmem:[#allocation47_spill] sm:$0xff] }
 0x87b   :  { %7412 = vmatmul.mubr.msk.f32.vlgmr.msra.gmra.mrb[36].mxu0 %vm5389_vm15, %v15164_v32  ;;  %vm5393_vm15 = vmor %vm5201_vm10, %vm5329_vm12  ;;  %vm5205_vm10 = vcmp.gt.f32.partialorder %v12874_v10, %v12858_v62  ;;  %v9065_v49 = vpop.eup %9064 }
 0x87c   :  { %7413 = vmatprep.mubr.msk.f32.mxu0 %vm5200_vm5, %v15164_v32  ;;  %vm5204_vm5 = vcmp.gt.f32.partialorder %v12775_v51, %v12841_v13  ;;  %v15265_v13 = vld [vmem:[#allocation44_spill] sm:$0xff]  ;;  %v9067_v29 = vpop.eup %9066 }
 0x87d   :  { %vm15266_vm1 = vcmp.lt.s32.totalorder %v15114_v47, %v15265_v13 }
 0x87e   :  { %3757 = vperm.xlu1 %8997, %v9047_v50   ;;  %3754 = vperm.xlu0 %8996, %v9045_v33   ;;  %vm5333_vm12 = vmand %vm5269_vm9, %vm15266_vm1  ;;  %vm5273_vm9 = vcmp.eq.f32.partialorder %v12874_v10, %v12889_v60  ;;  %v15281_v50 = vld [vmem:[#allocation52_spill] sm:$0xff] }
 0x87f   :  { %7414 = vmatmul.mubr.msk.f32.gmra.mrb[38].mxu0 %vm5391_vm14, %v15164_v32  ;;  %vm5395_vm14 = vmor %vm5203_vm11, %vm5331_vm0  ;;  %vm5207_vm11 = vcmp.gt.f32.partialorder %v12874_v10, %v12869_v34 }
 0x880   :  { %7415 = vmatprep.mubr.msk.f32.mxu0 %vm5202_vm13, %v15164_v32  ;;  %vm5206_vm13 = vcmp.gt.f32.partialorder %v12775_v51, %v12858_v62  ;;  %v15267_v62 = vld [vmem:[#allocation45_spill] sm:$0xff] }
 0x881   :  { %vm15268_vm2 = vcmp.lt.s32.totalorder %v15114_v47, %v15267_v62 }
 0x882   :  { %3763 = vperm.xlu1 %8997, %v9051_v55   ;;  %3760 = vperm.xlu0 %8996, %v9049_v43   ;;  %vm5335_vm0 = vmand %vm5271_vm6, %vm15268_vm2  ;;  %vm5275_vm6 = vcmp.eq.f32.partialorder %v12874_v10, %v12907_v40  ;;  %vm15272_vm2 = vcmp.lt.s32.totalorder %v15114_v47, %v15271_v61  ;;  %v15289_v43 = vld [vmem:[#allocation109_spill] sm:$0xff] }
 0x883   :  { %7416 = vmatmul.mubr.msk.f32.gmra.mrb[40].mxu0 %vm5393_vm15, %v15164_v32  ;;  %vm5397_vm15 = vmor %vm5205_vm10, %vm5333_vm12  ;;  %vm5209_vm10 = vcmp.gt.f32.partialorder %v12874_v10, %v12889_v60 }
 0x884   :  { %7417 = vmatprep.mubr.msk.f32.mxu0 %vm5204_vm5, %v15164_v32  ;;  %vm5208_vm5 = vcmp.gt.f32.partialorder %v12775_v51, %v12869_v34  ;;  %v15269_v34 = vld [vmem:[#allocation28_spill] sm:$0xff] }
 0x885   :  { %vm15270_vm1 = vcmp.lt.s32.totalorder %v15114_v47, %v15269_v34 }
 0x886   :  { %3769 = vperm.xlu1 %8997, %v9055_v35   ;;  %3766 = vperm.xlu0 %8996, %v9053_v46   ;;  %vm5337_vm12 = vmand %vm5273_vm9, %vm15270_vm1  ;;  %vm5277_vm9 = vcmp.eq.f32.partialorder %v12874_v10, %v5087_v48  ;;  %vm15274_vm1 = vcmp.lt.s32.totalorder %v15114_v47, %v15273_v57  ;;  %v15297_v35 = vld [vmem:[#allocation115_spill] sm:$0xff] }
 0x887   :  { %7418 = vmatmul.mubr.msk.f32.gmra.mrb[42].mxu0 %vm5395_vm14, %v15164_v32  ;;  %vm5399_vm14 = vmor %vm5207_vm11, %vm5335_vm0  ;;  %vm5211_vm11 = vcmp.gt.f32.partialorder %v12874_v10, %v12907_v40 }
 0x888   :  { %7419 = vmatprep.mubr.msk.f32.mxu0 %vm5206_vm13, %v15164_v32  ;;  %vm5210_vm13 = vcmp.gt.f32.partialorder %v12775_v51, %v12889_v60  ;;  %vm5339_vm0 = vmand %vm5275_vm6, %vm15272_vm2  ;;  %v5099_v60 = vpop.permute.xlu0 %5098  ;;  %vm5215_vm2 = vcmp.gt.f32.partialorder %v12874_v10, %v5091_v36 }
 0x88a   :  { %3775 = vperm.xlu1 %8997, %v9059_v17   ;;  %3772 = vperm.xlu0 %8996, %v9057_v7   ;;  %v15299_v17 = vld [vmem:[#allocation120_spill] sm:$0xff] }
 0x88b   :  { %7420 = vmatmul.mubr.msk.f32.gmra.mrb[44].mxu0 %vm5397_vm15, %v15164_v32  ;;  %vm5401_vm15 = vmor %vm5209_vm10, %vm5337_vm12  ;;  %vm5213_vm10 = vcmp.gt.f32.partialorder %v12874_v10, %v5087_v48 }
 0x88c   :  { %7421 = vmatprep.mubr.msk.f32.mxu0 %vm5208_vm5, %v15164_v32  ;;  %vm5212_vm5 = vcmp.gt.f32.partialorder %v12775_v51, %v12907_v40  ;;  %vm5341_vm12 = vmand %vm5277_vm9, %vm15274_vm1  ;;  %v5103_v30 = vpop.permute.xlu0 %5102  ;;  %vm5217_vm1 = vcmp.gt.f32.partialorder %v12874_v10, %v5095_v4  ;;  %v15283_v40 = vld [vmem:[#allocation51_spill] sm:$0xff] }
 0x88d   :  { %vm5405_vm6 = vmor %vm5213_vm10, %vm5341_vm12  ;;  %vm5218_vm10 = vcmp.gt.f32.partialorder %v12775_v51, %v5095_v4 }
 0x88e   :  { %3781 = vperm.xlu1 %8997, %v9063_v52   ;;  %3778 = vperm.xlu0 %8996, %v9061_v42   ;;  %v15301_v42 = vld [vmem:[#allocation118_spill] sm:$0xff] }
 0x88f   :  { %7422 = vmatmul.mubr.msk.f32.gmra.mrb[46].mxu0 %vm5399_vm14, %v15164_v32  ;;  %vm5403_vm14 = vmor %vm5211_vm11, %vm5339_vm0  ;;  %vm5216_vm11 = vcmp.gt.f32.partialorder %v12775_v51, %v5091_v36 }
 0x890   :  { %7423 = vmatprep.mubr.msk.f32.mxu0 %vm5210_vm13, %v15164_v32  ;;  %vm5214_vm13 = vcmp.gt.f32.partialorder %v12775_v51, %v5087_v48  ;;  %v5107_v38 = vpop.permute.xlu0 %5106  ;;  %v15295_v48 = vld [vmem:[#allocation117_spill] sm:$0xff] }
 0x892   :  { %3787 = vperm.xlu1 %8997, %v9067_v29   ;;  %3784 = vperm.xlu0 %8996, %v9065_v49   ;;  %v15305_v29 = vld [vmem:[#allocation119_spill] sm:$0xff] }
 0x893   :  { %7424 = vmatmul.mubr.msk.f32.gmra.mrb[48].mxu0 %vm5401_vm15, %v15164_v32  ;;  %vm5279_vm15 = vcmp.eq.f32.partialorder %v12874_v10, %v5091_v36 }
 0x894   :  { %7425 = vmatprep.mubr.msk.f32.mxu0 %vm5212_vm5, %v15164_v32  ;;  %vm15276_vm5 = vcmp.lt.s32.totalorder %v15114_v47, %v15275_v14  ;;  %v5111_v33 = vpop.permute.xlu0 %5110 }
 0x895   :  { %vm5343_vm0 = vmand %vm5279_vm15, %vm15276_vm5  ;;  %vm5219_vm5 = vcmp.gt.f32.partialorder %v12874_v10, %v5099_v60 }
 0x896   :  { %vm5407_vm9 = vmor %vm5215_vm2, %vm5343_vm0  ;;  %vm5220_vm2 = vcmp.gt.f32.partialorder %v12775_v51, %v5099_v60 }
 0x897   :  { %7426 = vmatmul.mubr.msk.f32.gmra.mrb[50].mxu0 %vm5403_vm14, %v15164_v32  ;;  %vm5281_vm14 = vcmp.eq.f32.partialorder %v12874_v10, %v5095_v4  ;;  %v15303_v4 = vld [vmem:[#allocation121_spill] sm:$0xff] }
 0x898   :  { %7427 = vmatprep.mubr.msk.f32.mxu0 %vm5214_vm13, %v15164_v32  ;;  %vm15278_vm13 = vcmp.lt.s32.totalorder %v15114_v47, %v15277_v58  ;;  %v5115_v19 = vpop.permute.xlu0 %5114 }
 0x899   :  { %vm5345_vm12 = vmand %vm5281_vm14, %vm15278_vm13  ;;  %vm5221_vm13 = vcmp.gt.f32.partialorder %v12874_v10, %v5103_v30 }
 0x89a   :  { %vm5409_vm15 = vmor %vm5217_vm1, %vm5345_vm12  ;;  %vm5222_vm1 = vcmp.gt.f32.partialorder %v12775_v51, %v5103_v30 }
 0x89b   :  { %7428 = vmatmul.mubr.msk.f32.gmra.mrb[52].mxu0 %vm5405_vm6, %v15164_v32  ;;  %vm5283_vm6 = vcmp.eq.f32.partialorder %v12874_v10, %v5099_v60 }
 0x89c   :  { %7429 = vmatprep.mubr.msk.f32.mxu0 %vm5216_vm11, %v15164_v32  ;;  %vm15280_vm11 = vcmp.lt.s32.totalorder %v15114_v47, %v15279_v2 }
 0x89d   :  { %vm5347_vm0 = vmand %vm5283_vm6, %vm15280_vm11  ;;  %vm5223_vm11 = vcmp.gt.f32.partialorder %v12874_v10, %v5107_v38 }
 0x89e   :  { %vm5411_vm14 = vmor %vm5219_vm5, %vm5347_vm0  ;;  %vm5224_vm5 = vcmp.gt.f32.partialorder %v12775_v51, %v5107_v38 }
 0x89f   :  { %7430 = vmatmul.mubr.msk.f32.gmra.mrb[54].mxu0 %vm5407_vm9, %v15164_v32  ;;  %vm5285_vm9 = vcmp.eq.f32.partialorder %v12874_v10, %v5103_v30  ;;  %v15307_v30 = vld [vmem:[#allocation122_spill] sm:$0xff] }
 0x8a0   :  { %7431 = vmatprep.mubr.msk.f32.mxu0 %vm5218_vm10, %v15164_v32  ;;  %vm15282_vm10 = vcmp.lt.s32.totalorder %v15114_v47, %v15281_v50 }
 0x8a1   :  { %vm5349_vm12 = vmand %vm5285_vm9, %vm15282_vm10  ;;  %vm5225_vm10 = vcmp.gt.f32.partialorder %v12874_v10, %v5111_v33 }
 0x8a2   :  { %vm5413_vm6 = vmor %vm5221_vm13, %vm5349_vm12  ;;  %vm5226_vm13 = vcmp.gt.f32.partialorder %v12775_v51, %v5111_v33 }
 0x8a3   :  { %7432 = vmatmul.mubr.msk.f32.gmra.mrb[56].mxu0 %vm5409_vm15, %v15164_v32  ;;  %vm5287_vm15 = vcmp.eq.f32.partialorder %v12874_v10, %v5107_v38 }
 0x8a4   :  { %7433 = vmatprep.mubr.msk.f32.mxu0 %vm5220_vm2, %v15164_v32  ;;  %vm15284_vm2 = vcmp.lt.s32.totalorder %v15114_v47, %v15283_v40 }
 0x8a5   :  { %vm5351_vm0 = vmand %vm5287_vm15, %vm15284_vm2  ;;  %vm5227_vm2 = vcmp.gt.f32.partialorder %v12874_v10, %v5115_v19 }
 0x8a6   :  { %vm5415_vm9 = vmor %vm5223_vm11, %vm5351_vm0  ;;  %vm5228_vm11 = vcmp.gt.f32.partialorder %v12775_v51, %v5115_v19 }
 0x8a7   :  { %7434 = vmatmul.mubr.msk.f32.gmra.mrb[58].mxu0 %vm5411_vm14, %v15164_v32  ;;  %vm5289_vm14 = vcmp.eq.f32.partialorder %v12874_v10, %v5111_v33  ;;  %v15309_v33 = vld [vmem:[#allocation123_spill] sm:$0xff] }
 0x8a8   :  { %7435 = vmatprep.mubr.msk.f32.mxu0 %vm5222_vm1, %v15164_v32  ;;  %vm15286_vm1 = vcmp.lt.s32.totalorder %v15114_v47, %v15285_v24 }
 0x8a9   :  { %vm5353_vm12 = vmand %vm5289_vm14, %vm15286_vm1 }
 0x8aa   :  { %vm5417_vm15 = vmor %vm5225_vm10, %vm5353_vm12  ;;  %vm15290_vm12 = vcmp.lt.s32.totalorder %v12305_v56, %v15289_v43 }
 0x8ab   :  { %7436 = vmatmul.mubr.msk.f32.gmra.mrb[60].mxu0 %vm5413_vm6, %v15164_v32  ;;  %vm5291_vm6 = vcmp.eq.f32.partialorder %v12874_v10, %v5115_v19 }
 0x8ac   :  { %7437 = vmatprep.mubr.msk.f32.mxu0 %vm5224_vm5, %v15164_v32  ;;  %vm15288_vm5 = vcmp.lt.s32.totalorder %v15114_v47, %v15287_v44 }
 0x8ad   :  { %vm5355_vm0 = vmand %vm5291_vm6, %vm15288_vm5 }
 0x8af   :  { %7438 = vmatmul.mubr.msk.f32.gmra.mrb[62].mxu0 %vm5415_vm9, %v15164_v32  ;;  %vm5419_vm9 = vmor %vm5227_vm2, %vm5355_vm0 }
 0x8b0   :  { %7439 = vmatprep.mubr.msk.f32.mxu0 %vm5226_vm13, %v15164_v32 }
 0x8b3   :  { %7440 = vmatmul.mubr.msk.f32.gmra.mrb[64].mxu0 %vm5417_vm15, %v15164_v32 }
 0x8b4   :  { %7441 = vmatprep.mubr.msk.f32.mxu0 %vm5228_vm11, %v15164_v32 }
 0x8b7   :  { %7442 = vmatmul.mubr.msk.f32.gmra.mrb[66].mxu0 %vm5419_vm9, %v15164_v32  ;;  %vm15292_vm9 = vcmp.lt.s32.totalorder %v12305_v56, %v15291_v22 }
 0x8b9   :  { %v5120_v21 = vpop.permute.xlu0 %5119 }
 0x8ba   :  { %vm5230_vm14 = vcmp.gt.f32.partialorder %v12775_v51, %v5120_v21  ;;  %vm5294_vm10 = vcmp.eq.f32.partialorder %v12775_v51, %v5120_v21  ;;  %vm5229_vm13 = vcmp.gt.f32.partialorder %v12874_v10, %v5120_v21  ;;  %vm5293_vm1 = vcmp.eq.f32.partialorder %v12874_v10, %v5120_v21  ;;  %v15311_v21 = vld [vmem:[#allocation72_spill] sm:$0xff] }
 0x8bb   :  { %vm5358_vm15 = vmand %vm5294_vm10, %vm15290_vm12 }
 0x8bc   :  { %vm5422_vm8 = vmor %vm5230_vm14, %vm5358_vm15  ;;  %vm15294_vm15 = vcmp.lt.s32.totalorder %v12305_v56, %v15293_v59 }
 0x8bd   :  { %v5125_v55 = vpop.permute.xlu0 %5124  ;;  %7443 = vmatprep.mubr.msk.f32.mxu0 %vm5422_vm8, %v15164_v32  ;;  %vm5421_vm6 = vmor %vm5229_vm13, %vm5293_vm1 }
 0x8be   :  { %7444 = vmatmul.mubr.msk.f32.gmra.mrb[68].mxu0 %vm5421_vm6, %v15164_v32  ;;  %vm5232_vm2 = vcmp.gt.f32.partialorder %v12775_v51, %v5125_v55  ;;  %vm5296_vm11 = vcmp.eq.f32.partialorder %v12775_v51, %v5125_v55  ;;  %vm5231_vm5 = vcmp.gt.f32.partialorder %v12874_v10, %v5125_v55  ;;  %vm5295_vm0 = vcmp.eq.f32.partialorder %v12874_v10, %v5125_v55 }
 0x8bf   :  { %vm5360_vm7 = vmand %vm5296_vm11, %vm15292_vm9 }
 0x8c0   :  { %vm5424_vm10 = vmor %vm5232_vm2, %vm5360_vm7 }
 0x8c1   :  { %v5130_v18 = vpop.permute.xlu1 %5129  ;;  %7445 = vmatprep.mubr.msk.f32.mxu0 %vm5424_vm10, %v15164_v32  ;;  %vm5423_vm8 = vmor %vm5231_vm5, %vm5295_vm0  ;;  %vm15296_vm10 = vcmp.lt.s32.totalorder %v12305_v56, %v15295_v48 }
 0x8c2   :  { %7446 = vmatmul.mubr.msk.f32.gmra.mrb[70].mxu0 %vm5423_vm8, %v15164_v32  ;;  %vm5234_vm14 = vcmp.gt.f32.partialorder %v12775_v51, %v5130_v18  ;;  %vm5298_vm13 = vcmp.eq.f32.partialorder %v12775_v51, %v5130_v18  ;;  %vm5233_vm1 = vcmp.gt.f32.partialorder %v12874_v10, %v5130_v18  ;;  %vm5297_vm12 = vcmp.eq.f32.partialorder %v12874_v10, %v5130_v18  ;;  %v15313_v18 = vld [vmem:[#allocation73_spill] sm:$0xff] }
 0x8c3   :  { %vm5362_vm6 = vmand %vm5298_vm13, %vm15294_vm15 }
 0x8c4   :  { %vm5426_vm11 = vmor %vm5234_vm14, %vm5362_vm6 }
 0x8c5   :  { %v5135_v53 = vpop.permute.xlu0 %5134  ;;  %7447 = vmatprep.mubr.msk.f32.mxu0 %vm5426_vm11, %v15164_v32  ;;  %vm5425_vm7 = vmor %vm5233_vm1, %vm5297_vm12  ;;  %vm15298_vm11 = vcmp.lt.s32.totalorder %v12305_v56, %v15297_v35 }
 0x8c6   :  { %7448 = vmatmul.mubr.msk.f32.gmra.mrb[72].mxu0 %vm5425_vm7, %v15164_v32  ;;  %vm5236_vm2 = vcmp.gt.f32.partialorder %v12775_v51, %v5135_v53  ;;  %vm5300_vm5 = vcmp.eq.f32.partialorder %v12775_v51, %v5135_v53  ;;  %vm5235_vm0 = vcmp.gt.f32.partialorder %v12874_v10, %v5135_v53  ;;  %vm5299_vm9 = vcmp.eq.f32.partialorder %v12874_v10, %v5135_v53 }
 0x8c7   :  { %vm5364_vm8 = vmand %vm5300_vm5, %vm15296_vm10 }
 0x8c8   :  { %vm5428_vm13 = vmor %vm5236_vm2, %vm5364_vm8 }
 0x8c9   :  { %v5140_v46 = vpop.permute.xlu1 %5139  ;;  %7449 = vmatprep.mubr.msk.f32.mxu0 %vm5428_vm13, %v15164_v32  ;;  %vm5427_vm14 = vmor %vm5235_vm0, %vm5299_vm9  ;;  %vm15300_vm13 = vcmp.lt.s32.totalorder %v12305_v56, %v15299_v17 }
 0x8ca   :  { %7450 = vmatmul.mubr.msk.f32.gmra.mrb[74].mxu0 %vm5427_vm14, %v15164_v32  ;;  %vm5238_vm1 = vcmp.gt.f32.partialorder %v12775_v51, %v5140_v46  ;;  %vm5302_vm12 = vcmp.eq.f32.partialorder %v12775_v51, %v5140_v46  ;;  %vm5237_vm15 = vcmp.gt.f32.partialorder %v12874_v10, %v5140_v46  ;;  %vm5301_vm6 = vcmp.eq.f32.partialorder %v12874_v10, %v5140_v46  ;;  %v15315_v46 = vld [vmem:[#allocation75_spill] sm:$0xff] }
 0x8cb   :  { %vm5366_vm7 = vmand %vm5302_vm12, %vm15298_vm11 }
 0x8cc   :  { %vm5430_vm5 = vmor %vm5238_vm1, %vm5366_vm7 }
 0x8cd   :  { %v5145_v7 = vpop.permute.xlu0 %5144  ;;  %7451 = vmatprep.mubr.msk.f32.mxu0 %vm5430_vm5, %v15164_v32  ;;  %vm5429_vm2 = vmor %vm5237_vm15, %vm5301_vm6  ;;  %vm15302_vm5 = vcmp.lt.s32.totalorder %v12305_v56, %v15301_v42 }
 0x8ce   :  { %7452 = vmatmul.mubr.msk.f32.gmra.mrb[76].mxu0 %vm5429_vm2, %v15164_v32  ;;  %vm5240_vm0 = vcmp.gt.f32.partialorder %v12775_v51, %v5145_v7  ;;  %vm5304_vm9 = vcmp.eq.f32.partialorder %v12775_v51, %v5145_v7  ;;  %vm5239_vm10 = vcmp.gt.f32.partialorder %v12874_v10, %v5145_v7  ;;  %vm5303_vm8 = vcmp.eq.f32.partialorder %v12874_v10, %v5145_v7 }
 0x8cf   :  { %vm5368_vm14 = vmand %vm5304_vm9, %vm15300_vm13 }
 0x8d0   :  { %vm5432_vm12 = vmor %vm5240_vm0, %vm5368_vm14 }
 0x8d1   :  { %v5150_v36 = vpop.permute.xlu1 %5149  ;;  %7453 = vmatprep.mubr.msk.f32.mxu0 %vm5432_vm12, %v15164_v32  ;;  %vm5431_vm1 = vmor %vm5239_vm10, %vm5303_vm8  ;;  %vm15304_vm12 = vcmp.lt.s32.totalorder %v12305_v56, %v15303_v4 }
 0x8d2   :  { %7454 = vmatmul.mubr.msk.f32.gmra.mrb[78].mxu0 %vm5431_vm1, %v15164_v32  ;;  %vm5242_vm15 = vcmp.gt.f32.partialorder %v12775_v51, %v5150_v36  ;;  %vm5306_vm6 = vcmp.eq.f32.partialorder %v12775_v51, %v5150_v36  ;;  %vm5241_vm11 = vcmp.gt.f32.partialorder %v12874_v10, %v5150_v36  ;;  %vm5305_vm7 = vcmp.eq.f32.partialorder %v12874_v10, %v5150_v36  ;;  %v15317_v36 = vld [vmem:[#allocation76_spill] sm:$0xff] }
 0x8d3   :  { %vm5370_vm2 = vmand %vm5306_vm6, %vm15302_vm5 }
 0x8d4   :  { %vm5434_vm9 = vmor %vm5242_vm15, %vm5370_vm2 }
 0x8d5   :  { %v5155_v52 = vpop.permute.xlu0 %5154  ;;  %7455 = vmatprep.mubr.msk.f32.mxu0 %vm5434_vm9, %v15164_v32  ;;  %vm5433_vm0 = vmor %vm5241_vm11, %vm5305_vm7  ;;  %vm15306_vm9 = vcmp.lt.s32.totalorder %v12305_v56, %v15305_v29 }
 0x8d6   :  { %7456 = vmatmul.mubr.msk.f32.gmra.mrb[80].mxu0 %vm5433_vm0, %v15164_v32  ;;  %vm5244_vm10 = vcmp.gt.f32.partialorder %v12775_v51, %v5155_v52  ;;  %vm5308_vm8 = vcmp.eq.f32.partialorder %v12775_v51, %v5155_v52  ;;  %vm5243_vm13 = vcmp.gt.f32.partialorder %v12874_v10, %v5155_v52  ;;  %vm5307_vm14 = vcmp.eq.f32.partialorder %v12874_v10, %v5155_v52 }
 0x8d7   :  { %vm5372_vm1 = vmand %vm5308_vm8, %vm15304_vm12 }
 0x8d8   :  { %vm5436_vm6 = vmor %vm5244_vm10, %vm5372_vm1 }
 0x8d9   :  { %v5160_v49 = vpop.permute.xlu1 %5159  ;;  %7457 = vmatprep.mubr.msk.f32.mxu0 %vm5436_vm6, %v15164_v32  ;;  %vm5435_vm15 = vmor %vm5243_vm13, %vm5307_vm14  ;;  %vm15308_vm6 = vcmp.lt.s32.totalorder %v12305_v56, %v15307_v30 }
 0x8da   :  { %7458 = vmatmul.mubr.msk.f32.gmra.mrb[82].mxu0 %vm5435_vm15, %v15164_v32  ;;  %vm5246_vm11 = vcmp.gt.f32.partialorder %v12775_v51, %v5160_v49  ;;  %vm5310_vm7 = vcmp.eq.f32.partialorder %v12775_v51, %v5160_v49  ;;  %vm5245_vm5 = vcmp.gt.f32.partialorder %v12874_v10, %v5160_v49  ;;  %vm5309_vm2 = vcmp.eq.f32.partialorder %v12874_v10, %v5160_v49 }
 0x8db   :  { %vm5374_vm0 = vmand %vm5310_vm7, %vm15306_vm9 }
 0x8dc   :  { %vm5438_vm8 = vmor %vm5246_vm11, %vm5374_vm0 }
 0x8dd   :  { %v5165_v60 = vpop.permute.xlu0 %5164  ;;  %7459 = vmatprep.mubr.msk.f32.mxu0 %vm5438_vm8, %v15164_v32  ;;  %vm5437_vm10 = vmor %vm5245_vm5, %vm5309_vm2  ;;  %vm15310_vm8 = vcmp.lt.s32.totalorder %v12305_v56, %v15309_v33 }
 0x8de   :  { %7460 = vmatmul.mubr.msk.f32.gmra.mrb[84].mxu0 %vm5437_vm10, %v15164_v32  ;;  %vm5248_vm13 = vcmp.gt.f32.partialorder %v12775_v51, %v5165_v60  ;;  %vm5312_vm14 = vcmp.eq.f32.partialorder %v12775_v51, %v5165_v60  ;;  %vm5247_vm12 = vcmp.gt.f32.partialorder %v12874_v10, %v5165_v60  ;;  %vm5311_vm1 = vcmp.eq.f32.partialorder %v12874_v10, %v5165_v60  ;;  %v15319_v60 = vld [vmem:[#allocation79_spill] sm:$0xff] }
 0x8df   :  { %vm5376_vm15 = vmand %vm5312_vm14, %vm15308_vm6 }
 0x8e0   :  { %vm5440_vm7 = vmor %vm5248_vm13, %vm5376_vm15 }
 0x8e1   :  { %v5170_v38 = vpop.permute.xlu1 %5169  ;;  %7461 = vmatprep.mubr.msk.f32.mxu0 %vm5440_vm7, %v15164_v32  ;;  %vm5439_vm11 = vmor %vm5247_vm12, %vm5311_vm1  ;;  %vm15312_vm7 = vcmp.lt.s32.totalorder %v12305_v56, %v15311_v21 }
 0x8e2   :  { %7462 = vmatmul.mubr.msk.f32.gmra.mrb[86].mxu0 %vm5439_vm11, %v15164_v32  ;;  %vm5250_vm5 = vcmp.gt.f32.partialorder %v12775_v51, %v5170_v38  ;;  %vm5314_vm2 = vcmp.eq.f32.partialorder %v12775_v51, %v5170_v38  ;;  %vm5249_vm9 = vcmp.gt.f32.partialorder %v12874_v10, %v5170_v38  ;;  %vm5313_vm0 = vcmp.eq.f32.partialorder %v12874_v10, %v5170_v38 }
 0x8e3   :  { %vm5378_vm10 = vmand %vm5314_vm2, %vm15310_vm8 }
 0x8e4   :  { %vm5442_vm14 = vmor %vm5250_vm5, %vm5378_vm10 }
 0x8e5   :  { %v5175_v19 = vpop.permute.xlu0 %5174  ;;  %7463 = vmatprep.mubr.msk.f32.mxu0 %vm5442_vm14, %v15164_v32  ;;  %vm5441_vm13 = vmor %vm5249_vm9, %vm5313_vm0  ;;  %vm15314_vm14 = vcmp.lt.s32.totalorder %v12305_v56, %v15313_v18 }
 0x8e6   :  { %7464 = vmatmul.mubr.msk.f32.gmra.mrb[88].mxu0 %vm5441_vm13, %v15164_v32  ;;  %vm5252_vm12 = vcmp.gt.f32.partialorder %v12775_v51, %v5175_v19  ;;  %vm5316_vm1 = vcmp.eq.f32.partialorder %v12775_v51, %v5175_v19  ;;  %vm5251_vm6 = vcmp.gt.f32.partialorder %v12874_v10, %v5175_v19  ;;  %vm5315_vm15 = vcmp.eq.f32.partialorder %v12874_v10, %v5175_v19 }
 0x8e7   :  { %vm5380_vm11 = vmand %vm5316_vm1, %vm15312_vm7 }
 0x8e8   :  { %vm5444_vm2 = vmor %vm5252_vm12, %vm5380_vm11 }
 0x8e9   :  { %v5180_v55 = vpop.permute.xlu1 %5179  ;;  %7465 = vmatprep.mubr.msk.f32.mxu0 %vm5444_vm2, %v15164_v32  ;;  %vm5443_vm5 = vmor %vm5251_vm6, %vm5315_vm15  ;;  %vm15316_vm2 = vcmp.lt.s32.totalorder %v12305_v56, %v15315_v46 }
 0x8ea   :  { %7466 = vmatmul.mubr.msk.f32.gmra.mrb[90].mxu0 %vm5443_vm5, %v15164_v32  ;;  %vm5254_vm9 = vcmp.gt.f32.partialorder %v12775_v51, %v5180_v55  ;;  %vm5318_vm0 = vcmp.eq.f32.partialorder %v12775_v51, %v5180_v55  ;;  %vm5253_vm8 = vcmp.gt.f32.partialorder %v12874_v10, %v5180_v55  ;;  %vm5317_vm10 = vcmp.eq.f32.partialorder %v12874_v10, %v5180_v55 }
 0x8eb   :  { %vm5382_vm13 = vmand %vm5318_vm0, %vm15314_vm14 }
 0x8ec   :  { %vm5446_vm1 = vmor %vm5254_vm9, %vm5382_vm13 }
 0x8ed   :  { %v5185_v53 = vpop.permute.xlu0 %5184  ;;  %7467 = vmatprep.mubr.msk.f32.mxu0 %vm5446_vm1, %v15164_v32  ;;  %vm5445_vm12 = vmor %vm5253_vm8, %vm5317_vm10  ;;  %vm15318_vm1 = vcmp.lt.s32.totalorder %v12305_v56, %v15317_v36 }
 0x8ee   :  { %7468 = vmatmul.mubr.msk.f32.gmra.mrb[92].mxu0 %vm5445_vm12, %v15164_v32  ;;  %vm5256_vm6 = vcmp.gt.f32.partialorder %v12775_v51, %v5185_v53  ;;  %vm5320_vm15 = vcmp.eq.f32.partialorder %v12775_v51, %v5185_v53  ;;  %vm5255_vm7 = vcmp.gt.f32.partialorder %v12874_v10, %v5185_v53  ;;  %vm5319_vm11 = vcmp.eq.f32.partialorder %v12874_v10, %v5185_v53 }
 0x8ef   :  { %vm5384_vm5 = vmand %vm5320_vm15, %vm15316_vm2 }
 0x8f0   :  { %vm5448_vm0 = vmor %vm5256_vm6, %vm5384_vm5  ;;  %vm15320_vm5 = vcmp.lt.s32.totalorder %v12305_v56, %v15319_v60 }
 0x8f1   :  { %v5190_v7 = vpop.permute.xlu1 %5189  ;;  %7469 = vmatprep.mubr.msk.f32.mxu0 %vm5448_vm0, %v15164_v32  ;;  %vm5447_vm9 = vmor %vm5255_vm7, %vm5319_vm11 }
 0x8f2   :  { %7470 = vmatmul.mubr.msk.f32.gmra.mrb[94].mxu0 %vm5447_vm9, %v15164_v32  ;;  %vm5258_vm8 = vcmp.gt.f32.partialorder %v12775_v51, %v5190_v7  ;;  %vm5322_vm10 = vcmp.eq.f32.partialorder %v12775_v51, %v5190_v7  ;;  %vm5257_vm14 = vcmp.gt.f32.partialorder %v12874_v10, %v5190_v7  ;;  %vm5321_vm13 = vcmp.eq.f32.partialorder %v12874_v10, %v5190_v7 }
 0x8f3   :  { %vm5386_vm12 = vmand %vm5322_vm10, %vm15318_vm1  ;;  %vm15323_vm1 = vcmask 392512  }
 0x8f4   :  { %vm5450_vm15 = vmor %vm5258_vm8, %vm5386_vm12  ;;  %vm15326_vm12 = vcmask 589312  }
 0x8f5   :  { %v3746_v52 = vpop.permute.xlu1 %3745  ;;  %v5195_v49 = vpop.permute.xlu0 %5194  ;;  %7471 = vmatprep.mubr.msk.f32.mxu0 %vm5450_vm15, %v15164_v32  ;;  %vm5449_vm6 = vmor %vm5257_vm14, %vm5321_vm13  ;;  %vm15321_vm14 = vcmask 261312   ;;  %vm15322_vm13 = vcmask 326912   ;;  %vm15327_vm15 = vcmask 654912  }
 0x8f6   :  { %7472 = vmatmul.mubr.msk.f32.gmra.mrb[96].mxu0 %vm5449_vm6, %v15164_v32  ;;  %vm5260_vm7 = vcmp.gt.f32.partialorder %v12775_v51, %v5195_v49  ;;  %vm5324_vm11 = vcmp.eq.f32.partialorder %v12775_v51, %v5195_v49  ;;  %vm5259_vm2 = vcmp.gt.f32.partialorder %v12874_v10, %v5195_v49  ;;  %vm5323_vm9 = vcmp.eq.f32.partialorder %v12874_v10, %v5195_v49 }
 0x8f7   :  { %vm5388_vm0 = vmand %vm5324_vm11, %vm15320_vm5  ;;  %v3795_v55 = vrot.slane %v3746_v52, %v11862_v54  ;;  %vm15328_vm6 = vcmask 720512   ;;  %vm15330_vm11 = vcmask 851712  }
 0x8f8   :  { %vm5452_vm8 = vmor %vm5260_vm7, %vm5388_vm0  ;;  %vm15329_vm7 = vcmask 786112  }
 0x8f9   :  { %v3752_v38 = vpop.permute.xlu1 %3751  ;;  %v3749_v19 = vpop.permute.xlu0 %3748  ;;  %7473 = vmatprep.mubr.msk.f32.mxu0 %vm5452_vm8, %v15164_v32  ;;  %vm5451_vm10 = vmor %vm5259_vm2, %vm5323_vm9 }
 0x8fa   :  { %v3804_v53 = vrot.slane %v3752_v38, %v11871_v3  ;;  %v3799_v51 = vrot.slane %v3749_v19, %v11853_v0  ;;  %7474 = vmatmul.mubr.msk.f32.gmra.mrb[98].mxu0 %vm5451_vm10, %v15164_v32 }
 0x8fc   :  { %v3800_v7 = vsel %vm3261_vm3, %v3799_v51, %v3795_v55  ;;  %vm15324_vm3 = vcmask 458112  }
 0x8fd   :  { %v3758_v20 = vpop.permute.xlu1 %3757  ;;  %v3805_v16 = vsel %vm3268_vm4, %v3804_v53, %v3800_v7  ;;  %v3755_v10 = vpop.permute.xlu0 %3754  ;;  %vm15325_vm4 = vcmask 523712  }
 0x8fe   :  { %v3814_v49 = vrot.slane %v3758_v20, %v11888_v45  ;;  %v3809_v60 = vrot.slane %v3755_v10, %v11868_v31 }
 0x900   :  { %v3810_v36 = vsel %vm15321_vm14, %v3809_v60, %v3805_v16 }
 0x901   :  { %v3764_v46 = vpop.permute.xlu1 %3763  ;;  %v3815_v54 = vsel %vm15322_vm13, %v3814_v49, %v3810_v36  ;;  %v3761_v3 = vpop.permute.xlu0 %3760 }
 0x902   :  { %v3824_v0 = vrot.slane %v3764_v46, %v11902_v1  ;;  %v3819_v32 = vrot.slane %v3761_v3, %v11882_v28 }
 0x904   :  { %v3820_v52 = vsel %vm15323_vm1, %v3819_v32, %v3815_v54 }
 0x905   :  { %v3770_v38 = vpop.permute.xlu1 %3769  ;;  %v3825_v19 = vsel %vm15324_vm3, %v3824_v0, %v3820_v52  ;;  %v3767_v55 = vpop.permute.xlu0 %3766 }
 0x906   :  { %v3834_v20 = vrot.slane %v3770_v38, %v11911_v25  ;;  %v3829_v31 = vrot.slane %v3767_v55, %v11894_v37 }
 0x908   :  { %v3830_v45 = vsel %vm15325_vm4, %v3829_v31, %v3825_v19 }
 0x909   :  { %v3776_v16 = vpop.permute.xlu1 %3775  ;;  %v3835_v36 = vsel %vm15326_vm12, %v3834_v20, %v3830_v45  ;;  %v3773_v60 = vpop.permute.xlu0 %3772 }
 0x90a   :  { %v3844_v1 = vrot.slane %v3776_v16, %v11964_v5  ;;  %v3839_v28 = vrot.slane %v3773_v60, %v11908_v15 }
 0x90c   :  { %v3840_v46 = vsel %vm15327_vm15, %v3839_v28, %v3835_v36 }
 0x90d   :  { %v3782_v53 = vpop.permute.xlu1 %3781  ;;  %v3845_v51 = vsel %vm15328_vm6, %v3844_v1, %v3840_v46  ;;  %v3779_v7 = vpop.permute.xlu0 %3778 }
 0x90e   :  { %v3854_v25 = vrot.slane %v3782_v53, %v12008_v26  ;;  %v3849_v37 = vrot.slane %v3779_v7, %v11926_v12  ;;  %v13209_v10 = vpop.f32.mrb[34].mxu0 }
 0x90f   :  { %v13211_v49 = vpop.f32.mrb[35].mxu0 }
 0x910   :  { %v3850_v54 = vsel %vm15329_vm7, %v3849_v37, %v3845_v51 }
 0x911   :  { %v13215_v5 = vsel %vm15330_vm11, %v3854_v25, %v3850_v54 }
 0x94e   :  { %v5583_v15 = vpop.f32.mrb[36].mxu0 }
 0x94f   :  { %v8922_v3 = vtrunc.f32 %v5583_v15  ;;  %v5585_v0 = vpop.f32.mrb[37].mxu0 }
 0x951   :  { %v8923_v32 = vcvt.f32.s32 %v8922_v3 }
 0x952   :  { %v5588_v52 = vpop.f32.mrb[38].mxu0 }
 0x953   :  { %v8924_v38 = vtrunc.f32 %v5588_v52  ;;  %5775 = vperm.xlu1 %8997, %v8923_v32   ;;  %v5590_v19 = vpop.f32.mrb[39].mxu0 }
 0x955   :  { %v8925_v26 = vcvt.f32.s32 %v8924_v38 }
 0x956   :  { %v5593_v55 = vpop.f32.mrb[40].mxu0 }
 0x957   :  { %v8926_v12 = vtrunc.f32 %v5593_v55  ;;  %5778 = vperm.xlu0 %8996, %v8925_v26   ;;  %v5595_v20 = vpop.f32.mrb[41].mxu0 }
 0x959   :  { %v8927_v31 = vcvt.f32.s32 %v8926_v12 }
 0x95a   :  { %v5598_v45 = vpop.f32.mrb[42].mxu0 }
 0x95b   :  { %v8928_v16 = vtrunc.f32 %v5598_v45  ;;  %5781 = vperm.xlu1 %8997, %v8927_v31   ;;  %v5600_v36 = vpop.f32.mrb[43].mxu0 }
 0x95d   :  { %v8929_v60 = vcvt.f32.s32 %v8928_v16 }
 0x95e   :  { %v5603_v1 = vpop.f32.mrb[44].mxu0 }
 0x95f   :  { %v8930_v28 = vtrunc.f32 %v5603_v1  ;;  %5784 = vperm.xlu0 %8996, %v8929_v60   ;;  %v5605_v46 = vpop.f32.mrb[45].mxu0 }
 0x961   :  { %v8931_v53 = vcvt.f32.s32 %v8930_v28 }
 0x962   :  { %v5608_v51 = vpop.f32.mrb[46].mxu0 }
 0x963   :  { %v8932_v7 = vtrunc.f32 %v5608_v51  ;;  %5787 = vperm.xlu1 %8997, %v8931_v53   ;;  %v5610_v25 = vpop.f32.mrb[47].mxu0 }
 0x965   :  { %v8933_v37 = vcvt.f32.s32 %v8932_v7 }
 0x966   :  { %v5613_v54 = vpop.f32.mrb[48].mxu0 }
 0x967   :  { %v8934_v15 = vtrunc.f32 %v5613_v54  ;;  %5790 = vperm.xlu0 %8996, %v8933_v37   ;;  %v5615_v3 = vpop.f32.mrb[49].mxu0 }
 0x969   :  { %v8935_v0 = vcvt.f32.s32 %v8934_v15 }
 0x96a   :  { %v5618_v32 = vpop.f32.mrb[50].mxu0 }
 0x96b   :  { %v8936_v52 = vtrunc.f32 %v5618_v32  ;;  %5793 = vperm.xlu1 %8997, %v8935_v0   ;;  %v5620_v38 = vpop.f32.mrb[51].mxu0 }
 0x96d   :  { %v8937_v19 = vcvt.f32.s32 %v8936_v52 }
 0x96e   :  { %v5623_v26 = vpop.f32.mrb[52].mxu0 }
 0x96f   :  { %v8938_v55 = vtrunc.f32 %v5623_v26  ;;  %5796 = vperm.xlu0 %8996, %v8937_v19   ;;  %v5625_v12 = vpop.f32.mrb[53].mxu0 }
 0x971   :  { %v8939_v20 = vcvt.f32.s32 %v8938_v55 }
 0x972   :  { %v5628_v31 = vpop.f32.mrb[54].mxu0 }
 0x973   :  { %v8940_v45 = vtrunc.f32 %v5628_v31  ;;  %5799 = vperm.xlu1 %8997, %v8939_v20   ;;  %v5630_v16 = vpop.f32.mrb[55].mxu0 }
 0x975   :  { %v8941_v36 = vcvt.f32.s32 %v8940_v45 }
 0x976   :  { %v5633_v60 = vpop.f32.mrb[56].mxu0 }
 0x977   :  { %v8942_v1 = vtrunc.f32 %v5633_v60  ;;  %5802 = vperm.xlu0 %8996, %v8941_v36   ;;  %v5635_v28 = vpop.f32.mrb[57].mxu0 }
 0x979   :  { %v8943_v46 = vcvt.f32.s32 %v8942_v1 }
 0x97a   :  { %v5638_v53 = vpop.f32.mrb[58].mxu0 }
 0x97b   :  { %v8944_v51 = vtrunc.f32 %v5638_v53  ;;  %5805 = vperm.xlu1 %8997, %v8943_v46   ;;  %v5640_v7 = vpop.f32.mrb[59].mxu0 }
 0x97d   :  { %v8945_v25 = vcvt.f32.s32 %v8944_v51 }
 0x97e   :  { %v5643_v37 = vpop.f32.mrb[60].mxu0 }
 0x97f   :  { %v8946_v54 = vtrunc.f32 %v5643_v37  ;;  %5808 = vperm.xlu0 %8996, %v8945_v25   ;;  %v5645_v15 = vpop.f32.mrb[61].mxu0 }
 0x981   :  { %v8947_v3 = vcvt.f32.s32 %v8946_v54 }
 0x982   :  { %v5648_v0 = vpop.f32.mrb[62].mxu0 }
 0x983   :  { %v8948_v32 = vtrunc.f32 %v5648_v0  ;;  %5811 = vperm.xlu1 %8997, %v8947_v3   ;;  %v5650_v52 = vpop.f32.mrb[63].mxu0 }
 0x985   :  { %v8949_v38 = vcvt.f32.s32 %v8948_v32 }
 0x986   :  { %v5653_v19 = vpop.f32.mrb[64].mxu0 }
 0x987   :  { %v8950_v26 = vtrunc.f32 %v5653_v19  ;;  %5814 = vperm.xlu0 %8996, %v8949_v38   ;;  %v5655_v55 = vpop.f32.mrb[65].mxu0 }
 0x989   :  { %v8951_v12 = vcvt.f32.s32 %v8950_v26 }
 0x98a   :  { %v5658_v20 = vpop.f32.mrb[66].mxu0 }
 0x98b   :  { %v8952_v31 = vtrunc.f32 %v5658_v20  ;;  %5817 = vperm.xlu1 %8997, %v8951_v12   ;;  %v5660_v45 = vpop.f32.mrb[67].mxu0 }
 0x98d   :  { %v8953_v16 = vcvt.f32.s32 %v8952_v31 }
 0x98f   :  { %5820 = vperm.xlu0 %8996, %v8953_v16  }
 0x991   :  { %v5663_v36 = vpop.f32.mrb[68].mxu0 }
 0x992   :  { %v8954_v60 = vtrunc.f32 %v5663_v36  ;;  %v5665_v1 = vpop.f32.mrb[69].mxu0 }
 0x994   :  { %v8955_v28 = vcvt.f32.s32 %v8954_v60 }
 0x995   :  { %v5668_v46 = vpop.f32.mrb[70].mxu0 }
 0x996   :  { %v8956_v53 = vtrunc.f32 %v5668_v46  ;;  %5823 = vperm.xlu1 %8997, %v8955_v28   ;;  %v5670_v51 = vpop.f32.mrb[71].mxu0 }
 0x998   :  { %v8957_v7 = vcvt.f32.s32 %v8956_v53 }
 0x999   :  { %v5673_v25 = vpop.f32.mrb[72].mxu0 }
 0x99a   :  { %v8958_v37 = vtrunc.f32 %v5673_v25  ;;  %5826 = vperm.xlu0 %8996, %v8957_v7   ;;  %v5675_v54 = vpop.f32.mrb[73].mxu0 }
 0x99c   :  { %v8959_v15 = vcvt.f32.s32 %v8958_v37 }
 0x99d   :  { %v5678_v3 = vpop.f32.mrb[74].mxu0 }
 0x99e   :  { %v8960_v0 = vtrunc.f32 %v5678_v3  ;;  %5829 = vperm.xlu1 %8997, %v8959_v15   ;;  %v5680_v32 = vpop.f32.mrb[75].mxu0 }
 0x9a0   :  { %v8961_v52 = vcvt.f32.s32 %v8960_v0 }
 0x9a1   :  { %v5683_v38 = vpop.f32.mrb[76].mxu0 }
 0x9a2   :  { %v8962_v19 = vtrunc.f32 %v5683_v38  ;;  %5832 = vperm.xlu0 %8996, %v8961_v52   ;;  %v5685_v26 = vpop.f32.mrb[77].mxu0 }
 0x9a4   :  { %v8963_v55 = vcvt.f32.s32 %v8962_v19 }
 0x9a5   :  { %v5688_v12 = vpop.f32.mrb[78].mxu0 }
 0x9a6   :  { %v8964_v20 = vtrunc.f32 %v5688_v12  ;;  %5835 = vperm.xlu1 %8997, %v8963_v55   ;;  %v5690_v31 = vpop.f32.mrb[79].mxu0 }
 0x9a8   :  { %v8965_v45 = vcvt.f32.s32 %v8964_v20 }
 0x9a9   :  { %v5693_v16 = vpop.f32.mrb[80].mxu0 }
 0x9aa   :  { %v8966_v36 = vtrunc.f32 %v5693_v16  ;;  %5838 = vperm.xlu0 %8996, %v8965_v45   ;;  %v5695_v60 = vpop.f32.mrb[81].mxu0 }
 0x9ab   :  { %v15331_v60 = vld [vmem:[#allocation30_spill] sm:$0xff] }
 0x9ac   :  { %v8967_v1 = vcvt.f32.s32 %v8966_v36 }
 0x9ad   :  { %v5698_v28 = vpop.f32.mrb[82].mxu0 }
 0x9ae   :  { %v8968_v46 = vtrunc.f32 %v5698_v28  ;;  %5841 = vperm.xlu1 %8997, %v8967_v1   ;;  %v5700_v53 = vpop.f32.mrb[83].mxu0  ;;  %v3232_v1 = vmul.f32 1.442695, %v15331_v60 }
 0x9b0   :  { %v8969_v51 = vcvt.f32.s32 %v8968_v46  ;;  %9068 = vpow2.f32 %v3232_v1 }
 0x9b1   :  { %v5703_v7 = vpop.f32.mrb[84].mxu0 }
 0x9b2   :  { %v8970_v25 = vtrunc.f32 %v5703_v7  ;;  %5844 = vperm.xlu0 %8996, %v8969_v51   ;;  %v5705_v37 = vpop.f32.mrb[85].mxu0 }
 0x9b4   :  { %v8971_v54 = vcvt.f32.s32 %v8970_v25 }
 0x9b5   :  { %v5708_v15 = vpop.f32.mrb[86].mxu0 }
 0x9b6   :  { %v8972_v3 = vtrunc.f32 %v5708_v15  ;;  %5847 = vperm.xlu0 %8996, %v8971_v54   ;;  %v5710_v0 = vpop.f32.mrb[87].mxu0 }
 0x9b8   :  { %v8973_v32 = vcvt.f32.s32 %v8972_v3 }
 0x9b9   :  { %v5713_v52 = vpop.f32.mrb[88].mxu0 }
 0x9ba   :  { %v8974_v38 = vtrunc.f32 %v5713_v52  ;;  %5850 = vperm.xlu1 %8997, %v8973_v32   ;;  %v5715_v19 = vpop.f32.mrb[89].mxu0  ;;  %v13218_v52 = vpop.permute.xlu1 %3787 }
 0x9bb   :  { %v9069_v19 = vpop.eup %9068 }
 0x9bc   :  { %v8975_v26 = vcvt.f32.s32 %v8974_v38 }
 0x9bd   :  { %v5718_v55 = vpop.f32.mrb[90].mxu0 }
 0x9be   :  { %v8976_v12 = vtrunc.f32 %v5718_v55  ;;  %5853 = vperm.xlu0 %8996, %v8975_v26   ;;  %v5720_v20 = vpop.f32.mrb[91].mxu0  ;;  %v13220_v26 = vpop.permute.xlu0 %3784 }
 0x9c0   :  { %v8977_v31 = vcvt.f32.s32 %v8976_v12 }
 0x9c1   :  { %v5723_v45 = vpop.f32.mrb[92].mxu0 }
 0x9c2   :  { %v8978_v16 = vtrunc.f32 %v5723_v45  ;;  %5856 = vperm.xlu1 %8997, %v8977_v31   ;;  %v5725_v36 = vpop.f32.mrb[93].mxu0 }
 0x9c4   :  { %v8979_v28 = vcvt.f32.s32 %v8978_v16 }
 0x9c5   :  { %v5728_v46 = vpop.f32.mrb[94].mxu0 }
 0x9c6   :  { %v8980_v53 = vtrunc.f32 %v5728_v46  ;;  %5859 = vperm.xlu0 %8996, %v8979_v28   ;;  %v5730_v51 = vpop.f32.mrb[95].mxu0 }
 0x9c8   :  { %v8981_v7 = vcvt.f32.s32 %v8980_v53 }
 0x9c9   :  { %v5733_v25 = vpop.f32.mrb[96].mxu0 }
 0x9ca   :  { %v8982_v37 = vtrunc.f32 %v5733_v25  ;;  %5862 = vperm.xlu1 %8997, %v8981_v7   ;;  %v5735_v54 = vpop.f32.mrb[97].mxu0 }
 0x9cc   :  { %v8983_v15 = vcvt.f32.s32 %v8982_v37 }
 0x9cd   :  { %v5738_v3 = vpop.f32.mrb[98].mxu0 }
 0x9ce   :  { %v8984_v0 = vtrunc.f32 %v5738_v3  ;;  %5865 = vperm.xlu0 %8996, %v8983_v15   ;;  %v5740_v32 = vpop.f32.mrb[99].mxu0 }
 0x9d0   :  { %v8985_v38 = vcvt.f32.s32 %v8984_v0 }
 0x9d2   :  { %3790 = vperm.xlu0 %8996, %v9069_v19   ;;  %5868 = vperm.xlu1 %8997, %v8985_v38   ;;  %v5776_v55 = vpop.permute.xlu1 %5775 }
 0x9d3   :  { %vm5871_vm2 = vcmp.eq.s32.totalorder %v5776_v55, %v12305_v56  ;;  %vm5870_vm9 = vcmp.eq.s32.totalorder %v5776_v55, %v15114_v47 }
 0x9d6   :  { %v5779_v12 = vpop.permute.xlu0 %5778 }
 0x9d7   :  { %vm5872_vm5 = vcmp.eq.s32.totalorder %v5779_v12, %v15114_v47  ;;  %vm5873_vm0 = vcmp.eq.s32.totalorder %v5779_v12, %v12305_v56 }
 0x9d8   :  { %vm8580_vm8 = vmpackc.low %vm5873_vm0, %vm5871_vm2 }
 0x9d9   :  { %vm8582_vm10 = vmpackc.low %vm5872_vm5, %vm5870_vm9  ;;  %8581 = vmatprep.subr.msk.bf16.mxu1 %vm8580_vm8, %v15117_v6 }
 0x9da   :  { %8583 = vmatpush1.bf16.msk.msra.mxu1 %vm8582_vm10, %v15117_v6  ;;  %v5782_v20 = vpop.permute.xlu1 %5781 }
 0x9db   :  { %vm5875_vm14 = vcmp.eq.s32.totalorder %v5782_v20, %v12305_v56  ;;  %vm5874_vm3 = vcmp.eq.s32.totalorder %v5782_v20, %v15114_v47 }
 0x9de   :  { %v5785_v31 = vpop.permute.xlu0 %5784 }
 0x9df   :  { %vm5876_vm13 = vcmp.eq.s32.totalorder %v5785_v31, %v15114_v47  ;;  %vm5877_vm1 = vcmp.eq.s32.totalorder %v5785_v31, %v12305_v56 }
 0x9e0   :  { %vm8584_vm4 = vmpackc.low %vm5877_vm1, %vm5875_vm14 }
 0x9e1   :  { %vm8586_vm12 = vmpackc.low %vm5876_vm13, %vm5874_vm3  ;;  %8585 = vmatprep.subr.msk.bf16.mxu1 %vm8584_vm4, %v15117_v6 }
 0x9e2   :  { %8587 = vmatpush1.bf16.msk.msra.mxu1 %vm8586_vm12, %v15117_v6  ;;  %v5788_v45 = vpop.permute.xlu1 %5787 }
 0x9e3   :  { %vm5879_vm15 = vcmp.eq.s32.totalorder %v5788_v45, %v12305_v56  ;;  %vm5878_vm11 = vcmp.eq.s32.totalorder %v5788_v45, %v15114_v47 }
 0x9e6   :  { %v5791_v16 = vpop.permute.xlu0 %5790 }
 0x9e7   :  { %vm5880_vm6 = vcmp.eq.s32.totalorder %v5791_v16, %v15114_v47  ;;  %vm5881_vm7 = vcmp.eq.s32.totalorder %v5791_v16, %v12305_v56 }
 0x9e8   :  { %vm8588_vm2 = vmpackc.low %vm5881_vm7, %vm5879_vm15 }
 0x9e9   :  { %vm8590_vm5 = vmpackc.low %vm5880_vm6, %vm5878_vm11  ;;  %8589 = vmatprep.subr.msk.bf16.mxu1 %vm8588_vm2, %v15117_v6 }
 0x9ea   :  { %8591 = vmatpush1.bf16.msk.msra.mxu1 %vm8590_vm5, %v15117_v6  ;;  %v5794_v36 = vpop.permute.xlu1 %5793 }
 0x9eb   :  { %vm5883_vm0 = vcmp.eq.s32.totalorder %v5794_v36, %v12305_v56  ;;  %vm5882_vm10 = vcmp.eq.s32.totalorder %v5794_v36, %v15114_v47 }
 0x9ee   :  { %v5797_v60 = vpop.permute.xlu0 %5796 }
 0x9ef   :  { %vm5884_vm9 = vcmp.eq.s32.totalorder %v5797_v60, %v15114_v47  ;;  %vm5885_vm8 = vcmp.eq.s32.totalorder %v5797_v60, %v12305_v56  ;;  %v3859_v60 = vrot.slane %v13220_v26, %v11987_v9 }
 0x9f0   :  { %vm8592_vm14 = vmpackc.low %vm5885_vm8, %vm5883_vm0 }
 0x9f1   :  { %vm8594_vm13 = vmpackc.low %vm5884_vm9, %vm5882_vm10  ;;  %8593 = vmatprep.subr.msk.bf16.mxu1 %vm8592_vm14, %v15117_v6 }
 0x9f2   :  { %8595 = vmatpush1.bf16.msk.msra.mxu1 %vm8594_vm13, %v15117_v6  ;;  %v5800_v1 = vpop.permute.xlu1 %5799 }
 0x9f3   :  { %vm5887_vm1 = vcmp.eq.s32.totalorder %v5800_v1, %v12305_v56  ;;  %vm5886_vm12 = vcmp.eq.s32.totalorder %v5800_v1, %v15114_v47 }
 0x9f6   :  { %v5803_v28 = vpop.permute.xlu0 %5802 }
 0x9f7   :  { %vm5888_vm3 = vcmp.eq.s32.totalorder %v5803_v28, %v15114_v47  ;;  %vm5889_vm4 = vcmp.eq.s32.totalorder %v5803_v28, %v12305_v56  ;;  %v3864_v28 = vrot.slane %v13218_v52, %v12033_v63 }
 0x9f8   :  { %vm8596_vm15 = vmpackc.low %vm5889_vm4, %vm5887_vm1 }
 0x9f9   :  { %vm8598_vm6 = vmpackc.low %vm5888_vm3, %vm5886_vm12  ;;  %8597 = vmatprep.subr.msk.bf16.mxu1 %vm8596_vm15, %v15117_v6 }
 0x9fa   :  { %8599 = vmatpush1.bf16.msk.msra.mxu1 %vm8598_vm6, %v15117_v6  ;;  %v5806_v46 = vpop.permute.xlu1 %5805 }
 0x9fb   :  { %vm5891_vm7 = vcmp.eq.s32.totalorder %v5806_v46, %v12305_v56  ;;  %vm5890_vm5 = vcmp.eq.s32.totalorder %v5806_v46, %v15114_v47 }
 0x9fe   :  { %v5809_v53 = vpop.permute.xlu0 %5808 }
 0x9ff   :  { %vm5892_vm11 = vcmp.eq.s32.totalorder %v5809_v53, %v15114_v47  ;;  %vm5893_vm2 = vcmp.eq.s32.totalorder %v5809_v53, %v12305_v56 }
 0xa00   :  { %vm8600_vm0 = vmpackc.low %vm5893_vm2, %vm5891_vm7 }
 0xa01   :  { %vm8602_vm9 = vmpackc.low %vm5892_vm11, %vm5890_vm5  ;;  %8601 = vmatprep.subr.msk.bf16.mxu1 %vm8600_vm0, %v15117_v6 }
 0xa02   :  { %8603 = vmatpush1.bf16.msk.msra.mxu1 %vm8602_vm9, %v15117_v6  ;;  %v5812_v51 = vpop.permute.xlu1 %5811 }
 0xa03   :  { %vm5895_vm8 = vcmp.eq.s32.totalorder %v5812_v51, %v12305_v56  ;;  %vm5894_vm13 = vcmp.eq.s32.totalorder %v5812_v51, %v15114_v47 }
 0xa06   :  { %v5815_v7 = vpop.permute.xlu0 %5814 }
 0xa07   :  { %vm5896_vm10 = vcmp.eq.s32.totalorder %v5815_v7, %v15114_v47  ;;  %vm5897_vm14 = vcmp.eq.s32.totalorder %v5815_v7, %v12305_v56 }
 0xa08   :  { %vm8604_vm1 = vmpackc.low %vm5897_vm14, %vm5895_vm8 }
 0xa09   :  { %vm8606_vm3 = vmpackc.low %vm5896_vm10, %vm5894_vm13  ;;  %8605 = vmatprep.subr.msk.bf16.mxu1 %vm8604_vm1, %v15117_v6 }
 0xa0a   :  { %8607 = vmatpush1.bf16.msk.msra.mxu1 %vm8606_vm3, %v15117_v6  ;;  %v5818_v25 = vpop.permute.xlu1 %5817 }
 0xa0b   :  { %vm5899_vm4 = vcmp.eq.s32.totalorder %v5818_v25, %v12305_v56  ;;  %vm5898_vm6 = vcmp.eq.s32.totalorder %v5818_v25, %v15114_v47 }
 0xa0e   :  { %v5821_v37 = vpop.permute.xlu0 %5820 }
 0xa0f   :  { %vm5900_vm12 = vcmp.eq.s32.totalorder %v5821_v37, %v15114_v47  ;;  %vm5901_vm15 = vcmp.eq.s32.totalorder %v5821_v37, %v12305_v56 }
 0xa10   :  { %vm8608_vm7 = vmpackc.low %vm5901_vm15, %vm5899_vm4 }
 0xa11   :  { %vm8610_vm11 = vmpackc.low %vm5900_vm12, %vm5898_vm6  ;;  %8609 = vmatprep.subr.msk.bf16.mxu1 %vm8608_vm7, %v15117_v6 }
 0xa12   :  { %8611 = vmatpush1.bf16.msk.msra.mxu1 %vm8610_vm11, %v15117_v6 }
 0xa15   :  { %v5824_v54 = vpop.permute.xlu1 %5823 }
 0xa16   :  { %vm5903_vm2 = vcmp.eq.s32.totalorder %v5824_v54, %v12305_v56  ;;  %vm5902_vm9 = vcmp.eq.s32.totalorder %v5824_v54, %v15114_v47 }
 0xa19   :  { %v5827_v15 = vpop.permute.xlu0 %5826 }
 0xa1a   :  { %vm5904_vm5 = vcmp.eq.s32.totalorder %v5827_v15, %v15114_v47  ;;  %vm5905_vm0 = vcmp.eq.s32.totalorder %v5827_v15, %v12305_v56 }
 0xa1b   :  { %vm8612_vm8 = vmpackc.low %vm5905_vm0, %vm5903_vm2 }
 0xa1c   :  { %vm8614_vm10 = vmpackc.low %vm5904_vm5, %vm5902_vm9  ;;  %8613 = vmatprep.subr.msk.bf16.mxu1 %vm8612_vm8, %v15117_v6 }
 0xa1d   :  { %8615 = vmatpush1.bf16.msk.msra.mxu1 %vm8614_vm10, %v15117_v6  ;;  %v5830_v3 = vpop.permute.xlu1 %5829 }
 0xa1e   :  { %vm5907_vm14 = vcmp.eq.s32.totalorder %v5830_v3, %v12305_v56  ;;  %vm5906_vm3 = vcmp.eq.s32.totalorder %v5830_v3, %v15114_v47 }
 0xa21   :  { %v5833_v0 = vpop.permute.xlu0 %5832 }
 0xa22   :  { %vm5908_vm13 = vcmp.eq.s32.totalorder %v5833_v0, %v15114_v47  ;;  %vm5909_vm1 = vcmp.eq.s32.totalorder %v5833_v0, %v12305_v56 }
 0xa23   :  { %vm8616_vm4 = vmpackc.low %vm5909_vm1, %vm5907_vm14 }
 0xa24   :  { %vm8618_vm12 = vmpackc.low %vm5908_vm13, %vm5906_vm3  ;;  %8617 = vmatprep.subr.msk.bf16.mxu1 %vm8616_vm4, %v15117_v6 }
 0xa25   :  { %8619 = vmatpush1.bf16.msk.msra.mxu1 %vm8618_vm12, %v15117_v6  ;;  %v5836_v32 = vpop.permute.xlu1 %5835 }
 0xa26   :  { %vm5911_vm15 = vcmp.eq.s32.totalorder %v5836_v32, %v12305_v56  ;;  %vm5910_vm11 = vcmp.eq.s32.totalorder %v5836_v32, %v15114_v47 }
 0xa29   :  { %v5839_v38 = vpop.permute.xlu0 %5838 }
 0xa2a   :  { %vm5912_vm6 = vcmp.eq.s32.totalorder %v5839_v38, %v15114_v47  ;;  %vm5913_vm7 = vcmp.eq.s32.totalorder %v5839_v38, %v12305_v56 }
 0xa2b   :  { %vm8620_vm2 = vmpackc.low %vm5913_vm7, %vm5911_vm15 }
 0xa2c   :  { %vm8622_vm5 = vmpackc.low %vm5912_vm6, %vm5910_vm11  ;;  %8621 = vmatprep.subr.msk.bf16.mxu1 %vm8620_vm2, %v15117_v6 }
 0xa2d   :  { %8623 = vmatpush1.bf16.msk.msra.mxu1 %vm8622_vm5, %v15117_v6  ;;  %v5842_v19 = vpop.permute.xlu1 %5841 }
 0xa2e   :  { %vm5915_vm0 = vcmp.eq.s32.totalorder %v5842_v19, %v12305_v56  ;;  %vm5914_vm10 = vcmp.eq.s32.totalorder %v5842_v19, %v15114_v47 }
 0xa31   :  { %v5845_v55 = vpop.permute.xlu0 %5844 }
 0xa32   :  { %vm5916_vm9 = vcmp.eq.s32.totalorder %v5845_v55, %v15114_v47  ;;  %vm5917_vm8 = vcmp.eq.s32.totalorder %v5845_v55, %v12305_v56 }
 0xa33   :  { %vm8624_vm14 = vmpackc.low %vm5917_vm8, %vm5915_vm0 }
 0xa34   :  { %vm8626_vm13 = vmpackc.low %vm5916_vm9, %vm5914_vm10  ;;  %8625 = vmatprep.subr.msk.bf16.mxu1 %vm8624_vm14, %v15117_v6 }
 0xa35   :  { %8627 = vmatpush1.bf16.msk.msra.mxu1 %vm8626_vm13, %v15117_v6  ;;  %v5848_v12 = vpop.permute.xlu0 %5847 }
 0xa36   :  { %vm5919_vm1 = vcmp.eq.s32.totalorder %v5848_v12, %v12305_v56  ;;  %vm5918_vm12 = vcmp.eq.s32.totalorder %v5848_v12, %v15114_v47 }
 0xa39   :  { %v5851_v20 = vpop.permute.xlu1 %5850 }
 0xa3a   :  { %vm5920_vm3 = vcmp.eq.s32.totalorder %v5851_v20, %v15114_v47  ;;  %vm5921_vm4 = vcmp.eq.s32.totalorder %v5851_v20, %v12305_v56 }
 0xa3b   :  { %vm8628_vm15 = vmpackc.low %vm5921_vm4, %vm5919_vm1  ;;  %vm15332_vm4 = vcmask 917312  }
 0xa3c   :  { %vm8630_vm6 = vmpackc.low %vm5920_vm3, %vm5918_vm12  ;;  %8629 = vmatprep.subr.msk.bf16.mxu1 %vm8628_vm15, %v15117_v6  ;;  %v3860_v46 = vsel %vm15332_vm4, %v3859_v60, %v13215_v5 }
 0xa3d   :  { %8631 = vmatpush1.bf16.msk.msra.mxu1 %vm8630_vm6, %v15117_v6  ;;  %v5854_v31 = vpop.permute.xlu0 %5853 }
 0xa3e   :  { %vm5923_vm7 = vcmp.eq.s32.totalorder %v5854_v31, %v12305_v56  ;;  %vm5922_vm5 = vcmp.eq.s32.totalorder %v5854_v31, %v15114_v47 }
 0xa41   :  { %v5857_v45 = vpop.permute.xlu1 %5856 }
 0xa42   :  { %vm5924_vm11 = vcmp.eq.s32.totalorder %v5857_v45, %v15114_v47  ;;  %vm5925_vm2 = vcmp.eq.s32.totalorder %v5857_v45, %v12305_v56 }
 0xa43   :  { %vm8632_vm0 = vmpackc.low %vm5925_vm2, %vm5923_vm7 }
 0xa44   :  { %vm8634_vm9 = vmpackc.low %vm5924_vm11, %vm5922_vm5  ;;  %8633 = vmatprep.subr.msk.bf16.mxu1 %vm8632_vm0, %v15117_v6  ;;  %vm15333_vm11 = vcmask 982912   ;;  %vm15334_vm5 = vcmask 1048512  }
 0xa45   :  { %8635 = vmatpush1.bf16.msk.msra.mxu1 %vm8634_vm9, %v15117_v6  ;;  %v5860_v16 = vpop.permute.xlu0 %5859  ;;  %v3865_v9 = vsel %vm15333_vm11, %v3864_v28, %v3860_v46 }
 0xa46   :  { %vm5927_vm8 = vcmp.eq.s32.totalorder %v5860_v16, %v12305_v56  ;;  %vm5926_vm13 = vcmp.eq.s32.totalorder %v5860_v16, %v15114_v47 }
 0xa49   :  { %v5863_v36 = vpop.permute.xlu1 %5862 }
 0xa4a   :  { %vm5928_vm10 = vcmp.eq.s32.totalorder %v5863_v36, %v15114_v47  ;;  %vm5929_vm14 = vcmp.eq.s32.totalorder %v5863_v36, %v12305_v56 }
 0xa4b   :  { %vm8636_vm1 = vmpackc.low %vm5929_vm14, %vm5927_vm8 }
 0xa4c   :  { %vm8638_vm3 = vmpackc.low %vm5928_vm10, %vm5926_vm13  ;;  %8637 = vmatprep.subr.msk.bf16.mxu1 %vm8636_vm1, %v15117_v6 }
 0xa4d   :  { %8639 = vmatpush1.bf16.msk.msra.mxu1 %vm8638_vm3, %v15117_v6  ;;  %v5866_v1 = vpop.permute.xlu0 %5865 }
 0xa4e   :  { %vm5931_vm12 = vcmp.eq.s32.totalorder %v5866_v1, %v12305_v56  ;;  %vm5930_vm7 = vcmp.eq.s32.totalorder %v5866_v1, %v15114_v47 }
 0xa51   :  { %v3791_v53 = vpop.permute.xlu0 %3790  ;;  %v5869_v51 = vpop.permute.xlu1 %5868 }
 0xa52   :  { %v3869_v7 = vrot.slane %v3791_v53, %v12067_v11  ;;  %vm5932_vm15 = vcmp.eq.s32.totalorder %v5869_v51, %v15114_v47  ;;  %vm5933_vm6 = vcmp.eq.s32.totalorder %v5869_v51, %v12305_v56 }
 0xa53   :  { %vm8640_vm2 = vmpackc.low %vm5933_vm6, %vm5931_vm12 }
 0xa54   :  { %v3870_v63 = vsel %vm15334_vm5, %v3869_v7, %v3865_v9  ;;  %vm8642_vm0 = vmpackc.low %vm5932_vm15, %vm5930_vm7  ;;  %8641 = vmatprep.subr.msk.bf16.mxu1 %vm8640_vm2, %v15117_v6 }
 0xa55   :  { %v5043_v5 = vmul.f32 %v3870_v63, %v12865_v27  ;;  %8643 = vmatpush1.bf16.msk.msra.mxu1 %vm8642_vm0, %v15117_v6 }
 0xa58   :  { %6127 = vmatmul.mubr.f32.vlgmr.msra.gmra.mrb[112].mxu1 %v5043_v5 }
 0xb2b   :  { %v13328_v11 = vpop.f32.mrb[112].mxu1 }
 0xb2c   :  { %v13330_v52 = vpop.f32.mrb[113].mxu1 }
 0xb2d   :  { %9120 = dma.done.wait [#allocation6], 8192 }
 0xb2e   :  { %9121 = vsyncadd [#allocation6], 4294959104 }
 0xb2f   :  { %9122 = dma.done.wait [#allocation6 + $0x1], 128 }
 0xb30   :  { %9123 = vsyncadd [#allocation6 + $0x1], 4294967168  ;;  %v6143_v26 = vpack.c.bf16 %v13211_v49, %v13211_v49  ;;  %v6147_v25 = vld [vmem:[#allocation2 + $0x8] sm:$0xff]  ;;  %v6146_v37 = vld [vmem:[#allocation2] sm:$0xff]  ;;  %v6303_v49 = vshra.s32 %v15251_v41, 5  ;;  %v6304_v38 = vshra.s32 %v15255_v8, 5 }
 0xb31   :  { %v6149_v54 = vld [vmem:[#allocation2 + $0x18] sm:$0xff]  ;;  %6221 = vmatprep.subr.bf16.mxu1 %v6147_v25  ;;  %v6148_v6 = vld [vmem:[#allocation2 + $0x10] sm:$0xff]  ;;  %v6151_v27 = vld [vmem:[#allocation2 + $0x28] sm:$0xff]  ;;  %v13337_v19 = vshra.s32 %v12305_v56, 5  ;;  %v13340_v12 = vshra.s32 %v15114_v47, 5  ;;  %v6305_v31 = vshra.s32 %v15259_v23, 5 }
 0xb32   :  { %6253 = vmatprep.mubr.bf16.mxu1 %v6143_v26  ;;  %6222 = vmatpush1.bf16.msra.mxu1 %v6146_v37  ;;  %v6150_v15 = vld [vmem:[#allocation2 + $0x20] sm:$0xff]  ;;  %v6153_v3 = vld [vmem:[#allocation2 + $0x38] sm:$0xff]  ;;  %v6152_v0 = vld [vmem:[#allocation2 + $0x30] sm:$0xff]  ;;  %v6306_v45 = vshra.s32 %v15263_v39, 5  ;;  %v6307_v36 = vshra.s32 %v15265_v13, 5  ;;  %v6308_v60 = vshra.s32 %v15267_v62, 5 }
 0xb33   :  { %6223 = vmatprep.subr.bf16.mxu1 %v6149_v54  ;;  %v6155_v32 = vld [vmem:[#allocation2 + $0x48] sm:$0xff]  ;;  %v6154_v55 = vld [vmem:[#allocation2 + $0x40] sm:$0xff]  ;;  %v6157_v20 = vld [vmem:[#allocation2 + $0x58] sm:$0xff]  ;;  %vm13345_vm9 = vcmp.eq.s32.totalorder %v6303_v49, %v13337_v19  ;;  %vm13350_vm8 = vcmp.eq.s32.totalorder %v6304_v38, %v13337_v19  ;;  %vm13357_vm10 = vcmp.eq.s32.totalorder %v6303_v49, %v13340_v12  ;;  %vm13362_vm14 = vcmp.eq.s32.totalorder %v6304_v38, %v13340_v12 }
 0xb34   :  { %v6156_v1 = vld [vmem:[#allocation2 + $0x50] sm:$0xff]  ;;  %v6159_v53 = vld [vmem:[#allocation2 + $0x68] sm:$0xff]  ;;  %vm13367_vm13 = vcmp.eq.s32.totalorder %v6305_v31, %v13337_v19  ;;  %v15343_v51 = vmov 0  ;;  %vm13372_vm1 = vcmp.eq.s32.totalorder %v6306_v45, %v13337_v19  ;;  %v15345_v7 = vmov 0  ;;  %vm14786_vm3 = vmpackc.low %vm13350_vm8, %vm13345_vm9 }
 0xb35   :  { %v15344_v51 = vsel %vm13367_vm13, 4294967295, %v15343_v51  ;;  %v15346_v7 = vsel %vm13372_vm1, 4294967295, %v15345_v7  ;;  %vm13381_vm4 = vcmp.eq.s32.totalorder %v6305_v31, %v13340_v12  ;;  %v15347_v9 = vmov 0  ;;  %vm14784_vm15 = vmpackc.low %vm13362_vm14, %vm13357_vm10 }
 0xb36   :  { %6224 = vmatpush1.bf16.msra.mxu1 %v6148_v6  ;;  %v15348_v9 = vsel %vm13381_vm4, 4294967295, %v15347_v9  ;;  %vm13386_vm12 = vcmp.eq.s32.totalorder %v6306_v45, %v13340_v12  ;;  %v15349_v63 = vmov 0  ;;  %v14796_v5 = vmov 0.03125|0.03125   ;;  %v6158_v6 = vld [vmem:[#allocation2 + $0x60] sm:$0xff]  ;;  %vm14785_vm11 = vmpackc.low %vm13372_vm1, %vm13367_vm13 }
 0xb37   :  { %6225 = vmatprep.subr.bf16.mxu1 %v6151_v27  ;;  %v15350_v63 = vsel %vm13386_vm12, 4294967295, %v15349_v63  ;;  %8645 = vmatprep.subr.msk.bf16.mxu0 %vm14786_vm3, %v14796_v5  ;;  %vm13401_vm6 = vcmp.eq.s32.totalorder %v6307_v36, %v13337_v19  ;;  %v15351_v26 = vmov 0  ;;  %vm13406_vm7 = vcmp.eq.s32.totalorder %v6308_v60, %v13337_v19  ;;  %v6161_v27 = vld [vmem:[#allocation2 + $0x78] sm:$0xff]  ;;  %vm14789_vm2 = vmpackc.low %vm13386_vm12, %vm13381_vm4 }
 0xb38   :  { %v15352_v26 = vsel %vm13401_vm6, 4294967295, %v15351_v26  ;;  %v15353_v25 = vmov 0  ;;  %v6309_v37 = vshra.s32 %v15269_v34, 5  ;;  %v6310_v54 = vshra.s32 %v15271_v61, 5  ;;  %8647 = vmatpush1.bf16.msk.msra.mxu0 %vm14784_vm15, %v14796_v5  ;;  %vm14791_vm5 = vmpackc.low %vm13406_vm7, %vm13401_vm6 }
 0xb39   :  { %v15354_v25 = vsel %vm13406_vm7, 4294967295, %v15353_v25  ;;  %8649 = vmatprep.subr.msk.bf16.mxu0 %vm14785_vm11, %v14796_v5  ;;  %vm13437_vm0 = vcmp.eq.s32.totalorder %v6307_v36, %v13340_v12  ;;  %vm13442_vm15 = vcmp.eq.s32.totalorder %v6308_v60, %v13340_v12  ;;  %v6311_v49 = vshra.s32 %v15273_v57, 5 }
 0xb3a   :  { %6226 = vmatpush1.bf16.msra.mxu1 %v6150_v15  ;;  %v15355_v15 = vmov 0  ;;  %vm13447_vm11 = vcmp.eq.s32.totalorder %v6309_v37, %v13337_v19  ;;  %vm13452_vm3 = vcmp.eq.s32.totalorder %v6310_v54, %v13337_v19  ;;  %v6312_v38 = vshra.s32 %v15275_v14, 5  ;;  %vm15371_vm1 = vmpackc.low %vm13442_vm15, %vm13437_vm0 }
 0xb3b   :  { %6227 = vmatprep.subr.bf16.mxu1 %v6153_v3  ;;  %v15356_v15 = vsel %vm13437_vm0, 4294967295, %v15355_v15  ;;  %v15357_v3 = vmov 0  ;;  %v15363_v31 = vmov 0  ;;  %vm13484_vm4 = vcmp.eq.s32.totalorder %v6310_v54, %v13340_v12  ;;  %v6165_v54 = vld [vmem:[#allocation2 + $0x98] sm:$0xff]  ;;  %vm15372_vm6 = vmpackc.low %vm13452_vm3, %vm13447_vm11 }
 0xb3c   :  { %v15358_v3 = vsel %vm13442_vm15, 4294967295, %v15357_v3  ;;  %8651 = vmatpush1.bf16.msk.msra.mxu0 %vm14789_vm2, %v14796_v5  ;;  %vm13479_vm2 = vcmp.eq.s32.totalorder %v6309_v37, %v13340_v12  ;;  %v15365_v45 = vmov 0  ;;  %v15367_v36 = vmov 0  ;;  %v6162_v37 = vld [vmem:[#allocation2 + $0x80] sm:$0xff] }
 0xb3d   :  { %8653 = vmatprep.subr.msk.bf16.mxu0 %vm14791_vm5, %v14796_v5  ;;  %v15364_v31 = vsel %vm13479_vm2, 4294967295, %v15363_v31  ;;  %v15366_v45 = vsel %vm13484_vm4, 4294967295, %v15365_v45  ;;  %vm13489_vm5 = vcmp.eq.s32.totalorder %v6311_v49, %v13337_v19  ;;  %vm13494_vm13 = vcmp.eq.s32.totalorder %v6312_v38, %v13337_v19  ;;  %vm15382_vm12 = vmpackc.low %vm13484_vm4, %vm13479_vm2 }
 0xb3e   :  { %6228 = vmatpush1.bf16.msra.mxu1 %v6152_v0  ;;  %v15359_v0 = vmov 0  ;;  %v15368_v36 = vsel %vm13489_vm5, 4294967295, %v15367_v36  ;;  %v15369_v60 = vmov 0  ;;  %vm13526_vm0 = vcmp.eq.s32.totalorder %v6312_v38, %v13340_v12  ;;  %v6164_v38 = vld [vmem:[#allocation2 + $0x90] sm:$0xff] }
 0xb3f   :  { %6229 = vmatprep.subr.bf16.mxu1 %v6155_v32  ;;  %v15360_v0 = vsel %vm13447_vm11, 4294967295, %v15359_v0  ;;  %v15361_v32 = vmov 0  ;;  %v15370_v60 = vsel %vm13494_vm13, 4294967295, %v15369_v60  ;;  %vm15383_vm11 = vmpackc.low %vm13494_vm13, %vm13489_vm5  ;;  %v6318_v14 = vshra.s32 %v15287_v44, 5 }
 0xb40   :  { %v15362_v32 = vsel %vm13452_vm3, 4294967295, %v15361_v32  ;;  %8655 = vmatpush1.bf16.msk.msra.mxu0 %vm15371_vm1, %v14796_v5  ;;  %vm13521_vm1 = vcmp.eq.s32.totalorder %v6311_v49, %v13340_v12  ;;  %v6315_v49 = vshra.s32 %v15281_v50, 5  ;;  %v15388_v50 = vmov 0 }
 0xb41   :  { %8657 = vmatprep.subr.msk.bf16.mxu0 %vm15372_vm6, %v14796_v5  ;;  %v6316_v5 = vshra.s32 %v15283_v40, 5  ;;  %v15386_v40 = vmov 0  ;;  %vm15392_vm15 = vmpackc.low %vm13526_vm0, %vm13521_vm1  ;;  %v15396_v44 = vmov 0  ;;  %vm13620_vm13 = vcmp.eq.s32.totalorder %v6318_v14, %v13337_v19 }
 0xb42   :  { %6230 = vmatpush1.bf16.msra.mxu1 %v6154_v55  ;;  %v6160_v55 = vld [vmem:[#allocation2 + $0x70] sm:$0xff]  ;;  %v15400_v57 = vmov 0  ;;  %v6320_v61 = vshra.s32 %v15291_v22, 5  ;;  %v15406_v22 = vmov 0  ;;  %v15410_v34 = vmov 0 }
 0xb43   :  { %6231 = vmatprep.subr.bf16.mxu1 %v6157_v20  ;;  %v6163_v20 = vld [vmem:[#allocation2 + $0x88] sm:$0xff]  ;;  %vm13578_vm3 = vcmp.eq.s32.totalorder %v6316_v5, %v13337_v19  ;;  %v15401_v57 = vsel %vm13620_vm13, 4294967295, %v15400_v57  ;;  %v6322_v62 = vshra.s32 %v15295_v48, 5  ;;  %v15416_v48 = vmov 0 }
 0xb44   :  { %v15421_v13 = vmov 0  ;;  %v6324_v39 = vshra.s32 %v15299_v17, 5  ;;  %v15427_v17 = vmov 0  ;;  %v15432_v23 = vmov 0 }
 0xb45   :  { %v6326_v47 = vshra.s32 %v15303_v4, 5  ;;  %v15439_v4 = vmov 0  ;;  %v15444_v8 = vmov 0 }
 0xb46   :  { %6232 = vmatpush1.bf16.msra.mxu1 %v6156_v1  ;;  %v6313_v1 = vshra.s32 %v15277_v58, 5  ;;  %v15390_v58 = vmov 0 }
 0xb47   :  { %6233 = vmatprep.subr.bf16.mxu1 %v6159_v53  ;;  %v6314_v53 = vshra.s32 %v15279_v2, 5  ;;  %v15381_v2 = vmov 0.03125|0.03125   ;;  %v15391_v58 = vsel %vm13578_vm3, 4294967295, %v15390_v58 }
 0xb48   :  { %vm13531_vm6 = vcmp.eq.s32.totalorder %v6313_v1, %v13337_v19  ;;  %8659 = vmatpush1.bf16.msk.msra.mxu0 %vm15382_vm12, %v15381_v2  ;;  %vm13563_vm12 = vcmp.eq.s32.totalorder %v6313_v1, %v13340_v12  ;;  %v6317_v1 = vshra.s32 %v15285_v24, 5  ;;  %v15398_v24 = vmov 0 }
 0xb49   :  { %vm13536_vm7 = vcmp.eq.s32.totalorder %v6314_v53, %v13337_v19  ;;  %8661 = vmatprep.subr.msk.bf16.mxu0 %vm15383_vm11, %v15381_v2  ;;  %vm13568_vm2 = vcmp.eq.s32.totalorder %v6314_v53, %v13340_v12  ;;  %vm13573_vm11 = vcmp.eq.s32.totalorder %v6315_v49, %v13337_v19  ;;  %v6166_v53 = vld [vmem:[#allocation2 + $0xa0] sm:$0xff] }
 0xb4a   :  { %6234 = vmatpush1.bf16.msra.mxu1 %v6158_v6  ;;  %v15373_v6 = vmov 0  ;;  %v15387_v40 = vsel %vm13568_vm2, 4294967295, %v15386_v40  ;;  %v15389_v50 = vsel %vm13573_vm11, 4294967295, %v15388_v50  ;;  %vm15393_vm5 = vmpackc.low %vm13536_vm7, %vm13531_vm6 }
 0xb4b   :  { %6235 = vmatprep.subr.bf16.mxu1 %v6161_v27  ;;  %v15374_v6 = vsel %vm13521_vm1, 4294967295, %v15373_v6  ;;  %v15375_v27 = vmov 0  ;;  %vm13610_vm1 = vcmp.eq.s32.totalorder %v6316_v5, %v13340_v12  ;;  %v6168_v5 = vld [vmem:[#allocation2 + $0xb0] sm:$0xff]  ;;  %vm15402_vm4 = vmpackc.low %vm13568_vm2, %vm13563_vm12 }
 0xb4c   :  { %v15376_v27 = vsel %vm13526_vm0, 4294967295, %v15375_v27  ;;  %8663 = vmatpush1.bf16.msk.msra.mxu0 %vm15392_vm15, %v15381_v2  ;;  %vm13605_vm15 = vcmp.eq.s32.totalorder %v6315_v49, %v13340_v12  ;;  %v15397_v44 = vsel %vm13610_vm1, 4294967295, %v15396_v44  ;;  %v6319_v49 = vshra.s32 %v15289_v43, 5 }
 0xb4d   :  { %8665 = vmatprep.subr.msk.bf16.mxu0 %vm15393_vm5, %v15381_v2  ;;  %vm13615_vm5 = vcmp.eq.s32.totalorder %v6317_v1, %v13337_v19  ;;  %v15404_v43 = vmov 0  ;;  %vm15412_vm0 = vmpackc.low %vm13610_vm1, %vm13605_vm15 }
 0xb4e   :  { %6236 = vmatpush1.bf16.msra.mxu1 %v6160_v55  ;;  %v15377_v55 = vmov 0  ;;  %v15399_v24 = vsel %vm13615_vm5, 4294967295, %v15398_v24 }
 0xb4f   :  { %6237 = vmatprep.subr.bf16.mxu1 %v6163_v20  ;;  %v15378_v55 = vsel %vm13531_vm6, 4294967295, %v15377_v55  ;;  %v15379_v20 = vmov 0  ;;  %vm15403_vm6 = vmpackc.low %vm13578_vm3, %vm13573_vm11  ;;  %vm13704_vm3 = vcmp.eq.s32.totalorder %v6322_v62, %v13337_v19 }
 0xb50   :  { %v15380_v20 = vsel %vm13536_vm7, 4294967295, %v15379_v20  ;;  %8667 = vmatpush1.bf16.msk.msra.mxu0 %vm15402_vm4, %v15381_v2  ;;  %vm13647_vm4 = vcmp.eq.s32.totalorder %v6317_v1, %v13340_v12  ;;  %vm13662_vm7 = vcmp.eq.s32.totalorder %v6320_v61, %v13337_v19  ;;  %v6321_v1 = vshra.s32 %v15293_v59, 5  ;;  %vm15413_vm11 = vmpackc.low %vm13620_vm13, %vm13615_vm5 }
 0xb51   :  { %8669 = vmatprep.subr.msk.bf16.mxu0 %vm15403_vm6, %v15381_v2  ;;  %v15405_v43 = vsel %vm13647_vm4, 4294967295, %v15404_v43  ;;  %vm13657_vm6 = vcmp.eq.s32.totalorder %v6319_v49, %v13337_v19  ;;  %v15411_v34 = vsel %vm13662_vm7, 4294967295, %v15410_v34  ;;  %v15414_v59 = vmov 0 }
 0xb52   :  { %6238 = vmatpush1.bf16.msra.mxu1 %v6162_v37  ;;  %v6167_v37 = vld [vmem:[#allocation2 + $0xa8] sm:$0xff]  ;;  %v15422_v13 = vsel %vm13704_vm3, 4294967295, %v15421_v13  ;;  %vm15424_vm5 = vmpackc.low %vm13662_vm7, %vm13657_vm6  ;;  %vm13746_vm13 = vcmp.eq.s32.totalorder %v6324_v39, %v13337_v19  ;;  %vm13788_vm7 = vcmp.eq.s32.totalorder %v6326_v47, %v13337_v19 }
 0xb53   :  { %6239 = vmatprep.subr.bf16.mxu1 %v6165_v54  ;;  %v15384_v54 = vmov 0  ;;  %v15433_v23 = vsel %vm13746_vm13, 4294967295, %v15432_v23  ;;  %v15445_v8 = vsel %vm13788_vm7, 4294967295, %v15444_v8 }
 0xb54   :  { %v15385_v54 = vsel %vm13563_vm12, 4294967295, %v15384_v54  ;;  %vm13652_vm12 = vcmp.eq.s32.totalorder %v6318_v14, %v13340_v12  ;;  %v6170_v14 = vld [vmem:[#allocation2 + $0xc0] sm:$0xff]  ;;  %8671 = vmatpush1.bf16.msk.msra.mxu0 %vm15412_vm0, %v15381_v2  ;;  %vm13689_vm0 = vcmp.eq.s32.totalorder %v6319_v49, %v13340_v12  ;;  %v6323_v49 = vshra.s32 %v15297_v35, 5  ;;  %15434 = vst [vmem:[#allocation41_spill] sm:$0xff] %v15433_v23  ;;  %15446 = vst [vmem:[#allocation43_spill] sm:$0xff] %v15445_v8 }
 0xb55   :  { %v15407_v22 = vsel %vm13652_vm12, 4294967295, %v15406_v22  ;;  %8673 = vmatprep.subr.msk.bf16.mxu0 %vm15413_vm11, %v15381_v2  ;;  %v15415_v59 = vsel %vm13689_vm0, 4294967295, %v15414_v59  ;;  %vm13699_vm11 = vcmp.eq.s32.totalorder %v6321_v1, %v13337_v19  ;;  %vm15423_vm2 = vmpackc.low %vm13652_vm12, %vm13647_vm4  ;;  %v15425_v35 = vmov 0 }
 0xb56   :  { %6240 = vmatpush1.bf16.msra.mxu1 %v6164_v38  ;;  %v6169_v38 = vld [vmem:[#allocation2 + $0xb8] sm:$0xff]  ;;  %vm13736_vm4 = vcmp.eq.s32.totalorder %v6322_v62, %v13340_v12  ;;  %v6174_v62 = vld [vmem:[#allocation2 + $0xe0] sm:$0xff]  ;;  %v6330_v23 = vshra.s32 %v15311_v21, 5 }
 0xb57   :  { %6241 = vmatprep.subr.bf16.mxu1 %v6167_v37  ;;  %v15394_v37 = vmov 0  ;;  %v15428_v17 = vsel %vm13736_vm4, 4294967295, %v15427_v17 }
 0xb58   :  { %v15395_v37 = vsel %vm13605_vm15, 4294967295, %v15394_v37  ;;  %vm13694_vm15 = vcmp.eq.s32.totalorder %v6320_v61, %v13340_v12  ;;  %v6172_v61 = vld [vmem:[#allocation2 + $0xd0] sm:$0xff]  ;;  %8675 = vmatpush1.bf16.msk.msra.mxu0 %vm15423_vm2, %v15381_v2  ;;  %vm13731_vm2 = vcmp.eq.s32.totalorder %v6321_v1, %v13340_v12  ;;  %v6325_v1 = vshra.s32 %v15301_v42, 5 }
 0xb59   :  { %v15417_v48 = vsel %vm13694_vm15, 4294967295, %v15416_v48  ;;  %8677 = vmatprep.subr.msk.bf16.mxu0 %vm15424_vm5, %v15381_v2  ;;  %v15426_v35 = vsel %vm13731_vm2, 4294967295, %v15425_v35  ;;  %vm13741_vm5 = vcmp.eq.s32.totalorder %v6323_v49, %v13337_v19  ;;  %vm15435_vm1 = vmpackc.low %vm13694_vm15, %vm13689_vm0  ;;  %v15437_v42 = vmov 0 }
 0xb5a   :  { %6242 = vmatpush1.bf16.msra.mxu1 %v6166_v53  ;;  %v6171_v53 = vld [vmem:[#allocation2 + $0xc8] sm:$0xff]  ;;  %vm13778_vm0 = vcmp.eq.s32.totalorder %v6324_v39, %v13340_v12  ;;  %v6176_v39 = vld [vmem:[#allocation2 + $0xf0] sm:$0xff]  ;;  %vm15447_vm12 = vmpackc.low %vm13736_vm4, %vm13731_vm2  ;;  %vm13819_vm2 = vcmp.eq.s32.totalorder %v6325_v1, %v13340_v12  ;;  %vm13876_vm4 = vcmp.eq.s32.totalorder %v6330_v23, %v13337_v19 }
 0xb5b   :  { %6243 = vmatprep.subr.bf16.mxu1 %v6169_v38  ;;  %v15408_v38 = vmov 0  ;;  %v15440_v4 = vsel %vm13778_vm0, 4294967295, %v15439_v4 }
 0xb5c   :  { %v15409_v38 = vsel %vm13657_vm6, 4294967295, %v15408_v38  ;;  %8679 = vmatpush1.bf16.msk.msra.mxu0 %vm15435_vm1, %v15381_v2  ;;  %vm15436_vm6 = vmpackc.low %vm13704_vm3, %vm13699_vm11  ;;  %vm13773_vm1 = vcmp.eq.s32.totalorder %v6323_v49, %v13340_v12  ;;  %v6327_v49 = vshra.s32 %v15305_v29, 5  ;;  %v6142_v29 = vpack.c.bf16 %v13209_v10, %v13209_v10 }
 0xb5d   :  { %8681 = vmatprep.subr.msk.bf16.mxu0 %vm15436_vm6, %v15381_v2  ;;  %v15438_v42 = vsel %vm13773_vm1, 4294967295, %v15437_v42  ;;  %vm13783_vm6 = vcmp.eq.s32.totalorder %v6325_v1, %v13337_v19  ;;  %v15453_v10 = vmov 0  ;;  %v6329_v1 = vshra.s32 %v15309_v33, 5 }
 0xb5e   :  { %6244 = vmatpush1.bf16.msra.mxu1 %v6168_v5  ;;  %v6173_v5 = vld [vmem:[#allocation2 + $0xd8] sm:$0xff]  ;;  %vm13829_vm3 = vcmp.eq.s32.totalorder %v6327_v49, %v13337_v19  ;;  %v15459_v33 = vmov 0 }
 0xb5f   :  { %6245 = vmatprep.subr.bf16.mxu1 %v6171_v53  ;;  %v15418_v53 = vmov 0  ;;  %v15454_v10 = vsel %vm13829_vm3, 4294967295, %v15453_v10 }
 0xb60   :  { %v15419_v53 = vsel %vm13699_vm11, 4294967295, %v15418_v53  ;;  %8683 = vmatpush1.bf16.msk.msra.mxu0 %vm15447_vm12, %v15381_v2  ;;  %vm15448_vm11 = vmpackc.low %vm13746_vm13, %vm13741_vm5 }
 0xb61   :  { %15420 = vst [vmem:[#allocation35_spill] sm:$0xff] %v15419_v53  ;;  %v6328_v53 = vshra.s32 %v15307_v30, 5  ;;  %8685 = vmatprep.subr.msk.bf16.mxu0 %vm15448_vm11, %v15381_v2  ;;  %v6145_v30 = vpack.c.bf16 %v13330_v52, %v13330_v52  ;;  %vm13824_vm11 = vcmp.eq.s32.totalorder %v6326_v47, %v13340_v12  ;;  %v15455_v52 = vmov 0  ;;  %v6178_v47 = vld [vmem:[#allocation2 + $0x100] sm:$0xff]  ;;  %vm15457_vm12 = vmpackc.low %vm13778_vm0, %vm13773_vm1 }
 0xb62   :  { %6246 = vmatpush1.bf16.msra.mxu1 %v6170_v14  ;;  %v6175_v14 = vld [vmem:[#allocation2 + $0xe8] sm:$0xff]  ;;  %vm15458_vm13 = vmpackc.low %vm13788_vm7, %vm13783_vm6 }
 0xb63   :  { %6247 = vmatprep.subr.bf16.mxu1 %v6173_v5  ;;  %v15429_v5 = vmov 0  ;;  %vm13866_vm0 = vcmp.eq.s32.totalorder %v6328_v53, %v13340_v12  ;;  %vm15470_vm1 = vmpackc.low %vm13824_vm11, %vm13819_vm2 }
 0xb64   :  { %v15430_v5 = vsel %vm13741_vm5, 4294967295, %v15429_v5  ;;  %vm13834_vm5 = vcmp.eq.s32.totalorder %v6328_v53, %v13337_v19  ;;  %8687 = vmatpush1.bf16.msk.msra.mxu0 %vm15457_vm12, %v15381_v2  ;;  %vm13861_vm12 = vcmp.eq.s32.totalorder %v6327_v49, %v13340_v12  ;;  %v6331_v49 = vshra.s32 %v15313_v18, 5  ;;  %v6180_v53 = vld [vmem:[#allocation2 + $0x110] sm:$0xff] }
 0xb65   :  { %15431 = vst [vmem:[#allocation29_spill] sm:$0xff] %v15430_v5  ;;  %v15451_v5 = vmov 0  ;;  %v15456_v52 = vsel %vm13834_vm5, 4294967295, %v15455_v52  ;;  %8689 = vmatprep.subr.msk.bf16.mxu0 %vm15458_vm13, %v15381_v2  ;;  %v15460_v33 = vsel %vm13861_vm12, 4294967295, %v15459_v33  ;;  %vm13871_vm13 = vcmp.eq.s32.totalorder %v6329_v1, %v13337_v19  ;;  %vm15484_vm15 = vmpackc.low %vm13866_vm0, %vm13861_vm12 }
 0xb66   :  { %6248 = vmatpush1.bf16.msra.mxu1 %v6172_v61  ;;  %v6177_v61 = vld [vmem:[#allocation2 + $0xf8] sm:$0xff]  ;;  %v15452_v5 = vsel %vm13824_vm11, 4294967295, %v15451_v5  ;;  %v15472_v18 = vmov 0 }
 0xb67   :  { %6249 = vmatprep.subr.bf16.mxu1 %v6175_v14  ;;  %v15441_v14 = vmov 0 }
 0xb68   :  { %v15442_v14 = vsel %vm13783_vm6, 4294967295, %v15441_v14  ;;  %8691 = vmatpush1.bf16.msk.msra.mxu0 %vm15470_vm1, %v15381_v2  ;;  %vm15471_vm6 = vmpackc.low %vm13834_vm5, %vm13829_vm3  ;;  %vm13903_vm1 = vcmp.eq.s32.totalorder %v6329_v1, %v13340_v12  ;;  %v6182_v1 = vld [vmem:[#allocation2 + $0x120] sm:$0xff] }
 0xb69   :  { %15443 = vst [vmem:[#allocation34_spill] sm:$0xff] %v15442_v14  ;;  %v15469_v14 = vld [vmem:[#allocation75_spill] sm:$0xff]  ;;  %8693 = vmatprep.subr.msk.bf16.mxu0 %vm15471_vm6, %v15381_v2  ;;  %v15473_v18 = vsel %vm13903_vm1, 4294967295, %v15472_v18  ;;  %vm13913_vm6 = vcmp.eq.s32.totalorder %v6331_v49, %v13337_v19  ;;  %vm15485_vm3 = vmpackc.low %vm13876_vm4, %vm13871_vm13 }
 0xb6a   :  { %6250 = vmatpush1.bf16.msra.mxu1 %v6174_v62  ;;  %v6179_v62 = vld [vmem:[#allocation2 + $0x108] sm:$0xff]  ;;  %v6332_v8 = vshra.s32 %v15469_v14, 5  ;;  %15474 = vst [vmem:[#allocation42_spill] sm:$0xff] %v15473_v18  ;;  %v15475_v14 = vmov 0  ;;  %v6197_v18 = vld [vmem:[#allocation2 + $0x198] sm:$0xff] }
 0xb6b   :  { %6251 = vmatprep.subr.bf16.mxu1 %v6177_v61  ;;  %v15449_v61 = vmov 0 }
 0xb6c   :  { %v15450_v61 = vsel %vm13819_vm2, 4294967295, %v15449_v61  ;;  %vm13908_vm2 = vcmp.eq.s32.totalorder %v6330_v23, %v13340_v12  ;;  %vm13918_vm7 = vcmp.eq.s32.totalorder %v6332_v8, %v13337_v19  ;;  %8695 = vmatpush1.bf16.msk.msra.mxu0 %vm15484_vm15, %v15381_v2  ;;  %v6185_v23 = vld [vmem:[#allocation2 + $0x138] sm:$0xff]  ;;  %vm13943_vm15 = vcmp.eq.s32.totalorder %v6331_v49, %v13340_v12 }
 0xb6d   :  { %v15476_v14 = vsel %vm13908_vm2, 4294967295, %v15475_v14  ;;  %8697 = vmatprep.subr.msk.bf16.mxu0 %vm15485_vm3, %v15381_v2  ;;  %vm14869_vm5 = vmpackc.low %vm13908_vm2, %vm13903_vm1  ;;  %vm13948_vm12 = vcmp.eq.s32.totalorder %v6332_v8, %v13340_v12  ;;  %v6186_v8 = vld [vmem:[#allocation2 + $0x140] sm:$0xff]  ;;  %v6189_v49 = vld [vmem:[#allocation2 + $0x158] sm:$0xff] }
 0xb6e   :  { %6252 = vmatpush1.bf16.msra.mxu1 %v6176_v39  ;;  %v6181_v39 = vld [vmem:[#allocation2 + $0x118] sm:$0xff]  ;;  %15477 = vst [vmem:[#allocation126_spill] sm:$0xff] %v15476_v14  ;;  %vm14868_vm11 = vmpackc.low %vm13918_vm7, %vm13913_vm6  ;;  %v6199_v14 = vld [vmem:[#allocation2 + $0x1a8] sm:$0xff] }
 0xb6f   :  { %6262 = vmatprep.subr.bf16.mxu1 %v6179_v62  ;;  %v15463_v62 = vmov 0  ;;  %vm14867_vm3 = vmpackc.low %vm13948_vm12, %vm13943_vm15 }
 0xb70   :  { %v15464_v62 = vsel %vm13871_vm13, 4294967295, %v15463_v62  ;;  %8699 = vmatpush1.bf16.msk.msra.mxu0 %vm14869_vm5, %v15381_v2 }
 0xb71   :  { %6254 = vmatmul.mubr.bf16.vlgmr.msra.gmra.mrb[116].mxu1 %v6142_v29  ;;  %15465 = vst [vmem:[#allocation40_spill] sm:$0xff] %v15464_v62  ;;  %v15466_v29 = vmov 0  ;;  %v6184_v62 = vld [vmem:[#allocation2 + $0x130] sm:$0xff]  ;;  %8701 = vmatprep.subr.msk.bf16.mxu0 %vm14868_vm11, %v15381_v2 }
 0xb72   :  { %6263 = vmatpush1.bf16.msra.mxu1 %v6178_v47  ;;  %6294 = vmatprep.mubr.bf16.mxu1 %v6145_v30  ;;  %v15467_v29 = vsel %vm13876_vm4, 4294967295, %v15466_v29  ;;  %v6183_v30 = vld [vmem:[#allocation2 + $0x128] sm:$0xff]  ;;  %v15478_v47 = vmov 0 }
 0xb73   :  { %15468 = vst [vmem:[#allocation33_spill] sm:$0xff] %v15467_v29  ;;  %6264 = vmatprep.subr.bf16.mxu1 %v6181_v39  ;;  %v15479_v47 = vsel %vm13913_vm6, 4294967295, %v15478_v47  ;;  %v15481_v39 = vmov 0  ;;  %v6187_v29 = vld [vmem:[#allocation2 + $0x148] sm:$0xff] }
 0xb74   :  { %15480 = vst [vmem:[#allocation23_spill] sm:$0xff] %v15479_v47  ;;  %v15482_v39 = vsel %vm13918_vm7, 4294967295, %v15481_v39  ;;  %8703 = vmatpush1.bf16.msk.msra.mxu0 %vm14867_vm3, %v15381_v2  ;;  %v6190_v47 = vld [vmem:[#allocation2 + $0x160] sm:$0xff]  ;;  %vm15502_vm7 = vmpackc.low %vm13350_vm8, %vm13345_vm9  ;;  %vm15505_vm8 = vnez %v15346_v7 }
 0xb75   :  { %15483 = vst [vmem:[#allocation32_spill] sm:$0xff] %v15482_v39  ;;  %v6193_v39 = vld [vmem:[#allocation2 + $0x178] sm:$0xff]  ;;  %vm15504_vm9 = vmpackc.low %vm13362_vm14, %vm13357_vm10  ;;  %vm15512_vm10 = vnez %v15352_v26 }
 0xb76   :  { %6265 = vmatpush1.bf16.msra.mxu1 %v6180_v53  ;;  %v15486_v53 = vmov 0 }
 0xb77   :  { %6266 = vmatprep.subr.bf16.mxu1 %v6183_v30  ;;  %v15487_v53 = vsel %vm13943_vm15, 4294967295, %v15486_v53  ;;  %v15489_v30 = vmov 0 }
 0xb78   :  { %15488 = vst [vmem:[#allocation124_spill] sm:$0xff] %v15487_v53  ;;  %v15490_v30 = vsel %vm13948_vm12, 4294967295, %v15489_v30  ;;  %v6196_v53 = vld [vmem:[#allocation2 + $0x190] sm:$0xff] }
 0xb79   :  { %15491 = vst [vmem:[#allocation36_spill] sm:$0xff] %v15490_v30  ;;  %v6194_v30 = vld [vmem:[#allocation2 + $0x180] sm:$0xff] }
 0xb7a   :  { %6267 = vmatpush1.bf16.msra.mxu1 %v6182_v1  ;;  %v6188_v1 = vld [vmem:[#allocation2 + $0x150] sm:$0xff] }
 0xb7b   :  { %6268 = vmatprep.subr.bf16.mxu1 %v6185_v23  ;;  %v6191_v23 = vld [vmem:[#allocation2 + $0x168] sm:$0xff] }
 0xb7c   :  { %v15587_v56 = vld [vmem:[#allocation32_spill] sm:$0xff]  ;;  %v15589_v28 = vld [vmem:[#allocation23_spill] sm:$0xff] }
 0xb7e   :  { %6269 = vmatpush1.bf16.msra.mxu1 %v6184_v62  ;;  %v6192_v62 = vld [vmem:[#allocation2 + $0x170] sm:$0xff] }
 0xb7f   :  { %6270 = vmatprep.subr.bf16.mxu1 %v6187_v29  ;;  %v6195_v29 = vld [vmem:[#allocation2 + $0x188] sm:$0xff] }
 0xb80   :  { %v15592_v46 = vld [vmem:[#allocation36_spill] sm:$0xff] }
 0xb82   :  { %6271 = vmatpush1.bf16.msra.mxu1 %v6186_v8  ;;  %v6198_v8 = vld [vmem:[#allocation2 + $0x1a0] sm:$0xff] }
 0xb83   :  { %6272 = vmatprep.subr.bf16.mxu1 %v6189_v49  ;;  %v6201_v49 = vld [vmem:[#allocation2 + $0x1b8] sm:$0xff] }
 0xb86   :  { %6273 = vmatpush1.bf16.msra.mxu1 %v6188_v1  ;;  %v6200_v1 = vld [vmem:[#allocation2 + $0x1b0] sm:$0xff] }
 0xb87   :  { %6274 = vmatprep.subr.bf16.mxu1 %v6191_v23  ;;  %v6203_v23 = vld [vmem:[#allocation2 + $0x1c8] sm:$0xff] }
 0xb8a   :  { %6275 = vmatpush1.bf16.msra.mxu1 %v6190_v47  ;;  %v6202_v47 = vld [vmem:[#allocation2 + $0x1c0] sm:$0xff] }
 0xb8b   :  { %6276 = vmatprep.subr.bf16.mxu1 %v6193_v39  ;;  %v6205_v39 = vld [vmem:[#allocation2 + $0x1d8] sm:$0xff] }
 0xb8e   :  { %6277 = vmatpush1.bf16.msra.mxu1 %v6192_v62  ;;  %v6204_v62 = vld [vmem:[#allocation2 + $0x1d0] sm:$0xff] }
 0xb8f   :  { %6278 = vmatprep.subr.bf16.mxu1 %v6195_v29  ;;  %v6207_v29 = vld [vmem:[#allocation2 + $0x1e8] sm:$0xff] }
 0xb92   :  { %6279 = vmatpush1.bf16.msra.mxu1 %v6194_v30  ;;  %v6209_v30 = vld [vmem:[#allocation2 + $0x1f8] sm:$0xff] }
 0xb93   :  { %6280 = vmatprep.subr.bf16.mxu1 %v6197_v18  ;;  %v6206_v18 = vld [vmem:[#allocation2 + $0x1e0] sm:$0xff] }
 0xb96   :  { %6281 = vmatpush1.bf16.msra.mxu1 %v6196_v53  ;;  %v6144_v53 = vpack.c.bf16 %v13328_v11, %v13328_v11  ;;  %v15498_v11 = vmov 0 }
 0xb97   :  { %6282 = vmatprep.subr.bf16.mxu1 %v6199_v14  ;;  %v6208_v14 = vld [vmem:[#allocation2 + $0x1f0] sm:$0xff] }
 0xb9a   :  { %6283 = vmatpush1.bf16.msra.mxu1 %v6198_v8  ;;  %v15492_v8 = vld [vmem:[#allocation76_spill] sm:$0xff] }
 0xb9b   :  { %6284 = vmatprep.subr.bf16.mxu1 %v6201_v49  ;;  %v6333_v49 = vshra.s32 %v15492_v8, 5 }
 0xb9d   :  { %vm13979_vm3 = vcmp.eq.s32.totalorder %v6333_v49, %v13337_v19  ;;  %vm13993_vm15 = vcmp.eq.s32.totalorder %v6333_v49, %v13340_v12 }
 0xb9e   :  { %6285 = vmatpush1.bf16.msra.mxu1 %v6200_v1  ;;  %v15493_v1 = vld [vmem:[#allocation79_spill] sm:$0xff]  ;;  %v15499_v11 = vsel %vm13993_vm15, 4294967295, %v15498_v11 }
 0xb9f   :  { %6286 = vmatprep.subr.bf16.mxu1 %v6203_v23  ;;  %v6334_v23 = vshra.s32 %v15493_v1, 5 }
 0xba1   :  { %vm13984_vm11 = vcmp.eq.s32.totalorder %v6334_v23, %v13337_v19  ;;  %vm13998_vm12 = vcmp.eq.s32.totalorder %v6334_v23, %v13340_v12  ;;  %v6217_v19 = vsub.s32 4, %v15251_v41  ;;  %v14025_v12 = vld [vmem:[#allocation3] sm:$0x77] }
 0xba2   :  { %6287 = vmatpush1.bf16.msra.mxu1 %v6202_v47  ;;  %v15494_v47 = vmov 0  ;;  %vm14875_vm5 = vmpackc.low %vm13984_vm11, %vm13979_vm3 }
 0xba3   :  { %6288 = vmatprep.subr.bf16.mxu1 %v6205_v39  ;;  %v15495_v47 = vsel %vm13979_vm3, 4294967295, %v15494_v47  ;;  %8705 = vmatprep.subr.msk.bf16.mxu0 %vm14875_vm5, %v15381_v2  ;;  %vm14874_vm6 = vmpackc.low %vm13998_vm12, %vm13993_vm15  ;;  %vm15508_vm5 = vnez %v15350_v63  ;;  %vm15509_vm15 = vnez %v15348_v9  ;;  %vm15511_vm3 = vnez %v15354_v25 }
 0xba4   :  { %8707 = vmatpush1.bf16.msk.msra.mxu0 %vm14874_vm6, %v15381_v2  ;;  %vm15513_vm14 = vmpackc.low %vm15511_vm3, %vm15512_vm10  ;;  %vm15521_vm3 = vnez %v15364_v31 }
 0xba5   :  { %8709 = vmatprep.subr.msk.bf16.mxu0 %vm15502_vm7, %v15381_v2  ;;  %vm15506_vm7 = vnez %v15344_v51  ;;  %v15594_v51 = vld [vmem:[#allocation124_spill] sm:$0xff] }
 0xba6   :  { %6289 = vmatpush1.bf16.msra.mxu1 %v6204_v62  ;;  %v15500_v62 = vmov 0  ;;  %vm15507_vm6 = vmpackc.low %vm15505_vm8, %vm15506_vm7  ;;  %vm15515_vm8 = vnez %v15356_v15  ;;  %vm15517_vm7 = vnez %v15362_v32 }
 0xba7   :  { %6290 = vmatprep.subr.bf16.mxu1 %v6207_v29  ;;  %v15501_v62 = vsel %vm13998_vm12, 4294967295, %v15500_v62  ;;  %v6218_v29 = vrot.slane %v14025_v12, %v6217_v19  ;;  %vm15510_vm12 = vmpackc.low %vm15508_vm5, %vm15509_vm15  ;;  %vm15518_vm5 = vnez %v15360_v0  ;;  %vm15520_vm15 = vnez %v15366_v45 }
 0xba8   :  { %vm15522_vm10 = vmpackc.low %vm15520_vm15, %vm15521_vm3  ;;  %vm15530_vm15 = vnez %v15378_v55  ;;  %v6617_v45 = vsub.s32 1, %v15251_v41 }
 0xbaa   :  { %6291 = vmatpush1.bf16.msra.mxu1 %v6206_v18  ;;  %v15503_v18 = vld [vmem:[#allocation113_spill] sm:$0xff] }
 0xbab   :  { %6292 = vmatprep.subr.bf16.mxu1 %v6209_v30  ;;  %v6214_v30 = vrot.slane %v14025_v12, %v15503_v18 }
 0xbae   :  { %6293 = vmatpush1.bf16.msra.mxu1 %v6208_v14 }
 0xbb1   :  { %6295 = vmatmul.mubr.bf16.vlgmr.msra.gmra.mrb[116].mxu1 %v6144_v53 }
 0xc84   :  { %v6296_v14 = vpop.f32.mrb[116].mxu1 }
 0xc85   :  { %v6298_v53 = vpop.f32.mrb[117].mxu1  ;;  %v8844_v1 = vadd.f32 %v6296_v14, %v6214_v30 }
 0xc86   :  { %v8845_v8 = vadd.f32 %v6298_v53, %v6218_v29  ;;  %v6300_v49 = vpop.f32.mrb[118].mxu1 }
 0xc87   :  { %v6301_v23 = vpop.f32.mrb[119].mxu1 }
 0xc88   :  { %6529 = vmatprep.mubr.f32.mxu0 %v8845_v8 }
 0xc89   :  { %6530 = vmatmul.mubr.f32.vlgmr.msra.gmra.mrb[100].mxu0 %v8844_v1 }
 0xc8a   :  { %8711 = vmatpush1.bf16.msk.msra.mxu0 %vm15504_vm9, %v15381_v2  ;;  %vm15514_vm9 = vnez %v15358_v3 }
 0xc8b   :  { %8713 = vmatprep.subr.msk.bf16.mxu0 %vm15507_vm6, %v15381_v2  ;;  %vm15516_vm6 = vmpackc.low %vm15514_vm9, %vm15515_vm8  ;;  %vm15524_vm9 = vnez %v15368_v36  ;;  %v6621_v36 = vsub.s32 5, %v15251_v41 }
 0xc8d   :  { %v6622_v55 = vrot.slane %v14025_v12, %v6621_v36 }
 0xc8e   :  { %8715 = vmatpush1.bf16.msk.msra.mxu0 %vm15510_vm12, %v15381_v2  ;;  %vm15519_vm12 = vmpackc.low %vm15517_vm7, %vm15518_vm5  ;;  %vm15527_vm7 = vnez %v15374_v6  ;;  %v6618_v6 = vrot.slane %v14025_v12, %v6617_v45 }
 0xc8f   :  { %8717 = vmatprep.subr.msk.bf16.mxu0 %vm15513_vm14, %v15381_v2  ;;  %vm15523_vm14 = vnez %v15370_v60  ;;  %v6633_v60 = vsub.s32 6, %v15251_v41 }
 0xc90   :  { %vm15525_vm8 = vmpackc.low %vm15523_vm14, %vm15524_vm9  ;;  %vm15533_vm14 = vnez %v15385_v54 }
 0xc92   :  { %8719 = vmatpush1.bf16.msk.msra.mxu0 %vm15516_vm6, %v15381_v2  ;;  %vm15526_vm6 = vnez %v15376_v27 }
 0xc93   :  { %8721 = vmatprep.subr.msk.bf16.mxu0 %vm15519_vm12, %v15381_v2  ;;  %vm15528_vm5 = vmpackc.low %vm15526_vm6, %vm15527_vm7  ;;  %vm15529_vm12 = vnez %v15380_v20  ;;  %vm15536_vm6 = vnez %v15389_v50  ;;  %v15570_v50 = vld [vmem:[#allocation34_spill] sm:$0xff] }
 0xc94   :  { %vm15531_vm3 = vmpackc.low %vm15529_vm12, %vm15530_vm15  ;;  %vm15539_vm12 = vnez %v15395_v37 }
 0xc96   :  { %8723 = vmatpush1.bf16.msk.msra.mxu0 %vm15522_vm10, %v15381_v2  ;;  %vm15532_vm10 = vnez %v15387_v40 }
 0xc97   :  { %8725 = vmatprep.subr.msk.bf16.mxu0 %vm15525_vm8, %v15381_v2  ;;  %vm15534_vm9 = vmpackc.low %vm15532_vm10, %vm15533_vm14  ;;  %vm15535_vm8 = vnez %v15391_v58  ;;  %vm15542_vm10 = vnez %v15399_v24  ;;  %v15562_v58 = vld [vmem:[#allocation29_spill] sm:$0xff] }
 0xc98   :  { %vm15537_vm7 = vmpackc.low %vm15535_vm8, %vm15536_vm6  ;;  %vm15545_vm8 = vnez %v15405_v43 }
 0xc9a   :  { %8727 = vmatpush1.bf16.msk.msra.mxu0 %vm15528_vm5, %v15381_v2  ;;  %vm15538_vm5 = vnez %v15397_v44 }
 0xc9b   :  { %8729 = vmatprep.subr.msk.bf16.mxu0 %vm15531_vm3, %v15381_v2  ;;  %vm15540_vm15 = vmpackc.low %vm15538_vm5, %vm15539_vm12  ;;  %vm15541_vm3 = vnez %v15401_v57  ;;  %vm15548_vm5 = vnez %v15409_v38  ;;  %v15554_v57 = vld [vmem:[#allocation35_spill] sm:$0xff] }
 0xc9c   :  { %vm15543_vm14 = vmpackc.low %vm15541_vm3, %vm15542_vm10  ;;  %vm15551_vm3 = vnez %v15415_v59 }
 0xc9e   :  { %8731 = vmatpush1.bf16.msk.msra.mxu0 %vm15534_vm9, %v15381_v2  ;;  %vm15544_vm9 = vnez %v15407_v22  ;;  %v6634_v22 = vrot.slane %v14025_v12, %v6633_v60 }
 0xc9f   :  { %8733 = vmatprep.subr.msk.bf16.mxu0 %vm15537_vm7, %v15381_v2  ;;  %vm15546_vm6 = vmpackc.low %vm15544_vm9, %vm15545_vm8  ;;  %vm15547_vm7 = vnez %v15411_v34  ;;  %vm15555_vm9 = vnez %v15554_v57  ;;  %v15560_v34 = vld [vmem:[#allocation41_spill] sm:$0xff] }
 0xca0   :  { %vm15549_vm12 = vmpackc.low %vm15547_vm7, %vm15548_vm5  ;;  %vm15558_vm7 = vnez %v15426_v35 }
 0xca2   :  { %8735 = vmatpush1.bf16.msk.msra.mxu0 %vm15540_vm15, %v15381_v2  ;;  %vm15550_vm15 = vnez %v15417_v48 }
 0xca3   :  { %8737 = vmatprep.subr.msk.bf16.mxu0 %vm15543_vm14, %v15381_v2  ;;  %vm15552_vm10 = vmpackc.low %vm15550_vm15, %vm15551_vm3  ;;  %vm15553_vm14 = vnez %v15422_v13  ;;  %vm15563_vm15 = vnez %v15562_v58  ;;  %v15568_v13 = vld [vmem:[#allocation43_spill] sm:$0xff] }
 0xca4   :  { %vm15556_vm8 = vmpackc.low %vm15553_vm14, %vm15555_vm9  ;;  %vm15566_vm14 = vnez %v15438_v42 }
 0xca6   :  { %8739 = vmatpush1.bf16.msk.msra.mxu0 %vm15546_vm6, %v15381_v2  ;;  %vm15557_vm6 = vnez %v15428_v17 }
 0xca7   :  { %8741 = vmatprep.subr.msk.bf16.mxu0 %vm15549_vm12, %v15381_v2  ;;  %vm15559_vm5 = vmpackc.low %vm15557_vm6, %vm15558_vm7  ;;  %vm15561_vm12 = vnez %v15560_v34  ;;  %vm15571_vm6 = vnez %v15570_v50 }
 0xca8   :  { %vm15564_vm3 = vmpackc.low %vm15561_vm12, %vm15563_vm15  ;;  %vm15574_vm12 = vnez %v15450_v61 }
 0xcaa   :  { %8743 = vmatpush1.bf16.msk.msra.mxu0 %vm15552_vm10, %v15381_v2  ;;  %vm15565_vm10 = vnez %v15440_v4 }
 0xcab   :  { %8745 = vmatprep.subr.msk.bf16.mxu0 %vm15556_vm8, %v15381_v2  ;;  %vm15567_vm9 = vmpackc.low %vm15565_vm10, %vm15566_vm14  ;;  %vm15569_vm8 = vnez %v15568_v13  ;;  %vm15577_vm10 = vnez %v15454_v10 }
 0xcac   :  { %vm15572_vm7 = vmpackc.low %vm15569_vm8, %vm15571_vm6 }
 0xcad   :  { %vm15583_vm6 = vmpackc.low %vm13876_vm4, %vm13871_vm13  ;;  %vm15595_vm4 = vnez %v15594_v51 }
 0xcae   :  { %8747 = vmatpush1.bf16.msk.msra.mxu0 %vm15559_vm5, %v15381_v2  ;;  %vm15573_vm5 = vnez %v15452_v5 }
 0xcaf   :  { %8749 = vmatprep.subr.msk.bf16.mxu0 %vm15564_vm3, %v15381_v2  ;;  %vm15575_vm15 = vmpackc.low %vm15573_vm5, %vm15574_vm12  ;;  %vm15576_vm3 = vnez %v15456_v52  ;;  %vm15588_vm5 = vnez %v15587_v56 }
 0xcb0   :  { %vm15578_vm14 = vmpackc.low %vm15576_vm3, %vm15577_vm10  ;;  %vm15599_vm3 = vnez %v15501_v62  ;;  %vm15600_vm10 = vnez %v15499_v11 }
 0xcb2   :  { %8751 = vmatpush1.bf16.msk.msra.mxu0 %vm15567_vm9, %v15381_v2  ;;  %vm15579_vm9 = vnez %v15460_v33 }
 0xcb3   :  { %8753 = vmatprep.subr.msk.bf16.mxu0 %vm15572_vm7, %v15381_v2  ;;  %vm15580_vm8 = vmpackc.low %vm13866_vm0, %vm15579_vm9  ;;  %vm15590_vm0 = vnez %v15589_v28 }
 0xcb4   :  { %vm15586_vm7 = vmpackc.low %vm13908_vm2, %vm13903_vm1  ;;  %vm15597_vm2 = vnez %v15495_v47 }
 0xcb5   :  { %vm15591_vm12 = vmpackc.low %vm15588_vm5, %vm15590_vm0 }
 0xcb6   :  { %8755 = vmatpush1.bf16.msk.msra.mxu0 %vm15575_vm15, %v15381_v2  ;;  %vm15593_vm15 = vnez %v15592_v46  ;;  %vm15598_vm1 = vmpackc.low %vm13984_vm11, %vm15597_vm2 }
 0xcb7   :  { %8757 = vmatprep.subr.msk.bf16.mxu0 %vm15578_vm14, %v15381_v2  ;;  %vm15596_vm13 = vmpackc.low %vm15593_vm15, %vm15595_vm4 }
 0xcb8   :  { %vm15601_vm14 = vmpackc.low %vm15599_vm3, %vm15600_vm10 }
 0xcba   :  { %8759 = vmatpush1.bf16.msk.msra.mxu0 %vm15580_vm8, %v15381_v2 }
 0xcbb   :  { %8761 = vmatprep.subr.msk.bf16.mxu0 %vm15583_vm6, %v15381_v2 }
 0xcbe   :  { %8763 = vmatpush1.bf16.msk.msra.mxu0 %vm15586_vm7, %v15381_v2 }
 0xcbf   :  { %8765 = vmatprep.subr.msk.bf16.mxu0 %vm15591_vm12, %v15381_v2 }
 0xcc2   :  { %8767 = vmatpush1.bf16.msk.msra.mxu0 %vm15596_vm13, %v15381_v2 }
 0xcc3   :  { %8769 = vmatprep.subr.msk.bf16.mxu0 %vm15598_vm1, %v15381_v2 }
 0xcc6   :  { %8771 = vmatpush1.bf16.msk.msra.mxu0 %vm15601_vm14, %v15381_v2  ;;  %v6629_v2 = vsub.s32 2, %v15251_v41 }
 0xcc8   :  { %v6630_v37 = vrot.slane %v14025_v12, %v6629_v2 }
 0xd5c   :  { %v6531_v7 = vpop.f32.mrb[100].mxu0 }
 0xd5d   :  { %v6536_v9 = vsub.f32 %v8844_v1, %v6531_v7  ;;  %v6533_v63 = vpop.f32.mrb[101].mxu0 }
 0xd5e   :  { %v6537_v26 = vsub.f32 %v8845_v8, %v6533_v63 }
 0xd5f   :  { %v6538_v15 = vmul.f32 %v6536_v9, %v6536_v9 }
 0xd60   :  { %v6539_v25 = vmul.f32 %v6537_v26, %v6537_v26 }
 0xd62   :  { %6604 = vmatprep.mubr.f32.mxu0 %v6539_v25 }
 0xd63   :  { %6605 = vmatmul.mubr.f32.vlgmr.msra.gmra.mrb[102].mxu0 %v6538_v15 }
 0xe36   :  { %v6606_v3 = vpop.f32.mrb[102].mxu0 }
 0xe37   :  { %v6607_v0 = vadd.f32 1e-05, %v6606_v3  ;;  %v6608_v32 = vpop.f32.mrb[103].mxu0 }
 0xe38   :  { %v6609_v31 = vadd.f32 1e-05, %v6608_v32 }
 0xe39   :  { %9070 = vrsqrt.f32 %v6607_v0 }
 0xe3a   :  { %9072 = vrsqrt.f32 %v6609_v31 }
 0xe43   :  { %v9071_v27 = vpop.eup %9070 }
 0xe44   :  { %v9073_v20 = vpop.eup %9072  ;;  %v6613_v54 = vmul.f32 %v9071_v27, %v6536_v9 }
 0xe45   :  { %v6614_v43 = vmul.f32 %v9073_v20, %v6537_v26 }
 0xe46   :  { %v6625_v38 = vmul.f32 %v6618_v6, %v6613_v54 }
 0xe47   :  { %v6626_v59 = vmul.f32 %v6622_v55, %v6614_v43 }
 0xe48   :  { %v14224_v48 = vadd.f32 %v6630_v37, %v6625_v38 }
 0xe49   :  { %v6638_v35 = vadd.f32 %v6634_v22, %v6626_v59 }
 0xe4a   :  { %v6639_v17 = vmax.f32 %v14224_v48, 0.0 }
 0xe4b   :  { %v6640_v5 = vmax.f32 %v6638_v35, 0.0 }
 0xe4c   :  { %9124 = dma.done.wait [#allocation6 + $0x2], 2048 }
 0xe4d   :  { %9125 = vsyncadd [#allocation6 + $0x2], 4294965248 }
 0xe4e   :  { %9126 = dma.done.wait [#allocation6 + $0x3], 2112 }
 0xe4f   :  { %9127 = vsyncadd [#allocation6 + $0x3], 4294965184  ;;  %v6666_v42 = vpack.c.bf16 %v6640_v5, %v6640_v5  ;;  %v15602_v4 = vmov 0.0|0.0   ;;  %v6723_v61 = vshra.s32 %v15251_v41, 4  ;;  %v15603_v10 = vld [vmem:[#allocation38_spill] sm:$0xff]  ;;  %v15604_v33 = vld [vmem:[#allocation21_spill] sm:$0xff] }
 0xe50   :  { %8772 = vmatprep.subr.bf16.mxu0 %v15602_v4  ;;  %v6724_v52 = vshra.s32 %v15603_v10, 4  ;;  %v14231_v21 = vshra.s32 %v15604_v33, 4  ;;  %v15605_v47 = vld [vmem:[#allocation27_spill] sm:$0xff]  ;;  %v15606_v11 = vld [vmem:[#allocation26_spill] sm:$0xff]  ;;  %v15607_v19 = vld [vmem:[#allocation44_spill] sm:$0xff]  ;;  %v15641_v37 = vmov 0 }
 0xe51   :  { %v6725_v39 = vshra.s32 %v15605_v47, 4  ;;  %v6726_v62 = vshra.s32 %v15606_v11, 4  ;;  %6715 = vmatprep.mubr.bf16.mxu1 %v6666_v42  ;;  %v6727_v12 = vshra.s32 %v15607_v19, 4  ;;  %v15608_v29 = vld [vmem:[#allocation45_spill] sm:$0xff]  ;;  %v9137_v8 = vmov 0.0625|0.0625  }
 0xe52   :  { %v6728_v18 = vshra.s32 %v15608_v29, 4  ;;  %vm14238_vm11 = vcmp.eq.s32.totalorder %v6723_v61, %v14231_v21  ;;  %vm14243_vm9 = vcmp.eq.s32.totalorder %v6724_v52, %v14231_v21  ;;  %v6675_v49 = vld [vmem:[#allocation4 + $0x40] sm:$0xff]  ;;  %v6676_v23 = vld [vmem:[#allocation4 + $0x48] sm:$0xff]  ;;  %v15622_v50 = vld [vmem:[#allocation22_spill] sm:$0xff]  ;;  %v6665_v42 = vpack.c.bf16 %v6639_v17, %v6639_v17  ;;  %s9139_s16 = smov [#allocation7]  }
 0xe53   :  { %vm14248_vm8 = vcmp.eq.s32.totalorder %v6725_v39, %v14231_v21  ;;  %vm14253_vm6 = vcmp.eq.s32.totalorder %v6726_v62, %v14231_v21  ;;  %vm14882_vm7 = vmpackc.low %vm14243_vm9, %vm14238_vm11  ;;  %v6667_v1 = vld [vmem:[#allocation4] sm:$0xff]  ;;  %vm14273_vm0 = vcmp.eq.s32.totalorder %v6727_v12, %v14231_v21  ;;  %v6730_v40 = vshra.s32 %v15622_v50, 4  ;;  %7896 = vmatprep.subr.bf16.mxu1 %v6675_v49  ;;  %v6668_v24 = vld [vmem:[#allocation4 + $0x8] sm:$0xff]  ;;  %s7003_s17 = sshll.u32 %s9139_s16, 4  ;;  %s7004_s17 = int_to_ptr.vmem [resolvable:$true] %s7003_s17 }
 0xe54   :  { %8774 = vmatpush3.bf16.msk.msra.mxu0 %vm14882_vm7, %v9137_v8  ;;  %vm14881_vm5 = vmpackc.low %vm14253_vm6, %vm14248_vm8  ;;  %vm14278_vm12 = vcmp.eq.s32.totalorder %v6728_v18, %v14231_v21  ;;  %v15621_v58 = vld [vmem:[#allocation28_spill] sm:$0xff]  ;;  %7897 = vmatpush3.bf16.msra.mxu1 %v6667_v1  ;;  %v6677_v44 = vld [vmem:[#allocation4 + $0x50] sm:$0xff]  ;;  %v15655_v52 = vmov 0.0   ;;  %s9098_s18 = scalar_lea.vmem %s7004_s17, 16  ;;  %s9102_s19 = scalar_lea.vmem %s7004_s17, 32 }
 0xe55   :  { %8775 = vmatprep.subr.bf16.mxu0 %v15602_v4  ;;  %v6729_v13 = vshra.s32 %v15621_v58, 4  ;;  %7898 = vmatprep.subr.bf16.mxu1 %v6676_v23  ;;  %vm14879_vm15 = vmpackc.low %vm14278_vm12, %vm14273_vm0  ;;  %vm14301_vm13 = vcmp.eq.s32.totalorder %v6730_v40, %v14231_v21  ;;  %v15627_v28 = vld [vmem:[#allocation47_spill] sm:$0xff]  ;;  %v15628_v51 = vld [vmem:[#allocation46_spill] sm:$0xff]  ;;  %p9099_p8 = scmp.ne.s32.totalorder %s7004_s17, %s9098_s18  ;;  %p9103_p9 = scmp.lt.s32.totalorder %s7004_s17, %s7004_s17 }
 0xe56   :  { %v6731_v46 = vshra.s32 %v15627_v28, 4  ;;  %v6732_v7 = vshra.s32 %v15628_v51, 4  ;;  %v6669_v9 = vld [vmem:[#allocation4 + $0x10] sm:$0xff]  ;;  %v6678_v63 = vld [vmem:[#allocation4 + $0x58] sm:$0xff]  ;;  %v15634_v0 = vld [vmem:[#allocation48_spill] sm:$0xff]  ;;  %p9104_p10 = scmp.lt.s32.totalorder %s9102_s19, %s9098_s18 }
 0xe57   :  { %vm14296_vm4 = vcmp.eq.s32.totalorder %v6729_v13, %v14231_v21  ;;  %v15633_v15 = vld [vmem:[#allocation49_spill] sm:$0xff]  ;;  %v6734_v32 = vshra.s32 %v15634_v0, 4  ;;  %v6670_v31 = vld [vmem:[#allocation4 + $0x18] sm:$0xff]  ;;  %v6679_v45 = vld [vmem:[#allocation4 + $0x60] sm:$0xff] }
 0xe58   :  { %8777 = vmatpush3.bf16.msk.msra.mxu0 %vm14881_vm5, %v9137_v8  ;;  %7899 = vmatpush3.bf16.msra.mxu1 %v6668_v24  ;;  %vm14880_vm2 = vmpackc.low %vm14301_vm13, %vm14296_vm4  ;;  %vm14319_vm1 = vcmp.eq.s32.totalorder %v6731_v46, %v14231_v21  ;;  %vm14324_vm3 = vcmp.eq.s32.totalorder %v6732_v7, %v14231_v21  ;;  %v6733_v3 = vshra.s32 %v15633_v15, 4  ;;  %v15639_v60 = vld [vmem:[#allocation52_spill] sm:$0xff]  ;;  %v15640_v27 = vld [vmem:[#allocation51_spill] sm:$0xff]  ;;  %p9105_p11 = por %p9104_p10, %p9103_p9 }
 0xe59   :  { %8778 = vmatprep.subr.bf16.mxu0 %v15602_v4  ;;  %7900 = vmatprep.subr.bf16.mxu1 %v6677_v44  ;;  %vm14883_vm10 = vmpackc.low %vm14324_vm3, %vm14319_vm1  ;;  %v6735_v6 = vshra.s32 %v15639_v60, 4  ;;  %v6736_v55 = vshra.s32 %v15640_v27, 4  ;;  %v6671_v20 = vld [vmem:[#allocation4 + $0x20] sm:$0xff]  ;;  %v6680_v54 = vld [vmem:[#allocation4 + $0x68] sm:$0xff] }
 0xe5a   :  { %vm14342_vm14 = vcmp.eq.s32.totalorder %v6733_v3, %v14231_v21  ;;  %v6672_v22 = vld [vmem:[#allocation4 + $0x28] sm:$0xff]  ;;  %v6681_v38 = vld [vmem:[#allocation4 + $0x70] sm:$0xff]  ;;  %v6682_v35 = vld [vmem:[#allocation4 + $0x78] sm:$0xff]  ;;  %p9106_p12 = pnand %p9105_p11, %p9099_p8 }
 0xe5b   :  { %vm14365_vm5 = vcmp.eq.s32.totalorder %v6735_v6, %v14231_v21  ;;  %vm14370_vm7 = vcmp.eq.s32.totalorder %v6736_v55, %v14231_v21  ;;  %v6673_v59 = vld [vmem:[#allocation4 + $0x30] sm:$0xff]  ;;  %v6674_v5 = vld [vmem:[#allocation4 + $0x38] sm:$0xff]  ;;  %v14454_v47 = vld [vmem:[#allocation5 + $0x80] sm:$0xf] }
 0xe5c   :  { %8780 = vmatpush3.bf16.msk.msra.mxu0 %vm14879_vm15, %v9137_v8  ;;  %7901 = vmatpush3.bf16.msra.mxu1 %v6669_v9  ;;  %vm14347_vm15 = vcmp.eq.s32.totalorder %v6734_v32, %v14231_v21  ;;  %v15642_v37 = vsel %vm14365_vm5, 4294967295, %v15641_v37  ;;  %v15653_v48 = vld [vmem:[#allocation54_spill] sm:$0xff]  ;;  %v15654_v61 = vld [vmem:[#allocation53_spill] sm:$0xff]  ;;  %v6648_v12 = vld [vmem:[#allocation5] sm:$0xff]  ;;  %v6917_v0 = vrot.slane %v14454_v47, 1  ;;  %v6924_v6 = vrot.slane %v14454_v47, 3 }
 0xe5d   :  { %8781 = vmatprep.subr.bf16.mxu0 %v15602_v4  ;;  %7902 = vmatprep.subr.bf16.mxu1 %v6678_v63  ;;  %v6737_v17 = vshra.s32 %v15653_v48, 4  ;;  %v6738_v10 = vshra.s32 %v15654_v61, 4  ;;  %v6649_v29 = vld [vmem:[#allocation5 + $0x8] sm:$0xff]  ;;  %v6650_v18 = vld [vmem:[#allocation5 + $0x10] sm:$0xff]  ;;  %v6651_v41 = vld [vmem:[#allocation5 + $0x18] sm:$0xff] }
 0xe5e   :  { %v8821_v30 = vpack.c.bf16 %v6649_v29, %v6648_v12  ;;  %v8824_v14 = vpack.c.bf16 %v6651_v41, %v6650_v18  ;;  %v6652_v53 = vld [vmem:[#allocation5 + $0x20] sm:$0xff]  ;;  %v6654_v58 = vld [vmem:[#allocation5 + $0x30] sm:$0xff]  ;;  %v6655_v13 = vld [vmem:[#allocation5 + $0x38] sm:$0xff] }
 0xe5f   :  { %v8830_v50 = vpack.c.bf16 %v6655_v13, %v6654_v58  ;;  %v6656_v40 = vld [vmem:[#allocation5 + $0x40] sm:$0xff]  ;;  %v6657_v24 = vld [vmem:[#allocation5 + $0x48] sm:$0xff]  ;;  %v6658_v16 = vld [vmem:[#allocation5 + $0x50] sm:$0xff] }
 0xe60   :  { %8783 = vmatpush3.bf16.msk.msra.mxu0 %vm14880_vm2, %v9137_v8  ;;  %7903 = vmatpush3.bf16.msra.mxu1 %v6670_v31  ;;  %vm14885_vm2 = vmpackc.low %vm14347_vm15, %vm14342_vm14  ;;  %v8833_v44 = vpack.c.bf16 %v6657_v24, %v6656_v40  ;;  %v6659_v56 = vld [vmem:[#allocation5 + $0x58] sm:$0xff]  ;;  %v6660_v46 = vld [vmem:[#allocation5 + $0x60] sm:$0xff] }
 0xe61   :  { %8784 = vmatprep.subr.bf16.mxu0 %v15602_v4  ;;  %7904 = vmatprep.subr.bf16.mxu1 %v6679_v45  ;;  %v8836_v28 = vpack.c.bf16 %v6659_v56, %v6658_v16  ;;  %v6661_v51 = vld [vmem:[#allocation5 + $0x68] sm:$0xff]  ;;  %v6662_v9 = vld [vmem:[#allocation5 + $0x70] sm:$0xff]  ;;  %v6663_v63 = vld [vmem:[#allocation5 + $0x78] sm:$0xff]  ;;  %v6920_v45 = vrot.slane %v14454_v47, 2 }
 0xe62   :  { %v8839_v7 = vpack.c.bf16 %v6661_v51, %v6660_v46  ;;  %v8842_v26 = vpack.c.bf16 %v6663_v63, %v6662_v9 }
 0xe64   :  { %8786 = vmatpush3.bf16.msk.msra.mxu0 %vm14883_vm10, %v9137_v8  ;;  %7905 = vmatpush3.bf16.msra.mxu1 %v6671_v20  ;;  %vm14884_vm10 = vmpackc.low %vm14370_vm7, %vm14365_vm5 }
 0xe65   :  { %8787 = vmatprep.subr.bf16.mxu0 %v15602_v4  ;;  %7906 = vmatprep.subr.bf16.mxu1 %v6680_v54  ;;  %vm15647_vm5 = vmpackc.low %vm14278_vm12, %vm14273_vm0  ;;  %vm6754_vm0 = vcmp.eq.s32.totalorder %v6737_v17, %v14231_v21  ;;  %vm6755_vm12 = vcmp.eq.s32.totalorder %v6738_v10, %v14231_v21 }
 0xe68   :  { %8789 = vmatpush3.bf16.msk.msra.mxu0 %vm14885_vm2, %v9137_v8  ;;  %7907 = vmatpush3.bf16.msra.mxu1 %v6672_v22  ;;  %vm15646_vm2 = vmpackc.low %vm14253_vm6, %vm14248_vm8  ;;  %vm15651_vm6 = vnez %v15642_v37 }
 0xe69   :  { %8790 = vmatprep.subr.bf16.mxu0 %v15602_v4  ;;  %7908 = vmatprep.subr.bf16.mxu1 %v6681_v38  ;;  %vm15650_vm8 = vmpackc.low %vm14347_vm15, %vm14342_vm14 }
 0xe6a   :  { %vm8794_vm15 = vmpackc.low %vm6755_vm12, %vm6754_vm0 }
 0xe6c   :  { %8792 = vmatpush3.bf16.msk.msra.mxu0 %vm14884_vm10, %v9137_v8  ;;  %7909 = vmatpush3.bf16.msra.mxu1 %v6673_v59  ;;  %vm15645_vm10 = vmpackc.low %vm14243_vm9, %vm14238_vm11 }
 0xe6d   :  { %8793 = vmatprep.subr.bf16.mxu0 %v15602_v4  ;;  %7910 = vmatprep.subr.bf16.mxu1 %v6682_v35  ;;  %vm15648_vm11 = vmpackc.low %vm14301_vm13, %vm14296_vm4  ;;  %vm9138_vm4 = vmmov 0  }
 0xe6e   :  { %vm15649_vm9 = vmpackc.low %vm14324_vm3, %vm14319_vm1  ;;  %8219 = vmatprep.mubr.msk.f32.mxu0 %vm9138_vm4, %v15655_v52 }
 0xe70   :  { %7911 = vmatpush3.bf16.msra.mxu1 %v6674_v5  ;;  %8795 = vmatpush3.bf16.msk.msra.mxu0 %vm8794_vm15, %v9137_v8 }
 0xe71   :  { %8796 = vmatprep.subr.bf16.mxu1 %v15602_v4  ;;  %8820 = vmatprep.subr.bf16.mxu0 %v15602_v4 }
 0xe73   :  { %6716 = vmatmul.mubr.bf16.vlgmr.msra.gmra.mrb[120].mxu1 %v6665_v42 }
 0xe74   :  { %8798 = vmatpush3.bf16.msk.msra.mxu1 %vm15645_vm10, %v9137_v8  ;;  %8254 = vmatprep.mubr.msk.f32.mxu1 %vm9138_vm4, %v15655_v52 }
 0xe75   :  { %8799 = vmatprep.subr.bf16.mxu1 %v15602_v4 }
 0xe78   :  { %8801 = vmatpush3.bf16.msk.msra.mxu1 %vm15646_vm2, %v9137_v8 }
 0xe79   :  { %8802 = vmatprep.subr.bf16.mxu1 %v15602_v4 }
 0xe7c   :  { %8804 = vmatpush3.bf16.msk.msra.mxu1 %vm15647_vm5, %v9137_v8  ;;  %vm15652_vm5 = vmpackc.low %vm14370_vm7, %vm15651_vm6 }
 0xe7d   :  { %8805 = vmatprep.subr.bf16.mxu1 %v15602_v4 }
 0xe80   :  { %8807 = vmatpush3.bf16.msk.msra.mxu1 %vm15648_vm11, %v9137_v8 }
 0xe81   :  { %8808 = vmatprep.subr.bf16.mxu1 %v15602_v4 }
 0xe84   :  { %8810 = vmatpush3.bf16.msk.msra.mxu1 %vm15649_vm9, %v9137_v8 }
 0xe85   :  { %8811 = vmatprep.subr.bf16.mxu1 %v15602_v4 }
 0xe88   :  { %8813 = vmatpush3.bf16.msk.msra.mxu1 %vm15650_vm8, %v9137_v8 }
 0xe89   :  { %8814 = vmatprep.subr.bf16.mxu1 %v15602_v4 }
 0xe8c   :  { %8816 = vmatpush3.bf16.msk.msra.mxu1 %vm15652_vm5, %v9137_v8 }
 0xe8d   :  { %8817 = vmatprep.subr.bf16.mxu1 %v15602_v4 }
 0xe90   :  { %8819 = vmatpush3.bf16.msk.msra.mxu1 %vm8794_vm15, %v9137_v8  ;;  %v6653_v8 = vld [vmem:[#allocation5 + $0x28] sm:$0xff] }
 0xe91   :  { %v8827_v49 = vpack.c.bf16 %v6653_v8, %v6652_v53 }
 0xf46   :  { %v7912_v33 = vpop.f32.mrb[120].mxu1 }
 0xf47   :  { %v7913_v39 = vpop.f32.mrb[121].mxu1 }
 0xf48   :  { %v7914_v11 = vadd.f32 %v7913_v39, %v7912_v33  ;;  %v7915_v62 = vpop.f32.mrb[122].mxu1 }
 0xf49   :  { %v7916_v19 = vpop.f32.mrb[123].mxu1 }
 0xf4a   :  { %v6718_v21 = vadd.f32 %v7914_v11, %v14454_v47 }
 0xf4c   :  { %8220 = vmatmul.mubr.f32.vlgmr.msra.gmra.mrb[104].mxu0 %v6718_v21 }
 0xf4d   :  { %8289 = vmatprep.mubr.msk.f32.mxu0 %vm9138_vm4, %v15655_v52  ;;  %8822 = vmatpush3.bf16.msra.mxu0 %v8821_v30 }
 0xf4e   :  { %8823 = vmatprep.subr.bf16.mxu0 %v15602_v4 }
 0xf51   :  { %8825 = vmatpush3.bf16.msra.mxu0 %v8824_v14 }
 0xf52   :  { %8826 = vmatprep.subr.bf16.mxu0 %v15602_v4 }
 0xf55   :  { %8828 = vmatpush3.bf16.msra.mxu0 %v8827_v49 }
 0xf56   :  { %8829 = vmatprep.subr.bf16.mxu0 %v15602_v4 }
 0xf59   :  { %8831 = vmatpush3.bf16.msra.mxu0 %v8830_v50 }
 0xf5a   :  { %8832 = vmatprep.subr.bf16.mxu0 %v15602_v4 }
 0xf5d   :  { %8834 = vmatpush3.bf16.msra.mxu0 %v8833_v44 }
 0xf5e   :  { %8835 = vmatprep.subr.bf16.mxu0 %v15602_v4 }
 0xf61   :  { %8837 = vmatpush3.bf16.msra.mxu0 %v8836_v28 }
 0xf62   :  { %8838 = vmatprep.subr.bf16.mxu0 %v15602_v4 }
 0xf65   :  { %8840 = vmatpush3.bf16.msra.mxu0 %v8839_v7 }
 0xf66   :  { %8841 = vmatprep.subr.bf16.mxu0 %v15602_v4 }
 0xf69   :  { %8843 = vmatpush3.bf16.msra.mxu0 %v8842_v26 }
0x101f   :  { %v6838_v1 = vpop.f32.mrb[104].mxu0 }
0x1020   :  { %v6842_v23 = vsub.f32 %v6718_v21, %v6838_v1  ;;  %v8221_v57 = vpop.f32.mrb[105].mxu0 }
0x1022   :  { %v6843_v34 = vmul.f32 %v6842_v23, %v6842_v23 }
0x1024   :  { %8255 = vmatmul.mubr.f32.vlgmr.msra.gmra.mrb[114].mxu1 %v6843_v34 }
0x10f7   :  { %v6910_v25 = vpop.f32.mrb[114].mxu1 }
0x10f8   :  { %v6911_v15 = vadd.f32 1e-05, %v6910_v25  ;;  %v8256_v3 = vpop.f32.mrb[115].mxu1 }
0x10fa   :  { %9074 = vrsqrt.f32 %v6911_v15 }
0x1104   :  { %v9075_v32 = vpop.eup %9074 }
0x1105   :  { %v6915_v31 = vmul.f32 %v9075_v32, %v6842_v23 }
0x1107   :  { %v6919_v36 = vmul.f32 %v6917_v0, %v6915_v31 }
0x1109   :  { %v6922_v2 = vadd.f32 %v6920_v45, %v6919_v36 }
0x110b   :  { %v6923_v60 = vmax.f32 %v6922_v2, 0.0 }
0x110d   :  { %8290 = vmatmul.mubr.f32.vlgmr.msra.gmra.mrb[106].mxu0 %v6923_v60 }
0x11e0   :  { %v6992_v4 = vpop.f32.mrb[106].mxu0 }
0x11e1   :  { %v6993_v27 = vadd.f32 %v6992_v4, %v6924_v6  ;;  %v8291_v55 = vpop.f32.mrb[107].mxu0 }
0x11e3   :  { %6996 = vst [vmem:[#allocation7] sm:$0x1] %v6993_v27 }
0x11e4   :  { %9109 = shalt.err (!%p9106_p12)
}
0x11e5   :  { %s9110_s22 = scalar_lea.hbm %s14488_s8, 16 }
0x11e6   :  { %p9111_p13 = scmp.ne.s32.totalorder %s14488_s8, %s9110_s22  ;;  %p9114_p0 = scmp.lt.u32.totalorder %s9110_s22, %s14488_s8 }
0x11e8   :  { %p9116_p1 = pnand %p9114_p0, %p9111_p13 }
0x11ea   :  { %9119 = shalt.err (!%p9116_p1)
}
0x11eb   :  { %7006 = dma.vmem_to_hbm [thread:$0]  %s7004_s17, 16, %s14488_s8, [#allocation8]  }
0x11ec   :  { %9128 = dma.done.wait [#allocation8], 16  }
0x11ed   :  { %9129 = vsyncadd [#allocation8], 4294967280 }
0x11ee   :  { %7010 = vsyncpa [#allocation8], 1 }
0x11ef   :  { %7011 = vsyncmov [#allocation6] }
0x11f2   :  { %s7012_s28 = vpop.sfrf %7011 }
0x11f3   :  { %p7763_p2 = scmp.ne.s32.totalorder %s7012_s28, 0 }
0x11f5   :  { %7016 = shalt.err (%p7763_p2)  }
0x11f6   :  { %7018 = vsyncmov [#allocation6 + $0x1] }
0x11f9   :  { %s7019_s1 = vpop.sfrf %7018 }
0x11fa   :  { %p7764_p3 = scmp.ne.s32.totalorder %s7019_s1, 0 }
0x11fc   :  { %7023 = shalt.err (%p7764_p3)  }
0x11fd   :  { %7025 = vsyncmov [#allocation6 + $0x2] }
0x1200   :  { %s7026_s29 = vpop.sfrf %7025 }
0x1201   :  { %p7765_p4 = scmp.ne.s32.totalorder %s7026_s29, 0 }
0x1203   :  { %7030 = shalt.err (%p7765_p4)  }
0x1204   :  { %7032 = vsyncmov [#allocation6 + $0x3] }
0x1207   :  { %s7033_s4 = vpop.sfrf %7032 }
0x1208   :  { %p7766_p5 = scmp.ne.s32.totalorder %s7033_s4, 0 }
0x120a   :  { %7037 = shalt.err (%p7766_p5)  }

</bundles_post_ra>
